<compile_context>
chip_gen: v7x
topology: tpu7x:2x2x1
jax: 0.10.0
libtpu: 0.0.40
codegen_flags: <defaults>
</compile_context>

<pallas_src>
import functools

import jax
import jax.numpy as jnp
from jax import lax
from jax.experimental import pallas as pl
from jax.experimental.pallas import tpu as pltpu

EPS = 1e-5  # BatchNorm2d default eps


def _conv_bn_relu(x, kh, w_ref, s_ref, t_ref):
    """Valid 1-D conv (kh taps) + folded eval-mode BN + ReLU.

    x: (H, Cin) f32; w_ref: (kh*Cin, Cout) bf16 with rows ordered k*Cin + c;
    s_ref/t_ref: (1, Cout) f32.  One MXU matmul via in-register im2col (lane concat).
    """
    hout = x.shape[0] - kh + 1
    cols = [x[k:k + hout, :] for k in range(kh)]
    patches = cols[0] if kh == 1 else jnp.concatenate(cols, axis=-1)   # (hout, kh*Cin)
    acc = jnp.dot(patches.astype(jnp.bfloat16), w_ref[...],
                  preferred_element_type=jnp.float32)                  # (hout, Cout) f32
    return jnp.maximum(acc * s_ref[...] + t_ref[...], 0.0)


def _cnn_kernel(x_ref, w1_ref, s1_ref, t1_ref, w2_ref, s2_ref, t2_ref,
                w3_ref, s3_ref, t3_ref, w4_ref, s4_ref, t4_ref,
                y_ref, h2_ref, *, hp, n_bins):
    # layer1: host-side im2col -> single (1010,16)@(16,16) bf16 matmul.
    a1 = jnp.dot(x_ref[0], w1_ref[...], preferred_element_type=jnp.float32)
    h1 = jnp.maximum(a1 * s1_ref[...] + t1_ref[...], 0.0)              # (1010, 16) f32

    # layer2 -> VMEM scratch so MaxPool2d((2,1),2) can read even/odd rows with stride-2 loads.
    h2_ref[...] = _conv_bn_relu(h1, 3, w2_ref, s2_ref, t2_ref)         # (1008, 32) f32
    even = h2_ref[pl.ds(0, hp, stride=2), :]
    odd = h2_ref[pl.ds(1, hp, stride=2), :]
    pooled = jnp.maximum(even, odd)                                    # (504, 32) f32

    h3 = _conv_bn_relu(pooled, 3, w3_ref, s3_ref, t3_ref)              # (502, 64) f32
    h4 = _conv_bn_relu(h3, 3, w4_ref, s4_ref, t4_ref)                  # (500, 128) f32

    # AdaptiveMaxPool2d((4,1)): 4 equal bins along H; one lane-dense (4, 128) store.
    binsz = h4.shape[0] // n_bins
    bins = [jnp.max(h4[b * binsz:(b + 1) * binsz, :], axis=0, keepdims=True)
            for b in range(n_bins)]
    y_ref[0] = jnp.concatenate(bins, axis=0)                           # (4, 128)


def cnn_forward(x_nchw, params):
    """x_nchw: (N, 1, H, 1) f32 (PyTorch layout).  Returns (N, 512) f32."""
    n = x_nchw.shape[0]
    h = x_nchw.shape[2]
    (w1, s1, t1), (w2, s2, t2), (w3, s3, t3), (w4, s4, t4) = params

    kh1 = 15
    h1_len = h - kh1 + 1          # 1010
    h2_len = h1_len - 3 + 1       # 1008
    assert h2_len % 2 == 0
    hp = h2_len // 2              # 504
    h3_len = hp - 3 + 1           # 502
    h4_len = h3_len - 3 + 1       # 500
    n_bins = 4
    assert h4_len % n_bins == 0

    # Host-side im2col of the 1-channel input -> lane-dense (N, 1010, 16) bf16
    # (16th column is zero padding; the matching weight row is zero too).
    x_nh = x_nchw.reshape(n, h)
    cols = [x_nh[:, k:k + h1_len] for k in range(kh1)]
    x_im2col = jnp.stack(cols, axis=-1)                                # (N, 1010, 15)
    x_im2col = jnp.pad(x_im2col, ((0, 0), (0, 0), (0, 16 - kh1))).astype(jnp.bfloat16)

    def const(arr):
        nd = arr.ndim
        return pl.BlockSpec(arr.shape, lambda i, _nd=nd: (0,) * _nd)

    y4 = pl.pallas_call(
        functools.partial(_cnn_kernel, hp=hp, n_bins=n_bins),
        out_shape=jax.ShapeDtypeStruct((n, n_bins, 128), jnp.float32),
        grid=(n,),
        in_specs=[
            pl.BlockSpec((1, h1_len, 16), lambda i: (i, 0, 0)),
            const(w1), const(s1), const(t1),
            const(w2), const(s2), const(t2),
            const(w3), const(s3), const(t3),
            const(w4), const(s4), const(t4),
        ],
        out_specs=pl.BlockSpec((1, n_bins, 128), lambda i: (i, 0, 0)),
        scratch_shapes=[pltpu.VMEM((h2_len, 32), jnp.float32)],
        compiler_params=pltpu.CompilerParams(dimension_semantics=("parallel",)),
    )(x_im2col, w1, s1, t1, w2, s2, t2, w3, s3, t3, w4, s4, t4)

    # PyTorch x.view(N, -1) on (N, 128, 4, 1) flattens channel-major -> (N, 128*4).
    # TODO(synk): the (4,128)->channel-major interleave stays as tiny XLA glue; doing it
    # in-kernel would need a lane-interleave transpose that costs more than this HLO.
    return jnp.transpose(y4, (0, 2, 1)).reshape(n, 128 * n_bins)


def init_params(key):
    """Deterministic synthetic parameters (BatchNorm in eval mode with running stats)."""
    layer_cfgs = [(1, 16, 15), (16, 32, 3), (32, 64, 3), (64, 128, 3)]  # (cin, cout, kh)
    params_kernel, params_raw = [], []
    for cin, cout, kh in layer_cfgs:
        key, kw, kb, kg, kbe, km, kv = jax.random.split(key, 7)
        w = jax.random.normal(kw, (cout, cin, kh, 1), jnp.float32) / jnp.sqrt(cin * kh)
        b = 0.05 * jax.random.normal(kb, (cout,), jnp.float32)
        gamma = 1.0 + 0.1 * jax.random.normal(kg, (cout,), jnp.float32)
        beta = 0.1 * jax.random.normal(kbe, (cout,), jnp.float32)
        mean = 0.1 * jax.random.normal(km, (cout,), jnp.float32)
        var = jax.random.uniform(kv, (cout,), jnp.float32, 0.5, 1.5)
        params_raw.append((w, b, gamma, beta, mean, var))
        # Fold conv bias + eval-mode BN into per-channel scale/shift (kept f32).
        scale = gamma / jnp.sqrt(var + EPS)
        shift = beta + (b - mean) * scale
        # Flatten taps into the contraction dim: (kh, cin, cout) -> (kh*cin, cout), bf16 for MXU.
        wf = jnp.transpose(w[:, :, :, 0], (2, 1, 0)).reshape(kh * cin, cout)
        if kh * cin == 15:  # layer1: pad K to 16 to match the zero-padded host im2col column
            wf = jnp.pad(wf, ((0, 1), (0, 0)))
        params_kernel.append((wf.astype(jnp.bfloat16), scale[None, :], shift[None, :]))
    return params_kernel, params_raw


def ref_forward(x_nchw, params_raw):
    """Pure-JAX f32 reference of the PyTorch forward (eval mode)."""
    y = x_nchw
    dn = ('NCHW', 'OIHW', 'NCHW')
    for li, (w, b, gamma, beta, mean, var) in enumerate(params_raw):
        y = lax.conv_general_dilated(y, w, (1, 1), 'VALID', dimension_numbers=dn)
        y = y + b[None, :, None, None]
        y = (y - mean[None, :, None, None]) \
            * (gamma / jnp.sqrt(var + EPS))[None, :, None, None] \
            + beta[None, :, None, None]
        y = jnp.maximum(y, 0.0)
        if li == 1:  # MaxPool2d((2,1), stride=2)
            nb, c, hh, _ = y.shape
            y = y.reshape(nb, c, hh // 2, 2, 1).max(axis=3)
        if li == 3:  # AdaptiveMaxPool2d((4,1))
            nb, c, hh, _ = y.shape
            y = y.reshape(nb, c, 4, hh // 4, 1).max(axis=3)
    return y.reshape(y.shape[0], -1)


if __name__ == "__main__":
    key = jax.random.PRNGKey(0)
    key, kx = jax.random.split(key)
    N, H = 2, 1024  # module requires 1x1024 input per sample
    x = jax.random.normal(kx, (N, 1, H, 1), jnp.float32)  # PyTorch NCHW input

    params_kernel, params_raw = init_params(key)

    out = jax.jit(cnn_forward)(x, params_kernel)
    out = jax.block_until_ready(out)

    ref = ref_forward(x, params_raw)
    assert out.shape == (N, 512)
    err = float(jnp.max(jnp.abs(out - ref)))
    assert jnp.allclose(out, ref, rtol=5e-2, atol=5e-2), err
    print("KERNEL_OK")
</pallas_src>

<mosaic_0001>
module attributes {stable_mosaic.version = 11 : i64} {
  func.func @_cnn_kernel(%arg0: i32, %arg1: memref<1x1010x16xbf16, #tpu.memory_space<vmem>>, %arg2: memref<16x16xbf16, #tpu.memory_space<vmem>>, %arg3: memref<1x16xf32, #tpu.memory_space<vmem>>, %arg4: memref<1x16xf32, #tpu.memory_space<vmem>>, %arg5: memref<48x32xbf16, #tpu.memory_space<vmem>>, %arg6: memref<1x32xf32, #tpu.memory_space<vmem>>, %arg7: memref<1x32xf32, #tpu.memory_space<vmem>>, %arg8: memref<96x64xbf16, #tpu.memory_space<vmem>>, %arg9: memref<1x64xf32, #tpu.memory_space<vmem>>, %arg10: memref<1x64xf32, #tpu.memory_space<vmem>>, %arg11: memref<192x128xbf16, #tpu.memory_space<vmem>>, %arg12: memref<1x128xf32, #tpu.memory_space<vmem>>, %arg13: memref<1x128xf32, #tpu.memory_space<vmem>>, %arg14: memref<1x4x128xf32, #tpu.memory_space<vmem>>, %arg15: memref<1008x32xf32, #tpu.memory_space<vmem>>) attributes {dimension_semantics = [#tpu.dimension_semantics<parallel>], iteration_bounds = array<i64: 2>, scalar_prefetch = 0 : i64, scratch_operands = 1 : i64, tpu.core_type = #tpu.core_type<tc>, window_params = [{transform_indices = @transform_0, window_bounds = array<i64: 1, 1010, 16>}, {pipeline_mode = #tpu.pipeline_mode<synchronous>, transform_indices = @transform_1, window_bounds = array<i64: 16, 16>}, {pipeline_mode = #tpu.pipeline_mode<synchronous>, transform_indices = @transform_2, window_bounds = array<i64: 1, 16>}, {pipeline_mode = #tpu.pipeline_mode<synchronous>, transform_indices = @transform_3, window_bounds = array<i64: 1, 16>}, {pipeline_mode = #tpu.pipeline_mode<synchronous>, transform_indices = @transform_4, window_bounds = array<i64: 48, 32>}, {pipeline_mode = #tpu.pipeline_mode<synchronous>, transform_indices = @transform_5, window_bounds = array<i64: 1, 32>}, {pipeline_mode = #tpu.pipeline_mode<synchronous>, transform_indices = @transform_6, window_bounds = array<i64: 1, 32>}, {pipeline_mode = #tpu.pipeline_mode<synchronous>, transform_indices = @transform_7, window_bounds = array<i64: 96, 64>}, {pipeline_mode = #tpu.pipeline_mode<synchronous>, transform_indices = @transform_8, window_bounds = array<i64: 1, 64>}, {pipeline_mode = #tpu.pipeline_mode<synchronous>, transform_indices = @transform_9, window_bounds = array<i64: 1, 64>}, {pipeline_mode = #tpu.pipeline_mode<synchronous>, transform_indices = @transform_10, window_bounds = array<i64: 192, 128>}, {pipeline_mode = #tpu.pipeline_mode<synchronous>, transform_indices = @transform_11, window_bounds = array<i64: 1, 128>}, {pipeline_mode = #tpu.pipeline_mode<synchronous>, transform_indices = @transform_12, window_bounds = array<i64: 1, 128>}, {transform_indices = @transform_13, window_bounds = array<i64: 1, 4, 128>}]} {
    %c0 = arith.constant 0 : index
    %c0_0 = arith.constant 0 : index
    %c0_1 = arith.constant 0 : index
    %0 = vector.load %arg1[%c0, %c0_0, %c0_1] : memref<1x1010x16xbf16, #tpu.memory_space<vmem>>, vector<1x1010x16xbf16>
    %1 = vector.shape_cast %0 : vector<1x1010x16xbf16> to vector<1010x16xbf16>
    %c0_2 = arith.constant 0 : index
    %c0_3 = arith.constant 0 : index
    %2 = vector.load %arg2[%c0_2, %c0_3] : memref<16x16xbf16, #tpu.memory_space<vmem>>, vector<16x16xbf16>
    %cst = arith.constant dense<0.000000e+00> : vector<1010x16xf32>
    %3 = tpu.matmul %1, %2, %cst {dimension_numbers = #tpu.dot_dimension_numbers<[1], [0], [0], [1], [0, 0, 1, 1], [], []>} : vector<1010x16xbf16>, vector<16x16xbf16>, vector<1010x16xf32> -> vector<1010x16xf32>
    %c0_4 = arith.constant 0 : index
    %c0_5 = arith.constant 0 : index
    %4 = vector.load %arg3[%c0_4, %c0_5] : memref<1x16xf32, #tpu.memory_space<vmem>>, vector<1x16xf32>
    %5 = vector.broadcast %4 : vector<1x16xf32> to vector<1010x16xf32>
    %6 = arith.mulf %3, %5 : vector<1010x16xf32>
    %c0_6 = arith.constant 0 : index
    %c0_7 = arith.constant 0 : index
    %7 = vector.load %arg4[%c0_6, %c0_7] : memref<1x16xf32, #tpu.memory_space<vmem>>, vector<1x16xf32>
    %8 = vector.broadcast %7 : vector<1x16xf32> to vector<1010x16xf32>
    %9 = arith.addf %6, %8 : vector<1010x16xf32>
    %cst_8 = arith.constant 0.000000e+00 : f32
    %10 = vector.broadcast %cst_8 : f32 to vector<1010x16xf32>
    %11 = arith.maximumf %9, %10 : vector<1010x16xf32>
    %12 = vector.extract_strided_slice %11 {offsets = [0, 0], sizes = [1008, 16], strides = [1, 1]} : vector<1010x16xf32> to vector<1008x16xf32>
    %13 = vector.extract_strided_slice %11 {offsets = [1, 0], sizes = [1008, 16], strides = [1, 1]} : vector<1010x16xf32> to vector<1008x16xf32>
    %14 = vector.extract_strided_slice %11 {offsets = [2, 0], sizes = [1008, 16], strides = [1, 1]} : vector<1010x16xf32> to vector<1008x16xf32>
    %15 = tpu.concatenate %12, %13, %14 in 1 : vector<1008x16xf32>, vector<1008x16xf32>, vector<1008x16xf32> -> vector<1008x48xf32>
    %16 = arith.truncf %15 : vector<1008x48xf32> to vector<1008x48xbf16>
    %c0_9 = arith.constant 0 : index
    %c0_10 = arith.constant 0 : index
    %17 = vector.load %arg5[%c0_9, %c0_10] : memref<48x32xbf16, #tpu.memory_space<vmem>>, vector<48x32xbf16>
    %cst_11 = arith.constant dense<0.000000e+00> : vector<1008x32xf32>
    %18 = tpu.matmul %16, %17, %cst_11 {dimension_numbers = #tpu.dot_dimension_numbers<[1], [0], [0], [1], [0, 0, 1, 1], [], []>} : vector<1008x48xbf16>, vector<48x32xbf16>, vector<1008x32xf32> -> vector<1008x32xf32>
    %c0_12 = arith.constant 0 : index
    %c0_13 = arith.constant 0 : index
    %19 = vector.load %arg6[%c0_12, %c0_13] : memref<1x32xf32, #tpu.memory_space<vmem>>, vector<1x32xf32>
    %20 = vector.broadcast %19 : vector<1x32xf32> to vector<1008x32xf32>
    %21 = arith.mulf %18, %20 : vector<1008x32xf32>
    %c0_14 = arith.constant 0 : index
    %c0_15 = arith.constant 0 : index
    %22 = vector.load %arg7[%c0_14, %c0_15] : memref<1x32xf32, #tpu.memory_space<vmem>>, vector<1x32xf32>
    %23 = vector.broadcast %22 : vector<1x32xf32> to vector<1008x32xf32>
    %24 = arith.addf %21, %23 : vector<1008x32xf32>
    %cst_16 = arith.constant 0.000000e+00 : f32
    %25 = vector.broadcast %cst_16 : f32 to vector<1008x32xf32>
    %26 = arith.maximumf %24, %25 : vector<1008x32xf32>
    %c0_17 = arith.constant 0 : index
    %c0_18 = arith.constant 0 : index
    %27 = vector.load %arg15[%c0_17, %c0_18] : memref<1008x32xf32, #tpu.memory_space<vmem>>, vector<1008x32xf32>
    tpu.vector_store %arg15[%c0_17, %c0_18], %26 {strides = array<i32>} : memref<1008x32xf32, #tpu.memory_space<vmem>>, vector<1008x32xf32>,
    %c0_19 = arith.constant 0 : index
    %c0_20 = arith.constant 0 : index
    %28 = tpu.strided_load %arg15[%c0_19, %c0_20] {strides = array<i32: 2, 1>} : memref<1008x32xf32, #tpu.memory_space<vmem>>, vector<504x32xf32>
    %c1 = arith.constant 1 : index
    %c0_21 = arith.constant 0 : index
    %29 = tpu.strided_load %arg15[%c1, %c0_21] {strides = array<i32: 2, 1>} : memref<1008x32xf32, #tpu.memory_space<vmem>>, vector<504x32xf32>
    %30 = arith.maximumf %28, %29 : vector<504x32xf32>
    %31 = vector.extract_strided_slice %30 {offsets = [0, 0], sizes = [502, 32], strides = [1, 1]} : vector<504x32xf32> to vector<502x32xf32>
    %32 = vector.extract_strided_slice %30 {offsets = [1, 0], sizes = [502, 32], strides = [1, 1]} : vector<504x32xf32> to vector<502x32xf32>
    %33 = vector.extract_strided_slice %30 {offsets = [2, 0], sizes = [502, 32], strides = [1, 1]} : vector<504x32xf32> to vector<502x32xf32>
    %34 = tpu.concatenate %31, %32, %33 in 1 : vector<502x32xf32>, vector<502x32xf32>, vector<502x32xf32> -> vector<502x96xf32>
    %35 = arith.truncf %34 : vector<502x96xf32> to vector<502x96xbf16>
    %c0_22 = arith.constant 0 : index
    %c0_23 = arith.constant 0 : index
    %36 = vector.load %arg8[%c0_22, %c0_23] : memref<96x64xbf16, #tpu.memory_space<vmem>>, vector<96x64xbf16>
    %cst_24 = arith.constant dense<0.000000e+00> : vector<502x64xf32>
    %37 = tpu.matmul %35, %36, %cst_24 {dimension_numbers = #tpu.dot_dimension_numbers<[1], [0], [0], [1], [0, 0, 1, 1], [], []>} : vector<502x96xbf16>, vector<96x64xbf16>, vector<502x64xf32> -> vector<502x64xf32>
    %c0_25 = arith.constant 0 : index
    %c0_26 = arith.constant 0 : index
    %38 = vector.load %arg9[%c0_25, %c0_26] : memref<1x64xf32, #tpu.memory_space<vmem>>, vector<1x64xf32>
    %39 = vector.broadcast %38 : vector<1x64xf32> to vector<502x64xf32>
    %40 = arith.mulf %37, %39 : vector<502x64xf32>
    %c0_27 = arith.constant 0 : index
    %c0_28 = arith.constant 0 : index
    %41 = vector.load %arg10[%c0_27, %c0_28] : memref<1x64xf32, #tpu.memory_space<vmem>>, vector<1x64xf32>
    %42 = vector.broadcast %41 : vector<1x64xf32> to vector<502x64xf32>
    %43 = arith.addf %40, %42 : vector<502x64xf32>
    %cst_29 = arith.constant 0.000000e+00 : f32
    %44 = vector.broadcast %cst_29 : f32 to vector<502x64xf32>
    %45 = arith.maximumf %43, %44 : vector<502x64xf32>
    %46 = vector.extract_strided_slice %45 {offsets = [0, 0], sizes = [500, 64], strides = [1, 1]} : vector<502x64xf32> to vector<500x64xf32>
    %47 = vector.extract_strided_slice %45 {offsets = [1, 0], sizes = [500, 64], strides = [1, 1]} : vector<502x64xf32> to vector<500x64xf32>
    %48 = vector.extract_strided_slice %45 {offsets = [2, 0], sizes = [500, 64], strides = [1, 1]} : vector<502x64xf32> to vector<500x64xf32>
    %49 = tpu.concatenate %46, %47, %48 in 1 : vector<500x64xf32>, vector<500x64xf32>, vector<500x64xf32> -> vector<500x192xf32>
    %50 = arith.truncf %49 : vector<500x192xf32> to vector<500x192xbf16>
    %c0_30 = arith.constant 0 : index
    %c0_31 = arith.constant 0 : index
    %51 = vector.load %arg11[%c0_30, %c0_31] : memref<192x128xbf16, #tpu.memory_space<vmem>>, vector<192x128xbf16>
    %cst_32 = arith.constant dense<0.000000e+00> : vector<500x128xf32>
    %52 = tpu.matmul %50, %51, %cst_32 {dimension_numbers = #tpu.dot_dimension_numbers<[1], [0], [0], [1], [0, 0, 1, 1], [], []>} : vector<500x192xbf16>, vector<192x128xbf16>, vector<500x128xf32> -> vector<500x128xf32>
    %c0_33 = arith.constant 0 : index
    %c0_34 = arith.constant 0 : index
    %53 = vector.load %arg12[%c0_33, %c0_34] : memref<1x128xf32, #tpu.memory_space<vmem>>, vector<1x128xf32>
    %54 = vector.broadcast %53 : vector<1x128xf32> to vector<500x128xf32>
    %55 = arith.mulf %52, %54 : vector<500x128xf32>
    %c0_35 = arith.constant 0 : index
    %c0_36 = arith.constant 0 : index
    %56 = vector.load %arg13[%c0_35, %c0_36] : memref<1x128xf32, #tpu.memory_space<vmem>>, vector<1x128xf32>
    %57 = vector.broadcast %56 : vector<1x128xf32> to vector<500x128xf32>
    %58 = arith.addf %55, %57 : vector<500x128xf32>
    %cst_37 = arith.constant 0.000000e+00 : f32
    %59 = vector.broadcast %cst_37 : f32 to vector<500x128xf32>
    %60 = arith.maximumf %58, %59 : vector<500x128xf32>
    %61 = vector.extract_strided_slice %60 {offsets = [0, 0], sizes = [125, 128], strides = [1, 1]} : vector<500x128xf32> to vector<125x128xf32>
    %cst_38 = arith.constant dense<0xFF800000> : vector<128xf32>
    %62 = vector.multi_reduction <maximumf>, %61, %cst_38 [0] : vector<125x128xf32> to vector<128xf32>
    %63 = vector.shape_cast %62 : vector<128xf32> to vector<1x128xf32>
    %64 = vector.extract_strided_slice %60 {offsets = [125, 0], sizes = [125, 128], strides = [1, 1]} : vector<500x128xf32> to vector<125x128xf32>
    %cst_39 = arith.constant dense<0xFF800000> : vector<128xf32>
    %65 = vector.multi_reduction <maximumf>, %64, %cst_39 [0] : vector<125x128xf32> to vector<128xf32>
    %66 = vector.shape_cast %65 : vector<128xf32> to vector<1x128xf32>
    %67 = vector.extract_strided_slice %60 {offsets = [250, 0], sizes = [125, 128], strides = [1, 1]} : vector<500x128xf32> to vector<125x128xf32>
    %cst_40 = arith.constant dense<0xFF800000> : vector<128xf32>
    %68 = vector.multi_reduction <maximumf>, %67, %cst_40 [0] : vector<125x128xf32> to vector<128xf32>
    %69 = vector.shape_cast %68 : vector<128xf32> to vector<1x128xf32>
    %70 = vector.extract_strided_slice %60 {offsets = [375, 0], sizes = [125, 128], strides = [1, 1]} : vector<500x128xf32> to vector<125x128xf32>
    %cst_41 = arith.constant dense<0xFF800000> : vector<128xf32>
    %71 = vector.multi_reduction <maximumf>, %70, %cst_41 [0] : vector<125x128xf32> to vector<128xf32>
    %72 = vector.shape_cast %71 : vector<128xf32> to vector<1x128xf32>
    %73 = tpu.concatenate %63, %66, %69, %72 in 0 : vector<1x128xf32>, vector<1x128xf32>, vector<1x128xf32>, vector<1x128xf32> -> vector<4x128xf32>
    %c0_42 = arith.constant 0 : index
    %c0_43 = arith.constant 0 : index
    %c0_44 = arith.constant 0 : index
    %74 = vector.load %arg14[%c0_42, %c0_43, %c0_44] : memref<1x4x128xf32, #tpu.memory_space<vmem>>, vector<1x4x128xf32>
    %75 = vector.shape_cast %74 : vector<1x4x128xf32> to vector<4x128xf32>
    %76 = vector.shape_cast %73 : vector<4x128xf32> to vector<1x4x128xf32>
    tpu.vector_store %arg14[%c0_42, %c0_43, %c0_44], %76 {strides = array<i32>} : memref<1x4x128xf32, #tpu.memory_space<vmem>>, vector<1x4x128xf32>,
    return
  }
  func.func @transform_0(%arg0: i32) -> (i32, i32, i32) {
    %c0_i32 = arith.constant 0 : i32
    %c0_i32_0 = arith.constant 0 : i32
    %c0_i32_1 = arith.constant 0 : i32
    return %arg0, %c0_i32, %c0_i32_0 : i32, i32, i32
  }
  func.func @transform_1(%arg0: i32) -> (i32, i32) {
    %c0_i32 = arith.constant 0 : i32
    %c0_i32_0 = arith.constant 0 : i32
    %c0_i32_1 = arith.constant 0 : i32
    return %c0_i32, %c0_i32_0 : i32, i32
  }
  func.func @transform_2(%arg0: i32) -> (i32, i32) {
    %c0_i32 = arith.constant 0 : i32
    %c0_i32_0 = arith.constant 0 : i32
    %c0_i32_1 = arith.constant 0 : i32
    return %c0_i32, %c0_i32_0 : i32, i32
  }
  func.func @transform_3(%arg0: i32) -> (i32, i32) {
    %c0_i32 = arith.constant 0 : i32
    %c0_i32_0 = arith.constant 0 : i32
    %c0_i32_1 = arith.constant 0 : i32
    return %c0_i32, %c0_i32_0 : i32, i32
  }
  func.func @transform_4(%arg0: i32) -> (i32, i32) {
    %c0_i32 = arith.constant 0 : i32
    %c0_i32_0 = arith.constant 0 : i32
    %c0_i32_1 = arith.constant 0 : i32
    return %c0_i32, %c0_i32_0 : i32, i32
  }
  func.func @transform_5(%arg0: i32) -> (i32, i32) {
    %c0_i32 = arith.constant 0 : i32
    %c0_i32_0 = arith.constant 0 : i32
    %c0_i32_1 = arith.constant 0 : i32
    return %c0_i32, %c0_i32_0 : i32, i32
  }
  func.func @transform_6(%arg0: i32) -> (i32, i32) {
    %c0_i32 = arith.constant 0 : i32
    %c0_i32_0 = arith.constant 0 : i32
    %c0_i32_1 = arith.constant 0 : i32
    return %c0_i32, %c0_i32_0 : i32, i32
  }
  func.func @transform_7(%arg0: i32) -> (i32, i32) {
    %c0_i32 = arith.constant 0 : i32
    %c0_i32_0 = arith.constant 0 : i32
    %c0_i32_1 = arith.constant 0 : i32
    return %c0_i32, %c0_i32_0 : i32, i32
  }
  func.func @transform_8(%arg0: i32) -> (i32, i32) {
    %c0_i32 = arith.constant 0 : i32
    %c0_i32_0 = arith.constant 0 : i32
    %c0_i32_1 = arith.constant 0 : i32
    return %c0_i32, %c0_i32_0 : i32, i32
  }
  func.func @transform_9(%arg0: i32) -> (i32, i32) {
    %c0_i32 = arith.constant 0 : i32
    %c0_i32_0 = arith.constant 0 : i32
    %c0_i32_1 = arith.constant 0 : i32
    return %c0_i32, %c0_i32_0 : i32, i32
  }
  func.func @transform_10(%arg0: i32) -> (i32, i32) {
    %c0_i32 = arith.constant 0 : i32
    %c0_i32_0 = arith.constant 0 : i32
    %c0_i32_1 = arith.constant 0 : i32
    return %c0_i32, %c0_i32_0 : i32, i32
  }
  func.func @transform_11(%arg0: i32) -> (i32, i32) {
    %c0_i32 = arith.constant 0 : i32
    %c0_i32_0 = arith.constant 0 : i32
    %c0_i32_1 = arith.constant 0 : i32
    return %c0_i32, %c0_i32_0 : i32, i32
  }
  func.func @transform_12(%arg0: i32) -> (i32, i32) {
    %c0_i32 = arith.constant 0 : i32
    %c0_i32_0 = arith.constant 0 : i32
    %c0_i32_1 = arith.constant 0 : i32
    return %c0_i32, %c0_i32_0 : i32, i32
  }
  func.func @transform_13(%arg0: i32) -> (i32, i32, i32) {
    %c0_i32 = arith.constant 0 : i32
    %c0_i32_0 = arith.constant 0 : i32
    %c0_i32_1 = arith.constant 0 : i32
    return %arg0, %c0_i32, %c0_i32_0 : i32, i32, i32
  }
}

</mosaic_0001>

<bundles_post_ra>
// kernel: cnn_forward.1
= control target key start
LH: loop header
LB: loop body
LE: loop exit
PB: predicated region body
PF: predicated region fallthrough
CT: control target
= control target key end

     0   :  { %s10558_s25 = smov 0   ;;  %s15423_s0 = inlined_call_operand.vmem [shape: bf16[2,1010,16], index: 0, kind: input, shape index: {}]   ;;  %s15424_s1 = inlined_call_operand.vmem [shape: bf16[16,16], index: 1, kind: input, shape index: {}]   ;;  %s15425_s2 = inlined_call_operand.vmem [shape: f32[1,16], index: 2, kind: input, shape index: {}]   ;;  %s15426_s3 = inlined_call_operand.vmem [shape: f32[1,16], index: 3, kind: input, shape index: {}]   ;;  %s15427_s4 = inlined_call_operand.vmem [shape: bf16[48,32], index: 4, kind: input, shape index: {}]   ;;  %s15428_s5 = inlined_call_operand.vmem [shape: f32[1,32], index: 5, kind: input, shape index: {}]   ;;  %s15429_s6 = inlined_call_operand.vmem [shape: f32[1,32], index: 6, kind: input, shape index: {}]   ;;  %s15430_s7 = inlined_call_operand.vmem [shape: bf16[96,64], index: 7, kind: input, shape index: {}]   ;;  %s15431_s8 = inlined_call_operand.vmem [shape: f32[1,64], index: 8, kind: input, shape index: {}]   ;;  %s15432_s9 = inlined_call_operand.vmem [shape: f32[1,64], index: 9, kind: input, shape index: {}]   ;;  %s15433_s10 = inlined_call_operand.vmem [shape: bf16[192,128], index: 10, kind: input, shape index: {}]   ;;  %s15434_s11 = inlined_call_operand.vmem [shape: f32[1,128], index: 11, kind: input, shape index: {}]   ;;  %s15435_s12 = inlined_call_operand.vmem [shape: f32[1,128], index: 12, kind: input, shape index: {}]   ;;  %s15436_s13 = inlined_call_operand.vmem [shape: f32[2,4,128], index: 13, kind: output, shape index: {}]  }
   0x1 LB: > { %s8334_s26 = sadd.s32 4294967295, %s10480_s25   ;;  %p8338_p0 = scmp.ge.s32.totalorder %s10480_s25, 1  ;;  %s10480_s25 = sphi %s10558_s25, %s23_s25  }
   0x2   : > { %p387_p1 = scmp.lt.s32.totalorder %s10480_s25, 3 }
   0x4   : > { %p388_p2 = pnand %p8338_p0, %p387_p1 }
   0x6   : > { %391 = sbr.rel (%p388_p2) target bundleno = 1881 (0x759), region = 72 }
   0xd   : > { %v10373_v0 = vld [vmem:[%s15424_s1] sm:$0xff]   ;;  %p430_p3 = scmp.lt.s32.totalorder %s8334_s26, 1  ;;  %vm893_vm0 = vcmask 130048   ;;  %v15437_v62 = vmov 0.0   ;;  %vm2152_vm1 = vcmask 1046528   ;;  %vm2784_vm2 = vcmask 1045504  }
   0xe   : > { %8797 = vmatprep.subr.bf16.mxu0 %v10373_v0  ;;  %9261 = vmatprep.subr.bf16.mxu1 %v10373_v0  ;;  %v10438_v60 = vld [vmem:[%s15427_s4] sm:$0xff]   ;;  %s10483_s28 = smov 16   ;;  %vm10484_vm3 = vmmov 0   ;;  %vm3542_vm4 = vcmask 261120   ;;  %vm3756_vm5 = vcmask 392192   ;;  %s10486_s27 = smov 64  }
   0xf   : > { %s15860_s26 = smov (!%p430_p3, %s8334_s26), 1  ;;  %8798 = vmatpush3.bf16.msra.mxu0 %v10373_v0  ;;  %9262 = vmatpush3.bf16.msra.mxu1 %v10373_v0  ;;  %vm6069_vm6 = vcmask 523264   ;;  %vm6213_vm7 = vcmask 785408   ;;  %vm8187_vm8 = vcmask 1044480   ;;  %vm8199_vm9 = vcmask 1047557  }
  0x10   : > { %s9263_s29 = smul.u32 508, %s15860_s26  ;;  %8927 = vmatprep.subr.bf16.mxu1 %v15437_v62  ;;  %vm8213_vm10 = vcmask 1041408   ;;  %vm8275_vm11 = vcmask 1040384   ;;  %vm8225_vm12 = vcmask 1047554   ;;  %vm8249_vm13 = vcmask 1047559   ;;  %s8340_s24 = sshll.u32 %s15860_s26, 2 }
  0x11   : > { %vm8263_vm14 = vcmask 1043456   ;;  %vm8278_vm15 = vcmask 1042432   ;;  %s438_s30 = scalar_lea.vmem %s15436_s13, %s8340_s24 }
  0x12   : > { %s10575_s15 = scalar_lea.vmem %s15423_s0, %s9263_s29  ;;  %s10485_s29 = smov 32  }
  0x13   : > { %v10374_v1 = vld [vmem:[%s10575_s15] sm:$0xff]   ;;  %v10375_v2 = vld [vmem:[%s10575_s15 + $0x8] sm:$0xff]   ;;  %v10376_v3 = vld [vmem:[%s10575_s15 + $0x10] sm:$0xff]  }
  0x14   : > { %8799 = vmatprep.mubr.msk.bf16.mxu0 %vm893_vm0, %v10374_v1  ;;  %v10377_v4 = vld [vmem:[%s10575_s15 + $0x18] sm:$0xff]   ;;  %v10378_v5 = vld [vmem:[%s10575_s15 + $0x20] sm:$0xff]   ;;  %v10379_v6 = vld [vmem:[%s10575_s15 + $0x28] sm:$0xff]  }
  0x15   : > { %8800 = vmatmul.mubr.msk.bf16.vlgmr.msra.gmra.mrb[0].mxu0 %vm893_vm0, %v10375_v2  ;;  %v10380_v7 = vld [vmem:[%s10575_s15 + $0x30] sm:$0xff]   ;;  %v10381_v8 = vld [vmem:[%s10575_s15 + $0x38] sm:$0xff]   ;;  %v10382_v9 = vld [vmem:[%s10575_s15 + $0x40] sm:$0xff]  }
  0x16   : > { %8803 = vmatprep.mubr.msk.bf16.mxu0 %vm893_vm0, %v10376_v3  ;;  %v10383_v10 = vld [vmem:[%s10575_s15 + $0x48] sm:$0xff]   ;;  %v10384_v11 = vld [vmem:[%s10575_s15 + $0x50] sm:$0xff]   ;;  %v10385_v12 = vld [vmem:[%s10575_s15 + $0x58] sm:$0xff]  }
  0x17   : > { %v10386_v13 = vld [vmem:[%s10575_s15 + $0x60] sm:$0xff]   ;;  %v10387_v14 = vld [vmem:[%s10575_s15 + $0x68] sm:$0xff]   ;;  %v10388_v15 = vld [vmem:[%s10575_s15 + $0x70] sm:$0xff]  }
  0x18   : > { %v10389_v16 = vld [vmem:[%s10575_s15 + $0x78] sm:$0xff]   ;;  %v10390_v17 = vld [vmem:[%s10575_s15 + $0x80] sm:$0xff]   ;;  %v10423_v19 = vld [vmem:[%s10575_s15 + $0x188] sm:$0xff]  }
  0x19   : > { %v10422_v18 = vld [vmem:[%s10575_s15 + $0x180] sm:$0xff]   ;;  %v10424_v20 = vld [vmem:[%s10575_s15 + $0x190] sm:$0xff]   ;;  %v10391_v21 = vld [vmem:[%s10575_s15 + $0x88] sm:$0xff]  }
  0x1a   : > { %8895 = vmatprep.mubr.msk.bf16.mxu1 %vm893_vm0, %v10422_v18  ;;  %v10392_v22 = vld [vmem:[%s10575_s15 + $0x90] sm:$0xff]   ;;  %v10425_v23 = vld [vmem:[%s10575_s15 + $0x198] sm:$0xff]   ;;  %v10426_v24 = vld [vmem:[%s10575_s15 + $0x1a0] sm:$0xff]  }
  0x1b   : > { %8896 = vmatmul.mubr.msk.bf16.vlgmr.msra.gmra.mrb[0].mxu1 %vm893_vm0, %v10423_v19  ;;  %v10393_v25 = vld [vmem:[%s10575_s15 + $0x98] sm:$0xff]   ;;  %v10394_v26 = vld [vmem:[%s10575_s15 + $0xa0] sm:$0xff]   ;;  %v10427_v27 = vld [vmem:[%s10575_s15 + $0x1a8] sm:$0xff]  }
  0x1c   : > { %8899 = vmatprep.mubr.msk.bf16.mxu1 %vm893_vm0, %v10424_v20  ;;  %v10395_v28 = vld [vmem:[%s10575_s15 + $0xa8] sm:$0xff]   ;;  %v10396_v29 = vld [vmem:[%s10575_s15 + $0xb0] sm:$0xff]   ;;  %v10397_v30 = vld [vmem:[%s10575_s15 + $0xb8] sm:$0xff]   ;;  %8928 = vmatpush3.bf16.msra.mxu1 %v10438_v60 }
  0x1d   : > { %8804 = vmatmul.mubr.msk.bf16.gmra.mrb[4].mxu0 %vm893_vm0, %v10377_v4  ;;  %v10398_v31 = vld [vmem:[%s10575_s15 + $0xc0] sm:$0xff]   ;;  %v10428_v32 = vld [vmem:[%s10575_s15 + $0x1b0] sm:$0xff]   ;;  %v10429_v33 = vld [vmem:[%s10575_s15 + $0x1b8] sm:$0xff]   ;;  %8929 = vmatprep.subr.bf16.mxu1 %v15437_v62 }
  0x1e   : > { %8807 = vmatprep.mubr.msk.bf16.mxu0 %vm893_vm0, %v10378_v5  ;;  %v10399_v34 = vld [vmem:[%s10575_s15 + $0xc8] sm:$0xff]   ;;  %v10400_v35 = vld [vmem:[%s10575_s15 + $0xd0] sm:$0xff]   ;;  %v10430_v36 = vld [vmem:[%s10575_s15 + $0x1c0] sm:$0xff]  }
  0x1f   : > { %v10431_v37 = vld [vmem:[%s10575_s15 + $0x1c8] sm:$0xff]   ;;  %v10401_v38 = vld [vmem:[%s10575_s15 + $0xd8] sm:$0xff]   ;;  %v10402_v39 = vld [vmem:[%s10575_s15 + $0xe0] sm:$0xff]  }
  0x20   : > { %v10432_v40 = vld [vmem:[%s10575_s15 + $0x1d0] sm:$0xff]   ;;  %v10433_v41 = vld [vmem:[%s10575_s15 + $0x1d8] sm:$0xff]   ;;  %v10403_v42 = vld [vmem:[%s10575_s15 + $0xe8] sm:$0xff]  }
  0x21   : > { %v10404_v43 = vld [vmem:[%s10575_s15 + $0xf0] sm:$0xff]   ;;  %v10434_v44 = vld [vmem:[%s10575_s15 + $0x1e0] sm:$0xff]   ;;  %v10435_v45 = vld [vmem:[%s10575_s15 + $0x1e8] sm:$0xff]  }
  0x22   : > { %v10405_v46 = vld [vmem:[%s10575_s15 + $0xf8] sm:$0xff]   ;;  %v10406_v47 = vld [vmem:[%s10575_s15 + $0x100] sm:$0xff]   ;;  %v10436_v48 = vld [vmem:[%s10575_s15 + $0x1f0] sm:$0xff]  }
  0x23   : > { %8900 = vmatmul.mubr.msk.bf16.gmra.mrb[4].mxu1 %vm893_vm0, %v10425_v23  ;;  %v10437_v49 = vld [vmem:[%s10575_s15 + $0x1f8] ss:$0 sps:$4 sm:$0x11]   ;;  %v10407_v50 = vld [vmem:[%s10575_s15 + $0x108] sm:$0xff]   ;;  %v10408_v51 = vld [vmem:[%s10575_s15 + $0x110] sm:$0xff]  }
  0x24   : > { %8903 = vmatprep.mubr.msk.bf16.mxu1 %vm893_vm0, %v10426_v24  ;;  %v10409_v52 = vld [vmem:[%s10575_s15 + $0x118] sm:$0xff]   ;;  %v10410_v53 = vld [vmem:[%s10575_s15 + $0x120] sm:$0xff]   ;;  %v10411_v54 = vld [vmem:[%s10575_s15 + $0x128] sm:$0xff]  }
  0x25   : > { %8808 = vmatmul.mubr.msk.bf16.gmra.mrb[8].mxu0 %vm893_vm0, %v10379_v6  ;;  %v10412_v55 = vld [vmem:[%s10575_s15 + $0x130] sm:$0xff]   ;;  %v10413_v56 = vld [vmem:[%s10575_s15 + $0x138] sm:$0xff]   ;;  %v10414_v57 = vld [vmem:[%s10575_s15 + $0x140] sm:$0xff]  }
  0x26   : > { %8811 = vmatprep.mubr.msk.bf16.mxu0 %vm893_vm0, %v10380_v7  ;;  %v10415_v58 = vld [vmem:[%s10575_s15 + $0x148] sm:$0xff]   ;;  %v10416_v59 = vld [vmem:[%s10575_s15 + $0x150] sm:$0xff]   ;;  %v10417_v61 = vld [vmem:[%s10575_s15 + $0x158] sm:$0xff]  }
  0x27   : > { %v10418_v63 = vld [vmem:[%s10575_s15 + $0x160] sm:$0xff]   ;;  %v10419_v0 = vld [vmem:[%s10575_s15 + $0x168] sm:$0xff]   ;;  %v10420_v1 = vld [vmem:[%s10575_s15 + $0x170] sm:$0xff]  }
  0x28   : > { %v10421_v2 = vld [vmem:[%s10575_s15 + $0x178] sm:$0xff]   ;;  %v10439_v3 = vld [vmem:[%s15427_s4 + $0x8] sm:$0xff]   ;;  %v10440_v4 = vld [vmem:[%s15427_s4 + $0x10] sm:$0xff]  }
  0x29   : > { %8930 = vmatpush3.bf16.msra.mxu1 %v10439_v3  ;;  %v10720_v5 = vld [vmem:[%s15425_s2] ss:$0 sm:$0xff] }
  0x2a   : > { %8931 = vmatprep.subr.bf16.mxu1 %v15437_v62  ;;  %v10725_v7 = vld [vmem:[%s15426_s3] ss:$0 sm:$0xff] }
  0x2b   : > { %8904 = vmatmul.mubr.msk.bf16.gmra.mrb[8].mxu1 %vm893_vm0, %v10427_v27 }
  0x2c   : > { %8907 = vmatprep.mubr.msk.bf16.mxu1 %vm893_vm0, %v10428_v32 }
  0x2d   : > { %8812 = vmatmul.mubr.msk.bf16.gmra.mrb[12].mxu0 %vm893_vm0, %v10381_v8  ;;  %8932 = vmatpush3.bf16.msra.mxu1 %v10440_v4 }
  0x2e   : > { %8815 = vmatprep.mubr.msk.bf16.mxu0 %vm893_vm0, %v10382_v9 }
  0x33   : > { %8908 = vmatmul.mubr.msk.bf16.gmra.mrb[12].mxu1 %vm893_vm0, %v10429_v33 }
  0x34   : > { %8911 = vmatprep.mubr.msk.bf16.mxu1 %vm893_vm0, %v10430_v36 }
  0x35   : > { %8816 = vmatmul.mubr.msk.bf16.gmra.mrb[16].mxu0 %vm893_vm0, %v10383_v10 }
  0x36   : > { %8819 = vmatprep.mubr.msk.bf16.mxu0 %vm893_vm0, %v10384_v11 }
  0x3b   : > { %8912 = vmatmul.mubr.msk.bf16.gmra.mrb[16].mxu1 %vm893_vm0, %v10431_v37 }
  0x3c   : > { %8915 = vmatprep.mubr.msk.bf16.mxu1 %vm893_vm0, %v10432_v40 }
  0x3d   : > { %8820 = vmatmul.mubr.msk.bf16.gmra.mrb[20].mxu0 %vm893_vm0, %v10385_v12 }
  0x3e   : > { %8823 = vmatprep.mubr.msk.bf16.mxu0 %vm893_vm0, %v10386_v13 }
  0x43   : > { %8916 = vmatmul.mubr.msk.bf16.gmra.mrb[20].mxu1 %vm893_vm0, %v10433_v41 }
  0x44   : > { %8919 = vmatprep.mubr.msk.bf16.mxu1 %vm893_vm0, %v10434_v44 }
  0x45   : > { %8824 = vmatmul.mubr.msk.bf16.gmra.mrb[24].mxu0 %vm893_vm0, %v10387_v14 }
  0x46   : > { %8827 = vmatprep.mubr.msk.bf16.mxu0 %vm893_vm0, %v10388_v15 }
  0x4b   : > { %8920 = vmatmul.mubr.msk.bf16.gmra.mrb[24].mxu1 %vm893_vm0, %v10435_v45 }
  0x4c   : > { %8923 = vmatprep.mubr.msk.bf16.mxu1 %vm893_vm0, %v10436_v48 }
  0x4d   : > { %8828 = vmatmul.mubr.msk.bf16.gmra.mrb[28].mxu0 %vm893_vm0, %v10389_v16 }
  0x4e   : > { %8831 = vmatprep.mubr.msk.bf16.mxu0 %vm893_vm0, %v10390_v17 }
  0x53   : > { %8924 = vmatmul.mubr.msk.bf16.gmra.mrb[28].mxu1 %vm893_vm0, %v10437_v49 }
  0x54   : > { %8933 = vmatprep.mubr.msk.bf16.mxu1 %vm10484_vm3, %v15437_v62 }
  0x55   : > { %8832 = vmatmul.mubr.msk.bf16.gmra.mrb[32].mxu0 %vm893_vm0, %v10391_v21 }
  0x56   : > { %8835 = vmatprep.mubr.msk.bf16.mxu0 %vm893_vm0, %v10392_v22 }
  0x5d   : > { %8836 = vmatmul.mubr.msk.bf16.gmra.mrb[36].mxu0 %vm893_vm0, %v10393_v25 }
  0x5e   : > { %8839 = vmatprep.mubr.msk.bf16.mxu0 %vm893_vm0, %v10394_v26 }
  0x65   : > { %8840 = vmatmul.mubr.msk.bf16.gmra.mrb[40].mxu0 %vm893_vm0, %v10395_v28 }
  0x66   : > { %8843 = vmatprep.mubr.msk.bf16.mxu0 %vm893_vm0, %v10396_v29 }
  0x6d   : > { %8844 = vmatmul.mubr.msk.bf16.gmra.mrb[44].mxu0 %vm893_vm0, %v10397_v30 }
  0x6e   : > { %8847 = vmatprep.mubr.msk.bf16.mxu0 %vm893_vm0, %v10398_v31 }
  0x75   : > { %8848 = vmatmul.mubr.msk.bf16.gmra.mrb[48].mxu0 %vm893_vm0, %v10399_v34 }
  0x76   : > { %8851 = vmatprep.mubr.msk.bf16.mxu0 %vm893_vm0, %v10400_v35 }
  0x7d   : > { %8852 = vmatmul.mubr.msk.bf16.gmra.mrb[52].mxu0 %vm893_vm0, %v10401_v38 }
  0x7e   : > { %8855 = vmatprep.mubr.msk.bf16.mxu0 %vm893_vm0, %v10402_v39 }
  0x85   : > { %8856 = vmatmul.mubr.msk.bf16.gmra.mrb[56].mxu0 %vm893_vm0, %v10403_v42 }
  0x86   : > { %8859 = vmatprep.mubr.msk.bf16.mxu0 %vm893_vm0, %v10404_v43 }
  0x8d   : > { %8860 = vmatmul.mubr.msk.bf16.gmra.mrb[60].mxu0 %vm893_vm0, %v10405_v46 }
  0x8e   : > { %8863 = vmatprep.mubr.msk.bf16.mxu0 %vm893_vm0, %v10406_v47 }
  0x95   : > { %8864 = vmatmul.mubr.msk.bf16.gmra.mrb[64].mxu0 %vm893_vm0, %v10407_v50 }
  0x96   : > { %8867 = vmatprep.mubr.msk.bf16.mxu0 %vm893_vm0, %v10408_v51 }
  0x9d   : > { %8868 = vmatmul.mubr.msk.bf16.gmra.mrb[68].mxu0 %vm893_vm0, %v10409_v52 }
  0x9e   : > { %8871 = vmatprep.mubr.msk.bf16.mxu0 %vm893_vm0, %v10410_v53 }
  0xa5   : > { %8872 = vmatmul.mubr.msk.bf16.gmra.mrb[72].mxu0 %vm893_vm0, %v10411_v54 }
  0xa6   : > { %8875 = vmatprep.mubr.msk.bf16.mxu0 %vm893_vm0, %v10412_v55 }
  0xad   : > { %8876 = vmatmul.mubr.msk.bf16.gmra.mrb[76].mxu0 %vm893_vm0, %v10413_v56 }
  0xae   : > { %8879 = vmatprep.mubr.msk.bf16.mxu0 %vm893_vm0, %v10414_v57 }
  0xb5   : > { %8880 = vmatmul.mubr.msk.bf16.gmra.mrb[80].mxu0 %vm893_vm0, %v10415_v58 }
  0xb6   : > { %8883 = vmatprep.mubr.msk.bf16.mxu0 %vm893_vm0, %v10416_v59 }
  0xbd   : > { %8884 = vmatmul.mubr.msk.bf16.gmra.mrb[84].mxu0 %vm893_vm0, %v10417_v61 }
  0xbe   : > { %8887 = vmatprep.mubr.msk.bf16.mxu0 %vm893_vm0, %v10418_v63 }
  0xc5   : > { %8888 = vmatmul.mubr.msk.bf16.gmra.mrb[88].mxu0 %vm893_vm0, %v10419_v0 }
  0xc6   : > { %8891 = vmatprep.mubr.msk.bf16.mxu0 %vm893_vm0, %v10420_v1 }
  0xcd   : > { %8892 = vmatmul.mubr.msk.bf16.gmra.mrb[92].mxu0 %vm893_vm0, %v10421_v2 }
  0xe8   : > { %v8801_v6 = vpop.f32.mrb[0].mxu0 }
  0xe9   : > { %v1639_v8 = vmul.f32 %v8801_v6, %v10720_v5  ;;  %v1120_v9 = vpop.f32.mrb[1].mxu0 }
  0xea   : > { %v1637_v10 = vmul.f32 %v10720_v5, %v1120_v9  ;;  %v8802_v11 = vpop.f32.mrb[2].mxu0 }
  0xeb   : > { %v1773_v12 = vadd.f32 %v10725_v7, %v1639_v8  ;;  %v1640_v13 = vmul.f32 %v8802_v11, %v10720_v5  ;;  %v1123_v14 = vpop.f32.mrb[3].mxu0 }
  0xec   : > { %v1771_v15 = vadd.f32 %v10725_v7, %v1637_v10  ;;  %v1638_v16 = vmul.f32 %v10720_v5, %v1123_v14 }
  0xed   : > { %v10733_v17 = vmax.f32 %v1773_v12, 0.0  ;;  %v1774_v18 = vadd.f32 %v10725_v7, %v1640_v13 }
  0xee   : > { %v10736_v19 = vmax.f32 %v1771_v15, 0.0  ;;  %v1772_v20 = vadd.f32 %v10725_v7, %v1638_v16 }
  0xef   : > { %v10739_v21 = vmax.f32 %v1774_v18, 0.0  ;;  %v2156_v27 = vrot.slane %v10733_v17, 1  ;;  %v2788_v28 = vrot.slane %v10733_v17, 2 }
  0xf0   : > { %v10741_v22 = vmax.f32 %v1772_v20, 0.0  ;;  %v8805_v23 = vpop.f32.mrb[4].mxu0  ;;  %v2153_v26 = vrot.slane %v10736_v19, 1  ;;  %v2785_v37 = vrot.slane %v10736_v19, 2 }
  0xf1   : > { %v1643_v24 = vmul.f32 %v8805_v23, %v10720_v5  ;;  %v1136_v25 = vpop.f32.mrb[5].mxu0  ;;  %v2158_v33 = vrot.slane %v10739_v21, 1  ;;  %v2790_v38 = vrot.slane %v10739_v21, 2 }
  0xf2   : > { %v1641_v29 = vmul.f32 %v10720_v5, %v1136_v25  ;;  %v8806_v30 = vpop.f32.mrb[6].mxu0  ;;  %v2154_v31 = vrot.slane %v10741_v22, 1  ;;  %v2786_v32 = vrot.slane %v10741_v22, 2 }
  0xf3   : > { %v1777_v34 = vadd.f32 %v10725_v7, %v1643_v24  ;;  %v1644_v35 = vmul.f32 %v8806_v30, %v10720_v5  ;;  %v1139_v36 = vpop.f32.mrb[7].mxu0  ;;  %v2159_v50 = vsel %vm2152_vm1, %v2156_v27, %v2158_v33  ;;  %v2791_v54 = vsel %vm2784_vm2, %v2788_v28, %v2790_v38 }
  0xf4   : > { %v1775_v39 = vadd.f32 %v10725_v7, %v1641_v29  ;;  %v1642_v40 = vmul.f32 %v10720_v5, %v1139_v36  ;;  %v2155_v41 = vsel %vm2152_vm1, %v2153_v26, %v2154_v31  ;;  %v2157_v42 = vsel %vm2152_vm1, %v2154_v31, %v2156_v27 }
  0xf5   : > { %v10759_v43 = vmax.f32 %v1777_v34, 0.0  ;;  %v1778_v44 = vadd.f32 %v10725_v7, %v1644_v35  ;;  %v9278_v45 = vpack.i.bf16 %v2157_v42, %v2155_v41  ;;  %v2787_v46 = vsel %vm2784_vm2, %v2785_v37, %v2786_v32 }
  0xf6   : > { %v10763_v47 = vmax.f32 %v1775_v39, 0.0  ;;  %v1776_v48 = vadd.f32 %v10725_v7, %v1642_v40  ;;  %v2789_v49 = vsel %vm2784_vm2, %v2786_v32, %v2788_v28 }
  0xf7   : > { %v10768_v51 = vmax.f32 %v1778_v44, 0.0  ;;  %9279 = vrot.lane.b32.xlu0 %v9278_v45, %s10483_s28  ;;  %v9283_v52 = vpack.i.bf16 %v2789_v49, %v2787_v46  ;;  %v2164_v53 = vrot.slane %v10759_v43, 1  ;;  %v2796_v61 = vrot.slane %v10759_v43, 2 }
  0xf8   : > { %v10773_v55 = vmax.f32 %v1776_v48, 0.0  ;;  %v8809_v56 = vpop.f32.mrb[8].mxu0  ;;  %v2160_v57 = vrot.slane %v10763_v47, 1  ;;  %v2792_v58 = vrot.slane %v10763_v47, 2 }
  0xf9   : > { %v1647_v59 = vmul.f32 %v8809_v56, %v10720_v5  ;;  %v1152_v60 = vpop.f32.mrb[9].mxu0  ;;  %v2166_v63 = vrot.slane %v10768_v51, 1  ;;  %v2798_v0 = vrot.slane %v10768_v51, 2 }
  0xfa   : > { %v1645_v1 = vmul.f32 %v10720_v5, %v1152_v60  ;;  %v8810_v2 = vpop.f32.mrb[10].mxu0  ;;  %v2161_v3 = vsel %vm2152_vm1, %v2158_v33, %v2160_v57  ;;  %v2162_v4 = vrot.slane %v10773_v55, 1  ;;  %v2793_v6 = vsel %vm2784_vm2, %v2790_v38, %v2792_v58 }
  0xfb   : > { %v1781_v8 = vadd.f32 %v10725_v7, %v1647_v59  ;;  %9284 = vrot.lane.b32.xlu0 %v9283_v52, %s10485_s29  ;;  %v1648_v9 = vmul.f32 %v8810_v2, %v10720_v5  ;;  %v9288_v10 = vpack.i.bf16 %v2161_v3, %v2159_v50  ;;  %v1155_v11 = vpop.f32.mrb[11].mxu0  ;;  %v9293_v12 = vpack.i.bf16 %v2793_v6, %v2791_v54 }
  0xfc   : > { %v1779_v13 = vadd.f32 %v10725_v7, %v1645_v1  ;;  %v1646_v14 = vmul.f32 %v10720_v5, %v1155_v11  ;;  %v2163_v15 = vsel %vm2152_vm1, %v2160_v57, %v2162_v4  ;;  %v2165_v16 = vsel %vm2152_vm1, %v2162_v4, %v2164_v53 }
  0xfd   : > { %v10794_v18 = vmax.f32 %v1781_v8, 0.0  ;;  %v1782_v20 = vadd.f32 %v10725_v7, %v1648_v9  ;;  %9289 = vrot.lane.b32.xlu1 %v9288_v10, %s10483_s28  ;;  %v9298_v23 = vpack.i.bf16 %v2165_v16, %v2163_v15  ;;  %v2794_v24 = vrot.slane %v10773_v55, 2 }
  0xfe   : > { %v10799_v25 = vmax.f32 %v1779_v13, 0.0  ;;  %v1780_v26 = vadd.f32 %v10725_v7, %v1646_v14  ;;  %v2167_v27 = vsel %vm2152_vm1, %v2164_v53, %v2166_v63  ;;  %v2799_v28 = vsel %vm2784_vm2, %v2796_v61, %v2798_v0 }
  0xff   : > { %v10804_v29 = vmax.f32 %v1782_v20, 0.0  ;;  %9299 = vrot.lane.b32.xlu0 %v9298_v23, %s10483_s28  ;;  %v2795_v30 = vsel %vm2784_vm2, %v2792_v58, %v2794_v24  ;;  %v2797_v31 = vsel %vm2784_vm2, %v2794_v24, %v2796_v61  ;;  %v2172_v32 = vrot.slane %v10794_v18, 1 }
 0x100   : > { %v10810_v33 = vmax.f32 %v1780_v26, 0.0  ;;  %v8813_v34 = vpop.f32.mrb[12].mxu0  ;;  %v9303_v35 = vpack.i.bf16 %v2797_v31, %v2795_v30  ;;  %v2168_v36 = vrot.slane %v10799_v25, 1  ;;  %v2800_v37 = vrot.slane %v10799_v25, 2 }
 0x101   : > { %v1651_v38 = vmul.f32 %v8813_v34, %v10720_v5  ;;  %9294 = vrot.lane.b32.xlu1 %v9293_v12, %s10485_s29  ;;  %v1168_v39 = vpop.f32.mrb[13].mxu0  ;;  %v2804_v40 = vrot.slane %v10794_v18, 2  ;;  %v2174_v41 = vrot.slane %v10804_v29, 1  ;;  %v2806_v42 = vrot.slane %v10804_v29, 2 }
 0x102   : > { %v1649_v44 = vmul.f32 %v10720_v5, %v1168_v39  ;;  %v8814_v45 = vpop.f32.mrb[14].mxu0  ;;  %v2169_v46 = vsel %vm2152_vm1, %v2166_v63, %v2168_v36  ;;  %v2801_v48 = vsel %vm2784_vm2, %v2798_v0, %v2800_v37  ;;  %v2170_v49 = vrot.slane %v10810_v33, 1 }
 0x103   : > { %v1785_v50 = vadd.f32 %v10725_v7, %v1651_v38  ;;  %v1652_v52 = vmul.f32 %v8814_v45, %v10720_v5  ;;  %v9308_v53 = vpack.i.bf16 %v2169_v46, %v2167_v27  ;;  %v1171_v54 = vpop.f32.mrb[15].mxu0  ;;  %v9313_v56 = vpack.i.bf16 %v2801_v48, %v2799_v28 }
 0x104   : > { %v1783_v57 = vadd.f32 %v10725_v7, %v1649_v44  ;;  %v1650_v58 = vmul.f32 %v10720_v5, %v1171_v54  ;;  %v2171_v59 = vsel %vm2152_vm1, %v2168_v36, %v2170_v49  ;;  %v2173_v60 = vsel %vm2152_vm1, %v2170_v49, %v2172_v32 }
 0x105   : > { %v10829_v61 = vmax.f32 %v1785_v50, 0.0  ;;  %v1786_v63 = vadd.f32 %v10725_v7, %v1652_v52  ;;  %9304 = vrot.lane.b32.xlu1 %v9303_v35, %s10485_s29  ;;  %9309 = vrot.lane.b32.xlu0 %v9308_v53, %s10483_s28  ;;  %v9318_v0 = vpack.i.bf16 %v2173_v60, %v2171_v59  ;;  %v2802_v1 = vrot.slane %v10810_v33, 2 }
 0x106   : > { %v10835_v2 = vmax.f32 %v1783_v57, 0.0  ;;  %v1784_v3 = vadd.f32 %v10725_v7, %v1650_v58  ;;  %v2175_v4 = vsel %vm2152_vm1, %v2172_v32, %v2174_v41  ;;  %v2807_v6 = vsel %vm2784_vm2, %v2804_v40, %v2806_v42 }
 0x107   : > { %v10840_v8 = vmax.f32 %v1786_v63, 0.0  ;;  %v2803_v9 = vsel %vm2784_vm2, %v2800_v37, %v2802_v1  ;;  %v2805_v10 = vsel %vm2784_vm2, %v2802_v1, %v2804_v40  ;;  %v2180_v11 = vrot.slane %v10829_v61, 1 }
 0x108   : > { %v10845_v12 = vmax.f32 %v1784_v3, 0.0  ;;  %v8817_v13 = vpop.f32.mrb[16].mxu0  ;;  %v9323_v14 = vpack.i.bf16 %v2805_v10, %v2803_v9  ;;  %v2176_v15 = vrot.slane %v10835_v2, 1  ;;  %v2808_v16 = vrot.slane %v10835_v2, 2 }
 0x109   : > { %v1655_v20 = vmul.f32 %v8817_v13, %v10720_v5  ;;  %9314 = vrot.lane.b32.xlu1 %v9313_v56, %s10485_s29  ;;  %9319 = vrot.lane.b32.xlu0 %v9318_v0, %s10483_s28  ;;  %v1184_v23 = vpop.f32.mrb[17].mxu0  ;;  %v2812_v24 = vrot.slane %v10829_v61, 2  ;;  %v2182_v26 = vrot.slane %v10840_v8, 1  ;;  %v2814_v27 = vrot.slane %v10840_v8, 2 }
 0x10a   : > { %v1653_v28 = vmul.f32 %v10720_v5, %v1184_v23  ;;  %v8818_v30 = vpop.f32.mrb[18].mxu0  ;;  %v2177_v31 = vsel %vm2152_vm1, %v2174_v41, %v2176_v15  ;;  %v2809_v32 = vsel %vm2784_vm2, %v2806_v42, %v2808_v16  ;;  %v2178_v34 = vrot.slane %v10845_v12, 1 }
 0x10b   : > { %v1789_v35 = vadd.f32 %v10725_v7, %v1655_v20  ;;  %v1656_v36 = vmul.f32 %v8818_v30, %v10720_v5  ;;  %v9328_v37 = vpack.i.bf16 %v2177_v31, %v2175_v4  ;;  %v1187_v38 = vpop.f32.mrb[19].mxu0  ;;  %v9333_v39 = vpack.i.bf16 %v2809_v32, %v2807_v6 }
 0x10c   : > { %v1787_v40 = vadd.f32 %v10725_v7, %v1653_v28  ;;  %v1654_v44 = vmul.f32 %v10720_v5, %v1187_v38  ;;  %v2179_v45 = vsel %vm2152_vm1, %v2176_v15, %v2178_v34  ;;  %v2181_v46 = vsel %vm2152_vm1, %v2178_v34, %v2180_v11 }
 0x10d   : > { %v10865_v41 = vmax.f32 %v1789_v35, 0.0  ;;  %v1790_v42 = vadd.f32 %v10725_v7, %v1656_v36  ;;  %9324 = vrot.lane.b32.xlu1 %v9323_v14, %s10485_s29  ;;  %9329 = vrot.lane.b32.xlu0 %v9328_v37, %s10483_s28  ;;  %v9338_v48 = vpack.i.bf16 %v2181_v46, %v2179_v45  ;;  %v2810_v49 = vrot.slane %v10845_v12, 2 }
 0x10e   : > { %v10871_v50 = vmax.f32 %v1787_v40, 0.0  ;;  %v1788_v52 = vadd.f32 %v10725_v7, %v1654_v44  ;;  %v2183_v53 = vsel %vm2152_vm1, %v2180_v11, %v2182_v26  ;;  %v2815_v54 = vsel %vm2784_vm2, %v2812_v24, %v2814_v27 }
 0x10f   : > { %v10876_v56 = vmax.f32 %v1790_v42, 0.0  ;;  %v2811_v57 = vsel %vm2784_vm2, %v2808_v16, %v2810_v49  ;;  %v2813_v58 = vsel %vm2784_vm2, %v2810_v49, %v2812_v24  ;;  %v2188_v59 = vrot.slane %v10865_v41, 1 }
 0x110   : > { %v10881_v60 = vmax.f32 %v1788_v52, 0.0  ;;  %v8821_v63 = vpop.f32.mrb[20].mxu0  ;;  %v9343_v0 = vpack.i.bf16 %v2813_v58, %v2811_v57  ;;  %v2184_v1 = vrot.slane %v10871_v50, 1  ;;  %v2816_v3 = vrot.slane %v10871_v50, 2 }
 0x111   : > { %v1659_v4 = vmul.f32 %v8821_v63, %v10720_v5  ;;  %9334 = vrot.lane.b32.xlu1 %v9333_v39, %s10485_s29  ;;  %9339 = vrot.lane.b32.xlu0 %v9338_v48, %s10483_s28  ;;  %v1200_v6 = vpop.f32.mrb[21].mxu0  ;;  %v2820_v9 = vrot.slane %v10865_v41, 2  ;;  %v2190_v10 = vrot.slane %v10876_v56, 1  ;;  %v2822_v11 = vrot.slane %v10876_v56, 2 }
 0x112   : > { %v1657_v13 = vmul.f32 %v10720_v5, %v1200_v6  ;;  %v8822_v14 = vpop.f32.mrb[22].mxu0  ;;  %v2185_v15 = vsel %vm2152_vm1, %v2182_v26, %v2184_v1  ;;  %v2817_v16 = vsel %vm2784_vm2, %v2814_v27, %v2816_v3  ;;  %v2186_v20 = vrot.slane %v10881_v60, 1 }
 0x113   : > { %v1793_v23 = vadd.f32 %v10725_v7, %v1659_v4  ;;  %v1660_v24 = vmul.f32 %v8822_v14, %v10720_v5  ;;  %v9348_v28 = vpack.i.bf16 %v2185_v15, %v2183_v53  ;;  %v1203_v30 = vpop.f32.mrb[23].mxu0  ;;  %v9353_v31 = vpack.i.bf16 %v2817_v16, %v2815_v54 }
 0x114   : > { %v1791_v32 = vadd.f32 %v10725_v7, %v1657_v13  ;;  %v1658_v34 = vmul.f32 %v10720_v5, %v1203_v30  ;;  %v2187_v35 = vsel %vm2152_vm1, %v2184_v1, %v2186_v20  ;;  %v2189_v36 = vsel %vm2152_vm1, %v2186_v20, %v2188_v59 }
 0x115   : > { %v10901_v26 = vmax.f32 %v1793_v23, 0.0  ;;  %v1794_v27 = vadd.f32 %v10725_v7, %v1660_v24  ;;  %9344 = vrot.lane.b32.xlu1 %v9343_v0, %s10485_s29  ;;  %9349 = vrot.lane.b32.xlu0 %v9348_v28, %s10483_s28  ;;  %v9358_v37 = vpack.i.bf16 %v2189_v36, %v2187_v35  ;;  %v2818_v38 = vrot.slane %v10881_v60, 2 }
 0x116   : > { %v10907_v39 = vmax.f32 %v1791_v32, 0.0  ;;  %v1792_v40 = vadd.f32 %v10725_v7, %v1658_v34  ;;  %v2191_v44 = vsel %vm2152_vm1, %v2188_v59, %v2190_v10  ;;  %v2823_v45 = vsel %vm2784_vm2, %v2820_v9, %v2822_v11 }
 0x117   : > { %15563 = vst [vmem:[#allocation3_spill] sm:$0xff] %v10901_v26  ;;  %v10912_v46 = vmax.f32 %v1794_v27, 0.0  ;;  %v2819_v42 = vsel %vm2784_vm2, %v2816_v3, %v2818_v38  ;;  %v2821_v48 = vsel %vm2784_vm2, %v2818_v38, %v2820_v9  ;;  %v2196_v49 = vrot.slane %v10901_v26, 1 }
 0x118   : > { %15564 = vst [vmem:[#allocation4_spill] sm:$0xff] %v10907_v39  ;;  %v10917_v52 = vmax.f32 %v1792_v40, 0.0  ;;  %v8825_v53 = vpop.f32.mrb[24].mxu0  ;;  %v9363_v54 = vpack.i.bf16 %v2821_v48, %v2819_v42  ;;  %v2192_v57 = vrot.slane %v10907_v39, 1  ;;  %v2824_v58 = vrot.slane %v10907_v39, 2 }
 0x119   : > { %15565 = vst [vmem:[#allocation5_spill] sm:$0xff] %v10912_v46  ;;  %v1663_v59 = vmul.f32 %v8825_v53, %v10720_v5  ;;  %9354 = vrot.lane.b32.xlu1 %v9353_v31, %s10485_s29  ;;  %9359 = vrot.lane.b32.xlu0 %v9358_v37, %s10483_s28  ;;  %v1216_v63 = vpop.f32.mrb[25].mxu0  ;;  %v2828_v0 = vrot.slane %v10901_v26, 2  ;;  %v2198_v1 = vrot.slane %v10912_v46, 1  ;;  %v2830_v3 = vrot.slane %v10912_v46, 2 }
 0x11a   : > { %15566 = vst [vmem:[#allocation6_spill] sm:$0xff] %v10917_v52  ;;  %v1661_v4 = vmul.f32 %v10720_v5, %v1216_v63  ;;  %v8826_v6 = vpop.f32.mrb[26].mxu0  ;;  %v2193_v9 = vsel %vm2152_vm1, %v2190_v10, %v2192_v57  ;;  %v2825_v13 = vsel %vm2784_vm2, %v2822_v11, %v2824_v58  ;;  %v2194_v14 = vrot.slane %v10917_v52, 1 }
 0x11b   : > { %v1797_v15 = vadd.f32 %v10725_v7, %v1663_v59  ;;  %v1664_v16 = vmul.f32 %v8826_v6, %v10720_v5  ;;  %v9368_v20 = vpack.i.bf16 %v2193_v9, %v2191_v44  ;;  %v1219_v23 = vpop.f32.mrb[27].mxu0  ;;  %v9373_v24 = vpack.i.bf16 %v2825_v13, %v2823_v45 }
 0x11c   : > { %v1795_v28 = vadd.f32 %v10725_v7, %v1661_v4  ;;  %v1662_v30 = vmul.f32 %v10720_v5, %v1219_v23  ;;  %v2195_v31 = vsel %vm2152_vm1, %v2192_v57, %v2194_v14  ;;  %v2197_v32 = vsel %vm2152_vm1, %v2194_v14, %v2196_v49 }
 0x11d   : > { %v10937_v10 = vmax.f32 %v1797_v15, 0.0  ;;  %v1798_v11 = vadd.f32 %v10725_v7, %v1664_v16  ;;  %9364 = vrot.lane.b32.xlu1 %v9363_v54, %s10485_s29  ;;  %9369 = vrot.lane.b32.xlu0 %v9368_v20, %s10483_s28  ;;  %v9378_v34 = vpack.i.bf16 %v2197_v32, %v2195_v31  ;;  %v2826_v35 = vrot.slane %v10917_v52, 2 }
 0x11e   : > { %v10943_v36 = vmax.f32 %v1795_v28, 0.0  ;;  %v1796_v27 = vadd.f32 %v10725_v7, %v1662_v30  ;;  %v2199_v37 = vsel %vm2152_vm1, %v2196_v49, %v2198_v1  ;;  %v2831_v38 = vsel %vm2784_vm2, %v2828_v0, %v2830_v3 }
 0x11f   : > { %15567 = vst [vmem:[#allocation7_spill] sm:$0xff] %v10937_v10  ;;  %v10948_v40 = vmax.f32 %v1798_v11, 0.0  ;;  %v2827_v44 = vsel %vm2784_vm2, %v2824_v58, %v2826_v35  ;;  %v2829_v45 = vsel %vm2784_vm2, %v2826_v35, %v2828_v0  ;;  %v2204_v42 = vrot.slane %v10937_v10, 1 }
 0x120   : > { %15568 = vst [vmem:[#allocation8_spill] sm:$0xff] %v10943_v36  ;;  %v10953_v48 = vmax.f32 %v1796_v27, 0.0  ;;  %v8829_v53 = vpop.f32.mrb[28].mxu0  ;;  %v9383_v54 = vpack.i.bf16 %v2829_v45, %v2827_v44  ;;  %v2200_v57 = vrot.slane %v10943_v36, 1  ;;  %v2832_v59 = vrot.slane %v10943_v36, 2 }
 0x121   : > { %15569 = vst [vmem:[#allocation9_spill] sm:$0xff] %v10948_v40  ;;  %v1667_v49 = vmul.f32 %v8829_v53, %v10720_v5  ;;  %9374 = vrot.lane.b32.xlu1 %v9373_v24, %s10485_s29  ;;  %9379 = vrot.lane.b32.xlu0 %v9378_v34, %s10483_s28  ;;  %v1232_v63 = vpop.f32.mrb[29].mxu0  ;;  %v2836_v58 = vrot.slane %v10937_v10, 2  ;;  %v2206_v0 = vrot.slane %v10948_v40, 1  ;;  %v2838_v4 = vrot.slane %v10948_v40, 2 }
 0x122   : > { %15570 = vst [vmem:[#allocation10_spill] sm:$0xff] %v10953_v48  ;;  %v1665_v6 = vmul.f32 %v10720_v5, %v1232_v63  ;;  %v8830_v9 = vpop.f32.mrb[30].mxu0  ;;  %v2201_v13 = vsel %vm2152_vm1, %v2198_v1, %v2200_v57  ;;  %v2833_v14 = vsel %vm2784_vm2, %v2830_v3, %v2832_v59  ;;  %v2202_v15 = vrot.slane %v10953_v48, 1 }
 0x123   : > { %v1801_v16 = vadd.f32 %v10725_v7, %v1667_v49  ;;  %v1668_v20 = vmul.f32 %v8830_v9, %v10720_v5  ;;  %v9388_v23 = vpack.i.bf16 %v2201_v13, %v2199_v37  ;;  %v1235_v24 = vpop.f32.mrb[31].mxu0  ;;  %v9393_v28 = vpack.i.bf16 %v2833_v14, %v2831_v38 }
 0x124   : > { %v1799_v30 = vadd.f32 %v10725_v7, %v1665_v6  ;;  %v1666_v31 = vmul.f32 %v10720_v5, %v1235_v24  ;;  %v2203_v32 = vsel %vm2152_vm1, %v2200_v57, %v2202_v15  ;;  %v2205_v11 = vsel %vm2152_vm1, %v2202_v15, %v2204_v42 }
 0x125   : > { %v10973_v1 = vmax.f32 %v1801_v16, 0.0  ;;  %v1802_v3 = vadd.f32 %v10725_v7, %v1668_v20  ;;  %9384 = vrot.lane.b32.xlu1 %v9383_v54, %s10485_s29  ;;  %9389 = vrot.lane.b32.xlu0 %v9388_v23, %s10483_s28  ;;  %v9398_v34 = vpack.i.bf16 %v2205_v11, %v2203_v32  ;;  %v2834_v35 = vrot.slane %v10953_v48, 2 }
 0x126   : > { %v10979_v27 = vmax.f32 %v1799_v30, 0.0  ;;  %v1800_v37 = vadd.f32 %v10725_v7, %v1666_v31  ;;  %v2207_v38 = vsel %vm2152_vm1, %v2204_v42, %v2206_v0  ;;  %v2839_v44 = vsel %vm2784_vm2, %v2836_v58, %v2838_v4 }
 0x127   : > { %15571 = vst [vmem:[#allocation11_spill] sm:$0xff] %v10973_v1  ;;  %v10984_v45 = vmax.f32 %v1802_v3, 0.0  ;;  %v2835_v53 = vsel %vm2784_vm2, %v2832_v59, %v2834_v35  ;;  %v2837_v57 = vsel %vm2784_vm2, %v2834_v35, %v2836_v58  ;;  %v2212_v54 = vrot.slane %v10973_v1, 1 }
 0x128   : > { %15572 = vst [vmem:[#allocation12_spill] sm:$0xff] %v10979_v27  ;;  %v10989_v49 = vmax.f32 %v1800_v37, 0.0  ;;  %v8833_v63 = vpop.f32.mrb[32].mxu0  ;;  %v9403_v6 = vpack.i.bf16 %v2837_v57, %v2835_v53  ;;  %v2208_v9 = vrot.slane %v10979_v27, 1  ;;  %v2840_v13 = vrot.slane %v10979_v27, 2 }
 0x129   : > { %15573 = vst [vmem:[#allocation13_spill] sm:$0xff] %v10984_v45  ;;  %v1671_v42 = vmul.f32 %v8833_v63, %v10720_v5  ;;  %9394 = vrot.lane.b32.xlu1 %v9393_v28, %s10485_s29  ;;  %9399 = vrot.lane.b32.xlu0 %v9398_v34, %s10483_s28  ;;  %v1248_v14 = vpop.f32.mrb[33].mxu0  ;;  %v2844_v59 = vrot.slane %v10973_v1, 2  ;;  %v2214_v58 = vrot.slane %v10984_v45, 1  ;;  %v2846_v15 = vrot.slane %v10984_v45, 2 }
 0x12a   : > { %15574 = vst [vmem:[#allocation14_spill] sm:$0xff] %v10989_v49  ;;  %v1669_v16 = vmul.f32 %v10720_v5, %v1248_v14  ;;  %v8834_v20 = vpop.f32.mrb[34].mxu0  ;;  %v2209_v23 = vsel %vm2152_vm1, %v2206_v0, %v2208_v9  ;;  %v2841_v24 = vsel %vm2784_vm2, %v2838_v4, %v2840_v13  ;;  %v2210_v30 = vrot.slane %v10989_v49, 1 }
 0x12b   : > { %v1805_v28 = vadd.f32 %v10725_v7, %v1671_v42  ;;  %v1672_v31 = vmul.f32 %v8834_v20, %v10720_v5  ;;  %v9408_v32 = vpack.i.bf16 %v2209_v23, %v2207_v38  ;;  %v1251_v11 = vpop.f32.mrb[35].mxu0  ;;  %v9413_v3 = vpack.i.bf16 %v2841_v24, %v2839_v44 }
 0x12c   : > { %v1803_v34 = vadd.f32 %v10725_v7, %v1669_v16  ;;  %v1670_v35 = vmul.f32 %v10720_v5, %v1251_v11  ;;  %v2211_v37 = vsel %vm2152_vm1, %v2208_v9, %v2210_v30  ;;  %v2213_v53 = vsel %vm2152_vm1, %v2210_v30, %v2212_v54 }
 0x12d   : > { %v11009_v0 = vmax.f32 %v1805_v28, 0.0  ;;  %v1806_v4 = vadd.f32 %v10725_v7, %v1672_v31  ;;  %9404 = vrot.lane.b32.xlu1 %v9403_v6, %s10485_s29  ;;  %9409 = vrot.lane.b32.xlu0 %v9408_v32, %s10483_s28  ;;  %v9418_v57 = vpack.i.bf16 %v2213_v53, %v2211_v37  ;;  %v2842_v38 = vrot.slane %v10989_v49, 2 }
 0x12e   : > { %v11015_v44 = vmax.f32 %v1803_v34, 0.0  ;;  %v1804_v63 = vadd.f32 %v10725_v7, %v1670_v35  ;;  %v2215_v42 = vsel %vm2152_vm1, %v2212_v54, %v2214_v58  ;;  %v2847_v9 = vsel %vm2784_vm2, %v2844_v59, %v2846_v15 }
 0x12f   : > { %15575 = vst [vmem:[#allocation15_spill] sm:$0xff] %v11009_v0  ;;  %v2220_v14 = vrot.slane %v11009_v0, 1  ;;  %v2852_v16 = vrot.slane %v11009_v0, 2  ;;  %v11022_v20 = vmax.f32 %v1806_v4, 0.0  ;;  %v2843_v6 = vsel %vm2784_vm2, %v2840_v13, %v2842_v38 }
 0x130   : > { %15576 = vst [vmem:[#allocation16_spill] sm:$0xff] %v11015_v44  ;;  %v2216_v23 = vrot.slane %v11015_v44, 1  ;;  %v2848_v24 = vrot.slane %v11015_v44, 2  ;;  %v11027_v30 = vmax.f32 %v1804_v63, 0.0  ;;  %v8837_v28 = vpop.f32.mrb[36].mxu0  ;;  %v2845_v31 = vsel %vm2784_vm2, %v2842_v38, %v2844_v59 }
 0x131   : > { %15577 = vst [vmem:[#allocation17_spill] sm:$0xff] %v11022_v20  ;;  %v2222_v54 = vrot.slane %v11022_v20, 1  ;;  %v2854_v32 = vrot.slane %v11022_v20, 2  ;;  %v1675_v11 = vmul.f32 %v8837_v28, %v10720_v5  ;;  %9414 = vrot.lane.b32.xlu1 %v9413_v3, %s10485_s29  ;;  %9419 = vrot.lane.b32.xlu0 %v9418_v57, %s10483_s28  ;;  %v1264_v13 = vpop.f32.mrb[37].mxu0  ;;  %v9423_v34 = vpack.i.bf16 %v2845_v31, %v2843_v6 }
 0x132   : > { %15578 = vst [vmem:[#allocation18_spill] sm:$0xff] %v11027_v30  ;;  %v2218_v35 = vrot.slane %v11027_v30, 1  ;;  %v2850_v37 = vrot.slane %v11027_v30, 2  ;;  %v1673_v53 = vmul.f32 %v10720_v5, %v1264_v13  ;;  %v8838_v4 = vpop.f32.mrb[38].mxu0  ;;  %v2217_v59 = vsel %vm2152_vm1, %v2214_v58, %v2216_v23 }
 0x133   : > { %v1809_v38 = vadd.f32 %v10725_v7, %v1675_v11  ;;  %v1676_v63 = vmul.f32 %v8838_v4, %v10720_v5  ;;  %v9428_v28 = vpack.i.bf16 %v2217_v59, %v2215_v42  ;;  %v1267_v62 = vpop.f32.mrb[39].mxu0  ;;  %v2849_v3 = vsel %vm2784_vm2, %v2846_v15, %v2848_v24 }
 0x134   : > { %v1807_v57 = vadd.f32 %v10725_v7, %v1673_v53  ;;  %v1674_v6 = vmul.f32 %v10720_v5, %v1267_v62  ;;  %v9433_v31 = vpack.i.bf16 %v2849_v3, %v2847_v9  ;;  %v2219_v0 = vsel %vm2152_vm1, %v2216_v23, %v2218_v35 }
 0x135   : > { %v11045_v20 = vmax.f32 %v1809_v38, 0.0  ;;  %v1810_v13 = vadd.f32 %v10725_v7, %v1676_v63  ;;  %9424 = vrot.lane.b32.xlu1 %v9423_v34, %s10485_s29  ;;  %9429 = vrot.lane.b32.xlu0 %v9428_v28, %s10483_s28  ;;  %v2221_v58 = vsel %vm2152_vm1, %v2218_v35, %v2220_v14  ;;  %v2851_v42 = vsel %vm2784_vm2, %v2848_v24, %v2850_v37 }
 0x136   : > { %v11052_v15 = vmax.f32 %v1807_v57, 0.0  ;;  %v1808_v11 = vadd.f32 %v10725_v7, %v1674_v6  ;;  %v9438_v62 = vpack.i.bf16 %v2221_v58, %v2219_v0  ;;  %v2853_v9 = vsel %vm2784_vm2, %v2850_v37, %v2852_v16 }
 0x137   : > { %15579 = vst [vmem:[#allocation19_spill] sm:$0xff] %v11045_v20  ;;  %v2228_v23 = vrot.slane %v11045_v20, 1  ;;  %v2860_v53 = vrot.slane %v11045_v20, 2  ;;  %v11058_v4 = vmax.f32 %v1810_v13, 0.0  ;;  %v9443_v34 = vpack.i.bf16 %v2853_v9, %v2851_v42 }
 0x138   : > { %15580 = vst [vmem:[#allocation20_spill] sm:$0xff] %v11052_v15  ;;  %v2224_v59 = vrot.slane %v11052_v15, 1  ;;  %v2856_v35 = vrot.slane %v11052_v15, 2  ;;  %v11062_v38 = vmax.f32 %v1808_v11, 0.0  ;;  %v8841_v24 = vpop.f32.mrb[40].mxu0  ;;  %v2223_v63 = vsel %vm2152_vm1, %v2220_v14, %v2222_v54 }
 0x139   : > { %15581 = vst [vmem:[#allocation21_spill] sm:$0xff] %v11058_v4  ;;  %v2230_v0 = vrot.slane %v11058_v4, 1  ;;  %v2862_v37 = vrot.slane %v11058_v4, 2  ;;  %v1679_v28 = vmul.f32 %v8841_v24, %v10720_v5  ;;  %9434 = vrot.lane.b32.xlu1 %v9433_v31, %s10485_s29  ;;  %9439 = vrot.lane.b32.xlu0 %v9438_v62, %s10483_s28  ;;  %v1280_v3 = vpop.f32.mrb[41].mxu0  ;;  %v2855_v57 = vsel %vm2784_vm2, %v2852_v16, %v2854_v32 }
 0x13a   : > { %15582 = vst [vmem:[#allocation22_spill] sm:$0xff] %v11062_v38  ;;  %v2226_v6 = vrot.slane %v11062_v38, 1  ;;  %v2858_v13 = vrot.slane %v11062_v38, 2  ;;  %v1677_v58 = vmul.f32 %v10720_v5, %v1280_v3  ;;  %v8842_v14 = vpop.f32.mrb[42].mxu0  ;;  %v2225_v42 = vsel %vm2152_vm1, %v2222_v54, %v2224_v59 }
 0x13b   : > { %v1813_v11 = vadd.f32 %v10725_v7, %v1679_v28  ;;  %v1680_v9 = vmul.f32 %v8842_v14, %v10720_v5  ;;  %v9448_v24 = vpack.i.bf16 %v2225_v42, %v2223_v63  ;;  %v1283_v31 = vpop.f32.mrb[43].mxu0  ;;  %v2857_v62 = vsel %vm2784_vm2, %v2854_v32, %v2856_v35 }
 0x13c   : > { %v1811_v20 = vadd.f32 %v10725_v7, %v1677_v58  ;;  %v1678_v16 = vmul.f32 %v10720_v5, %v1283_v31  ;;  %v9453_v4 = vpack.i.bf16 %v2857_v62, %v2855_v57  ;;  %v2227_v15 = vsel %vm2152_vm1, %v2224_v59, %v2226_v6 }
 0x13d   : > { %v11081_v38 = vmax.f32 %v1813_v11, 0.0  ;;  %v1814_v3 = vadd.f32 %v10725_v7, %v1680_v9  ;;  %9444 = vrot.lane.b32.xlu1 %v9443_v34, %s10485_s29  ;;  %9449 = vrot.lane.b32.xlu0 %v9448_v24, %s10483_s28  ;;  %v2229_v54 = vsel %vm2152_vm1, %v2226_v6, %v2228_v23  ;;  %v2859_v63 = vsel %vm2784_vm2, %v2856_v35, %v2858_v13 }
 0x13e   : > { %v11088_v32 = vmax.f32 %v1811_v20, 0.0  ;;  %v1812_v28 = vadd.f32 %v10725_v7, %v1678_v16  ;;  %v9458_v58 = vpack.i.bf16 %v2229_v54, %v2227_v15  ;;  %v2861_v57 = vsel %vm2784_vm2, %v2858_v13, %v2860_v53 }
 0x13f   : > { %15583 = vst [vmem:[#allocation23_spill] sm:$0xff] %v11081_v38  ;;  %v2236_v59 = vrot.slane %v11081_v38, 1  ;;  %v2868_v14 = vrot.slane %v11081_v38, 2  ;;  %v11094_v42 = vmax.f32 %v1814_v3, 0.0  ;;  %v9463_v34 = vpack.i.bf16 %v2861_v57, %v2859_v63 }
 0x140   : > { %15584 = vst [vmem:[#allocation24_spill] sm:$0xff] %v11088_v32  ;;  %v2232_v11 = vrot.slane %v11088_v32, 1  ;;  %v2864_v6 = vrot.slane %v11088_v32, 2  ;;  %v11098_v9 = vmax.f32 %v1812_v28, 0.0  ;;  %v8845_v20 = vpop.f32.mrb[44].mxu0  ;;  %v2231_v35 = vsel %vm2152_vm1, %v2228_v23, %v2230_v0 }
 0x141   : > { %15585 = vst [vmem:[#allocation25_spill] sm:$0xff] %v11094_v42  ;;  %v2238_v15 = vrot.slane %v11094_v42, 1  ;;  %v2870_v13 = vrot.slane %v11094_v42, 2  ;;  %v1683_v24 = vmul.f32 %v8845_v20, %v10720_v5  ;;  %9454 = vrot.lane.b32.xlu1 %v9453_v4, %s10485_s29  ;;  %9459 = vrot.lane.b32.xlu0 %v9458_v58, %s10483_s28  ;;  %v1296_v31 = vpop.f32.mrb[45].mxu0  ;;  %v2863_v62 = vsel %vm2784_vm2, %v2860_v53, %v2862_v37 }
 0x142   : > { %15586 = vst [vmem:[#allocation26_spill] sm:$0xff] %v11098_v9  ;;  %v2234_v16 = vrot.slane %v11098_v9, 1  ;;  %v2866_v3 = vrot.slane %v11098_v9, 2  ;;  %v1681_v54 = vmul.f32 %v10720_v5, %v1296_v31  ;;  %v8846_v23 = vpop.f32.mrb[46].mxu0  ;;  %v2233_v63 = vsel %vm2152_vm1, %v2230_v0, %v2232_v11 }
 0x143   : > { %v1817_v28 = vadd.f32 %v10725_v7, %v1683_v24  ;;  %v1684_v57 = vmul.f32 %v8846_v23, %v10720_v5  ;;  %v9468_v20 = vpack.i.bf16 %v2233_v63, %v2231_v35  ;;  %v1299_v4 = vpop.f32.mrb[47].mxu0  ;;  %v2865_v58 = vsel %vm2784_vm2, %v2862_v37, %v2864_v6 }
 0x144   : > { %v1815_v38 = vadd.f32 %v10725_v7, %v1681_v54  ;;  %v1682_v53 = vmul.f32 %v10720_v5, %v1299_v4  ;;  %v9473_v42 = vpack.i.bf16 %v2865_v58, %v2863_v62  ;;  %v2235_v32 = vsel %vm2152_vm1, %v2232_v11, %v2234_v16 }
 0x145   : > { %v11117_v9 = vmax.f32 %v1817_v28, 0.0  ;;  %v1818_v31 = vadd.f32 %v10725_v7, %v1684_v57  ;;  %9464 = vrot.lane.b32.xlu1 %v9463_v34, %s10485_s29  ;;  %9469 = vrot.lane.b32.xlu0 %v9468_v20, %s10483_s28  ;;  %v2237_v0 = vsel %vm2152_vm1, %v2234_v16, %v2236_v59  ;;  %v2867_v35 = vsel %vm2784_vm2, %v2864_v6, %v2866_v3 }
 0x146   : > { %v11124_v37 = vmax.f32 %v1815_v38, 0.0  ;;  %v1816_v24 = vadd.f32 %v10725_v7, %v1682_v53  ;;  %v9478_v54 = vpack.i.bf16 %v2237_v0, %v2235_v32  ;;  %v2869_v62 = vsel %vm2784_vm2, %v2866_v3, %v2868_v14  ;;  %v11143_v53 = vpop.f32.mrb[0].mxu1 }
 0x147   : > { %15587 = vst [vmem:[#allocation27_spill] sm:$0xff] %v11117_v9  ;;  %v2244_v11 = vrot.slane %v11117_v9, 1  ;;  %v2876_v23 = vrot.slane %v11117_v9, 2  ;;  %v11130_v63 = vmax.f32 %v1818_v31, 0.0  ;;  %v9483_v34 = vpack.i.bf16 %v2869_v62, %v2867_v35  ;;  %v11149_v62 = vpop.f32.mrb[1].mxu1 }
 0x148   : > { %15588 = vst [vmem:[#allocation28_spill] sm:$0xff] %v11124_v37  ;;  %v2240_v28 = vrot.slane %v11124_v37, 1  ;;  %v2872_v16 = vrot.slane %v11124_v37, 2  ;;  %v11134_v57 = vmax.f32 %v1816_v24, 0.0  ;;  %v8849_v38 = vpop.f32.mrb[48].mxu0  ;;  %v2239_v6 = vsel %vm2152_vm1, %v2236_v59, %v2238_v15 }
 0x149   : > { %15589 = vst [vmem:[#allocation29_spill] sm:$0xff] %v11130_v63  ;;  %v2246_v32 = vrot.slane %v11130_v63, 1  ;;  %v2878_v3 = vrot.slane %v11130_v63, 2  ;;  %v1687_v20 = vmul.f32 %v8849_v38, %v10720_v5  ;;  %9474 = vrot.lane.b32.xlu1 %v9473_v42, %s10485_s29  ;;  %9479 = vrot.lane.b32.xlu0 %v9478_v54, %s10483_s28  ;;  %v1312_v4 = vpop.f32.mrb[49].mxu0  ;;  %v2871_v58 = vsel %vm2784_vm2, %v2868_v14, %v2870_v13 }
 0x14a   : > { %15590 = vst [vmem:[#allocation30_spill] sm:$0xff] %v11134_v57  ;;  %v2242_v31 = vrot.slane %v11134_v57, 1  ;;  %v2874_v0 = vrot.slane %v11134_v57, 2  ;;  %v1685_v59 = vmul.f32 %v10720_v5, %v1312_v4  ;;  %v8850_v35 = vpop.f32.mrb[50].mxu0  ;;  %v2241_v24 = vsel %vm2152_vm1, %v2238_v15, %v2240_v28 }
 0x14b   : > { %v1821_v42 = vadd.f32 %v10725_v7, %v1687_v20  ;;  %v1688_v54 = vmul.f32 %v8850_v35, %v10720_v5  ;;  %v9488_v38 = vpack.i.bf16 %v2241_v24, %v2239_v6  ;;  %v1315_v9 = vpop.f32.mrb[51].mxu0  ;;  %v2873_v14 = vsel %vm2784_vm2, %v2870_v13, %v2872_v16 }
 0x14c   : > { %v1819_v63 = vadd.f32 %v10725_v7, %v1685_v59  ;;  %v1686_v37 = vmul.f32 %v10720_v5, %v1315_v9  ;;  %v9493_v57 = vpack.i.bf16 %v2873_v14, %v2871_v58  ;;  %v2243_v4 = vsel %vm2152_vm1, %v2240_v28, %v2242_v31  ;;  %v11168_v28 = vpop.f32.mrb[2].mxu1 }
 0x14d   : > { %v11157_v44 = vmax.f32 %v1821_v42, 0.0  ;;  %v1822_v15 = vadd.f32 %v10725_v7, %v1688_v54  ;;  %9484 = vrot.lane.b32.xlu1 %v9483_v34, %s10485_s29  ;;  %9489 = vrot.lane.b32.xlu0 %v9488_v38, %s10483_s28  ;;  %v2245_v6 = vsel %vm2152_vm1, %v2242_v31, %v2244_v11  ;;  %v2875_v20 = vsel %vm2784_vm2, %v2872_v16, %v2874_v0 }
 0x14e   : > { %v11164_v13 = vmax.f32 %v1819_v63, 0.0  ;;  %v1820_v59 = vadd.f32 %v10725_v7, %v1686_v37  ;;  %v9498_v9 = vpack.i.bf16 %v2245_v6, %v2243_v4  ;;  %v2877_v58 = vsel %vm2784_vm2, %v2874_v0, %v2876_v23 }
 0x14f   : > { %15591 = vst [vmem:[#allocation31_spill] sm:$0xff] %v11157_v44  ;;  %v2252_v35 = vrot.slane %v11157_v44, 1  ;;  %v2884_v24 = vrot.slane %v11157_v44, 2  ;;  %v11172_v34 = vmax.f32 %v1822_v15, 0.0  ;;  %v9503_v42 = vpack.i.bf16 %v2877_v58, %v2875_v20  ;;  %v11189_v58 = vpop.f32.mrb[3].mxu1 }
 0x150   : > { %15592 = vst [vmem:[#allocation32_spill] sm:$0xff] %v11164_v13  ;;  %v2248_v31 = vrot.slane %v11164_v13, 1  ;;  %v2880_v16 = vrot.slane %v11164_v13, 2  ;;  %v11176_v63 = vmax.f32 %v1820_v59, 0.0  ;;  %v8853_v54 = vpop.f32.mrb[52].mxu0  ;;  %v2247_v7 = vsel %vm2152_vm1, %v2244_v11, %v2246_v32 }
 0x151   : > { %15593 = vst [vmem:[#allocation33_spill] sm:$0xff] %v11172_v34  ;;  %v2254_v37 = vrot.slane %v11172_v34, 1  ;;  %v2886_v0 = vrot.slane %v11172_v34, 2  ;;  %v1691_v38 = vmul.f32 %v8853_v54, %v10720_v5  ;;  %9494 = vrot.lane.b32.xlu1 %v9493_v57, %s10485_s29  ;;  %9499 = vrot.lane.b32.xlu0 %v9498_v9, %s10483_s28  ;;  %v1328_v14 = vpop.f32.mrb[53].mxu0  ;;  %v2879_v4 = vsel %vm2784_vm2, %v2876_v23, %v2878_v3  ;;  %v11194_v57 = vld [vmem:[%s15426_s3] ss:$0 sm:$0xff] }
 0x152   : > { %15594 = vst [vmem:[#allocation34_spill] sm:$0xff] %v11176_v63  ;;  %v2250_v15 = vrot.slane %v11176_v63, 1  ;;  %v2882_v6 = vrot.slane %v11176_v63, 2  ;;  %v1689_v20 = vmul.f32 %v10720_v5, %v1328_v14  ;;  %v8854_v11 = vpop.f32.mrb[54].mxu0  ;;  %v2249_v59 = vsel %vm2152_vm1, %v2246_v32, %v2248_v31  ;;  %v11200_v23 = vld [vmem:[%s15425_s2] ss:$0 sm:$0xff] }
 0x153   : > { %v1825_v9 = vadd.f32 %v11194_v57, %v1691_v38  ;;  %v1692_v54 = vmul.f32 %v11200_v23, %v8854_v11  ;;  %v9508_v5 = vpack.i.bf16 %v2249_v59, %v2247_v7  ;;  %v1331_v14 = vpop.f32.mrb[55].mxu0  ;;  %v2881_v32 = vsel %vm2784_vm2, %v2878_v3, %v2880_v16  ;;  %v11204_v34 = vpop.f32.mrb[4].mxu1 }
 0x154   : > { %v1823_v44 = vadd.f32 %v11194_v57, %v1689_v20  ;;  %v1690_v13 = vmul.f32 %v11200_v23, %v1331_v14  ;;  %v9513_v63 = vpack.i.bf16 %v2881_v32, %v2879_v4  ;;  %v2251_v38 = vsel %vm2152_vm1, %v2248_v31, %v2250_v15  ;;  %v11224_v14 = vpop.f32.mrb[5].mxu1 }
 0x155   : > { %v11209_v30 = vmax.f32 %v1825_v9, 0.0  ;;  %v1826_v1 = vadd.f32 %v11194_v57, %v1692_v54  ;;  %9504 = vrot.lane.b32.xlu1 %v9503_v42, %s10485_s29  ;;  %9509 = vrot.lane.b32.xlu0 %v9508_v5, %s10483_s28  ;;  %v2253_v7 = vsel %vm2152_vm1, %v2250_v15, %v2252_v35  ;;  %v2883_v3 = vsel %vm2784_vm2, %v2880_v16, %v2882_v6 }
 0x156   : > { %v11216_v11 = vmax.f32 %v1823_v44, 0.0  ;;  %v1824_v20 = vadd.f32 %v11194_v57, %v1690_v13  ;;  %v9518_v59 = vpack.i.bf16 %v2253_v7, %v2251_v38  ;;  %v2885_v4 = vsel %vm2784_vm2, %v2882_v6, %v2884_v24 }
 0x157   : > { %15595 = vst [vmem:[#allocation35_spill] sm:$0xff] %v11209_v30  ;;  %v2260_v31 = vrot.slane %v11209_v30, 1  ;;  %v2892_v9 = vrot.slane %v11209_v30, 2  ;;  %v11222_v54 = vmax.f32 %v1826_v1, 0.0  ;;  %v9523_v42 = vpack.i.bf16 %v2885_v4, %v2883_v3  ;;  %v11237_v3 = vpop.f32.mrb[6].mxu1 }
 0x158   : > { %15596 = vst [vmem:[#allocation36_spill] sm:$0xff] %v11216_v11  ;;  %v2256_v15 = vrot.slane %v11216_v11, 1  ;;  %v2888_v16 = vrot.slane %v11216_v11, 2  ;;  %v11228_v44 = vmax.f32 %v1824_v20, 0.0  ;;  %v8857_v5 = vpop.f32.mrb[56].mxu0  ;;  %v2255_v13 = vsel %vm2152_vm1, %v2252_v35, %v2254_v37 }
 0x159   : > { %15597 = vst [vmem:[#allocation37_spill] sm:$0xff] %v11222_v54  ;;  %v2262_v6 = vrot.slane %v11222_v54, 1  ;;  %v2894_v32 = vrot.slane %v11222_v54, 2  ;;  %v1695_v38 = vmul.f32 %v11200_v23, %v8857_v5  ;;  %9514 = vrot.lane.b32.xlu1 %v9513_v63, %s10485_s29  ;;  %9519 = vrot.lane.b32.xlu0 %v9518_v59, %s10483_s28  ;;  %v1344_v1 = vpop.f32.mrb[57].mxu0  ;;  %v2887_v7 = vsel %vm2784_vm2, %v2884_v24, %v2886_v0 }
 0x15a   : > { %15598 = vst [vmem:[#allocation38_spill] sm:$0xff] %v11228_v44  ;;  %v2258_v20 = vrot.slane %v11228_v44, 1  ;;  %v2890_v4 = vrot.slane %v11228_v44, 2  ;;  %v1693_v35 = vmul.f32 %v11200_v23, %v1344_v1  ;;  %v8858_v30 = vpop.f32.mrb[58].mxu0  ;;  %v2257_v54 = vsel %vm2152_vm1, %v2254_v37, %v2256_v15 }
 0x15b   : > { %v1829_v5 = vadd.f32 %v11194_v57, %v1695_v38  ;;  %v1696_v63 = vmul.f32 %v11200_v23, %v8858_v30  ;;  %v9528_v11 = vpack.i.bf16 %v2257_v54, %v2255_v13  ;;  %v1347_v59 = vpop.f32.mrb[59].mxu0  ;;  %v2889_v45 = vsel %vm2784_vm2, %v2886_v0, %v2888_v16  ;;  %v11256_v0 = vpop.f32.mrb[7].mxu1 }
 0x15c   : > { %v1827_v24 = vadd.f32 %v11194_v57, %v1693_v35  ;;  %v1694_v27 = vmul.f32 %v11200_v23, %v1347_v59  ;;  %v9533_v49 = vpack.i.bf16 %v2889_v45, %v2887_v7  ;;  %v2259_v44 = vsel %vm2152_vm1, %v2256_v15, %v2258_v20 }
 0x15d   : > { %v11249_v10 = vmax.f32 %v1829_v5, 0.0  ;;  %v1830_v1 = vadd.f32 %v11194_v57, %v1696_v63  ;;  %9524 = vrot.lane.b32.xlu1 %v9523_v42, %s10485_s29  ;;  %9529 = vrot.lane.b32.xlu0 %v9528_v11, %s10483_s28  ;;  %v2261_v30 = vsel %vm2152_vm1, %v2258_v20, %v2260_v31  ;;  %v2891_v37 = vsel %vm2784_vm2, %v2888_v16, %v2890_v4  ;;  %v11265_v42 = vpop.f32.mrb[8].mxu1 }
 0x15e   : > { %v11258_v54 = vmax.f32 %v1827_v24, 0.0  ;;  %v1828_v45 = vadd.f32 %v11194_v57, %v1694_v27  ;;  %v9538_v13 = vpack.i.bf16 %v2261_v30, %v2259_v44  ;;  %v2893_v15 = vsel %vm2784_vm2, %v2890_v4, %v2892_v9  ;;  %15602 = vst [vmem:[#allocation42_spill] sm:$0xff] %v11265_v42 }
 0x15f   : > { %15599 = vst [vmem:[#allocation39_spill] sm:$0xff] %v11249_v10  ;;  %v2268_v38 = vrot.slane %v11249_v10, 1  ;;  %v11263_v7 = vmax.f32 %v1830_v1, 0.0  ;;  %v2263_v5 = vsel %vm2152_vm1, %v2260_v31, %v2262_v6  ;;  %v2900_v27 = vrot.slane %v11249_v10, 2 }
 0x160   : > { %15600 = vst [vmem:[#allocation40_spill] sm:$0xff] %v11258_v54  ;;  %v2264_v11 = vrot.slane %v11258_v54, 1  ;;  %v2896_v20 = vrot.slane %v11258_v54, 2  ;;  %v11269_v16 = vmax.f32 %v1828_v45, 0.0  ;;  %v8861_v35 = vpop.f32.mrb[60].mxu0  ;;  %v9543_v63 = vpack.i.bf16 %v2893_v15, %v2891_v37 }
 0x161   : > { %15601 = vst [vmem:[#allocation41_spill] sm:$0xff] %v11263_v7  ;;  %v1699_v44 = vmul.f32 %v11200_v23, %v8861_v35  ;;  %9534 = vrot.lane.b32.xlu1 %v9533_v49, %s10485_s29  ;;  %9539 = vrot.lane.b32.xlu0 %v9538_v13, %s10483_s28  ;;  %v1360_v4 = vpop.f32.mrb[61].mxu0  ;;  %v2895_v59 = vsel %vm2784_vm2, %v2892_v9, %v2894_v32  ;;  %v2270_v49 = vrot.slane %v11263_v7, 1  ;;  %v2902_v15 = vrot.slane %v11263_v7, 2 }
 0x162   : > { %15603 = vst [vmem:[#allocation43_spill] sm:$0xff] %v11269_v16  ;;  %v2266_v24 = vrot.slane %v11269_v16, 1  ;;  %v2898_v1 = vrot.slane %v11269_v16, 2  ;;  %v1697_v30 = vmul.f32 %v11200_v23, %v1360_v4  ;;  %v8862_v45 = vpop.f32.mrb[62].mxu0  ;;  %v2265_v31 = vsel %vm2152_vm1, %v2262_v6, %v2264_v11 }
 0x163   : > { %v9548_v10 = vpack.i.bf16 %v2265_v31, %v2263_v5  ;;  %v1363_v54 = vpop.f32.mrb[63].mxu0  ;;  %v2897_v35 = vsel %vm2784_vm2, %v2894_v32, %v2896_v20  ;;  %v1833_v16 = vadd.f32 %v11194_v57, %v1699_v44  ;;  %v11291_v32 = vpop.f32.mrb[9].mxu1  ;;  %v2903_v7 = vsel %vm2784_vm2, %v2900_v27, %v2902_v15 }
 0x164   : > { %v1831_v13 = vadd.f32 %v11194_v57, %v1697_v30  ;;  %v1698_v37 = vmul.f32 %v11200_v23, %v1363_v54  ;;  %v2267_v9 = vsel %vm2152_vm1, %v2264_v11, %v2266_v24  ;;  %v9553_v6 = vpack.i.bf16 %v2897_v35, %v2895_v59  ;;  %15604 = vst [vmem:[#allocation44_spill] sm:$0xff] %v11291_v32  ;;  %v11297_v31 = vpop.f32.mrb[10].mxu1 }
 0x165   : > { %9544 = vrot.lane.b32.xlu1 %v9543_v63, %s10485_s29  ;;  %9549 = vrot.lane.b32.xlu0 %v9548_v10, %s10483_s28  ;;  %v2269_v5 = vsel %vm2152_vm1, %v2266_v24, %v2268_v38  ;;  %v2899_v54 = vsel %vm2784_vm2, %v2896_v20, %v2898_v1  ;;  %v2901_v11 = vsel %vm2784_vm2, %v2898_v1, %v2900_v27 }
 0x166   : > { %v11293_v4 = vmax.f32 %v1831_v13, 0.0  ;;  %v9558_v30 = vpack.i.bf16 %v2269_v5, %v2267_v9  ;;  %15606 = vst [vmem:[#allocation46_spill] sm:$0xff] %v11297_v31  ;;  %v1700_v63 = vmul.f32 %v11200_v23, %v8862_v45  ;;  %v1832_v10 = vadd.f32 %v11194_v57, %v1698_v37 }
 0x167   : > { %v9563_v20 = vpack.i.bf16 %v2901_v11, %v2899_v54  ;;  %v2271_v1 = vsel %vm2152_vm1, %v2268_v38, %v2270_v49  ;;  %v11306_v9 = vmax.f32 %v1833_v16, 0.0  ;;  %v11314_v54 = vpop.f32.mrb[11].mxu1 }
 0x168   : > { %15605 = vst [vmem:[#allocation45_spill] sm:$0xff] %v11293_v4  ;;  %v2272_v44 = vrot.slane %v11293_v4, 1  ;;  %v8865_v59 = vpop.f32.mrb[64].mxu0  ;;  %v11312_v48 = vmax.f32 %v1832_v10, 0.0  ;;  %15609 = vst [vmem:[#allocation49_spill] sm:$0xff] %v11314_v54  ;;  %v15610_v27 = vrot.slane %v11293_v4, 2 }
 0x169   : > { %v9280_v35 = vpop.permute.xlu0 %9279  ;;  %9554 = vrot.lane.b32.xlu1 %v9553_v6, %s10485_s29  ;;  %9559 = vrot.lane.b32.xlu0 %v9558_v30, %s10483_s28  ;;  %v1376_v13 = vpop.f32.mrb[65].mxu0  ;;  %15607 = vst [vmem:[#allocation47_spill] sm:$0xff] %v11306_v9  ;;  %v1834_v6 = vadd.f32 %v11194_v57, %v1700_v63 }
 0x16a   : > { %v8866_v5 = vpop.f32.mrb[66].mxu0  ;;  %v9282_v45 = vunpack.i.h.bf16 %v9280_v35  ;;  %v9281_v40 = vunpack.i.l.bf16 %v9280_v35  ;;  %v1701_v37 = vmul.f32 %v11200_v23, %v1376_v13  ;;  %v2273_v24 = vsel %vm2152_vm1, %v2270_v49, %v2272_v44  ;;  %15608 = vst [vmem:[#allocation48_spill] sm:$0xff] %v11312_v48  ;;  %v11321_v35 = vpop.f32.mrb[12].mxu1 }
 0x16b   : > { %v1379_v36 = vpop.f32.mrb[67].mxu0  ;;  %v9568_v30 = vpack.i.bf16 %v2273_v24, %v2271_v1  ;;  %v2905_v11 = vsel %vm2784_vm2, %v2902_v15, %v15610_v27  ;;  %15611 = vst [vmem:[#allocation50_spill] sm:$0xff] %v11321_v35  ;;  %v2276_v49 = vrot.slane %v11306_v9, 1  ;;  %v1703_v13 = vmul.f32 %v11200_v23, %v8865_v59 }
 0x16c   : > { %v1835_v38 = vadd.f32 %v11194_v57, %v1701_v37  ;;  %v9573_v24 = vpack.i.bf16 %v2905_v11, %v2903_v7  ;;  %v3417_v1 = vsel %vm893_vm0, %v10741_v22, %v9282_v45  ;;  %v1702_v37 = vmul.f32 %v11200_v23, %v1379_v36  ;;  %v11341_v36 = vpop.f32.mrb[13].mxu1 }
 0x16d   : > { %v9285_v16 = vpop.permute.xlu0 %9284  ;;  %9564 = vrot.lane.b32.xlu1 %v9563_v20, %s10485_s29  ;;  %9569 = vrot.lane.b32.xlu0 %v9568_v30, %s10483_s28  ;;  %v3416_v20 = vsel %vm893_vm0, %v10736_v19, %v9281_v40  ;;  %v11331_v15 = vmax.f32 %v1834_v6, 0.0  ;;  %v2274_v27 = vrot.slane %v11312_v48, 1  ;;  %15614 = vst [vmem:[#allocation53_spill] sm:$0xff] %v11341_v36  ;;  %v2908_v40 = vrot.slane %v11306_v9, 2 }
 0x16e   : > { %v9287_v63 = vunpack.i.h.bf16 %v9285_v16  ;;  %v9286_v10 = vunpack.i.l.bf16 %v9285_v16  ;;  %v11336_v7 = vmax.f32 %v1835_v38, 0.0  ;;  %v2906_v6 = vrot.slane %v11312_v48, 2 }
 0x16f   : > { %15612 = vst [vmem:[#allocation51_spill] sm:$0xff] %v11331_v15  ;;  %v9290_v59 = vpop.permute.xlu1 %9289  ;;  %v1837_v11 = vadd.f32 %v11194_v57, %v1703_v13  ;;  %v15616_v9 = vmov 0.0  }
 0x170   : > { %v3543_v26 = vsel %vm3542_vm4, %v3416_v20, %v9286_v10  ;;  %v3544_v16 = vsel %vm3542_vm4, %v3417_v1, %v9287_v63  ;;  %v8869_v30 = vpop.f32.mrb[68].mxu0  ;;  %15613 = vst [vmem:[#allocation52_spill] sm:$0xff] %v11336_v7  ;;  %v1836_v63 = vadd.f32 %v11194_v57, %v1702_v37  ;;  %v2278_v10 = vrot.slane %v11331_v15, 1  ;;  %v11352_v20 = vpop.f32.mrb[14].mxu1 }
 0x171   : > { %9574 = vrot.lane.b32.xlu1 %v9573_v24, %s10485_s29  ;;  %v1392_v22 = vpop.f32.mrb[69].mxu0  ;;  %v3669_v45 = vpack.c.bf16 %v3544_v16, %v3543_v26  ;;  %v1704_v24 = vmul.f32 %v11200_v23, %v8866_v5  ;;  %v2275_v1 = vsel %vm2152_vm1, %v2272_v44, %v2274_v27  ;;  %v2277_v26 = vsel %vm2152_vm1, %v2274_v27, %v2276_v49 }
 0x172   : > { %v11339_v19 = vpop.f32.mrb[70].mxu0  ;;  %15615 = vst [vmem:[#allocation54_spill] sm:$0xff] %v11352_v20  ;;  %v2280_v16 = vrot.slane %v11336_v7, 1  ;;  %v9578_v13 = vpack.i.bf16 %v2277_v26, %v2275_v1  ;;  %v1705_v37 = vmul.f32 %v11200_v23, %v1392_v22  ;;  %v11358_v48 = vmax.f32 %v1837_v11, 0.0 }
 0x173   : > { %v1395_v38 = vpop.f32.mrb[71].mxu0  ;;  %8934 = vmatmul.mubr.msk.bf16.vlgmr.msra.gmra.mrb[32].mxu1 %vm3756_vm5, %v3669_v45  ;;  %v11360_v46 = vmax.f32 %v1836_v63, 0.0  ;;  %v9295_v5 = vpop.permute.xlu1 %9294  ;;  %v15619_v44 = vrot.slane %v11293_v4, 2  ;;  %v2909_v45 = vsel %vm2784_vm2, %v2906_v6, %v2908_v40  ;;  %v2910_v20 = vrot.slane %v11331_v15, 2 }
 0x174   : > { %8937 = vmatprep.mubr.msk.bf16.mxu1 %vm10484_vm3, %v15616_v9  ;;  %15617 = vst [vmem:[#allocation55_spill] sm:$0xff] %v11358_v48  ;;  %v1838_v35 = vadd.f32 %v11194_v57, %v1704_v24  ;;  %9579 = vrot.lane.b32.xlu0 %v9578_v13, %s10483_s28  ;;  %v2279_v22 = vsel %vm2152_vm1, %v2276_v49, %v2278_v10  ;;  %v11372_v63 = vpop.f32.mrb[15].mxu1  ;;  %v9292_v26 = vunpack.i.h.bf16 %v9290_v59  ;;  %v9291_v36 = vunpack.i.l.bf16 %v9290_v59 }
 0x175   : > { %15618 = vst [vmem:[#allocation56_spill] sm:$0xff] %v11360_v46  ;;  %v2907_v27 = vsel %vm2784_vm2, %v15619_v44, %v2906_v6  ;;  %15620 = vst [vmem:[#allocation57_spill] sm:$0xff] %v11372_v63  ;;  %v1707_v4 = vmul.f32 %v11200_v23, %v8869_v30  ;;  %v2281_v44 = vsel %vm2152_vm1, %v2278_v10, %v2280_v16  ;;  %v11376_v31 = vpop.f32.mrb[16].mxu1  ;;  %v9297_v15 = vunpack.i.h.bf16 %v9295_v5 }
 0x176   : > { %v9583_v1 = vpack.i.bf16 %v2909_v45, %v2907_v27  ;;  %15621 = vst [vmem:[#allocation58_spill] sm:$0xff] %v11376_v31  ;;  %v1839_v24 = vadd.f32 %v11194_v57, %v1705_v37  ;;  %v9296_v13 = vunpack.i.l.bf16 %v9295_v5  ;;  %v9588_v49 = vpack.i.bf16 %v2281_v44, %v2279_v22  ;;  %v11394_v22 = vpop.f32.mrb[17].mxu1 }
 0x177   : > { %v2284_v45 = vrot.slane %v11358_v48, 1  ;;  %v2912_v59 = vrot.slane %v11336_v7, 2  ;;  %v2282_v30 = vrot.slane %v11360_v46, 1  ;;  %v1706_v10 = vmul.f32 %v11200_v23, %v1395_v38  ;;  %15623 = vst [vmem:[#allocation60_spill] sm:$0xff] %v11394_v22 }
 0x178   : > { %v11370_v11 = vpop.f32.mrb[72].mxu0  ;;  %9584 = vrot.lane.b32.xlu1 %v9583_v1, %s10485_s29  ;;  %9589 = vrot.lane.b32.xlu0 %v9588_v49, %s10483_s28  ;;  %v11387_v63 = vmax.f32 %v1838_v35, 0.0  ;;  %v3419_v37 = vsel %vm893_vm0, %v10739_v21, %v9292_v26  ;;  %v3418_v5 = vsel %vm893_vm0, %v10733_v17, %v9291_v36  ;;  %v2911_v1 = vsel %vm2784_vm2, %v2908_v40, %v2910_v20 }
 0x179   : > { %v1408_v6 = vpop.f32.mrb[73].mxu0  ;;  %v1841_v44 = vadd.f32 %v11194_v57, %v1707_v4  ;;  %v11397_v7 = vmax.f32 %v1839_v24, 0.0  ;;  %v3545_v38 = vsel %vm3542_vm4, %v3418_v5, %v9296_v13  ;;  %v3546_v49 = vsel %vm3542_vm4, %v3419_v37, %v9297_v15  ;;  %v11409_v24 = vpop.f32.mrb[18].mxu1 }
 0x17a   : > { %v11380_v27 = vpop.f32.mrb[74].mxu0  ;;  %15622 = vst [vmem:[#allocation59_spill] sm:$0xff] %v11387_v63  ;;  %v1840_v35 = vadd.f32 %v11194_v57, %v1706_v10  ;;  %v2913_v54 = vsel %vm2784_vm2, %v2910_v20, %v2912_v59  ;;  %v2283_v21 = vsel %vm2152_vm1, %v2280_v16, %v2282_v30  ;;  %v2285_v17 = vsel %vm2152_vm1, %v2282_v30, %v2284_v45  ;;  %v9300_v13 = vpop.permute.xlu0 %9299 }
 0x17b   : > { %v1411_v31 = vpop.f32.mrb[75].mxu0  ;;  %15624 = vst [vmem:[#allocation61_spill] sm:$0xff] %v11397_v7  ;;  %v2916_v36 = vrot.slane %v11358_v48, 2  ;;  %v2914_v40 = vrot.slane %v11360_v46, 2  ;;  %v9593_v26 = vpack.i.bf16 %v2913_v54, %v2911_v1  ;;  %15625 = vst [vmem:[#allocation62_spill] sm:$0xff] %v11409_v24  ;;  %v1708_v15 = vmul.f32 %v11200_v23, %v11339_v19  ;;  %v9305_v48 = vpop.permute.xlu1 %9304 }
 0x17c   : > { %v9598_v10 = vpack.i.bf16 %v2285_v17, %v2283_v21  ;;  %v1709_v20 = vmul.f32 %v11200_v23, %v1408_v6  ;;  %v3670_v37 = vpack.c.bf16 %v3546_v49, %v3545_v38  ;;  %v2286_v30 = vrot.slane %v11387_v63, 1 }
 0x17d   : > { %v2288_v5 = vrot.slane %v11397_v7, 1  ;;  %9594 = vrot.lane.b32.xlu1 %v9593_v26, %s10485_s29  ;;  %v2918_v1 = vrot.slane %v11387_v63, 2  ;;  %v11422_v46 = vmax.f32 %v1841_v44, 0.0  ;;  %v11424_v19 = vmax.f32 %v1840_v35, 0.0  ;;  %v11434_v26 = vpop.f32.mrb[19].mxu1 }
 0x17e   : > { %9599 = vrot.lane.b32.xlu0 %v9598_v10, %s10483_s28  ;;  %8938 = vmatmul.mubr.msk.bf16.gmra.mrb[36].mxu1 %vm3756_vm5, %v3670_v37  ;;  %v9302_v6 = vunpack.i.h.bf16 %v9300_v13  ;;  %v9301_v38 = vunpack.i.l.bf16 %v9300_v13  ;;  %v2915_v49 = vsel %vm2784_vm2, %v2912_v59, %v2914_v40  ;;  %v2917_v21 = vsel %vm2784_vm2, %v2914_v40, %v2916_v36  ;;  %15628 = vst [vmem:[#allocation65_spill] sm:$0xff] %v11434_v26  ;;  %v11438_v37 = vpop.f32.mrb[20].mxu1  ;;  %v11446_v39 = vpop.permute.xlu0 %9309 }
 0x17f   : > { %15626 = vst [vmem:[#allocation63_spill] sm:$0xff] %v11422_v46  ;;  %15627 = vst [vmem:[#allocation64_spill] sm:$0xff] %v11424_v19  ;;  %8941 = vmatprep.mubr.msk.bf16.mxu1 %vm10484_vm3, %v15616_v9  ;;  %v1842_v44 = vadd.f32 %v11194_v57, %v1708_v15  ;;  %v9307_v35 = vunpack.i.h.bf16 %v9305_v48  ;;  %v9306_v63 = vunpack.i.l.bf16 %v9305_v48  ;;  %v1843_v10 = vadd.f32 %v11194_v57, %v1709_v20 }
 0x180   : > { %v11407_v4 = vpop.f32.mrb[76].mxu0  ;;  %15629 = vst [vmem:[#allocation66_spill] sm:$0xff] %v11438_v37  ;;  %v9603_v13 = vpack.i.bf16 %v2917_v21, %v2915_v49  ;;  %v2287_v59 = vsel %vm2152_vm1, %v2284_v45, %v2286_v30  ;;  %v2289_v40 = vsel %vm2152_vm1, %v2286_v30, %v2288_v5  ;;  %v1710_v24 = vmul.f32 %v11200_v23, %v1411_v31  ;;  %v11462_v21 = vpop.f32.mrb[21].mxu1 }
 0x181   : > { %v11414_v16 = vpop.f32.mrb[77].mxu0  ;;  %v2292_v22 = vrot.slane %v11422_v46, 1  ;;  %v2920_v42 = vrot.slane %v11397_v7, 2  ;;  %v2290_v26 = vrot.slane %v11424_v19, 1  ;;  %v9608_v15 = vpack.i.bf16 %v2289_v40, %v2287_v59  ;;  %15631 = vst [vmem:[#allocation68_spill] sm:$0xff] %v11462_v21 }
 0x182   : > { %v11419_v54 = vpop.f32.mrb[78].mxu0  ;;  %v1711_v48 = vmul.f32 %v11200_v23, %v11370_v11  ;;  %9604 = vrot.lane.b32.xlu1 %v9603_v13, %s10485_s29  ;;  %v3421_v45 = vsel %vm893_vm0, %v10773_v55, %v9302_v6  ;;  %v3420_v31 = vsel %vm893_vm0, %v10763_v47, %v9301_v38  ;;  %v11457_v30 = vmax.f32 %v1842_v44, 0.0  ;;  %v11484_v37 = vpop.permute.xlu0 %9319 }
 0x183   : > { %v11432_v17 = vpop.f32.mrb[79].mxu0  ;;  %9609 = vrot.lane.b32.xlu0 %v9608_v15, %s10483_s28  ;;  %v3547_v11 = vsel %vm3542_vm4, %v3420_v31, %v9306_v63  ;;  %v3548_v13 = vsel %vm3542_vm4, %v3421_v45, %v9307_v35  ;;  %v11466_v59 = vmax.f32 %v1843_v10, 0.0  ;;  %v1844_v40 = vadd.f32 %v11194_v57, %v1710_v24  ;;  %v11480_v24 = vpop.f32.mrb[22].mxu1 }
 0x184   : > { %15630 = vst [vmem:[#allocation67_spill] sm:$0xff] %v11457_v30  ;;  %v2919_v47 = vsel %vm2784_vm2, %v2916_v36, %v2918_v1  ;;  %v2921_v6 = vsel %vm2784_vm2, %v2918_v1, %v2920_v42  ;;  %v2291_v38 = vsel %vm2152_vm1, %v2288_v5, %v2290_v26  ;;  %v2293_v44 = vsel %vm2152_vm1, %v2290_v26, %v2292_v22  ;;  %v9315_v5 = vpop.permute.xlu1 %9314 }
 0x185   : > { %15632 = vst [vmem:[#allocation69_spill] sm:$0xff] %v11466_v59  ;;  %v2924_v15 = vrot.slane %v11422_v46, 2  ;;  %v2922_v63 = vrot.slane %v11424_v19, 2  ;;  %v1845_v35 = vadd.f32 %v11194_v57, %v1711_v48  ;;  %v9613_v10 = vpack.i.bf16 %v2921_v6, %v2919_v47  ;;  %15633 = vst [vmem:[#allocation70_spill] sm:$0xff] %v11480_v24 }
 0x186   : > { %v9618_v31 = vpack.i.bf16 %v2293_v44, %v2291_v38  ;;  %v3671_v7 = vpack.c.bf16 %v3548_v13, %v3547_v11  ;;  %v2294_v36 = vrot.slane %v11457_v30, 1  ;;  %v2296_v1 = vrot.slane %v11466_v59, 1  ;;  %v11505_v44 = vpop.f32.mrb[23].mxu1 }
 0x187   : > { %v1712_v26 = vmul.f32 %v11200_v23, %v11380_v27  ;;  %9614 = vrot.lane.b32.xlu1 %v9613_v10, %s10485_s29  ;;  %v1713_v48 = vmul.f32 %v11200_v23, %v11414_v16  ;;  %v9312_v47 = vunpack.i.h.bf16 %v11446_v39  ;;  %v11492_v6 = vmax.f32 %v1844_v40, 0.0  ;;  %15636 = vst [vmem:[#allocation73_spill] sm:$0xff] %v11505_v44 }
 0x188   : > { %v11451_v20 = vpop.f32.mrb[80].mxu0  ;;  %9619 = vrot.lane.b32.xlu0 %v9618_v31, %s10483_s28  ;;  %8942 = vmatmul.mubr.msk.bf16.gmra.mrb[40].mxu1 %vm3756_vm5, %v3671_v7  ;;  %v9311_v11 = vunpack.i.l.bf16 %v11446_v39  ;;  %v11497_v13 = vmax.f32 %v1845_v35, 0.0  ;;  %v2923_v38 = vsel %vm2784_vm2, %v2920_v42, %v2922_v63  ;;  %v2925_v27 = vsel %vm2784_vm2, %v2922_v63, %v2924_v15  ;;  %v11510_v39 = vpop.f32.mrb[24].mxu1 }
 0x189   : > { %v11460_v49 = vpop.f32.mrb[81].mxu0  ;;  %15634 = vst [vmem:[#allocation71_spill] sm:$0xff] %v11492_v6  ;;  %8945 = vmatprep.mubr.msk.bf16.mxu1 %vm10484_vm3, %v15616_v9  ;;  %v2926_v40 = vrot.slane %v11457_v30, 2  ;;  %v9317_v10 = vunpack.i.h.bf16 %v9315_v5  ;;  %v9316_v31 = vunpack.i.l.bf16 %v9315_v5  ;;  %v9623_v7 = vpack.i.bf16 %v2925_v27, %v2923_v38  ;;  %15637 = vst [vmem:[#allocation74_spill] sm:$0xff] %v11510_v39  ;;  %v11524_v27 = vpop.permute.xlu0 %9329 }
 0x18a   : > { %v11469_v55 = vpop.f32.mrb[82].mxu0  ;;  %15635 = vst [vmem:[#allocation72_spill] sm:$0xff] %v11497_v13  ;;  %v1846_v42 = vadd.f32 %v11194_v57, %v1712_v26  ;;  %v1847_v63 = vadd.f32 %v11194_v57, %v1713_v48  ;;  %v2295_v35 = vsel %vm2152_vm1, %v2292_v22, %v2294_v36  ;;  %v2297_v19 = vsel %vm2152_vm1, %v2294_v36, %v2296_v1 }
 0x18b   : > { %v11478_v45 = vpop.f32.mrb[83].mxu0  ;;  %v2928_v44 = vrot.slane %v11466_v59, 2  ;;  %v2298_v30 = vrot.slane %v11492_v6, 1  ;;  %9624 = vrot.lane.b32.xlu1 %v9623_v7, %s10485_s29  ;;  %v9628_v5 = vpack.i.bf16 %v2297_v19, %v2295_v35  ;;  %v3423_v38 = vsel %vm893_vm0, %v10768_v51, %v9312_v47  ;;  %v11542_v35 = vpop.f32.mrb[25].mxu1 }
 0x18c   : > { %v2300_v26 = vrot.slane %v11497_v13, 1  ;;  %v1715_v22 = vmul.f32 %v11200_v23, %v11407_v4  ;;  %v1714_v36 = vmul.f32 %v11200_v23, %v11432_v17  ;;  %v3422_v59 = vsel %vm893_vm0, %v10759_v43, %v9311_v11  ;;  %15640 = vst [vmem:[#allocation77_spill] sm:$0xff] %v11542_v35 }
 0x18d   : > { %v3550_v19 = vsel %vm3542_vm4, %v3423_v38, %v9317_v10  ;;  %9629 = vrot.lane.b32.xlu0 %v9628_v5, %s10483_s28  ;;  %v3549_v51 = vsel %vm3542_vm4, %v3422_v59, %v9316_v31  ;;  %v11537_v47 = vmax.f32 %v1846_v42, 0.0  ;;  %v11539_v7 = vmax.f32 %v1847_v63, 0.0  ;;  %v11552_v42 = vpop.f32.mrb[26].mxu1  ;;  %v9325_v63 = vpop.permute.xlu1 %9324 }
 0x18e   : > { %v2927_v4 = vsel %vm2784_vm2, %v2924_v15, %v2926_v40  ;;  %v2932_v17 = vrot.slane %v11497_v13, 2  ;;  %v2929_v39 = vsel %vm2784_vm2, %v2926_v40, %v2928_v44  ;;  %v2299_v43 = vsel %vm2152_vm1, %v2296_v1, %v2298_v30  ;;  %15641 = vst [vmem:[#allocation78_spill] sm:$0xff] %v11552_v42 }
 0x18f   : > { %15638 = vst [vmem:[#allocation75_spill] sm:$0xff] %v11537_v47  ;;  %15639 = vst [vmem:[#allocation76_spill] sm:$0xff] %v11539_v7  ;;  %v1849_v11 = vadd.f32 %v11194_v57, %v1715_v22  ;;  %v1848_v10 = vadd.f32 %v11194_v57, %v1714_v36  ;;  %v9633_v5 = vpack.i.bf16 %v2929_v39, %v2927_v4  ;;  %v2930_v15 = vrot.slane %v11492_v6, 2  ;;  %v11561_v36 = vpop.permute.xlu0 %9339 }
 0x190   : > { %v11503_v16 = vpop.f32.mrb[84].mxu0  ;;  %v2301_v59 = vsel %vm2152_vm1, %v2298_v30, %v2300_v26  ;;  %v1716_v38 = vmul.f32 %v11200_v23, %v11419_v54  ;;  %v3672_v13 = vpack.c.bf16 %v3550_v19, %v3549_v51  ;;  %v2302_v22 = vrot.slane %v11537_v47, 1 }
 0x191   : > { %v11508_v46 = vpop.f32.mrb[85].mxu0  ;;  %v9638_v40 = vpack.i.bf16 %v2301_v59, %v2299_v43  ;;  %v2304_v39 = vrot.slane %v11539_v7, 1  ;;  %9634 = vrot.lane.b32.xlu1 %v9633_v5, %s10485_s29  ;;  %v1717_v30 = vmul.f32 %v11200_v23, %v11460_v49  ;;  %v9322_v6 = vunpack.i.h.bf16 %v11484_v37  ;;  %v11578_v49 = vpop.f32.mrb[27].mxu1 }
 0x192   : > { %v11516_v24 = vpop.f32.mrb[86].mxu0  ;;  %8946 = vmatmul.mubr.msk.bf16.gmra.mrb[44].mxu1 %vm3756_vm5, %v3672_v13  ;;  %v9321_v54 = vunpack.i.l.bf16 %v11484_v37  ;;  %v9327_v19 = vunpack.i.h.bf16 %v9325_v63  ;;  %v9326_v51 = vunpack.i.l.bf16 %v9325_v63  ;;  %v11572_v43 = vmax.f32 %v1848_v10, 0.0  ;;  %15643 = vst [vmem:[#allocation80_spill] sm:$0xff] %v11578_v49  ;;  %v11588_v21 = vpop.f32.mrb[28].mxu1 }
 0x193   : > { %v11530_v48 = vpop.f32.mrb[87].mxu0  ;;  %9639 = vrot.lane.b32.xlu0 %v9638_v40, %s10483_s28  ;;  %8949 = vmatprep.mubr.msk.bf16.mxu1 %vm10484_vm3, %v15616_v9  ;;  %v11580_v59 = vmax.f32 %v1849_v11, 0.0  ;;  %v1850_v42 = vadd.f32 %v11194_v57, %v1716_v38  ;;  %v2931_v40 = vsel %vm2784_vm2, %v2928_v44, %v2930_v15  ;;  %v2933_v13 = vsel %vm2784_vm2, %v2930_v15, %v2932_v17  ;;  %v11593_v32 = vpop.permute.xlu0 %9349 }
 0x194   : > { %15642 = vst [vmem:[#allocation79_spill] sm:$0xff] %v11572_v43  ;;  %v1851_v37 = vadd.f32 %v11194_v57, %v1717_v30  ;;  %v9643_v63 = vpack.i.bf16 %v2933_v13, %v2931_v40  ;;  %v2303_v10 = vsel %vm2152_vm1, %v2300_v26, %v2302_v22  ;;  %v2305_v35 = vsel %vm2152_vm1, %v2302_v22, %v2304_v39 }
 0x195   : > { %15644 = vst [vmem:[#allocation81_spill] sm:$0xff] %v11580_v59  ;;  %v2934_v52 = vrot.slane %v11537_v47, 2  ;;  %v2936_v11 = vrot.slane %v11539_v7, 2  ;;  %v9648_v49 = vpack.i.bf16 %v2305_v35, %v2303_v10  ;;  %v2306_v38 = vrot.slane %v11572_v43, 1 }
 0x196   : > { %v1719_v44 = vmul.f32 %v11200_v23, %v11451_v20  ;;  %9644 = vrot.lane.b32.xlu1 %v9643_v63, %s10485_s29  ;;  %v1718_v26 = vmul.f32 %v11200_v23, %v11478_v45  ;;  %v3425_v22 = vsel %vm893_vm0, %v10810_v33, %v9322_v6  ;;  %v3424_v35 = vsel %vm893_vm0, %v10799_v25, %v9321_v54  ;;  %v11618_v33 = vpop.f32.mrb[29].mxu1 }
 0x197   : > { %v2308_v30 = vrot.slane %v11580_v59, 1  ;;  %9649 = vrot.lane.b32.xlu0 %v9648_v49, %s10483_s28  ;;  %v3551_v20 = vsel %vm3542_vm4, %v3424_v35, %v9326_v51  ;;  %v3552_v13 = vsel %vm3542_vm4, %v3425_v22, %v9327_v19  ;;  %v11612_v63 = vmax.f32 %v1850_v42, 0.0  ;;  %v8926_v42 = vpop.f32.mrb[30].mxu1 }
 0x198   : > { %v11550_v31 = vpop.f32.mrb[88].mxu0  ;;  %v11614_v45 = vmax.f32 %v1851_v37, 0.0  ;;  %v2935_v25 = vsel %vm2784_vm2, %v2932_v17, %v2934_v52  ;;  %v2937_v6 = vsel %vm2784_vm2, %v2934_v52, %v2936_v11  ;;  %v1853_v54 = vadd.f32 %v11194_v57, %v1719_v44  ;;  %v11630_v17 = vpop.f32.mrb[31].mxu1 }
 0x199   : > { %v11557_v1 = vpop.f32.mrb[89].mxu0  ;;  %15645 = vst [vmem:[#allocation82_spill] sm:$0xff] %v11612_v63  ;;  %v1852_v49 = vadd.f32 %v11194_v57, %v1718_v26  ;;  %v9653_v7 = vpack.i.bf16 %v2937_v6, %v2935_v25  ;;  %v2307_v51 = vsel %vm2152_vm1, %v2304_v39, %v2306_v38  ;;  %v2940_v37 = vrot.slane %v11580_v59, 2  ;;  %15646 = vst [vmem:[#allocation83_spill] sm:$0xff] %v11630_v17  ;;  %v9335_v52 = vpop.permute.xlu1 %9334 }
 0x19a   : > { %v11566_v4 = vpop.f32.mrb[90].mxu0  ;;  %v2938_v22 = vrot.slane %v11572_v43, 2  ;;  %v2309_v35 = vsel %vm2152_vm1, %v2306_v38, %v2308_v30  ;;  %v3673_v47 = vpack.c.bf16 %v3552_v13, %v3551_v20  ;;  %v2310_v44 = vrot.slane %v11612_v63, 1  ;;  %v11634_v25 = vpop.permute.xlu0 %9359 }
 0x19b   : > { %v11576_v5 = vpop.f32.mrb[91].mxu0  ;;  %v2312_v26 = vrot.slane %v11614_v45, 1  ;;  %9654 = vrot.lane.b32.xlu1 %v9653_v7, %s10485_s29  ;;  %v9658_v39 = vpack.i.bf16 %v2309_v35, %v2307_v51  ;;  %v1720_v6 = vmul.f32 %v11200_v23, %v11469_v55  ;;  %v1721_v42 = vmul.f32 %v11200_v23, %v11508_v46 }
 0x19c   : > { %8950 = vmatmul.mubr.msk.bf16.gmra.mrb[48].mxu1 %vm3756_vm5, %v3673_v47  ;;  %v9332_v38 = vunpack.i.h.bf16 %v11524_v27  ;;  %v9331_v20 = vunpack.i.l.bf16 %v11524_v27  ;;  %v11644_v13 = vmax.f32 %v1853_v54, 0.0  ;;  %v11646_v59 = vmax.f32 %v1852_v49, 0.0 }
 0x19d   : > { %9659 = vrot.lane.b32.xlu0 %v9658_v39, %s10483_s28  ;;  %v9337_v7 = vunpack.i.h.bf16 %v9335_v52  ;;  %v9336_v51 = vunpack.i.l.bf16 %v9335_v52  ;;  %v2939_v35 = vsel %vm2784_vm2, %v2936_v11, %v2938_v22  ;;  %v2941_v55 = vsel %vm2784_vm2, %v2938_v22, %v2940_v37  ;;  %8953 = vmatprep.mubr.msk.bf16.mxu1 %vm10484_vm3, %v15616_v9 }
 0x19e   : > { %v2942_v46 = vrot.slane %v11612_v63, 2  ;;  %v9663_v47 = vpack.i.bf16 %v2941_v55, %v2939_v35  ;;  %v2311_v27 = vsel %vm2152_vm1, %v2308_v30, %v2310_v44  ;;  %v2313_v54 = vsel %vm2152_vm1, %v2310_v44, %v2312_v26  ;;  %v11663_v63 = vpop.permute.xlu0 %9369 }
 0x19f   : > { %v1854_v49 = vadd.f32 %v11194_v57, %v1720_v6  ;;  %v1723_v39 = vmul.f32 %v11200_v23, %v11503_v16  ;;  %v1855_v52 = vadd.f32 %v11194_v57, %v1721_v42  ;;  %v9668_v11 = vpack.i.bf16 %v2313_v54, %v2311_v27 }
 0x1a0   : > { %v11600_v15 = vpop.f32.mrb[92].mxu0  ;;  %v2316_v22 = vrot.slane %v11644_v13, 1  ;;  %v2944_v43 = vrot.slane %v11614_v45, 2  ;;  %v2314_v17 = vrot.slane %v11646_v59, 1  ;;  %9664 = vrot.lane.b32.xlu1 %v9663_v47, %s10485_s29  ;;  %v1722_v30 = vmul.f32 %v11200_v23, %v11530_v48 }
 0x1a1   : > { %v11608_v40 = vpop.f32.mrb[93].mxu0  ;;  %v3427_v44 = vsel %vm893_vm0, %v10804_v29, %v9332_v38  ;;  %9669 = vrot.lane.b32.xlu0 %v9668_v11, %s10483_s28  ;;  %v3426_v16 = vsel %vm893_vm0, %v10794_v18, %v9331_v20  ;;  %v2943_v42 = vsel %vm2784_vm2, %v2940_v37, %v2942_v46  ;;  %v11676_v55 = vmax.f32 %v1854_v49, 0.0  ;;  %v9345_v20 = vpop.permute.xlu1 %9344 }
 0x1a2   : > { %v11616_v10 = vpop.f32.mrb[94].mxu0  ;;  %v3554_v6 = vsel %vm3542_vm4, %v3427_v44, %v9337_v7  ;;  %v3553_v35 = vsel %vm3542_vm4, %v3426_v16, %v9336_v51  ;;  %v1857_v47 = vadd.f32 %v11194_v57, %v1723_v39  ;;  %v11679_v27 = vmax.f32 %v1855_v52, 0.0  ;;  %v11687_v54 = vpop.permute.xlu0 %9379 }
 0x1a3   : > { %v11625_v19 = vpop.f32.mrb[95].mxu0  ;;  %v1856_v48 = vadd.f32 %v11194_v57, %v1722_v30  ;;  %v2945_v29 = vsel %vm2784_vm2, %v2942_v46, %v2944_v43  ;;  %v2315_v38 = vsel %vm2152_vm1, %v2312_v26, %v2314_v17  ;;  %v2317_v18 = vsel %vm2152_vm1, %v2314_v17, %v2316_v22 }
 0x1a4   : > { %v2948_v7 = vrot.slane %v11644_v13, 2  ;;  %v2946_v37 = vrot.slane %v11646_v59, 2  ;;  %v9673_v51 = vpack.i.bf16 %v2945_v29, %v2943_v42  ;;  %v1724_v49 = vmul.f32 %v11200_v23, %v11516_v24 }
 0x1a5   : > { %v9678_v39 = vpack.i.bf16 %v2317_v18, %v2315_v38  ;;  %v3674_v52 = vpack.c.bf16 %v3554_v6, %v3553_v35  ;;  %v2318_v11 = vrot.slane %v11676_v55, 1  ;;  %v2320_v46 = vrot.slane %v11679_v27, 1 }
 0x1a6   : > { %9674 = vrot.lane.b32.xlu1 %v9673_v51, %s10485_s29  ;;  %v1725_v17 = vmul.f32 %v11200_v23, %v11557_v1  ;;  %v11696_v26 = vmax.f32 %v1857_v47, 0.0  ;;  %v11698_v30 = vmax.f32 %v1856_v48, 0.0  ;;  %v9342_v24 = vunpack.i.h.bf16 %v11561_v36  ;;  %v11710_v48 = vpop.permute.xlu1 %9354 }
 0x1a7   : > { %9679 = vrot.lane.b32.xlu0 %v9678_v39, %s10483_s28  ;;  %8954 = vmatmul.mubr.msk.bf16.gmra.mrb[52].mxu1 %vm3756_vm5, %v3674_v52  ;;  %v9341_v44 = vunpack.i.l.bf16 %v11561_v36  ;;  %v2947_v16 = vsel %vm2784_vm2, %v2944_v43, %v2946_v37  ;;  %v2949_v6 = vsel %vm2784_vm2, %v2946_v37, %v2948_v7  ;;  %v9347_v1 = vunpack.i.h.bf16 %v9345_v20 }
 0x1a8   : > { %15647 = vst [vmem:[#allocation84_spill] sm:$0xff] %v11696_v26  ;;  %8957 = vmatprep.mubr.msk.bf16.mxu1 %vm10484_vm3, %v15616_v9  ;;  %v9346_v42 = vunpack.i.l.bf16 %v9345_v20  ;;  %v2950_v35 = vrot.slane %v11676_v55, 2  ;;  %v1858_v47 = vadd.f32 %v11194_v57, %v1724_v49  ;;  %v1859_v29 = vadd.f32 %v11194_v57, %v1725_v17  ;;  %v11718_v20 = vpop.permute.xlu0 %9389 }
 0x1a9   : > { %v9683_v38 = vpack.i.bf16 %v2949_v6, %v2947_v16  ;;  %v2319_v36 = vsel %vm2152_vm1, %v2316_v22, %v2318_v11  ;;  %v2321_v43 = vsel %vm2152_vm1, %v2318_v11, %v2320_v46  ;;  %v2324_v18 = vrot.slane %v11696_v26, 1 }
 0x1aa   : > { %v2952_v37 = vrot.slane %v11679_v27, 2  ;;  %v2322_v51 = vrot.slane %v11698_v30, 1  ;;  %v9688_v39 = vpack.i.bf16 %v2321_v43, %v2319_v36  ;;  %v3429_v49 = vsel %vm893_vm0, %v10845_v12, %v9342_v24 }
 0x1ab   : > { %9684 = vrot.lane.b32.xlu1 %v9683_v38, %s10485_s29  ;;  %v3428_v52 = vsel %vm893_vm0, %v10835_v2, %v9341_v44  ;;  %v1727_v22 = vmul.f32 %v11200_v23, %v11550_v31  ;;  %v1726_v11 = vmul.f32 %v11200_v23, %v11576_v5  ;;  %v3556_v16 = vsel %vm3542_vm4, %v3429_v49, %v9347_v1  ;;  %v11740_v44 = vpop.permute.xlu1 %9364 }
 0x1ac   : > { %9689 = vrot.lane.b32.xlu0 %v9688_v39, %s10483_s28  ;;  %v3555_v17 = vsel %vm3542_vm4, %v3428_v52, %v9346_v42  ;;  %v11732_v6 = vmax.f32 %v1858_v47, 0.0  ;;  %v11734_v38 = vmax.f32 %v1859_v29, 0.0  ;;  %v2951_v12 = vsel %vm2784_vm2, %v2948_v7, %v2950_v35  ;;  %v11745_v47 = vpop.permute.xlu0 %9399 }
 0x1ad   : > { %v2953_v2 = vsel %vm2784_vm2, %v2950_v35, %v2952_v37  ;;  %v2323_v24 = vsel %vm2152_vm1, %v2320_v46, %v2322_v51  ;;  %v2325_v31 = vsel %vm2152_vm1, %v2322_v51, %v2324_v18  ;;  %v2956_v5 = vrot.slane %v11696_v26, 2 }
 0x1ae   : > { %15648 = vst [vmem:[#allocation85_spill] sm:$0xff] %v11732_v6  ;;  %15649 = vst [vmem:[#allocation86_spill] sm:$0xff] %v11734_v38  ;;  %v2954_v42 = vrot.slane %v11698_v30, 2  ;;  %v9693_v36 = vpack.i.bf16 %v2953_v2, %v2951_v12  ;;  %v1861_v1 = vadd.f32 %v11194_v57, %v1727_v22  ;;  %v1860_v29 = vadd.f32 %v11194_v57, %v1726_v11 }
 0x1af   : > { %v9698_v7 = vpack.i.bf16 %v2325_v31, %v2323_v24  ;;  %v3675_v43 = vpack.c.bf16 %v3556_v16, %v3555_v17  ;;  %v2326_v35 = vrot.slane %v11732_v6, 1  ;;  %v2328_v46 = vrot.slane %v11734_v38, 1  ;;  %v11770_v16 = vpop.permute.xlu1 %9374 }
 0x1b0   : > { %v1728_v51 = vmul.f32 %v11200_v23, %v11566_v4  ;;  %9694 = vrot.lane.b32.xlu1 %v9693_v36, %s10485_s29  ;;  %v1729_v39 = vmul.f32 %v11200_v23, %v11608_v40  ;;  %v9352_v49 = vunpack.i.h.bf16 %v11593_v32  ;;  %v9351_v52 = vunpack.i.l.bf16 %v11593_v32  ;;  %v11787_v36 = vld [vmem:[%s15425_s2] ss:$0 sm:$0xff] }
 0x1b1   : > { %9699 = vrot.lane.b32.xlu0 %v9698_v7, %s10483_s28  ;;  %8958 = vmatmul.mubr.msk.bf16.gmra.mrb[56].mxu1 %vm3756_vm5, %v3675_v43  ;;  %v9357_v57 = vunpack.i.h.bf16 %v11710_v48  ;;  %v9356_v22 = vunpack.i.l.bf16 %v11710_v48  ;;  %v2955_v11 = vsel %vm2784_vm2, %v2952_v37, %v2954_v42  ;;  %v2957_v4 = vsel %vm2784_vm2, %v2954_v42, %v2956_v5  ;;  %v11775_v48 = vld [vmem:[%s15426_s3] ss:$0 sm:$0xff]  ;;  %v11782_v42 = vpop.permute.xlu0 %9409 }
 0x1b2   : > { %8961 = vmatprep.mubr.msk.bf16.mxu1 %vm10484_vm3, %v15616_v9  ;;  %v2958_v23 = vrot.slane %v11732_v6, 2  ;;  %v11766_v40 = vmax.f32 %v1861_v1, 0.0  ;;  %v11768_v32 = vmax.f32 %v1860_v29, 0.0  ;;  %v9703_v17 = vpack.i.bf16 %v2957_v4, %v2955_v11  ;;  %v15710_v6 = vld [vmem:[#allocation78_spill] sm:$0xff] }
 0x1b3   : > { %v1862_v37 = vadd.f32 %v11775_v48, %v1728_v51  ;;  %v1863_v12 = vadd.f32 %v11775_v48, %v1729_v39  ;;  %v2327_v2 = vsel %vm2152_vm1, %v2324_v18, %v2326_v35  ;;  %v2329_v24 = vsel %vm2152_vm1, %v2326_v35, %v2328_v46 }
 0x1b4   : > { %15650 = vst [vmem:[#allocation87_spill] sm:$0xff] %v11766_v40  ;;  %15651 = vst [vmem:[#allocation88_spill] sm:$0xff] %v11768_v32  ;;  %v2960_v31 = vrot.slane %v11734_v38, 2  ;;  %v1731_v1 = vmul.f32 %v11787_v36, %v11600_v15  ;;  %9704 = vrot.lane.b32.xlu1 %v9703_v17, %s10485_s29  ;;  %v9708_v29 = vpack.i.bf16 %v2329_v24, %v2327_v2  ;;  %v2332_v35 = vrot.slane %v11766_v40, 1  ;;  %v15702_v38 = vld [vmem:[#allocation77_spill] sm:$0xff] }
 0x1b5   : > { %v1730_v18 = vmul.f32 %v11787_v36, %v11625_v19  ;;  %v3431_v7 = vsel %vm893_vm0, %v10840_v8, %v9352_v49  ;;  %v3430_v43 = vsel %vm893_vm0, %v10829_v61, %v9351_v52  ;;  %v2330_v51 = vrot.slane %v11768_v32, 1  ;;  %v11811_v52 = vpop.permute.xlu1 %9384 }
 0x1b6   : > { %9709 = vrot.lane.b32.xlu0 %v9708_v29, %s10483_s28  ;;  %v3557_v15 = vsel %vm3542_vm4, %v3430_v43, %v9356_v22  ;;  %v3558_v39 = vsel %vm3542_vm4, %v3431_v7, %v9357_v57  ;;  %v11803_v11 = vmax.f32 %v1862_v37, 0.0  ;;  %v11805_v4 = vmax.f32 %v1863_v12, 0.0  ;;  %v11815_v57 = vpop.permute.xlu0 %9419 }
 0x1b7   : > { %v1865_v19 = vadd.f32 %v11775_v48, %v1731_v1  ;;  %v1864_v8 = vadd.f32 %v11775_v48, %v1730_v18  ;;  %v2959_v61 = vsel %vm2784_vm2, %v2956_v5, %v2958_v23  ;;  %v2961_v49 = vsel %vm2784_vm2, %v2958_v23, %v2960_v31 }
 0x1b8   : > { %15652 = vst [vmem:[#allocation89_spill] sm:$0xff] %v11803_v11  ;;  %15653 = vst [vmem:[#allocation90_spill] sm:$0xff] %v11805_v4  ;;  %v2964_v17 = vrot.slane %v11766_v40, 2  ;;  %v2962_v22 = vrot.slane %v11768_v32, 2  ;;  %v9713_v2 = vpack.i.bf16 %v2961_v49, %v2959_v61  ;;  %v1732_v37 = vmul.f32 %v11787_v36, %v11616_v10  ;;  %v15697_v40 = vld [vmem:[#allocation9_spill] sm:$0xff] }
 0x1b9   : > { %v2331_v12 = vsel %vm2152_vm1, %v2328_v46, %v2330_v51  ;;  %v2333_v24 = vsel %vm2152_vm1, %v2330_v51, %v2332_v35  ;;  %v3676_v1 = vpack.c.bf16 %v3558_v39, %v3557_v15  ;;  %v2334_v5 = vrot.slane %v11803_v11, 1  ;;  %v11841_v61 = vpop.permute.xlu1 %9394 }
 0x1ba   : > { %v2336_v23 = vrot.slane %v11805_v4, 1  ;;  %9714 = vrot.lane.b32.xlu1 %v9713_v2, %s10485_s29  ;;  %v9718_v29 = vpack.i.bf16 %v2333_v24, %v2331_v12  ;;  %v11824_v18 = vmax.f32 %v1865_v19, 0.0  ;;  %v11826_v7 = vmax.f32 %v1864_v8, 0.0  ;;  %v11849_v12 = vpop.permute.xlu0 %9429 }
 0x1bb   : > { %8962 = vmatmul.mubr.msk.bf16.gmra.mrb[60].mxu1 %vm3756_vm5, %v3676_v1  ;;  %v9362_v10 = vunpack.i.h.bf16 %v11634_v25  ;;  %v9361_v46 = vunpack.i.l.bf16 %v11634_v25  ;;  %v2963_v43 = vsel %vm2784_vm2, %v2960_v31, %v2962_v22  ;;  %v2965_v51 = vsel %vm2784_vm2, %v2962_v22, %v2964_v17 }
 0x1bc   : > { %15654 = vst [vmem:[#allocation91_spill] sm:$0xff] %v11824_v18  ;;  %15655 = vst [vmem:[#allocation92_spill] sm:$0xff] %v11826_v7  ;;  %9719 = vrot.lane.b32.xlu0 %v9718_v29, %s10483_s28  ;;  %v9367_v15 = vunpack.i.h.bf16 %v11740_v44  ;;  %v9366_v39 = vunpack.i.l.bf16 %v11740_v44  ;;  %v1866_v19 = vadd.f32 %v11775_v48, %v1732_v37  ;;  %v1733_v8 = vmul.f32 %v11787_v36, %v11149_v62 }
 0x1bd   : > { %8965 = vmatprep.mubr.msk.bf16.mxu1 %vm10484_vm3, %v15616_v9  ;;  %v2966_v25 = vrot.slane %v11803_v11, 2  ;;  %v9723_v49 = vpack.i.bf16 %v2965_v51, %v2963_v43  ;;  %v2335_v31 = vsel %vm2152_vm1, %v2332_v35, %v2334_v5  ;;  %v2337_v22 = vsel %vm2152_vm1, %v2334_v5, %v2336_v23 }
 0x1be   : > { %v2340_v2 = vrot.slane %v11824_v18, 1  ;;  %v2968_v44 = vrot.slane %v11805_v4, 2  ;;  %v2338_v37 = vrot.slane %v11826_v7, 1  ;;  %v9728_v62 = vpack.i.bf16 %v2337_v22, %v2335_v31  ;;  %v11877_v22 = vpop.permute.xlu0 %9439 }
 0x1bf   : > { %9724 = vrot.lane.b32.xlu1 %v9723_v49, %s10485_s29  ;;  %v3433_v24 = vsel %vm893_vm0, %v10881_v60, %v9362_v10  ;;  %v3432_v1 = vsel %vm893_vm0, %v10871_v50, %v9361_v46  ;;  %v11856_v35 = vmax.f32 %v1866_v19, 0.0  ;;  %v1867_v5 = vadd.f32 %v11775_v48, %v1733_v8  ;;  %v11870_v19 = vpop.permute.xlu1 %9404 }
 0x1c0   : > { %9729 = vrot.lane.b32.xlu0 %v9728_v62, %s10483_s28  ;;  %v3559_v29 = vsel %vm3542_vm4, %v3432_v1, %v9366_v39  ;;  %v3560_v43 = vsel %vm3542_vm4, %v3433_v24, %v9367_v15  ;;  %v1735_v51 = vmul.f32 %v11787_v36, %v11143_v53  ;;  %v2967_v49 = vsel %vm2784_vm2, %v2964_v17, %v2966_v25 }
 0x1c1   : > { %15656 = vst [vmem:[#allocation93_spill] sm:$0xff] %v11856_v35  ;;  %v1734_v60 = vmul.f32 %v11787_v36, %v11189_v58  ;;  %v2969_v50 = vsel %vm2784_vm2, %v2966_v25, %v2968_v44  ;;  %v2339_v10 = vsel %vm2152_vm1, %v2336_v23, %v2338_v37  ;;  %v2341_v46 = vsel %vm2152_vm1, %v2338_v37, %v2340_v2 }
 0x1c2   : > { %v2972_v39 = vrot.slane %v11824_v18, 2  ;;  %v9733_v8 = vpack.i.bf16 %v2969_v50, %v2967_v49  ;;  %v9738_v15 = vpack.i.bf16 %v2341_v46, %v2339_v10  ;;  %v2342_v31 = vrot.slane %v11856_v35, 1  ;;  %v15682_v18 = vld [vmem:[#allocation60_spill] sm:$0xff] }
 0x1c3   : > { %v2970_v53 = vrot.slane %v11826_v7, 2  ;;  %v11875_v17 = vmax.f32 %v1867_v5, 0.0  ;;  %v3677_v58 = vpack.c.bf16 %v3560_v43, %v3559_v29  ;;  %v1736_v23 = vmul.f32 %v11787_v36, %v11168_v28  ;;  %v11898_v49 = vpop.permute.xlu1 %9414  ;;  %v15687_v7 = vld [vmem:[#allocation8_spill] sm:$0xff] }
 0x1c4   : > { %v1737_v25 = vmul.f32 %v11787_v36, %v11224_v14  ;;  %9734 = vrot.lane.b32.xlu1 %v9733_v8, %s10485_s29  ;;  %9739 = vrot.lane.b32.xlu0 %v9738_v15, %s10483_s28  ;;  %v1869_v37 = vadd.f32 %v11775_v48, %v1735_v51  ;;  %v1868_v62 = vadd.f32 %v11775_v48, %v1734_v60  ;;  %v9372_v24 = vunpack.i.h.bf16 %v11663_v63 }
 0x1c5   : > { %15657 = vst [vmem:[#allocation94_spill] sm:$0xff] %v11875_v17  ;;  %8966 = vmatmul.mubr.msk.bf16.gmra.mrb[64].mxu1 %vm3756_vm5, %v3677_v58  ;;  %v9371_v1 = vunpack.i.l.bf16 %v11663_v63  ;;  %v9377_v5 = vunpack.i.h.bf16 %v11770_v16  ;;  %v9376_v28 = vunpack.i.l.bf16 %v11770_v16  ;;  %v2971_v14 = vsel %vm2784_vm2, %v2968_v44, %v2970_v53  ;;  %v11907_v44 = vpop.permute.xlu0 %9449 }
 0x1c6   : > { %8969 = vmatprep.mubr.msk.bf16.mxu1 %vm10484_vm3, %v15616_v9  ;;  %v2973_v29 = vsel %vm2784_vm2, %v2970_v53, %v2972_v39  ;;  %v2343_v43 = vsel %vm2152_vm1, %v2340_v2, %v2342_v31  ;;  %v2344_v51 = vrot.slane %v11875_v17, 1  ;;  %v1870_v60 = vadd.f32 %v11775_v48, %v1736_v23 }
 0x1c7   : > { %v1871_v63 = vadd.f32 %v11775_v48, %v1737_v25  ;;  %v9743_v50 = vpack.i.bf16 %v2973_v29, %v2971_v14  ;;  %v2974_v16 = vrot.slane %v11856_v35, 2  ;;  %v11903_v10 = vmax.f32 %v1869_v37, 0.0 }
 0x1c8   : > { %v11905_v46 = vmax.f32 %v1868_v62, 0.0  ;;  %v2345_v8 = vsel %vm2152_vm1, %v2342_v31, %v2344_v51  ;;  %v3435_v2 = vsel %vm893_vm0, %v10876_v56, %v9372_v24  ;;  %v3434_v15 = vsel %vm893_vm0, %v10865_v41, %v9371_v1 }
 0x1c9   : > { %15658 = vst [vmem:[#allocation95_spill] sm:$0xff] %v11903_v10  ;;  %v1739_v53 = vmul.f32 %v11787_v36, %v11204_v34  ;;  %9744 = vrot.lane.b32.xlu1 %v9743_v50, %s10485_s29  ;;  %v9748_v58 = vpack.i.bf16 %v2345_v8, %v2343_v43  ;;  %v3561_v23 = vsel %vm3542_vm4, %v3434_v15, %v9376_v28  ;;  %v11921_v31 = vmax.f32 %v1870_v60, 0.0  ;;  %v11932_v28 = vpop.permute.xlu1 %9424  ;;  %v11935_v29 = vpop.permute.xlu0 %9459 }
 0x1ca   : > { %15659 = vst [vmem:[#allocation96_spill] sm:$0xff] %v11905_v46  ;;  %v3562_v25 = vsel %vm3542_vm4, %v3435_v2, %v9377_v5  ;;  %v1738_v37 = vmul.f32 %v11787_v36, %v11256_v0  ;;  %v11923_v62 = vmax.f32 %v1871_v63, 0.0  ;;  %v2975_v41 = vsel %vm2784_vm2, %v2972_v39, %v2974_v16 }
 0x1cb   : > { %15660 = vst [vmem:[#allocation97_spill] sm:$0xff] %v11921_v31  ;;  %9749 = vrot.lane.b32.xlu0 %v9748_v58, %s10483_s28  ;;  %v2976_v56 = vrot.slane %v11875_v17, 2  ;;  %v2346_v34 = vrot.slane %v11905_v46, 1  ;;  %v2348_v24 = vrot.slane %v11903_v10, 1  ;;  %v9382_v1 = vunpack.i.h.bf16 %v11687_v54 }
 0x1cc   : > { %15661 = vst [vmem:[#allocation98_spill] sm:$0xff] %v11923_v62  ;;  %v9381_v5 = vunpack.i.l.bf16 %v11687_v54  ;;  %v1873_v0 = vadd.f32 %v11775_v48, %v1739_v53  ;;  %v3678_v14 = vpack.c.bf16 %v3562_v25, %v3561_v23  ;;  %v1872_v43 = vadd.f32 %v11775_v48, %v1738_v37  ;;  %v15662_v53 = vld [vmem:[#allocation44_spill] sm:$0xff] }
 0x1cd   : > { %v2977_v39 = vsel %vm2784_vm2, %v2974_v16, %v2976_v56  ;;  %v2347_v60 = vsel %vm2152_vm1, %v2344_v51, %v2346_v34  ;;  %v2349_v63 = vsel %vm2152_vm1, %v2346_v34, %v2348_v24  ;;  %v2350_v50 = vrot.slane %v11921_v31, 1  ;;  %v15663_v51 = vld [vmem:[#allocation6_spill] sm:$0xff]  ;;  %v15664_v23 = vld [vmem:[#allocation4_spill] sm:$0xff] }
 0x1ce   : > { %v2352_v8 = vrot.slane %v11923_v62, 1  ;;  %v9753_v54 = vpack.i.bf16 %v2977_v39, %v2975_v41  ;;  %v9758_v2 = vpack.i.bf16 %v2349_v63, %v2347_v60  ;;  %8970 = vmatmul.mubr.msk.bf16.gmra.mrb[68].mxu1 %vm3756_vm5, %v3678_v14  ;;  %v1740_v15 = vmul.f32 %v11787_v36, %v11237_v3  ;;  %v11962_v14 = vpop.permute.xlu1 %9434 }
 0x1cf   : > { %v1741_v58 = vmul.f32 %v11787_v36, %v15662_v53  ;;  %8973 = vmatprep.mubr.msk.bf16.mxu1 %vm10484_vm3, %v15616_v9  ;;  %v3437_v16 = vsel %vm893_vm0, %v15663_v51, %v9382_v1  ;;  %v3436_v25 = vsel %vm893_vm0, %v15664_v23, %v9381_v5  ;;  %v9387_v37 = vunpack.i.h.bf16 %v11811_v52  ;;  %v15668_v51 = vld [vmem:[#allocation49_spill] sm:$0xff] }
 0x1d0   : > { %9754 = vrot.lane.b32.xlu1 %v9753_v54, %s10485_s29  ;;  %9759 = vrot.lane.b32.xlu0 %v9758_v2, %s10483_s28  ;;  %v9386_v3 = vunpack.i.l.bf16 %v11811_v52  ;;  %v11958_v41 = vmax.f32 %v1873_v0, 0.0  ;;  %v11960_v34 = vmax.f32 %v1872_v43, 0.0  ;;  %v2978_v39 = vrot.slane %v11905_v46, 2  ;;  %v11970_v2 = vpop.permute.xlu0 %9469  ;;  %v15667_v43 = vld [vmem:[#allocation42_spill] sm:$0xff] }
 0x1d1   : > { %v2980_v1 = vrot.slane %v11903_v10, 2  ;;  %v2351_v5 = vsel %vm2152_vm1, %v2348_v24, %v2350_v50  ;;  %v2353_v60 = vsel %vm2152_vm1, %v2350_v50, %v2352_v8  ;;  %v2982_v63 = vrot.slane %v11921_v31, 2 }
 0x1d2   : > { %15665 = vst [vmem:[#allocation44_spill] sm:$0xff] %v11958_v41  ;;  %15666 = vst [vmem:[#allocation6_spill] sm:$0xff] %v11960_v34  ;;  %v1874_v54 = vadd.f32 %v11775_v48, %v1740_v15  ;;  %v1875_v52 = vadd.f32 %v11775_v48, %v1741_v58  ;;  %v9768_v0 = vpack.i.bf16 %v2353_v60, %v2351_v5  ;;  %v2356_v50 = vrot.slane %v11958_v41, 1 }
 0x1d3   : > { %v1743_v53 = vmul.f32 %v11787_v36, %v15667_v43  ;;  %v1742_v23 = vmul.f32 %v11787_v36, %v15668_v51  ;;  %v2979_v10 = vsel %vm2784_vm2, %v2976_v56, %v2978_v39  ;;  %v2981_v24 = vsel %vm2784_vm2, %v2978_v39, %v2980_v1  ;;  %v11990_v56 = vpop.permute.xlu1 %9444 }
 0x1d4   : > { %v2984_v31 = vrot.slane %v11923_v62, 2  ;;  %v2354_v15 = vrot.slane %v11960_v34, 1  ;;  %v9763_v17 = vpack.i.bf16 %v2981_v24, %v2979_v10  ;;  %9769 = vrot.lane.b32.xlu0 %v9768_v0, %s10483_s28  ;;  %v3563_v58 = vsel %vm3542_vm4, %v3436_v25, %v9386_v3  ;;  %v11995_v24 = vpop.permute.xlu0 %9479 }
 0x1d5   : > { %v3564_v5 = vsel %vm3542_vm4, %v3437_v16, %v9387_v37  ;;  %v11985_v60 = vmax.f32 %v1874_v54, 0.0  ;;  %v11987_v43 = vmax.f32 %v1875_v52, 0.0  ;;  %v1877_v39 = vadd.f32 %v11775_v48, %v1743_v53  ;;  %v15671_v54 = vld [vmem:[#allocation46_spill] sm:$0xff] }
 0x1d6   : > { %9764 = vrot.lane.b32.xlu1 %v9763_v17, %s10485_s29  ;;  %v1876_v51 = vadd.f32 %v11775_v48, %v1742_v23  ;;  %v2983_v10 = vsel %vm2784_vm2, %v2980_v1, %v2982_v63  ;;  %v2985_v25 = vsel %vm2784_vm2, %v2982_v63, %v2984_v31  ;;  %v2355_v16 = vsel %vm2152_vm1, %v2352_v8, %v2354_v15  ;;  %v15672_v63 = vld [vmem:[#allocation53_spill] sm:$0xff] }
 0x1d7   : > { %15669 = vst [vmem:[#allocation4_spill] sm:$0xff] %v11985_v60  ;;  %15670 = vst [vmem:[#allocation42_spill] sm:$0xff] %v11987_v43  ;;  %v2357_v37 = vsel %vm2152_vm1, %v2354_v15, %v2356_v50  ;;  %v3679_v3 = vpack.c.bf16 %v3564_v5, %v3563_v58  ;;  %v1744_v17 = vmul.f32 %v11787_v36, %v15671_v54  ;;  %v2988_v53 = vrot.slane %v11958_v41, 2 }
 0x1d8   : > { %v9773_v52 = vpack.i.bf16 %v2985_v25, %v2983_v10  ;;  %v9778_v0 = vpack.i.bf16 %v2357_v37, %v2355_v16  ;;  %v2358_v23 = vrot.slane %v11985_v60, 1  ;;  %v2986_v1 = vrot.slane %v11960_v34, 2  ;;  %v12021_v37 = vpop.permute.xlu1 %9454  ;;  %v12024_v54 = vpop.permute.xlu0 %9489 }
 0x1d9   : > { %v2360_v62 = vrot.slane %v11987_v43, 1  ;;  %8974 = vmatmul.mubr.msk.bf16.gmra.mrb[72].mxu1 %vm3756_vm5, %v3679_v3  ;;  %v1745_v8 = vmul.f32 %v11787_v36, %v15672_v63  ;;  %v9392_v15 = vunpack.i.h.bf16 %v11718_v20  ;;  %v12012_v58 = vmax.f32 %v1877_v39, 0.0  ;;  %v15675_v63 = vld [vmem:[#allocation57_spill] sm:$0xff] }
 0x1da   : > { %9774 = vrot.lane.b32.xlu1 %v9773_v52, %s10485_s29  ;;  %9779 = vrot.lane.b32.xlu0 %v9778_v0, %s10483_s28  ;;  %v12014_v5 = vmax.f32 %v1876_v51, 0.0  ;;  %v9391_v10 = vunpack.i.l.bf16 %v11718_v20  ;;  %v9397_v25 = vunpack.i.h.bf16 %v11841_v61  ;;  %v9396_v16 = vunpack.i.l.bf16 %v11841_v61 }
 0x1db   : > { %15673 = vst [vmem:[#allocation49_spill] sm:$0xff] %v12012_v58  ;;  %8977 = vmatprep.mubr.msk.bf16.mxu1 %vm10484_vm3, %v15616_v9  ;;  %v1878_v3 = vadd.f32 %v11775_v48, %v1744_v17  ;;  %v2987_v39 = vsel %vm2784_vm2, %v2984_v31, %v2986_v1  ;;  %v2989_v51 = vsel %vm2784_vm2, %v2986_v1, %v2988_v53  ;;  %v2990_v46 = vrot.slane %v11985_v60, 2  ;;  %v15676_v1 = vld [vmem:[#allocation50_spill] sm:$0xff] }
 0x1dc   : > { %15674 = vst [vmem:[#allocation46_spill] sm:$0xff] %v12014_v5  ;;  %v2359_v52 = vsel %vm2152_vm1, %v2356_v50, %v2358_v23  ;;  %v2361_v0 = vsel %vm2152_vm1, %v2358_v23, %v2360_v62  ;;  %v1879_v20 = vadd.f32 %v11775_v48, %v1745_v8  ;;  %v1746_v41 = vmul.f32 %v11787_v36, %v15675_v63  ;;  %v15677_v23 = vld [vmem:[#allocation5_spill] sm:$0xff] }
 0x1dd   : > { %v9783_v61 = vpack.i.bf16 %v2989_v51, %v2987_v39  ;;  %v9788_v34 = vpack.i.bf16 %v2361_v0, %v2359_v52  ;;  %v2364_v17 = vrot.slane %v12012_v58, 1  ;;  %v2992_v35 = vrot.slane %v11987_v43, 2  ;;  %v15678_v39 = vld [vmem:[#allocation3_spill] sm:$0xff]  ;;  %v12049_v43 = vpop.permute.xlu1 %9464 }
 0x1de   : > { %v2362_v31 = vrot.slane %v12014_v5, 1  ;;  %v1747_v50 = vmul.f32 %v11787_v36, %v15676_v1  ;;  %v3439_v8 = vsel %vm893_vm0, %v15677_v23, %v9392_v15  ;;  %v3438_v51 = vsel %vm893_vm0, %v15678_v39, %v9391_v10  ;;  %v12054_v1 = vpop.permute.xlu0 %9499 }
 0x1df   : > { %9784 = vrot.lane.b32.xlu1 %v9783_v61, %s10485_s29  ;;  %9789 = vrot.lane.b32.xlu0 %v9788_v34, %s10483_s28  ;;  %v12045_v52 = vmax.f32 %v1878_v3, 0.0  ;;  %v3565_v0 = vsel %vm3542_vm4, %v3438_v51, %v9396_v16  ;;  %v3566_v63 = vsel %vm3542_vm4, %v3439_v8, %v9397_v25  ;;  %v12051_v60 = vmax.f32 %v1879_v20, 0.0 }
 0x1e0   : > { %v1880_v61 = vadd.f32 %v11775_v48, %v1746_v41  ;;  %v2991_v34 = vsel %vm2784_vm2, %v2988_v53, %v2990_v46  ;;  %v2993_v15 = vsel %vm2784_vm2, %v2990_v46, %v2992_v35  ;;  %v2363_v10 = vsel %vm2152_vm1, %v2360_v62, %v2362_v31  ;;  %v15681_v53 = vld [vmem:[#allocation54_spill] sm:$0xff] }
 0x1e1   : > { %15679 = vst [vmem:[#allocation53_spill] sm:$0xff] %v12045_v52  ;;  %15680 = vst [vmem:[#allocation57_spill] sm:$0xff] %v12051_v60  ;;  %v2365_v3 = vsel %vm2152_vm1, %v2362_v31, %v2364_v17  ;;  %v1881_v16 = vadd.f32 %v11775_v48, %v1747_v50  ;;  %v9793_v23 = vpack.i.bf16 %v2993_v15, %v2991_v34  ;;  %v2996_v8 = vrot.slane %v12012_v58, 2  ;;  %v12078_v15 = vpop.permute.xlu1 %9474 }
 0x1e2   : > { %v9798_v25 = vpack.i.bf16 %v2365_v3, %v2363_v10  ;;  %v2366_v20 = vrot.slane %v12045_v52, 1  ;;  %v2994_v41 = vrot.slane %v12014_v5, 2  ;;  %v3680_v39 = vpack.c.bf16 %v3566_v63, %v3565_v0  ;;  %v12085_v3 = vpop.permute.xlu0 %9509 }
 0x1e3   : > { %v2368_v51 = vrot.slane %v12051_v60, 1  ;;  %v1748_v46 = vmul.f32 %v11787_v36, %v15681_v53  ;;  %v1749_v62 = vmul.f32 %v11787_v36, %v15682_v18  ;;  %9794 = vrot.lane.b32.xlu1 %v9793_v23, %s10485_s29  ;;  %v9402_v31 = vunpack.i.h.bf16 %v11745_v47 }
 0x1e4   : > { %9799 = vrot.lane.b32.xlu0 %v9798_v25, %s10483_s28  ;;  %v12072_v50 = vmax.f32 %v1880_v61, 0.0  ;;  %8978 = vmatmul.mubr.msk.bf16.gmra.mrb[76].mxu1 %vm3756_vm5, %v3680_v39  ;;  %v9401_v0 = vunpack.i.l.bf16 %v11745_v47  ;;  %v9407_v63 = vunpack.i.h.bf16 %v11870_v19  ;;  %v9406_v34 = vunpack.i.l.bf16 %v11870_v19 }
 0x1e5   : > { %v12080_v10 = vmax.f32 %v1881_v16, 0.0  ;;  %8981 = vmatprep.mubr.msk.bf16.mxu1 %vm10484_vm3, %v15616_v9  ;;  %v2998_v18 = vrot.slane %v12045_v52, 2  ;;  %v2995_v61 = vsel %vm2784_vm2, %v2992_v35, %v2994_v41  ;;  %v2997_v23 = vsel %vm2784_vm2, %v2994_v41, %v2996_v8  ;;  %v15685_v52 = vld [vmem:[#allocation58_spill] sm:$0xff] }
 0x1e6   : > { %15683 = vst [vmem:[#allocation50_spill] sm:$0xff] %v12072_v50  ;;  %v2367_v47 = vsel %vm2152_vm1, %v2364_v17, %v2366_v20  ;;  %v1882_v25 = vadd.f32 %v11775_v48, %v1748_v46  ;;  %v1883_v19 = vadd.f32 %v11775_v48, %v1749_v62  ;;  %v9803_v39 = vpack.i.bf16 %v2997_v23, %v2995_v61  ;;  %v15686_v35 = vld [vmem:[#allocation10_spill] sm:$0xff]  ;;  %v15688_v62 = vld [vmem:[#allocation65_spill] sm:$0xff] }
 0x1e7   : > { %15684 = vst [vmem:[#allocation5_spill] sm:$0xff] %v12080_v10  ;;  %v2369_v16 = vsel %vm2152_vm1, %v2366_v20, %v2368_v51  ;;  %v3000_v53 = vrot.slane %v12051_v60, 2  ;;  %v2370_v58 = vrot.slane %v12072_v50, 1  ;;  %v1751_v5 = vmul.f32 %v11787_v36, %v15685_v52  ;;  %v12108_v52 = vpop.permute.xlu1 %9484 }
 0x1e8   : > { %v9808_v4 = vpack.i.bf16 %v2369_v16, %v2367_v47  ;;  %v3441_v41 = vsel %vm893_vm0, %v15686_v35, %v9402_v31  ;;  %v3440_v17 = vsel %vm893_vm0, %v15687_v7, %v9401_v0  ;;  %v2372_v46 = vrot.slane %v12080_v10, 1  ;;  %9804 = vrot.lane.b32.xlu1 %v9803_v39, %s10485_s29  ;;  %v12116_v16 = vpop.permute.xlu0 %9519 }
 0x1e9   : > { %v1750_v61 = vmul.f32 %v11787_v36, %v15688_v62  ;;  %v3567_v20 = vsel %vm3542_vm4, %v3440_v17, %v9406_v34  ;;  %v3568_v23 = vsel %vm3542_vm4, %v3441_v41, %v9407_v63  ;;  %v12110_v47 = vmax.f32 %v1882_v25, 0.0 }
 0x1ea   : > { %9809 = vrot.lane.b32.xlu0 %v9808_v4, %s10483_s28  ;;  %v3002_v31 = vrot.slane %v12072_v50, 2  ;;  %v12113_v7 = vmax.f32 %v1883_v19, 0.0  ;;  %v1885_v0 = vadd.f32 %v11775_v48, %v1751_v5  ;;  %v2999_v39 = vsel %vm2784_vm2, %v2996_v8, %v2998_v18  ;;  %v15691_v19 = vld [vmem:[#allocation62_spill] sm:$0xff]  ;;  %v15692_v50 = vld [vmem:[#allocation68_spill] sm:$0xff] }
 0x1eb   : > { %15689 = vst [vmem:[#allocation3_spill] sm:$0xff] %v12110_v47  ;;  %v3001_v34 = vsel %vm2784_vm2, %v2998_v18, %v3000_v53  ;;  %v2371_v63 = vsel %vm2152_vm1, %v2368_v51, %v2370_v58  ;;  %v1884_v4 = vadd.f32 %v11775_v48, %v1750_v61  ;;  %v2373_v25 = vsel %vm2152_vm1, %v2370_v58, %v2372_v46 }
 0x1ec   : > { %15690 = vst [vmem:[#allocation54_spill] sm:$0xff] %v12113_v7  ;;  %v9813_v35 = vpack.i.bf16 %v3001_v34, %v2999_v39  ;;  %v3681_v41 = vpack.c.bf16 %v3568_v23, %v3567_v20  ;;  %v3004_v17 = vrot.slane %v12080_v10, 2  ;;  %v1752_v62 = vmul.f32 %v11787_v36, %v15691_v19  ;;  %v12138_v20 = vpop.permute.xlu1 %9494  ;;  %v15696_v10 = vld [vmem:[#allocation73_spill] sm:$0xff] }
 0x1ed   : > { %v9818_v5 = vpack.i.bf16 %v2373_v25, %v2371_v63  ;;  %v2374_v60 = vrot.slane %v12110_v47, 1  ;;  %v2376_v8 = vrot.slane %v12113_v7, 1  ;;  %v1753_v18 = vmul.f32 %v11787_v36, %v15692_v50 }
 0x1ee   : > { %9814 = vrot.lane.b32.xlu1 %v9813_v35, %s10485_s29  ;;  %8982 = vmatmul.mubr.msk.bf16.gmra.mrb[80].mxu1 %vm3756_vm5, %v3681_v41  ;;  %v9412_v58 = vunpack.i.h.bf16 %v11782_v42  ;;  %v9411_v51 = vunpack.i.l.bf16 %v11782_v42  ;;  %v9417_v61 = vunpack.i.h.bf16 %v11898_v49  ;;  %v12140_v23 = vmax.f32 %v1885_v0, 0.0  ;;  %v12148_v35 = vpop.permute.xlu0 %9529 }
 0x1ef   : > { %9819 = vrot.lane.b32.xlu0 %v9818_v5, %s10483_s28  ;;  %8985 = vmatprep.mubr.msk.bf16.mxu1 %vm10484_vm3, %v15616_v9  ;;  %v12142_v50 = vmax.f32 %v1884_v4, 0.0  ;;  %v3003_v39 = vsel %vm2784_vm2, %v3000_v53, %v3002_v31  ;;  %v9416_v34 = vunpack.i.l.bf16 %v11898_v49  ;;  %v3006_v63 = vrot.slane %v12110_v47, 2  ;;  %v15695_v53 = vld [vmem:[#allocation66_spill] sm:$0xff] }
 0x1f0   : > { %15693 = vst [vmem:[#allocation60_spill] sm:$0xff] %v12140_v23  ;;  %v1886_v42 = vadd.f32 %v11775_v48, %v1752_v62  ;;  %v3005_v25 = vsel %vm2784_vm2, %v3002_v31, %v3004_v17  ;;  %v1887_v41 = vadd.f32 %v11775_v48, %v1753_v18  ;;  %v2375_v0 = vsel %vm2152_vm1, %v2372_v46, %v2374_v60  ;;  %v15698_v31 = vld [vmem:[#allocation7_spill] sm:$0xff] }
 0x1f1   : > { %15694 = vst [vmem:[#allocation58_spill] sm:$0xff] %v12142_v50  ;;  %v9823_v19 = vpack.i.bf16 %v3005_v25, %v3003_v39  ;;  %v2377_v4 = vsel %vm2152_vm1, %v2374_v60, %v2376_v8  ;;  %v3008_v5 = vrot.slane %v12113_v7, 2  ;;  %v1755_v49 = vmul.f32 %v11787_v36, %v15695_v53 }
 0x1f2   : > { %v1754_v47 = vmul.f32 %v11787_v36, %v15696_v10  ;;  %v9828_v62 = vpack.i.bf16 %v2377_v4, %v2375_v0  ;;  %v3443_v11 = vsel %vm893_vm0, %v15697_v40, %v9412_v58  ;;  %v3442_v18 = vsel %vm893_vm0, %v15698_v31, %v9411_v51  ;;  %v12171_v40 = vpop.permute.xlu1 %9504  ;;  %v12178_v53 = vpop.permute.xlu0 %9539 }
 0x1f3   : > { %v2380_v39 = vrot.slane %v12140_v23, 1  ;;  %v2378_v46 = vrot.slane %v12142_v50, 1  ;;  %9824 = vrot.lane.b32.xlu1 %v9823_v19, %s10485_s29  ;;  %v3569_v60 = vsel %vm3542_vm4, %v3442_v18, %v9416_v34  ;;  %v3570_v25 = vsel %vm3542_vm4, %v3443_v11, %v9417_v61 }
 0x1f4   : > { %9829 = vrot.lane.b32.xlu0 %v9828_v62, %s10483_s28  ;;  %v9422_v10 = vunpack.i.h.bf16 %v11815_v57  ;;  %v9421_v0 = vunpack.i.l.bf16 %v11815_v57  ;;  %v12173_v58 = vmax.f32 %v1886_v42, 0.0  ;;  %v12175_v51 = vmax.f32 %v1887_v41, 0.0  ;;  %v15701_v41 = vld [vmem:[#allocation70_spill] sm:$0xff] }
 0x1f5   : > { %v1889_v4 = vadd.f32 %v11775_v48, %v1755_v49  ;;  %v1888_v34 = vadd.f32 %v11775_v48, %v1754_v47  ;;  %v3007_v11 = vsel %vm2784_vm2, %v3004_v17, %v3006_v63  ;;  %v3009_v61 = vsel %vm2784_vm2, %v3006_v63, %v3008_v5 }
 0x1f6   : > { %15699 = vst [vmem:[#allocation10_spill] sm:$0xff] %v12173_v58  ;;  %15700 = vst [vmem:[#allocation8_spill] sm:$0xff] %v12175_v51  ;;  %v9833_v19 = vpack.i.bf16 %v3009_v61, %v3007_v11  ;;  %v2379_v62 = vsel %vm2152_vm1, %v2376_v8, %v2378_v46  ;;  %v2381_v57 = vsel %vm2152_vm1, %v2378_v46, %v2380_v39  ;;  %v3010_v42 = vrot.slane %v12142_v50, 2  ;;  %v15703_v8 = vld [vmem:[#allocation14_spill] sm:$0xff] }
 0x1f7   : > { %v3682_v31 = vpack.c.bf16 %v3570_v25, %v3569_v60  ;;  %v1756_v18 = vmul.f32 %v11787_v36, %v15701_v41  ;;  %v9838_v49 = vpack.i.bf16 %v2381_v57, %v2379_v62  ;;  %v3012_v7 = vrot.slane %v12140_v23, 2  ;;  %v15704_v60 = vld [vmem:[#allocation12_spill] sm:$0xff]  ;;  %v12206_v62 = vpop.permute.xlu1 %9514 }
 0x1f8   : > { %v2382_v47 = vrot.slane %v12173_v58, 1  ;;  %v2384_v17 = vrot.slane %v12175_v51, 1  ;;  %v1757_v63 = vmul.f32 %v11787_v36, %v15702_v38  ;;  %9834 = vrot.lane.b32.xlu1 %v9833_v19, %s10485_s29  ;;  %v3445_v46 = vsel %vm893_vm0, %v15703_v8, %v9422_v10  ;;  %v15707_v41 = vld [vmem:[#allocation80_spill] sm:$0xff] }
 0x1f9   : > { %8986 = vmatmul.mubr.msk.bf16.gmra.mrb[84].mxu1 %vm3756_vm5, %v3682_v31  ;;  %v3444_v25 = vsel %vm893_vm0, %v15704_v60, %v9421_v0  ;;  %v9427_v11 = vunpack.i.h.bf16 %v11932_v28  ;;  %v9426_v61 = vunpack.i.l.bf16 %v11932_v28  ;;  %9839 = vrot.lane.b32.xlu0 %v9838_v49, %s10483_s28  ;;  %v9432_v38 = vunpack.i.h.bf16 %v11849_v12  ;;  %v12214_v28 = vpop.permute.xlu0 %9549 }
 0x1fa   : > { %8989 = vmatprep.mubr.msk.bf16.mxu1 %vm10484_vm3, %v15616_v9  ;;  %v9431_v19 = vunpack.i.l.bf16 %v11849_v12  ;;  %v12208_v57 = vmax.f32 %v1889_v4, 0.0  ;;  %v12210_v10 = vmax.f32 %v1888_v34, 0.0  ;;  %v3014_v0 = vrot.slane %v12173_v58, 2  ;;  %v15708_v58 = vld [vmem:[#allocation74_spill] sm:$0xff] }
 0x1fb   : > { %v1890_v31 = vadd.f32 %v11775_v48, %v1756_v18  ;;  %v1758_v49 = vmul.f32 %v11787_v36, %v15707_v41  ;;  %v3011_v8 = vsel %vm2784_vm2, %v3008_v5, %v3010_v42  ;;  %v1891_v60 = vadd.f32 %v11775_v48, %v1757_v63 }
 0x1fc   : > { %15705 = vst [vmem:[#allocation65_spill] sm:$0xff] %v12208_v57  ;;  %15706 = vst [vmem:[#allocation62_spill] sm:$0xff] %v12210_v10  ;;  %v3013_v12 = vsel %vm2784_vm2, %v3010_v42, %v3012_v7  ;;  %v2383_v4 = vsel %vm2152_vm1, %v2380_v39, %v2382_v47  ;;  %v2385_v34 = vsel %vm2152_vm1, %v2382_v47, %v2384_v17  ;;  %v2388_v41 = vrot.slane %v12208_v57, 1  ;;  %v15709_v42 = vld [vmem:[#allocation13_spill] sm:$0xff] }
 0x1fd   : > { %v3572_v23 = vsel %vm3542_vm4, %v3445_v46, %v9427_v11  ;;  %v1759_v18 = vmul.f32 %v11787_v36, %v15708_v58  ;;  %v9843_v50 = vpack.i.bf16 %v3013_v12, %v3011_v8  ;;  %v9848_v32 = vpack.i.bf16 %v2385_v34, %v2383_v4  ;;  %v15711_v58 = vld [vmem:[#allocation11_spill] sm:$0xff]  ;;  %v12239_v11 = vpop.permute.xlu1 %9524 }
 0x1fe   : > { %v3571_v26 = vsel %vm3542_vm4, %v3444_v25, %v9426_v61  ;;  %v3016_v5 = vrot.slane %v12175_v51, 2  ;;  %v2386_v63 = vrot.slane %v12210_v10, 1  ;;  %v3447_v39 = vsel %vm893_vm0, %v15709_v42, %v9432_v38 }
 0x1ff   : > { %v1760_v47 = vmul.f32 %v11787_v36, %v15710_v6  ;;  %v1892_v46 = vadd.f32 %v11775_v48, %v1758_v49  ;;  %9844 = vrot.lane.b32.xlu1 %v9843_v50, %s10485_s29  ;;  %9849 = vrot.lane.b32.xlu0 %v9848_v32, %s10483_s28  ;;  %v3446_v25 = vsel %vm893_vm0, %v15711_v58, %v9431_v19  ;;  %v12241_v61 = vmax.f32 %v1890_v31, 0.0  ;;  %v12249_v50 = vpop.permute.xlu0 %9559 }
 0x200   : > { %v12243_v8 = vmax.f32 %v1891_v60, 0.0  ;;  %v3015_v38 = vsel %vm2784_vm2, %v3012_v7, %v3014_v0  ;;  %v9437_v12 = vunpack.i.h.bf16 %v11962_v14  ;;  %v3020_v6 = vrot.slane %v12208_v57, 2 }
 0x201   : > { %15712 = vst [vmem:[#allocation68_spill] sm:$0xff] %v12241_v61  ;;  %v1893_v49 = vadd.f32 %v11775_v48, %v1759_v18  ;;  %v1761_v32 = vmul.f32 %v11787_v36, %v11618_v33  ;;  %v3018_v19 = vrot.slane %v12210_v10, 2  ;;  %v3017_v31 = vsel %vm2784_vm2, %v3014_v0, %v3016_v5 }
 0x202   : > { %15713 = vst [vmem:[#allocation66_spill] sm:$0xff] %v12243_v8  ;;  %v2387_v60 = vsel %vm2152_vm1, %v2384_v17, %v2386_v63  ;;  %v2389_v4 = vsel %vm2152_vm1, %v2386_v63, %v2388_v41  ;;  %v1894_v7 = vadd.f32 %v11775_v48, %v1760_v47  ;;  %v12258_v34 = vmax.f32 %v1892_v46, 0.0  ;;  %v15716_v63 = vld [vmem:[#allocation83_spill] sm:$0xff] }
 0x203   : > { %v9853_v42 = vpack.i.bf16 %v3017_v31, %v3015_v38  ;;  %v9858_v58 = vpack.i.bf16 %v2389_v4, %v2387_v60  ;;  %v2390_v18 = vrot.slane %v12241_v61, 1  ;;  %v2392_v57 = vrot.slane %v12243_v8, 1  ;;  %v12274_v31 = vpop.permute.xlu1 %9534 }
 0x204   : > { %15714 = vst [vmem:[#allocation73_spill] sm:$0xff] %v12258_v34  ;;  %v1763_v33 = vmul.f32 %v11787_v36, %v11588_v21  ;;  %v3683_v51 = vpack.c.bf16 %v3572_v23, %v3571_v26  ;;  %v9436_v0 = vunpack.i.l.bf16 %v11962_v14  ;;  %v12265_v10 = vmax.f32 %v1893_v49, 0.0  ;;  %v12282_v49 = vpop.permute.xlu0 %9569 }
 0x205   : > { %v1895_v17 = vadd.f32 %v11775_v48, %v1761_v32  ;;  %9854 = vrot.lane.b32.xlu1 %v9853_v42, %s10485_s29  ;;  %9859 = vrot.lane.b32.xlu0 %v9858_v58, %s10483_s28  ;;  %v1762_v47 = vmul.f32 %v11787_v36, %v15716_v63  ;;  %v9442_v46 = vunpack.i.h.bf16 %v11877_v22  ;;  %v9441_v38 = vunpack.i.l.bf16 %v11877_v22 }
 0x206   : > { %15715 = vst [vmem:[#allocation9_spill] sm:$0xff] %v12265_v10  ;;  %v3022_v21 = vrot.slane %v12241_v61, 2  ;;  %v3024_v26 = vrot.slane %v12243_v8, 2  ;;  %8990 = vmatmul.mubr.msk.bf16.gmra.mrb[88].mxu1 %vm3756_vm5, %v3683_v51  ;;  %v12279_v14 = vmax.f32 %v1894_v7, 0.0  ;;  %v2394_v23 = vrot.slane %v12258_v34, 1 }
 0x207   : > { %v1896_v36 = vadd.f32 %v11775_v48, %v1762_v47  ;;  %v3019_v32 = vsel %vm2784_vm2, %v3016_v5, %v3018_v19  ;;  %8993 = vmatprep.mubr.msk.bf16.mxu1 %vm10484_vm3, %v15616_v9  ;;  %v1897_v22 = vadd.f32 %v11775_v48, %v1763_v33  ;;  %v3021_v60 = vsel %vm2784_vm2, %v3018_v19, %v3020_v6 }
 0x208   : > { %15717 = vst [vmem:[#allocation7_spill] sm:$0xff] %v12279_v14  ;;  %v2391_v4 = vsel %vm2152_vm1, %v2388_v41, %v2390_v18  ;;  %v2393_v51 = vsel %vm2152_vm1, %v2390_v18, %v2392_v57  ;;  %v2396_v7 = vrot.slane %v12265_v10, 1  ;;  %v12293_v42 = vmax.f32 %v1895_v17, 0.0  ;;  %v12306_v17 = vpop.permute.xlu1 %9544 }
 0x209   : > { %v9863_v58 = vpack.i.bf16 %v3021_v60, %v3019_v32  ;;  %v9868_v63 = vpack.i.bf16 %v2393_v51, %v2391_v4  ;;  %v3573_v47 = vsel %vm3542_vm4, %v3446_v25, %v9436_v0  ;;  %v3574_v5 = vsel %vm3542_vm4, %v3447_v39, %v9437_v12 }
 0x20a   : > { %15718 = vst [vmem:[#allocation70_spill] sm:$0xff] %v12293_v42  ;;  %v3026_v8 = vrot.slane %v12258_v34, 2  ;;  %v3023_v48 = vsel %vm2784_vm2, %v3020_v6, %v3022_v21  ;;  %v9447_v19 = vunpack.i.h.bf16 %v11990_v56  ;;  %v3028_v41 = vrot.slane %v12265_v10, 2 }
 0x20b   : > { %v12301_v33 = vmax.f32 %v1896_v36, 0.0  ;;  %9864 = vrot.lane.b32.xlu1 %v9863_v58, %s10485_s29  ;;  %9869 = vrot.lane.b32.xlu0 %v9868_v63, %s10483_s28  ;;  %v3025_v18 = vsel %vm2784_vm2, %v3022_v21, %v3024_v26  ;;  %v2398_v39 = vrot.slane %v12279_v14, 1  ;;  %v2024_v25 = vmax.f32 %v1897_v22, 0.0  ;;  %v12312_v36 = vpop.permute.xlu0 %9579  ;;  %v15720_v22 = vld [vmem:[#allocation18_spill] sm:$0xff] }
 0x20c   : > { %v9873_v12 = vpack.i.bf16 %v3025_v18, %v3023_v48  ;;  %v2395_v6 = vsel %vm2152_vm1, %v2392_v57, %v2394_v23  ;;  %v9446_v0 = vunpack.i.l.bf16 %v11990_v56  ;;  %v2400_v32 = vrot.slane %v12293_v42, 1 }
 0x20d   : > { %15719 = vst [vmem:[#allocation77_spill] sm:$0xff] %v12301_v33  ;;  %v2397_v60 = vsel %vm2152_vm1, %v2394_v23, %v2396_v7  ;;  %v3684_v4 = vpack.c.bf16 %v3574_v5, %v3573_v47  ;;  %v3030_v51 = vrot.slane %v12279_v14, 2  ;;  %v3032_v21 = vrot.slane %v12293_v42, 2  ;;  %v15721_v23 = vld [vmem:[#allocation16_spill] sm:$0xff] }
 0x20e   : > { %v9878_v58 = vpack.i.bf16 %v2397_v60, %v2395_v6  ;;  %v3027_v63 = vsel %vm2784_vm2, %v3024_v26, %v3026_v8  ;;  %v3449_v48 = vsel %vm893_vm0, %v15720_v22, %v9442_v46  ;;  %v2402_v57 = vrot.slane %v12301_v33, 1 }
 0x20f   : > { %9874 = vrot.lane.b32.xlu1 %v9873_v12, %s10485_s29  ;;  %8994 = vmatmul.mubr.msk.bf16.gmra.mrb[92].mxu1 %vm3756_vm5, %v3684_v4  ;;  %v3029_v56 = vsel %vm2784_vm2, %v3026_v8, %v3028_v41  ;;  %v3448_v47 = vsel %vm893_vm0, %v15721_v23, %v9441_v38  ;;  %v2404_v5 = vrot.slane %v2024_v25, 1  ;;  %v2399_v26 = vsel %vm2152_vm1, %v2396_v7, %v2398_v39  ;;  %v12333_v8 = vpop.permute.xlu1 %9554  ;;  %v12338_v7 = vpop.permute.xlu0 %9589 }
 0x210   : > { %9879 = vrot.lane.b32.xlu0 %v9878_v58, %s10483_s28  ;;  %v9883_v18 = vpack.i.bf16 %v3029_v56, %v3027_v63  ;;  %v3575_v6 = vsel %vm3542_vm4, %v3448_v47, %v9446_v0  ;;  %v3576_v46 = vsel %vm3542_vm4, %v3449_v48, %v9447_v19  ;;  %v3036_v60 = vrot.slane %v2024_v25, 2  ;;  %8997 = vmatprep.mubr.msk.bf16.mxu1 %vm10484_vm3, %v15616_v9 }
 0x211   : > { %v2401_v12 = vsel %vm2152_vm1, %v2398_v39, %v2400_v32  ;;  %v3034_v38 = vrot.slane %v12301_v33, 2  ;;  %v3031_v58 = vsel %vm2784_vm2, %v3028_v41, %v3030_v51  ;;  %v3033_v63 = vsel %vm2784_vm2, %v3030_v51, %v3032_v21 }
 0x212   : > { %v9888_v4 = vpack.i.bf16 %v2401_v12, %v2399_v26  ;;  %v9893_v19 = vpack.i.bf16 %v3033_v63, %v3031_v58  ;;  %v2403_v25 = vsel %vm2152_vm1, %v2400_v32, %v2402_v57  ;;  %v2405_v39 = vsel %vm2152_vm1, %v2402_v57, %v2404_v5 }
 0x213   : > { %9884 = vrot.lane.b32.xlu1 %v9883_v18, %s10485_s29  ;;  %v9452_v0 = vunpack.i.h.bf16 %v11907_v44  ;;  %v9451_v22 = vunpack.i.l.bf16 %v11907_v44  ;;  %v9898_v48 = vpack.i.bf16 %v2405_v39, %v2403_v25  ;;  %v3685_v56 = vpack.c.bf16 %v3576_v46, %v3575_v6  ;;  %v12352_v32 = vpop.permute.xlu1 %9564  ;;  %v15722_v44 = vld [vmem:[#allocation17_spill] sm:$0xff]  ;;  %v12361_v18 = vpop.permute.xlu0 %9599  ;;  %v15725_v39 = vld [vmem:[#allocation20_spill] sm:$0xff] }
 0x214   : > { %9889 = vrot.lane.b32.xlu0 %v9888_v4, %s10483_s28  ;;  %v9457_v41 = vunpack.i.h.bf16 %v12021_v37  ;;  %v9456_v51 = vunpack.i.l.bf16 %v12021_v37  ;;  %v3035_v23 = vsel %vm2784_vm2, %v3032_v21, %v3034_v38  ;;  %v3037_v47 = vsel %vm2784_vm2, %v3034_v38, %v3036_v60  ;;  %v15723_v37 = vld [vmem:[#allocation15_spill] sm:$0xff] }
 0x215   : > { %v9903_v57 = vpack.i.bf16 %v3037_v47, %v3035_v23  ;;  %v3451_v5 = vsel %vm893_vm0, %v15722_v44, %v9452_v0  ;;  %v3450_v21 = vsel %vm893_vm0, %v15723_v37, %v9451_v22  ;;  %v9462_v46 = vunpack.i.h.bf16 %v11935_v29 }
 0x216   : > { %v3577_v26 = vsel %vm3542_vm4, %v3450_v21, %v9456_v51  ;;  %v3578_v6 = vsel %vm3542_vm4, %v3451_v5, %v9457_v41  ;;  %v9461_v60 = vunpack.i.l.bf16 %v11935_v29  ;;  %v9467_v38 = vunpack.i.h.bf16 %v12049_v43  ;;  %v15727_v5 = vld [vmem:[#allocation19_spill] sm:$0xff] }
 0x217   : > { %9894 = vrot.lane.b32.xlu1 %v9893_v19, %s10485_s29  ;;  %8998 = vmatmul.mubr.msk.bf16.gmra.mrb[96].mxu1 %vm3756_vm5, %v3685_v56  ;;  %v3686_v12 = vpack.c.bf16 %v3578_v6, %v3577_v26  ;;  %v9466_v4 = vunpack.i.l.bf16 %v12049_v43  ;;  %v12370_v58 = vpop.permute.xlu1 %9574  ;;  %v12372_v63 = vpop.permute.xlu0 %9609  ;;  %v15724_v19 = vld [vmem:[#allocation22_spill] sm:$0xff]  ;;  %v9471_v56 = vunpack.i.l.bf16 %v11970_v2  ;;  %v9477_v23 = vunpack.i.h.bf16 %v12078_v15 }
 0x218   : > { %9899 = vrot.lane.b32.xlu0 %v9898_v48, %s10483_s28  ;;  %9001 = vmatprep.mubr.msk.bf16.mxu1 %vm10484_vm3, %v15616_v9  ;;  %v3453_v25 = vsel %vm893_vm0, %v15724_v19, %v9462_v46  ;;  %v3452_v29 = vsel %vm893_vm0, %v15725_v39, %v9461_v60  ;;  %v9472_v48 = vunpack.i.h.bf16 %v11970_v2  ;;  %v9476_v47 = vunpack.i.l.bf16 %v12078_v15 }
 0x219   : > { %v3579_v0 = vsel %vm3542_vm4, %v3452_v29, %v9466_v4  ;;  %v3580_v22 = vsel %vm3542_vm4, %v3453_v25, %v9467_v38  ;;  %v3454_v37 = vsel %vm893_vm0, %v15727_v5, %v9471_v56  ;;  %v9482_v60 = vunpack.i.h.bf16 %v11995_v24  ;;  %v12412_v29 = vld [vmem:[%s15428_s5] ss:$0 sm:$0xff] }
 0x21a   : > { %v3687_v51 = vpack.c.bf16 %v3580_v22, %v3579_v0  ;;  %v3581_v2 = vsel %vm3542_vm4, %v3454_v37, %v9476_v47  ;;  %v9487_v19 = vunpack.i.h.bf16 %v12108_v52  ;;  %v9486_v25 = vunpack.i.l.bf16 %v12108_v52 }
 0x21b   : > { %9904 = vrot.lane.b32.xlu1 %v9903_v57, %s10485_s29  ;;  %v12383_v43 = vpop.permute.xlu1 %9584  ;;  %v12387_v41 = vpop.permute.xlu0 %9619  ;;  %v15726_v57 = vld [vmem:[#allocation21_spill] sm:$0xff] }
 0x21c   : > { %v3455_v44 = vsel %vm893_vm0, %v15726_v57, %v9472_v48  ;;  %v15729_v48 = vld [vmem:[#allocation24_spill] sm:$0xff] }
 0x21d   : > { %v3582_v21 = vsel %vm3542_vm4, %v3455_v44, %v9477_v23 }
 0x21e   : > { %v3688_v38 = vpack.c.bf16 %v3582_v21, %v3581_v2  ;;  %v9492_v2 = vunpack.i.h.bf16 %v12024_v54  ;;  %v9491_v21 = vunpack.i.l.bf16 %v12024_v54  ;;  %v15730_v54 = vld [vmem:[#allocation25_spill] sm:$0xff] }
 0x21f   : > { %9002 = vmatmul.mubr.msk.bf16.gmra.mrb[100].mxu1 %vm3756_vm5, %v3686_v12  ;;  %v12400_v26 = vpop.permute.xlu1 %9594  ;;  %v12402_v46 = vpop.permute.xlu0 %9629  ;;  %v9481_v12 = vunpack.i.l.bf16 %v11995_v24  ;;  %v15728_v24 = vld [vmem:[#allocation26_spill] sm:$0xff] }
 0x220   : > { %9005 = vmatprep.mubr.msk.bf16.mxu1 %vm10484_vm3, %v15616_v9  ;;  %v3457_v22 = vsel %vm893_vm0, %v15728_v24, %v9482_v60  ;;  %v9497_v60 = vunpack.i.h.bf16 %v12138_v20 }
 0x221   : > { %v3456_v56 = vsel %vm893_vm0, %v15729_v48, %v9481_v12  ;;  %v3584_v47 = vsel %vm3542_vm4, %v3457_v22, %v9487_v19  ;;  %v9496_v12 = vunpack.i.l.bf16 %v12138_v20 }
 0x222   : > { %v3583_v23 = vsel %vm3542_vm4, %v3456_v56, %v9486_v25 }
 0x223   : > { %v12414_v0 = vpop.permute.xlu1 %9604  ;;  %v12422_v52 = vpop.permute.xlu0 %9639 }
 0x227   : > { %9006 = vmatmul.mubr.msk.bf16.gmra.mrb[104].mxu1 %vm3756_vm5, %v3687_v51  ;;  %v12427_v51 = vld [vmem:[%s15429_s6] ss:$0 sm:$0xff] }
 0x228   : > { %9009 = vmatprep.mubr.msk.bf16.mxu1 %vm10484_vm3, %v15616_v9 }
 0x22f   : > { %9010 = vmatmul.mubr.msk.bf16.gmra.mrb[108].mxu1 %vm3756_vm5, %v3688_v38  ;;  %v12439_v38 = vpop.permute.xlu1 %9614 }
 0x230   : > { %9013 = vmatprep.mubr.msk.bf16.mxu1 %vm10484_vm3, %v15616_v9 }
 0x246   : > { %v3980_v6 = vpop.f32.mrb[32].mxu1 }
 0x247   : > { %v8935_v15 = vpop.f32.mrb[33].mxu1  ;;  %v4490_v57 = vmul.f32 %v12412_v29, %v3980_v6  ;;  %v12441_v6 = vpop.permute.xlu0 %9649 }
 0x248   : > { %v3983_v4 = vpop.f32.mrb[34].mxu1  ;;  %v3689_v15 = vpack.c.bf16 %v3584_v47, %v3583_v23  ;;  %v12455_v47 = vpop.permute.xlu1 %9624 }
 0x249   : > { %v8936_v39 = vpop.f32.mrb[35].mxu1  ;;  %v4491_v44 = vmul.f32 %v12412_v29, %v3983_v4  ;;  %v4623_v5 = vadd.f32 %v12427_v51, %v4490_v57  ;;  %v3459_v4 = vsel %vm893_vm0, %v15730_v54, %v9492_v2  ;;  %v15732_v54 = vld [vmem:[#allocation30_spill] sm:$0xff] }
 0x24a   : > { %9014 = vmatmul.mubr.msk.bf16.gmra.mrb[112].mxu1 %vm3756_vm5, %v3689_v15  ;;  %v15731_v39 = vld [vmem:[#allocation23_spill] sm:$0xff]  ;;  %v3586_v48 = vsel %vm3542_vm4, %v3459_v4, %v9497_v60  ;;  %v9506_v60 = vunpack.i.l.bf16 %v12171_v40 }
 0x24b   : > { %v4624_v37 = vadd.f32 %v12427_v51, %v4491_v44  ;;  %v4749_v19 = vmax.f32 %v4623_v5, 0.0  ;;  %9017 = vmatprep.mubr.msk.bf16.mxu1 %vm10484_vm3, %v15616_v9  ;;  %v3458_v20 = vsel %vm893_vm0, %v15731_v39, %v9491_v21  ;;  %v9502_v5 = vunpack.i.h.bf16 %v12054_v1  ;;  %v12460_v2 = vpop.permute.xlu0 %9659  ;;  %v15733_v39 = vld [vmem:[#allocation28_spill] sm:$0xff] }
 0x24c   : > { %v3585_v22 = vsel %vm3542_vm4, %v3458_v20, %v9496_v12  ;;  %v9507_v12 = vunpack.i.h.bf16 %v12171_v40 }
 0x24d   : > { %v4750_v25 = vmax.f32 %v4624_v37, 0.0  ;;  %4875 = vst.msk [vmem:[#allocation2] sm:$0xff] %vm3542_vm4, %v4749_v19  ;;  %v9501_v37 = vunpack.i.l.bf16 %v12054_v1  ;;  %v3690_v21 = vpack.c.bf16 %v3586_v48, %v3585_v22  ;;  %v3461_v4 = vsel %vm893_vm0, %v15732_v54, %v9502_v5  ;;  %v12476_v22 = vpop.permute.xlu1 %9634  ;;  %v15735_v54 = vld [vmem:[#allocation27_spill] sm:$0xff] }
 0x24f   : > { %4876 = vst.msk [vmem:[#allocation2 + $0x8] sm:$0xff] %vm3542_vm4, %v4750_v25  ;;  %v3460_v20 = vsel %vm893_vm0, %v15733_v39, %v9501_v37  ;;  %v12478_v48 = vpop.permute.xlu0 %9669  ;;  %v9516_v37 = vunpack.i.l.bf16 %v12206_v62 }
 0x250   : > { %v3587_v40 = vsel %vm3542_vm4, %v3460_v20, %v9506_v60 }
 0x251   : > { %v3988_v24 = vpop.f32.mrb[36].mxu1  ;;  %v12487_v60 = vpop.permute.xlu1 %9644 }
 0x252   : > { %v4492_v56 = vmul.f32 %v12412_v29, %v3988_v24  ;;  %v8939_v23 = vpop.f32.mrb[37].mxu1  ;;  %9018 = vmatmul.mubr.msk.bf16.gmra.mrb[116].mxu1 %vm3756_vm5, %v3690_v21  ;;  %v3588_v24 = vsel %vm3542_vm4, %v3461_v4, %v9507_v12  ;;  %v9517_v21 = vunpack.i.h.bf16 %v12206_v62 }
 0x253   : > { %v3991_v44 = vpop.f32.mrb[38].mxu1  ;;  %9021 = vmatprep.mubr.msk.bf16.mxu1 %vm10484_vm3, %v15616_v9  ;;  %v9512_v23 = vunpack.i.h.bf16 %v12085_v3  ;;  %v12496_v62 = vpop.permute.xlu0 %9679 }
 0x254   : > { %v4625_v57 = vadd.f32 %v12427_v51, %v4492_v56  ;;  %v8940_v15 = vpop.f32.mrb[39].mxu1  ;;  %v4493_v25 = vmul.f32 %v12412_v29, %v3991_v44  ;;  %v3691_v44 = vpack.c.bf16 %v3588_v24, %v3587_v40 }
 0x256   : > { %v4751_v19 = vmax.f32 %v4625_v57, 0.0  ;;  %v4626_v1 = vadd.f32 %v12427_v51, %v4493_v25  ;;  %v9511_v57 = vunpack.i.l.bf16 %v12085_v3  ;;  %v15734_v25 = vld [vmem:[#allocation29_spill] sm:$0xff] }
 0x258   : > { %4877 = vst.msk [vmem:[#allocation2 + $0x10] sm:$0xff] %vm3542_vm4, %v4751_v19  ;;  %v4752_v56 = vmax.f32 %v4626_v1, 0.0  ;;  %v3463_v1 = vsel %vm893_vm0, %v15734_v25, %v9512_v23  ;;  %v3462_v4 = vsel %vm893_vm0, %v15735_v54, %v9511_v57  ;;  %v9521_v23 = vunpack.i.l.bf16 %v12116_v16  ;;  %v12507_v25 = vpop.permute.xlu1 %9654 }
 0x259   : > { %v3589_v20 = vsel %vm3542_vm4, %v3462_v4, %v9516_v37  ;;  %v3590_v40 = vsel %vm3542_vm4, %v3463_v1, %v9517_v21  ;;  %v9527_v57 = vunpack.i.h.bf16 %v12239_v11  ;;  %v12509_v21 = vpop.permute.xlu0 %9689 }
 0x25a   : > { %4878 = vst.msk [vmem:[#allocation2 + $0x18] sm:$0xff] %vm3542_vm4, %v4752_v56  ;;  %9022 = vmatmul.mubr.msk.bf16.gmra.mrb[120].mxu1 %vm3756_vm5, %v3691_v44 }
 0x25b   : > { %v3996_v5 = vpop.f32.mrb[40].mxu1  ;;  %9025 = vmatprep.mubr.msk.bf16.mxu1 %vm10484_vm3, %v15616_v9 }
 0x25c   : > { %v4494_v15 = vmul.f32 %v12412_v29, %v3996_v5  ;;  %v8943_v12 = vpop.f32.mrb[41].mxu1  ;;  %v9522_v5 = vunpack.i.h.bf16 %v12116_v16 }
 0x25d   : > { %v3999_v19 = vpop.f32.mrb[42].mxu1  ;;  %v9526_v12 = vunpack.i.l.bf16 %v12239_v11 }
 0x25e   : > { %v4627_v3 = vadd.f32 %v12427_v51, %v4494_v15  ;;  %v8944_v39 = vpop.f32.mrb[43].mxu1  ;;  %v4495_v56 = vmul.f32 %v12412_v29, %v3999_v19  ;;  %v3692_v15 = vpack.c.bf16 %v3590_v40, %v3589_v20  ;;  %v15737_v19 = vld [vmem:[#allocation32_spill] sm:$0xff] }
 0x25f   : > { %v3464_v1 = vsel %vm893_vm0, %v15737_v19, %v9521_v23  ;;  %v9532_v19 = vunpack.i.h.bf16 %v12148_v35 }
 0x260   : > { %v4753_v24 = vmax.f32 %v4627_v3, 0.0  ;;  %v4628_v44 = vadd.f32 %v12427_v51, %v4495_v56  ;;  %v15736_v3 = vld [vmem:[#allocation34_spill] sm:$0xff]  ;;  %v3591_v39 = vsel %vm3542_vm4, %v3464_v1, %v9526_v12  ;;  %v9536_v12 = vunpack.i.l.bf16 %v12274_v31  ;;  %v12530_v1 = vpop.permute.xlu0 %9699 }
 0x261   : > { %v3465_v16 = vsel %vm893_vm0, %v15736_v3, %v9522_v5  ;;  %v5003_v11 = vld [vmem:[#allocation2 + $0x10] ss:$2 sm:$0xff]  ;;  %v5129_v4 = vld [vmem:[#allocation2 + $0x11] ss:$2 sm:$0xff]  ;;  %v5001_v56 = vld [vmem:[#allocation2] ss:$2 sm:$0xff] }
 0x262   : > { %4879 = vst.msk [vmem:[#allocation2 + $0x20] sm:$0xff] %vm3542_vm4, %v4753_v24  ;;  %v4754_v37 = vmax.f32 %v4628_v44, 0.0  ;;  %9026 = vmatmul.mubr.msk.bf16.gmra.mrb[124].mxu1 %vm3756_vm5, %v3692_v15  ;;  %v3592_v20 = vsel %vm3542_vm4, %v3465_v16, %v9527_v57  ;;  %v5127_v44 = vld [vmem:[#allocation2 + $0x1] ss:$2 sm:$0xff]  ;;  %v9531_v15 = vunpack.i.l.bf16 %v12148_v35  ;;  %v12526_v23 = vmax.f32 %v5003_v11, %v5129_v4  ;;  %v15738_v4 = vld [vmem:[#allocation31_spill] sm:$0xff] }
 0x263   : > { %9029 = vmatprep.mubr.msk.bf16.mxu1 %vm10484_vm3, %v15616_v9  ;;  %v3693_v57 = vpack.c.bf16 %v3592_v20, %v3591_v39  ;;  %v12534_v33 = vmax.f32 %v5001_v56, %v5127_v44  ;;  %v15739_v56 = vld [vmem:[#allocation33_spill] sm:$0xff] }
 0x264   : > { %4880 = vst.msk [vmem:[#allocation2 + $0x28] sm:$0xff] %vm3542_vm4, %v4754_v37  ;;  %v12523_v37 = vpop.permute.xlu1 %9664  ;;  %v3466_v35 = vsel %vm893_vm0, %v15738_v4, %v9531_v15  ;;  %v5379_v20 = vrot.slane %v12526_v23, 1  ;;  %v3467_v44 = vsel %vm893_vm0, %v15739_v56, %v9532_v19  ;;  %v12554_v4 = vpop.permute.xlu0 %9709 }
 0x265   : > { %v4004_v54 = vpop.f32.mrb[44].mxu1  ;;  %15740 = vst [vmem:[#allocation14_spill] sm:$0xff] %v12554_v4 }
 0x266   : > { %v4496_v40 = vmul.f32 %v12412_v29, %v4004_v54  ;;  %v8947_v24 = vpop.f32.mrb[45].mxu1  ;;  %v9537_v54 = vunpack.i.h.bf16 %v12274_v31 }
 0x267   : > { %v4007_v3 = vpop.f32.mrb[46].mxu1 }
 0x268   : > { %v4629_v5 = vadd.f32 %v12427_v51, %v4496_v40  ;;  %v8948_v16 = vpop.f32.mrb[47].mxu1  ;;  %v4497_v42 = vmul.f32 %v12412_v29, %v4007_v3  ;;  %v3594_v3 = vsel %vm3542_vm4, %v3467_v44, %v9537_v54  ;;  %v5693_v54 = vrot.slane %v12526_v23, 2 }
 0x269   : > { %v5378_v16 = vrot.slane %v12534_v33, 1 }
 0x26a   : > { %v4755_v24 = vmax.f32 %v4629_v5, 0.0  ;;  %9030 = vmatmul.mubr.msk.bf16.gmra.mrb[128].mxu1 %vm3756_vm5, %v3693_v57  ;;  %v4630_v39 = vadd.f32 %v12427_v51, %v4497_v42  ;;  %v3593_v5 = vsel %vm3542_vm4, %v3466_v35, %v9536_v12  ;;  %v12550_v57 = vpop.permute.xlu1 %9674  ;;  %v9547_v35 = vunpack.i.h.bf16 %v12306_v17 }
 0x26b   : > { %v5005_v40 = vld [vmem:[#allocation2 + $0x20] ss:$2 sm:$0xff]  ;;  %v5131_v11 = vld [vmem:[#allocation2 + $0x21] ss:$2 sm:$0xff]  ;;  %9033 = vmatprep.mubr.msk.bf16.mxu1 %vm10484_vm3, %v15616_v9  ;;  %v5380_v19 = vsel %vm2152_vm1, %v5378_v16, %v5379_v20  ;;  %v9546_v42 = vunpack.i.l.bf16 %v12306_v17  ;;  %v5692_v16 = vrot.slane %v12534_v33, 2 }
 0x26c   : > { %4881 = vst.msk [vmem:[#allocation2 + $0x30] sm:$0xff] %vm3542_vm4, %v4755_v24  ;;  %v12543_v31 = vmax.f32 %v5005_v40, %v5131_v11  ;;  %v4756_v15 = vmax.f32 %v4630_v39, 0.0  ;;  %v9542_v40 = vunpack.i.h.bf16 %v12178_v53  ;;  %v9541_v11 = vunpack.i.l.bf16 %v12178_v53 }
 0x26d   : > { %v3694_v39 = vpack.c.bf16 %v3594_v3, %v3593_v5 }
 0x26e   : > { %v15537_v24 = vrot.slane %v12543_v31, 1  ;;  %4882 = vst.msk [vmem:[#allocation2 + $0x38] sm:$0xff] %vm3542_vm4, %v4756_v15  ;;  %v15741_v10 = vrot.slane %v12543_v31, 2  ;;  %v12574_v53 = vpop.permute.xlu1 %9684 }
 0x26f   : > { %v4012_v56 = vpop.f32.mrb[48].mxu1 }
 0x270   : > { %v5382_v12 = vsel %vm2152_vm1, %v5379_v20, %v15537_v24  ;;  %v4498_v14 = vmul.f32 %v12412_v29, %v4012_v56  ;;  %v8951_v15 = vpop.f32.mrb[49].mxu1  ;;  %v5696_v20 = vsel %vm2784_vm2, %v5693_v54, %v15741_v10  ;;  %v15743_v56 = vld [vmem:[#allocation36_spill] sm:$0xff] }
 0x271   : > { %v9908_v44 = vpack.i.bf16 %v5382_v12, %v5380_v19  ;;  %v4015_v24 = vpop.f32.mrb[50].mxu1  ;;  %v5694_v19 = vsel %vm2784_vm2, %v5692_v16, %v5693_v54  ;;  %v15742_v12 = vld [vmem:[#allocation38_spill] sm:$0xff]  ;;  %v12585_v15 = vpop.permute.xlu0 %9719  ;;  %v9551_v54 = vunpack.i.l.bf16 %v12214_v28  ;;  %v9557_v16 = vunpack.i.h.bf16 %v12333_v8 }
 0x272   : > { %9034 = vmatmul.mubr.msk.bf16.gmra.mrb[132].mxu1 %vm3756_vm5, %v3694_v39  ;;  %v4631_v17 = vadd.f32 %v12427_v51, %v4498_v14  ;;  %v4499_v5 = vmul.f32 %v12412_v29, %v4015_v24  ;;  %v8952_v3 = vpop.f32.mrb[51].mxu1  ;;  %v3469_v10 = vsel %vm893_vm0, %v15742_v12, %v9542_v40  ;;  %v3468_v39 = vsel %vm893_vm0, %v15743_v56, %v9541_v11 }
 0x273   : > { %9909 = vrot.lane.b32.xlu0 %v9908_v44, %s10485_s29  ;;  %9037 = vmatprep.mubr.msk.bf16.mxu1 %vm10484_vm3, %v15616_v9  ;;  %v9913_v44 = vpack.i.bf16 %v5696_v20, %v5694_v19  ;;  %v3595_v34 = vsel %vm3542_vm4, %v3468_v39, %v9546_v42  ;;  %v3596_v61 = vsel %vm3542_vm4, %v3469_v10, %v9547_v35  ;;  %v9552_v40 = vunpack.i.h.bf16 %v12214_v28  ;;  %v12596_v20 = vpop.permute.xlu1 %9694  ;;  %v15746_v28 = vld [vmem:[#allocation35_spill] sm:$0xff] }
 0x274   : > { %v4757_v4 = vmax.f32 %v4631_v17, 0.0  ;;  %v4632_v14 = vadd.f32 %v12427_v51, %v4499_v5  ;;  %v3695_v11 = vpack.c.bf16 %v3596_v61, %v3595_v34  ;;  %v9556_v42 = vunpack.i.l.bf16 %v12333_v8 }
 0x275   : > { %v12599_v35 = vpop.permute.xlu0 %9729  ;;  %v3470_v61 = vsel %vm893_vm0, %v15746_v28, %v9551_v54  ;;  %v5007_v34 = vld [vmem:[#allocation2 + $0x30] ss:$2 sm:$0xff]  ;;  %v5133_v5 = vld [vmem:[#allocation2 + $0x31] ss:$2 sm:$0xff]  ;;  %v9562_v56 = vunpack.i.h.bf16 %v12249_v50  ;;  %v9567_v28 = vunpack.i.h.bf16 %v12352_v32 }
 0x276   : > { %4883 = vst.msk [vmem:[#allocation2 + $0x40] sm:$0xff] %vm3542_vm4, %v4757_v4  ;;  %v4758_v24 = vmax.f32 %v4632_v14, 0.0  ;;  %15744 = vst [vmem:[#allocation12_spill] sm:$0xff] %v12599_v35  ;;  %v15745_v4 = vld [vmem:[#allocation37_spill] sm:$0xff]  ;;  %v3597_v8 = vsel %vm3542_vm4, %v3470_v61, %v9556_v42  ;;  %v12614_v14 = vmax.f32 %v5007_v34, %v5133_v5  ;;  %v9566_v61 = vunpack.i.l.bf16 %v12352_v32 }
 0x277   : > { %9914 = vrot.lane.b32.xlu0 %v9913_v44, %s10486_s27  ;;  %v3471_v17 = vsel %vm893_vm0, %v15745_v4, %v9552_v40  ;;  %v12612_v39 = vpop.permute.xlu1 %9704 }
 0x278   : > { %4884 = vst.msk [vmem:[#allocation2 + $0x48] sm:$0xff] %vm3542_vm4, %v4758_v24  ;;  %v3598_v3 = vsel %vm3542_vm4, %v3471_v17, %v9557_v16  ;;  %v9561_v24 = vunpack.i.l.bf16 %v12249_v50  ;;  %v5383_v5 = vrot.slane %v12614_v14, 1 }
 0x279   : > { %v12617_v40 = vpop.permute.xlu0 %9739  ;;  %v3696_v54 = vpack.c.bf16 %v3598_v3, %v3597_v8  ;;  %v15748_v3 = vld [vmem:[#allocation43_spill] sm:$0xff] }
 0x27a   : > { %9038 = vmatmul.mubr.msk.bf16.gmra.mrb[136].mxu1 %vm3756_vm5, %v3695_v11  ;;  %v4020_v19 = vpop.f32.mrb[52].mxu1  ;;  %15747 = vst [vmem:[#allocation80_spill] sm:$0xff] %v12617_v40 }
 0x27b   : > { %9041 = vmatprep.mubr.msk.bf16.mxu1 %vm10484_vm3, %v15616_v9  ;;  %v4500_v12 = vmul.f32 %v12412_v29, %v4020_v19  ;;  %v8955_v10 = vpop.f32.mrb[53].mxu1 }
 0x27c   : > { %v4023_v44 = vpop.f32.mrb[54].mxu1  ;;  %v15749_v10 = vld [vmem:[#allocation40_spill] sm:$0xff] }
 0x27d   : > { %v4633_v11 = vadd.f32 %v12427_v51, %v4500_v12  ;;  %v4501_v16 = vmul.f32 %v12412_v29, %v4023_v44  ;;  %v8956_v42 = vpop.f32.mrb[55].mxu1  ;;  %v3473_v12 = vsel %vm893_vm0, %v15748_v3, %v9562_v56  ;;  %v3472_v32 = vsel %vm893_vm0, %v15749_v10, %v9561_v24 }
 0x27e   : > { %v15751_v24 = vrot.slane %v12543_v31, 1  ;;  %v9576_v10 = vunpack.i.l.bf16 %v12370_v58 }
 0x27f   : > { %v5009_v4 = vld [vmem:[#allocation2 + $0x40] ss:$2 sm:$0xff]  ;;  %v5135_v17 = vld [vmem:[#allocation2 + $0x41] ss:$2 sm:$0xff]  ;;  %v4759_v34 = vmax.f32 %v4633_v11, 0.0  ;;  %v4634_v50 = vadd.f32 %v12427_v51, %v4501_v16  ;;  %v3600_v11 = vsel %vm3542_vm4, %v3473_v12, %v9567_v28  ;;  %v12638_v16 = vpop.permute.xlu1 %9714  ;;  %v9572_v28 = vunpack.i.h.bf16 %v12282_v49 }
 0x280   : > { %v12623_v19 = vmax.f32 %v5009_v4, %v5135_v17  ;;  %v12641_v4 = vpop.permute.xlu0 %9749  ;;  %v5384_v17 = vsel %vm2152_vm1, %v15751_v24, %v5383_v5  ;;  %v9577_v12 = vunpack.i.h.bf16 %v12370_v58 }
 0x281   : > { %4885 = vst.msk [vmem:[#allocation2 + $0x50] sm:$0xff] %vm3542_vm4, %v4759_v34  ;;  %v4760_v44 = vmax.f32 %v4634_v50, 0.0  ;;  %15750 = vst [vmem:[#allocation74_spill] sm:$0xff] %v12641_v4  ;;  %v9571_v34 = vunpack.i.l.bf16 %v12282_v49 }
 0x282   : > { %9042 = vmatmul.mubr.msk.bf16.gmra.mrb[140].mxu1 %vm3756_vm5, %v3696_v54  ;;  %v15542_v8 = vrot.slane %v12623_v19, 1  ;;  %v3599_v54 = vsel %vm3542_vm4, %v3472_v32, %v9566_v61  ;;  %v15541_v42 = vrot.slane %v12623_v19, 2  ;;  %v5697_v61 = vrot.slane %v12614_v14, 2 }
 0x283   : > { %9045 = vmatprep.mubr.msk.bf16.mxu1 %vm10484_vm3, %v15616_v9  ;;  %4886 = vst.msk [vmem:[#allocation2 + $0x58] sm:$0xff] %vm3542_vm4, %v4760_v44  ;;  %v3697_v50 = vpack.c.bf16 %v3600_v11, %v3599_v54  ;;  %v12661_v24 = vpop.permute.xlu1 %9724  ;;  %v15752_v54 = vrot.slane %v12543_v31, 2  ;;  %v15753_v11 = vld [vmem:[#allocation41_spill] sm:$0xff] }
 0x284   : > { %v5386_v56 = vsel %vm2152_vm1, %v5383_v5, %v15542_v8  ;;  %v4028_v32 = vpop.f32.mrb[56].mxu1  ;;  %v5700_v44 = vsel %vm2784_vm2, %v5697_v61, %v15541_v42  ;;  %v12672_v42 = vpop.permute.xlu0 %9759 }
 0x285   : > { %v9918_v3 = vpack.i.bf16 %v5386_v56, %v5384_v17  ;;  %v4502_v5 = vmul.f32 %v12412_v29, %v4028_v32  ;;  %v8959_v49 = vpop.f32.mrb[57].mxu1  ;;  %v5698_v58 = vsel %vm2784_vm2, %v15752_v54, %v5697_v61  ;;  %v3475_v56 = vsel %vm893_vm0, %v15753_v11, %v9572_v28  ;;  %v15754_v17 = vld [vmem:[#allocation39_spill] sm:$0xff] }
 0x286   : > { %v4031_v32 = vpop.f32.mrb[58].mxu1  ;;  %v9923_v8 = vpack.i.bf16 %v5700_v44, %v5698_v58  ;;  %v3602_v49 = vsel %vm3542_vm4, %v3475_v56, %v9577_v12  ;;  %v9582_v28 = vunpack.i.h.bf16 %v12312_v36  ;;  %v9587_v44 = vunpack.i.h.bf16 %v12383_v43 }
 0x287   : > { %9919 = vrot.lane.b32.xlu1 %v9918_v3, %s10485_s29  ;;  %v4635_v3 = vadd.f32 %v12427_v51, %v4502_v5  ;;  %v8960_v40 = vpop.f32.mrb[59].mxu1  ;;  %v4503_v61 = vmul.f32 %v12412_v29, %v4031_v32  ;;  %v12685_v12 = vpop.permute.xlu1 %9734 }
 0x288   : > { %v12687_v40 = vpop.permute.xlu0 %9769 }
 0x289   : > { %v4761_v35 = vmax.f32 %v4635_v3, 0.0  ;;  %v4636_v5 = vadd.f32 %v12427_v51, %v4503_v61 }
 0x28a   : > { %9046 = vmatmul.mubr.msk.bf16.gmra.mrb[144].mxu1 %vm3756_vm5, %v3697_v50  ;;  %v3474_v50 = vsel %vm893_vm0, %v15754_v17, %v9571_v34  ;;  %v9581_v34 = vunpack.i.l.bf16 %v12312_v36  ;;  %v15755_v36 = vld [vmem:[#allocation48_spill] sm:$0xff] }
 0x28b   : > { %9049 = vmatprep.mubr.msk.bf16.mxu1 %vm10484_vm3, %v15616_v9  ;;  %v3601_v4 = vsel %vm3542_vm4, %v3474_v50, %v9576_v10  ;;  %9924 = vrot.lane.b32.xlu1 %v9923_v8, %s10486_s27  ;;  %4887 = vst.msk [vmem:[#allocation2 + $0x60] sm:$0xff] %vm3542_vm4, %v4761_v35  ;;  %v9586_v10 = vunpack.i.l.bf16 %v12383_v43  ;;  %v4762_v8 = vmax.f32 %v4636_v5, 0.0  ;;  %v15756_v35 = vld [vmem:[#allocation45_spill] sm:$0xff]  ;;  %v5011_v17 = vld [vmem:[#allocation2 + $0x50] ss:$2 sm:$0xff]  ;;  %v12701_v61 = vpop.permute.xlu1 %9744 }
 0x28c   : > { %v3698_v54 = vpack.c.bf16 %v3602_v49, %v3601_v4  ;;  %v3477_v4 = vsel %vm893_vm0, %v15755_v36, %v9582_v28  ;;  %v3476_v58 = vsel %vm893_vm0, %v15756_v35, %v9581_v34  ;;  %v5137_v50 = vld [vmem:[#allocation2 + $0x51] ss:$2 sm:$0xff]  ;;  %v9592_v49 = vunpack.i.h.bf16 %v12338_v7  ;;  %v12704_v34 = vpop.permute.xlu0 %9779 }
 0x28d   : > { %4888 = vst.msk [vmem:[#allocation2 + $0x68] sm:$0xff] %vm3542_vm4, %v4762_v8  ;;  %v3603_v43 = vsel %vm3542_vm4, %v3476_v58, %v9586_v10  ;;  %v3604_v11 = vsel %vm3542_vm4, %v3477_v4, %v9587_v44  ;;  %15757 = vst [vmem:[#allocation13_spill] sm:$0xff] %v12704_v34  ;;  %v12707_v44 = vmax.f32 %v5011_v17, %v5137_v50  ;;  %v9597_v36 = vunpack.i.h.bf16 %v12400_v26  ;;  %v15759_v50 = vld [vmem:[#allocation47_spill] sm:$0xff] }
 0x28e   : > { %v4036_v56 = vpop.f32.mrb[60].mxu1  ;;  %v3699_v5 = vpack.c.bf16 %v3604_v11, %v3603_v43  ;;  %v9596_v4 = vunpack.i.l.bf16 %v12400_v26 }
 0x28f   : > { %v4504_v3 = vmul.f32 %v12412_v29, %v4036_v56  ;;  %v8963_v32 = vpop.f32.mrb[61].mxu1  ;;  %v15758_v56 = vld [vmem:[#allocation51_spill] sm:$0xff] }
 0x290   : > { %v4039_v28 = vpop.f32.mrb[62].mxu1  ;;  %v3479_v17 = vsel %vm893_vm0, %v15758_v56, %v9592_v49  ;;  %v5387_v32 = vrot.slane %v12707_v44, 1 }
 0x291   : > { %v4637_v10 = vadd.f32 %v12427_v51, %v4504_v3  ;;  %v8964_v8 = vpop.f32.mrb[63].mxu1  ;;  %v4505_v35 = vmul.f32 %v12412_v29, %v4039_v28 }
 0x292   : > { %9050 = vmatmul.mubr.msk.bf16.gmra.mrb[148].mxu1 %vm3756_vm5, %v3698_v54  ;;  %v9591_v54 = vunpack.i.l.bf16 %v12338_v7 }
 0x293   : > { %9053 = vmatprep.mubr.msk.bf16.mxu1 %vm10484_vm3, %v15616_v9  ;;  %v4763_v58 = vmax.f32 %v4637_v10, 0.0  ;;  %v4638_v7 = vadd.f32 %v12427_v51, %v4505_v35  ;;  %v12726_v10 = vpop.permute.xlu1 %9754  ;;  %v12728_v35 = vpop.permute.xlu0 %9789 }
 0x294   : > { %v5013_v43 = vld [vmem:[#allocation2 + $0x60] ss:$2 sm:$0xff]  ;;  %v5139_v11 = vld [vmem:[#allocation2 + $0x61] ss:$2 sm:$0xff]  ;;  %v3478_v3 = vsel %vm893_vm0, %v15759_v50, %v9591_v54  ;;  %15760 = vst [vmem:[#allocation78_spill] sm:$0xff] %v12728_v35  ;;  %v9607_v50 = vunpack.i.h.bf16 %v12414_v0 }
 0x295   : > { %4889 = vst.msk [vmem:[#allocation2 + $0x70] sm:$0xff] %vm3542_vm4, %v4763_v58  ;;  %v12721_v26 = vmax.f32 %v5013_v43, %v5139_v11  ;;  %v3605_v28 = vsel %vm3542_vm4, %v3478_v3, %v9596_v4  ;;  %v4764_v8 = vmax.f32 %v4638_v7, 0.0  ;;  %v10441_v54 = vld [vmem:[%s15430_s7] sm:$0xff]   ;;  %v9602_v58 = vunpack.i.h.bf16 %v12361_v18 }
 0x296   : > { %v9601_v43 = vunpack.i.l.bf16 %v12361_v18  ;;  %v15761_v4 = vrot.slane %v12623_v19, 1  ;;  %9185 = vmatprep.subr.bf16.mxu0 %v10441_v54  ;;  %v9606_v3 = vunpack.i.l.bf16 %v12414_v0 }
 0x297   : > { %v15546_v49 = vrot.slane %v12721_v26, 1  ;;  %4890 = vst.msk [vmem:[#allocation2 + $0x78] sm:$0xff] %vm3542_vm4, %v4764_v8  ;;  %9186 = vmatpush3.bf16.msra.mxu0 %v10441_v54  ;;  %v15762_v8 = vrot.slane %v12721_v26, 2  ;;  %v12754_v35 = vpop.permute.xlu1 %9764  ;;  %v15764_v54 = vld [vmem:[#allocation52_spill] sm:$0xff] }
 0x298   : > { %v5388_v7 = vsel %vm2152_vm1, %v15761_v4, %v5387_v32  ;;  %v4044_v56 = vpop.f32.mrb[64].mxu1 }
 0x299   : > { %v5390_v11 = vsel %vm2152_vm1, %v5387_v32, %v15546_v49  ;;  %v15763_v32 = vld [vmem:[#allocation56_spill] sm:$0xff] }
 0x29a   : > { %9054 = vmatmul.mubr.msk.bf16.gmra.mrb[152].mxu1 %vm3756_vm5, %v3699_v5  ;;  %v3606_v5 = vsel %vm3542_vm4, %v3479_v17, %v9597_v36  ;;  %v5701_v17 = vrot.slane %v12707_v44, 2  ;;  %v9928_v18 = vpack.i.bf16 %v5390_v11, %v5388_v7  ;;  %v3481_v49 = vsel %vm893_vm0, %v15763_v32, %v9602_v58  ;;  %v10442_v32 = vld [vmem:[%s15430_s7 + $0x8] sm:$0xff]  }
 0x29b   : > { %9057 = vmatprep.mubr.msk.bf16.mxu1 %vm10484_vm3, %v15616_v9  ;;  %v3700_v36 = vpack.c.bf16 %v3606_v5, %v3605_v28  ;;  %v4506_v28 = vmul.f32 %v12412_v29, %v4044_v56  ;;  %v8967_v5 = vpop.f32.mrb[65].mxu1  ;;  %v12761_v56 = vpop.permute.xlu0 %9799  ;;  %v15766_v58 = vrot.slane %v12623_v19, 2  ;;  %v3608_v34 = vsel %vm3542_vm4, %v3481_v49, %v9607_v50  ;;  %9187 = vmatprep.subr.bf16.mxu0 %v10442_v32 }
 0x29c   : > { %v5704_v4 = vsel %vm2784_vm2, %v5701_v17, %v15762_v8  ;;  %v4047_v0 = vpop.f32.mrb[66].mxu1  ;;  %9929 = vrot.lane.b32.xlu0 %v9928_v18, %s10485_s29  ;;  %15765 = vst [vmem:[#allocation11_spill] sm:$0xff] %v12761_v56  ;;  %9188 = vmatpush3.bf16.msra.mxu0 %v10442_v32  ;;  %v9617_v50 = vunpack.i.h.bf16 %v12439_v38 }
 0x29d   : > { %v4639_v7 = vadd.f32 %v12427_v51, %v4506_v28  ;;  %v4507_v11 = vmul.f32 %v12412_v29, %v4047_v0  ;;  %v8968_v5 = vpop.f32.mrb[67].mxu1  ;;  %v5702_v8 = vsel %vm2784_vm2, %v15766_v58, %v5701_v17  ;;  %v10443_v28 = vld [vmem:[%s15430_s7 + $0x10] sm:$0xff]   ;;  %v9612_v17 = vunpack.i.h.bf16 %v12372_v63 }
 0x29e   : > { %v9611_v0 = vunpack.i.l.bf16 %v12372_v63  ;;  %9189 = vmatprep.subr.bf16.mxu0 %v10443_v28  ;;  %v5015_v63 = vld [vmem:[#allocation2 + $0x70] ss:$2 sm:$0xff] }
 0x29f   : > { %v4640_v56 = vadd.f32 %v12427_v51, %v4507_v11  ;;  %v15770_v11 = vld [vmem:[#allocation55_spill] sm:$0xff] }
 0x2a0   : > { %9190 = vmatpush3.bf16.msra.mxu0 %v10443_v28  ;;  %v9622_v28 = vunpack.i.h.bf16 %v12387_v41 }
 0x2a1   : > { %v4766_v49 = vmax.f32 %v4640_v56, 0.0  ;;  %v15769_v56 = vld [vmem:[#allocation59_spill] sm:$0xff]  ;;  %v4052_v58 = vpop.f32.mrb[68].mxu1 }
 0x2a2   : > { %9058 = vmatmul.mubr.msk.bf16.gmra.mrb[156].mxu1 %vm3756_vm5, %v3700_v36  ;;  %v3480_v36 = vsel %vm893_vm0, %v15764_v54, %v9601_v43  ;;  %v9933_v43 = vpack.i.bf16 %v5704_v4, %v5702_v8  ;;  %v4765_v54 = vmax.f32 %v4639_v7, 0.0  ;;  %v12783_v4 = vpop.permute.xlu1 %9774  ;;  %v3483_v7 = vsel %vm893_vm0, %v15769_v56, %v9612_v17  ;;  %v10444_v8 = vld [vmem:[%s15430_s7 + $0x18] sm:$0xff]  }
 0x2a3   : > { %9061 = vmatprep.mubr.msk.bf16.mxu1 %vm10484_vm3, %v15616_v9  ;;  %v3607_v18 = vsel %vm3542_vm4, %v3480_v36, %v9606_v3  ;;  %v9616_v3 = vunpack.i.l.bf16 %v12439_v38  ;;  %15767 = vst [vmem:[#allocation83_spill] sm:$0xff] %v12783_v4  ;;  %v12785_v36 = vpop.permute.xlu0 %9809  ;;  %4892 = vst.msk [vmem:[#allocation2 + $0x88] sm:$0xff] %vm3542_vm4, %v4766_v49  ;;  %v3482_v38 = vsel %vm893_vm0, %v15770_v11, %v9611_v0  ;;  %9191 = vmatprep.subr.bf16.mxu0 %v10444_v8  ;;  %v10445_v0 = vld [vmem:[%s15430_s7 + $0x20] sm:$0xff]  }
 0x2a4   : > { %9934 = vrot.lane.b32.xlu0 %v9933_v43, %s10486_s27  ;;  %v3701_v5 = vpack.c.bf16 %v3608_v34, %v3607_v18  ;;  %4891 = vst.msk [vmem:[#allocation2 + $0x80] sm:$0xff] %vm3542_vm4, %v4765_v54  ;;  %15768 = vst [vmem:[#allocation18_spill] sm:$0xff] %v12785_v36  ;;  %v5141_v34 = vld [vmem:[#allocation2 + $0x71] ss:$2 sm:$0xff]  ;;  %v3610_v18 = vsel %vm3542_vm4, %v3483_v7, %v9617_v50  ;;  %v4508_v43 = vmul.f32 %v12412_v29, %v4052_v58  ;;  %v8971_v54 = vpop.f32.mrb[69].mxu1  ;;  %v15773_v4 = vld [vmem:[#allocation61_spill] sm:$0xff] }
 0x2a5   : > { %v3609_v32 = vsel %vm3542_vm4, %v3482_v38, %v9616_v3  ;;  %v4055_v17 = vpop.f32.mrb[70].mxu1  ;;  %v12803_v49 = vmax.f32 %v5015_v63, %v5141_v34  ;;  %9192 = vmatpush3.bf16.msra.mxu0 %v10444_v8  ;;  %v9626_v63 = vunpack.i.l.bf16 %v12455_v47 }
 0x2a6   : > { %v12808_v56 = vpop.permute.xlu1 %9784  ;;  %v4641_v3 = vadd.f32 %v12427_v51, %v4508_v43  ;;  %v4509_v50 = vmul.f32 %v12412_v29, %v4055_v17  ;;  %v8972_v7 = vpop.f32.mrb[71].mxu1  ;;  %v3702_v38 = vpack.c.bf16 %v3610_v18, %v3609_v32  ;;  %9193 = vmatprep.subr.bf16.mxu0 %v10445_v0 }
 0x2a7   : > { %15771 = vst [vmem:[#allocation16_spill] sm:$0xff] %v12808_v56  ;;  %v12812_v11 = vpop.permute.xlu0 %9819  ;;  %v15772_v56 = vld [vmem:[#allocation64_spill] sm:$0xff]  ;;  %v5391_v32 = vrot.slane %v12803_v49, 1  ;;  %v15774_v7 = vrot.slane %v12721_v26, 1 }
 0x2a8   : > { %v4767_v34 = vmax.f32 %v4641_v3, 0.0  ;;  %v4642_v58 = vadd.f32 %v12427_v51, %v4509_v50  ;;  %v3485_v43 = vsel %vm893_vm0, %v15772_v56, %v9622_v28  ;;  %v9632_v56 = vunpack.i.h.bf16 %v12402_v46 }
 0x2a9   : > { %9194 = vmatpush3.bf16.msra.mxu0 %v10445_v0  ;;  %v9631_v0 = vunpack.i.l.bf16 %v12402_v46 }
 0x2aa   : > { %9062 = vmatmul.mubr.msk.bf16.gmra.mrb[160].mxu1 %vm3756_vm5, %v3701_v5  ;;  %v9621_v5 = vunpack.i.l.bf16 %v12387_v41  ;;  %v9627_v41 = vunpack.i.h.bf16 %v12455_v47  ;;  %4893 = vst.msk [vmem:[#allocation2 + $0x90] sm:$0xff] %vm3542_vm4, %v4767_v34  ;;  %v4768_v47 = vmax.f32 %v4642_v58, 0.0  ;;  %v12836_v3 = vpop.permute.xlu1 %9794 }
 0x2ab   : > { %9065 = vmatprep.mubr.msk.bf16.mxu1 %vm10484_vm3, %v15616_v9  ;;  %v5017_v54 = vld [vmem:[#allocation2 + $0x80] ss:$2 sm:$0xff]  ;;  %v5143_v36 = vld [vmem:[#allocation2 + $0x81] ss:$2 sm:$0xff]  ;;  %v12840_v50 = vpop.permute.xlu0 %9829 }
 0x2ac   : > { %v3484_v17 = vsel %vm893_vm0, %v15773_v4, %v9621_v5  ;;  %v12822_v8 = vmax.f32 %v5017_v54, %v5143_v36  ;;  %v10446_v4 = vld [vmem:[%s15430_s7 + $0x28] sm:$0xff]   ;;  %v3612_v5 = vsel %vm3542_vm4, %v3485_v43, %v9627_v41  ;;  %4894 = vst.msk [vmem:[#allocation2 + $0x98] sm:$0xff] %vm3542_vm4, %v4768_v47  ;;  %v5705_v41 = vrot.slane %v12803_v49, 2  ;;  %v15775_v47 = vld [vmem:[#allocation67_spill] sm:$0xff] }
 0x2ad   : > { %v3611_v36 = vsel %vm3542_vm4, %v3484_v17, %v9626_v63  ;;  %9195 = vmatprep.subr.bf16.mxu0 %v10446_v4  ;;  %v9637_v54 = vunpack.i.h.bf16 %v12476_v22  ;;  %v9636_v43 = vunpack.i.l.bf16 %v12476_v22  ;;  %v4060_v17 = vpop.f32.mrb[72].mxu1 }
 0x2ae   : > { %v15553_v18 = vrot.slane %v12822_v8, 1  ;;  %v15554_v28 = vrot.slane %v12822_v8, 2  ;;  %9196 = vmatpush3.bf16.msra.mxu0 %v10446_v4  ;;  %v3703_v58 = vpack.c.bf16 %v3612_v5, %v3611_v36  ;;  %v4510_v4 = vmul.f32 %v12412_v29, %v4060_v17  ;;  %v8975_v36 = vpop.f32.mrb[73].mxu1 }
 0x2af   : > { %v15777_v5 = vrot.slane %v12721_v26, 2  ;;  %v4063_v22 = vpop.f32.mrb[74].mxu1  ;;  %v9641_v36 = vunpack.i.l.bf16 %v12422_v52 }
 0x2b0   : > { %v5394_v63 = vsel %vm2152_vm1, %v5391_v32, %v15553_v18  ;;  %v5708_v46 = vsel %vm2784_vm2, %v5705_v41, %v15554_v28  ;;  %v15782_v28 = vld [vmem:[#allocation75_spill] sm:$0xff] }
 0x2b2   : > { %9066 = vmatmul.mubr.msk.bf16.gmra.mrb[164].mxu1 %vm3756_vm5, %v3702_v38  ;;  %v5392_v38 = vsel %vm2152_vm1, %v15774_v7, %v5391_v32  ;;  %v3487_v32 = vsel %vm893_vm0, %v15775_v47, %v9632_v56  ;;  %v15776_v7 = vld [vmem:[#allocation63_spill] sm:$0xff]  ;;  %v12868_v56 = vpop.permute.xlu0 %9839  ;;  %v8976_v47 = vpop.f32.mrb[75].mxu1 }
 0x2b3   : > { %9069 = vmatprep.mubr.msk.bf16.mxu1 %vm10484_vm3, %v15616_v9  ;;  %v9938_v34 = vpack.i.bf16 %v5394_v63, %v5392_v38  ;;  %v3486_v18 = vsel %vm893_vm0, %v15776_v7, %v9631_v0  ;;  %v5706_v38 = vsel %vm2784_vm2, %v15777_v5, %v5705_v41  ;;  %v12864_v63 = vpop.permute.xlu1 %9804  ;;  %v4643_v0 = vadd.f32 %v12427_v51, %v4510_v4 }
 0x2b4   : > { %v3613_v17 = vsel %vm3542_vm4, %v3486_v18, %v9636_v43  ;;  %v3614_v7 = vsel %vm3542_vm4, %v3487_v32, %v9637_v54  ;;  %v9642_v41 = vunpack.i.h.bf16 %v12422_v52  ;;  %v9646_v47 = vunpack.i.l.bf16 %v12487_v60  ;;  %v15778_v54 = vld [vmem:[#allocation71_spill] sm:$0xff]  ;;  %v15779_v32 = vld [vmem:[#allocation69_spill] sm:$0xff] }
 0x2b5   : > { %9939 = vrot.lane.b32.xlu1 %v9938_v34, %s10485_s29  ;;  %v9943_v34 = vpack.i.bf16 %v5708_v46, %v5706_v38  ;;  %v4769_v5 = vmax.f32 %v4643_v0, 0.0  ;;  %v3704_v38 = vpack.c.bf16 %v3614_v7, %v3613_v17  ;;  %v5019_v0 = vld [vmem:[#allocation2 + $0x90] ss:$2 sm:$0xff]  ;;  %v9652_v7 = vunpack.i.h.bf16 %v12441_v6 }
 0x2b6   : > { %v3489_v43 = vsel %vm893_vm0, %v15778_v54, %v9642_v41  ;;  %v12887_v52 = vpop.permute.xlu0 %9849  ;;  %v9651_v41 = vunpack.i.l.bf16 %v12441_v6  ;;  %v9656_v6 = vunpack.i.l.bf16 %v12507_v25 }
 0x2b7   : > { %4895 = vst.msk [vmem:[#allocation2 + $0xa0] sm:$0xff] %vm3542_vm4, %v4769_v5  ;;  %v12881_v18 = vpop.permute.xlu1 %9814  ;;  %15780 = vst [vmem:[#allocation17_spill] sm:$0xff] %v12887_v52 }
 0x2b9   : > { %9944 = vrot.lane.b32.xlu1 %v9943_v34, %s10486_s27  ;;  %v3488_v34 = vsel %vm893_vm0, %v15779_v32, %v9641_v36 }
 0x2ba   : > { %9070 = vmatmul.mubr.msk.bf16.gmra.mrb[168].mxu1 %vm3756_vm5, %v3703_v58  ;;  %v4511_v58 = vmul.f32 %v12412_v29, %v4063_v22  ;;  %v9647_v22 = vunpack.i.h.bf16 %v12487_v60  ;;  %v3615_v60 = vsel %vm3542_vm4, %v3488_v34, %v9646_v47  ;;  %v3491_v47 = vsel %vm893_vm0, %v15782_v28, %v9652_v7  ;;  %v15783_v34 = vld [vmem:[#allocation72_spill] sm:$0xff] }
 0x2bb   : > { %9073 = vmatprep.mubr.msk.bf16.mxu1 %vm10484_vm3, %v15616_v9  ;;  %v12899_v5 = vpop.permute.xlu1 %9824 }
 0x2bc   : > { %v4644_v46 = vadd.f32 %v12427_v51, %v4511_v58  ;;  %v5145_v58 = vld [vmem:[#allocation2 + $0x91] ss:$2 sm:$0xff]  ;;  %v3616_v17 = vsel %vm3542_vm4, %v3489_v43, %v9647_v22  ;;  %v3490_v22 = vsel %vm893_vm0, %v15783_v34, %v9651_v41  ;;  %v9657_v43 = vunpack.i.h.bf16 %v12507_v25 }
 0x2bd   : > { %v12897_v36 = vmax.f32 %v5019_v0, %v5145_v58 }
 0x2be   : > { %v4770_v4 = vmax.f32 %v4644_v46, 0.0  ;;  %v4068_v46 = vpop.f32.mrb[76].mxu1 }
 0x2bf   : > { %v4512_v54 = vmul.f32 %v12412_v29, %v4068_v46  ;;  %v8979_v32 = vpop.f32.mrb[77].mxu1  ;;  %v5395_v28 = vrot.slane %v12897_v36, 1 }
 0x2c0   : > { %4896 = vst.msk [vmem:[#allocation2 + $0xa8] sm:$0xff] %vm3542_vm4, %v4770_v4  ;;  %v3705_v4 = vpack.c.bf16 %v3616_v17, %v3615_v60  ;;  %v4071_v0 = vpop.f32.mrb[78].mxu1 }
 0x2c1   : > { %v4645_v60 = vadd.f32 %v12427_v51, %v4512_v54  ;;  %v4513_v17 = vmul.f32 %v12412_v29, %v4071_v0  ;;  %v8980_v46 = vpop.f32.mrb[79].mxu1  ;;  %v3618_v54 = vsel %vm3542_vm4, %v3491_v47, %v9657_v43  ;;  %v9662_v0 = vunpack.i.h.bf16 %v12460_v2 }
 0x2c2   : > { %9074 = vmatmul.mubr.msk.bf16.gmra.mrb[172].mxu1 %vm3756_vm5, %v3704_v38  ;;  %v12901_v38 = vpop.permute.xlu0 %9859  ;;  %v5709_v47 = vrot.slane %v12897_v36, 2 }
 0x2c3   : > { %9077 = vmatprep.mubr.msk.bf16.mxu1 %vm10484_vm3, %v15616_v9  ;;  %15781 = vst [vmem:[#allocation15_spill] sm:$0xff] %v12901_v38  ;;  %v4771_v7 = vmax.f32 %v4645_v60, 0.0  ;;  %v4646_v25 = vadd.f32 %v12427_v51, %v4513_v17  ;;  %v15785_v17 = vrot.slane %v12822_v8, 1 }
 0x2c5   : > { %4897 = vst.msk [vmem:[#allocation2 + $0xb0] sm:$0xff] %vm3542_vm4, %v4771_v7  ;;  %v4772_v60 = vmax.f32 %v4646_v25, 0.0  ;;  %v5396_v41 = vsel %vm2152_vm1, %v15785_v17, %v5395_v28  ;;  %v9667_v7 = vunpack.i.h.bf16 %v12523_v37  ;;  %v9666_v25 = vunpack.i.l.bf16 %v12523_v37  ;;  %v15788_v17 = vld [vmem:[#allocation79_spill] sm:$0xff] }
 0x2c6   : > { %v12927_v46 = vpop.permute.xlu0 %9869  ;;  %v3493_v38 = vsel %vm893_vm0, %v15788_v17, %v9662_v0 }
 0x2c7   : > { %v5021_v58 = vld [vmem:[#allocation2 + $0xa0] ss:$2 sm:$0xff]  ;;  %v5147_v52 = vld [vmem:[#allocation2 + $0xa1] ss:$2 sm:$0xff]  ;;  %15784 = vst [vmem:[#allocation22_spill] sm:$0xff] %v12927_v46  ;;  %4898 = vst.msk [vmem:[#allocation2 + $0xb8] sm:$0xff] %vm3542_vm4, %v4772_v60 }
 0x2c8   : > { %v12913_v32 = vmax.f32 %v5021_v58, %v5147_v52  ;;  %v9661_v52 = vunpack.i.l.bf16 %v12460_v2  ;;  %v12925_v58 = vpop.permute.xlu1 %9834 }
 0x2ca   : > { %9078 = vmatmul.mubr.msk.bf16.gmra.mrb[176].mxu1 %vm3756_vm5, %v3705_v4  ;;  %v3617_v4 = vsel %vm3542_vm4, %v3490_v22, %v9656_v6  ;;  %v15786_v34 = vrot.slane %v12913_v32, 1  ;;  %v15787_v2 = vrot.slane %v12913_v32, 2  ;;  %v12957_v0 = vpop.permute.xlu0 %9879 }
 0x2cb   : > { %9081 = vmatprep.mubr.msk.bf16.mxu1 %vm10484_vm3, %v15616_v9  ;;  %v3706_v6 = vpack.c.bf16 %v3618_v54, %v3617_v4  ;;  %v15790_v4 = vrot.slane %v12822_v8, 2  ;;  %15791 = vst [vmem:[#allocation20_spill] sm:$0xff] %v12957_v0 }
 0x2cc   : > { %v5398_v22 = vsel %vm2152_vm1, %v5395_v28, %v15786_v34  ;;  %v5712_v46 = vsel %vm2784_vm2, %v5709_v47, %v15787_v2  ;;  %v15789_v28 = vld [vmem:[#allocation76_spill] sm:$0xff]  ;;  %v12952_v60 = vpop.permute.xlu1 %9844 }
 0x2cd   : > { %v9948_v43 = vpack.i.bf16 %v5398_v22, %v5396_v41  ;;  %v3492_v34 = vsel %vm893_vm0, %v15789_v28, %v9661_v52  ;;  %v4076_v41 = vpop.f32.mrb[80].mxu1  ;;  %v5710_v54 = vsel %vm2784_vm2, %v15790_v4, %v5709_v47  ;;  %v12965_v47 = vld [vmem:[%s15428_s5] ss:$0 sm:$0xff] }
 0x2ce   : > { %v4514_v37 = vmul.f32 %v12412_v29, %v4076_v41  ;;  %v8983_v22 = vpop.f32.mrb[81].mxu1  ;;  %v3619_v52 = vsel %vm3542_vm4, %v3492_v34, %v9666_v25  ;;  %v9672_v29 = vunpack.i.h.bf16 %v12478_v48  ;;  %v9677_v25 = vunpack.i.h.bf16 %v12550_v57 }
 0x2cf   : > { %9949 = vrot.lane.b32.xlu0 %v9948_v43, %s10485_s29  ;;  %v9953_v43 = vpack.i.bf16 %v5712_v46, %v5710_v54  ;;  %v4079_v2 = vpop.f32.mrb[82].mxu1  ;;  %v9671_v46 = vunpack.i.l.bf16 %v12478_v48  ;;  %v9676_v34 = vunpack.i.l.bf16 %v12550_v57  ;;  %v15792_v22 = vld [vmem:[#allocation82_spill] sm:$0xff]  ;;  %v5023_v57 = vld [vmem:[#allocation2 + $0xb0] ss:$2 sm:$0xff] }
 0x2d0   : > { %v4647_v17 = vadd.f32 %v12427_v51, %v4514_v37  ;;  %v4515_v28 = vmul.f32 %v12965_v47, %v4079_v2  ;;  %v8984_v4 = vpop.f32.mrb[83].mxu1  ;;  %v12979_v54 = vpop.permute.xlu1 %9854  ;;  %v3495_v48 = vsel %vm893_vm0, %v15792_v22, %v9672_v29  ;;  %v9682_v29 = vunpack.i.h.bf16 %v12496_v62 }
 0x2d1   : > { %v9681_v4 = vunpack.i.l.bf16 %v12496_v62  ;;  %v9686_v22 = vunpack.i.l.bf16 %v12574_v53 }
 0x2d2   : > { %9082 = vmatmul.mubr.msk.bf16.gmra.mrb[180].mxu1 %vm3756_vm5, %v3706_v6  ;;  %v3620_v6 = vsel %vm3542_vm4, %v3493_v38, %v9667_v7  ;;  %v4773_v41 = vmax.f32 %v4647_v17, 0.0  ;;  %v12974_v38 = vld [vmem:[%s15429_s6] ss:$0 sm:$0xff]  ;;  %v12986_v17 = vpop.permute.xlu0 %9889 }
 0x2d3   : > { %9085 = vmatprep.mubr.msk.bf16.mxu1 %vm10484_vm3, %v15616_v9  ;;  %9954 = vrot.lane.b32.xlu0 %v9953_v43, %s10486_s27  ;;  %v4648_v51 = vadd.f32 %v12974_v38, %v4515_v28  ;;  %v3707_v7 = vpack.c.bf16 %v3620_v6, %v3619_v52  ;;  %v15793_v43 = vld [vmem:[#allocation81_spill] sm:$0xff]  ;;  %15794 = vst [vmem:[#allocation21_spill] sm:$0xff] %v12986_v17  ;;  %v5149_v52 = vld [vmem:[#allocation2 + $0xb1] ss:$2 sm:$0xff] }
 0x2d4   : > { %4899 = vst.msk [vmem:[#allocation2 + $0xc0] sm:$0xff] %vm3542_vm4, %v4773_v41  ;;  %v3494_v2 = vsel %vm893_vm0, %v15793_v43, %v9671_v46  ;;  %v3622_v28 = vsel %vm3542_vm4, %v3495_v48, %v9677_v25  ;;  %v4084_v46 = vpop.f32.mrb[84].mxu1  ;;  %v12996_v41 = vpop.permute.xlu1 %9864  ;;  %v3496_v25 = vsel %vm893_vm0, %v11614_v45, %v9681_v4  ;;  %v9687_v48 = vunpack.i.h.bf16 %v12574_v53 }
 0x2d5   : > { %v4774_v37 = vmax.f32 %v4648_v51, 0.0  ;;  %v3621_v6 = vsel %vm3542_vm4, %v3494_v2, %v9676_v34  ;;  %v4516_v51 = vmul.f32 %v12965_v47, %v4084_v46 }
 0x2d6   : > { %v13002_v43 = vpop.permute.xlu0 %9899  ;;  %v3708_v17 = vpack.c.bf16 %v3622_v28, %v3621_v6  ;;  %v3623_v28 = vsel %vm3542_vm4, %v3496_v25, %v9686_v22  ;;  %v9697_v22 = vunpack.i.h.bf16 %v12596_v20  ;;  %v15797_v25 = vrot.slane %v12913_v32, 1 }
 0x2d7   : > { %4900 = vst.msk [vmem:[#allocation2 + $0xc8] sm:$0xff] %vm3542_vm4, %v4774_v37  ;;  %v12999_v37 = vmax.f32 %v5023_v57, %v5149_v52  ;;  %15795 = vst [vmem:[#allocation19_spill] sm:$0xff] %v13002_v43  ;;  %v4649_v62 = vadd.f32 %v12974_v38, %v4516_v51  ;;  %v3497_v57 = vsel %vm893_vm0, %v11646_v59, %v9682_v29  ;;  %v9696_v51 = vunpack.i.l.bf16 %v12596_v20 }
 0x2d8   : > { %v3624_v59 = vsel %vm3542_vm4, %v3497_v57, %v9687_v48  ;;  %v15799_v20 = vrot.slane %v12913_v32, 2 }
 0x2d9   : > { %v5399_v53 = vrot.slane %v12999_v37, 1 }
 0x2da   : > { %9086 = vmatmul.mubr.msk.bf16.gmra.mrb[184].mxu1 %vm3756_vm5, %v3707_v7  ;;  %v8987_v7 = vpop.f32.mrb[85].mxu1 }
 0x2db   : > { %9089 = vmatprep.mubr.msk.bf16.mxu1 %vm10484_vm3, %v15616_v9  ;;  %v4087_v34 = vpop.f32.mrb[86].mxu1  ;;  %v4775_v7 = vmax.f32 %v4649_v62, 0.0  ;;  %v13025_v62 = vpop.permute.xlu1 %9874  ;;  %v5400_v48 = vsel %vm2152_vm1, %v15797_v25, %v5399_v53 }
 0x2dc   : > { %v4517_v2 = vmul.f32 %v12965_v47, %v4087_v34  ;;  %v8988_v0 = vpop.f32.mrb[87].mxu1  ;;  %v9691_v34 = vunpack.i.l.bf16 %v12509_v21  ;;  %15796 = vst [vmem:[#allocation26_spill] sm:$0xff] %v13025_v62 }
 0x2dd   : > { %v9692_v0 = vunpack.i.h.bf16 %v12509_v21  ;;  %4901 = vst.msk [vmem:[#allocation2 + $0xd0] sm:$0xff] %vm3542_vm4, %v4775_v7  ;;  %v3709_v7 = vpack.c.bf16 %v3624_v59, %v3623_v28 }
 0x2de   : > { %v5025_v52 = vld [vmem:[#allocation2 + $0xc0] ss:$2 sm:$0xff]  ;;  %v5151_v46 = vld [vmem:[#allocation2 + $0xc1] ss:$2 sm:$0xff]  ;;  %v4650_v6 = vadd.f32 %v12974_v38, %v4517_v2 }
 0x2df   : > { %v13015_v45 = vmax.f32 %v5025_v52, %v5151_v46  ;;  %v5713_v46 = vrot.slane %v12999_v37, 2  ;;  %v3499_v21 = vsel %vm893_vm0, %v11676_v55, %v9692_v0 }
 0x2e1   : > { %v5401_v29 = vrot.slane %v13015_v45, 1  ;;  %v5714_v0 = vsel %vm2784_vm2, %v15799_v20, %v5713_v46 }
 0x2e2   : > { %9090 = vmatmul.mubr.msk.bf16.gmra.mrb[188].mxu1 %vm3756_vm5, %v3708_v17  ;;  %v4776_v17 = vmax.f32 %v4650_v6, 0.0 }
 0x2e3   : > { %9093 = vmatprep.mubr.msk.bf16.mxu1 %vm10484_vm3, %v15616_v9  ;;  %v5402_v57 = vsel %vm2152_vm1, %v5399_v53, %v5401_v29  ;;  %v3498_v53 = vsel %vm893_vm0, %v11644_v13, %v9691_v34  ;;  %v13057_v34 = vpop.permute.xlu1 %9884 }
 0x2e4   : > { %4902 = vst.msk [vmem:[#allocation2 + $0xd8] sm:$0xff] %vm3542_vm4, %v4776_v17  ;;  %v9958_v6 = vpack.i.bf16 %v5402_v57, %v5400_v48  ;;  %v15798_v17 = vrot.slane %v13015_v45, 2  ;;  %v4092_v48 = vpop.f32.mrb[88].mxu1 }
 0x2e5   : > { %v9910_v4 = vpop.permute.xlu0 %9909 }
 0x2e6   : > { %v9912_v2 = vunpack.i.h.bf16 %v9910_v4  ;;  %v9911_v52 = vunpack.i.l.bf16 %v9910_v4  ;;  %v5716_v43 = vsel %vm2784_vm2, %v5713_v46, %v15798_v17  ;;  %9959 = vrot.lane.b32.xlu1 %v9958_v6, %s10485_s29  ;;  %v9702_v6 = vunpack.i.h.bf16 %v12530_v1 }
 0x2e7   : > { %v9963_v57 = vpack.i.bf16 %v5716_v43, %v5714_v0  ;;  %v9701_v46 = vunpack.i.l.bf16 %v12530_v1 }
 0x2e8   : > { %v6007_v55 = vsel %vm3542_vm4, %v12526_v23, %v9912_v2  ;;  %v6006_v28 = vsel %vm3542_vm4, %v12534_v33, %v9911_v52  ;;  %v3625_v2 = vsel %vm3542_vm4, %v3498_v53, %v9696_v51  ;;  %v3626_v33 = vsel %vm3542_vm4, %v3499_v21, %v9697_v22 }
 0x2e9   : > { %v9915_v4 = vpop.permute.xlu0 %9914  ;;  %v4518_v52 = vmul.f32 %v12965_v47, %v4092_v48  ;;  %v3710_v51 = vpack.c.bf16 %v3626_v33, %v3625_v2  ;;  %v9707_v22 = vunpack.i.h.bf16 %v12612_v39  ;;  %v9706_v21 = vunpack.i.l.bf16 %v12612_v39 }
 0x2ea   : > { %v9917_v25 = vunpack.i.h.bf16 %v9915_v4  ;;  %v9916_v62 = vunpack.i.l.bf16 %v9915_v4  ;;  %9094 = vmatmul.mubr.msk.bf16.gmra.mrb[192].mxu1 %vm3756_vm5, %v3709_v7  ;;  %v8991_v7 = vpop.f32.mrb[89].mxu1  ;;  %9964 = vrot.lane.b32.xlu1 %v9963_v57, %s10486_s27  ;;  %v3501_v1 = vsel %vm893_vm0, %v11698_v30, %v9702_v6  ;;  %v9717_v33 = vunpack.i.h.bf16 %v12638_v16 }
 0x2eb   : > { %9097 = vmatprep.mubr.msk.bf16.mxu1 %vm10484_vm3, %v15616_v9  ;;  %v4651_v4 = vadd.f32 %v12974_v38, %v4518_v52  ;;  %v3628_v0 = vsel %vm3542_vm4, %v3501_v1, %v9707_v22  ;;  %v5027_v48 = vld [vmem:[#allocation2 + $0xd0] ss:$2 sm:$0xff]  ;;  %v5153_v57 = vld [vmem:[#allocation2 + $0xd1] ss:$2 sm:$0xff]  ;;  %v9716_v52 = vunpack.i.l.bf16 %v12638_v16 }
 0x2ec   : > { %v6070_v59 = vsel %vm6069_vm6, %v6006_v28, %v9916_v62  ;;  %v6071_v13 = vsel %vm6069_vm6, %v6007_v55, %v9917_v25  ;;  %v4095_v62 = vpop.f32.mrb[90].mxu1  ;;  %v3500_v55 = vsel %vm893_vm0, %v11679_v27, %v9701_v46  ;;  %v13075_v28 = vpop.permute.xlu1 %9894 }
 0x2ed   : > { %v6133_v23 = vpack.c.bf16 %v6071_v13, %v6070_v59  ;;  %v4519_v43 = vmul.f32 %v12965_v47, %v4095_v62  ;;  %v8992_v17 = vpop.f32.mrb[91].mxu1  ;;  %v4777_v25 = vmax.f32 %v4651_v4, 0.0  ;;  %v3627_v39 = vsel %vm3542_vm4, %v3500_v55, %v9706_v21  ;;  %v15800_v59 = vld [vmem:[#allocation14_spill] sm:$0xff]  ;;  %v15802_v21 = vld [vmem:[#allocation84_spill] sm:$0xff] }
 0x2ee   : > { %v9712_v13 = vunpack.i.h.bf16 %v15800_v59  ;;  %v9711_v30 = vunpack.i.l.bf16 %v15800_v59  ;;  %v4100_v27 = vpop.f32.mrb[92].mxu1  ;;  %v13093_v17 = vmax.f32 %v5027_v48, %v5153_v57  ;;  %v9721_v55 = vunpack.i.l.bf16 %v12585_v15 }
 0x2ef   : > { %9197 = vmatprep.mubr.msk.bf16.mxu0 %vm6213_vm7, %v6133_v23  ;;  %v4652_v53 = vadd.f32 %v12974_v38, %v4519_v43  ;;  %4903 = vst.msk [vmem:[#allocation2 + $0xe0] sm:$0xff] %vm3542_vm4, %v4777_v25  ;;  %v4520_v23 = vmul.f32 %v12965_v47, %v4100_v27  ;;  %v8995_v2 = vpop.f32.mrb[93].mxu1  ;;  %v3711_v43 = vpack.c.bf16 %v3628_v0, %v3627_v39  ;;  %v9727_v48 = vunpack.i.h.bf16 %v12661_v24 }
 0x2f0   : > { %v4103_v7 = vpop.f32.mrb[94].mxu1  ;;  %v13089_v6 = vpop.permute.xlu1 %9904  ;;  %v3502_v25 = vsel %vm893_vm0, %v15802_v21, %v9711_v30  ;;  %v5403_v30 = vrot.slane %v13093_v17, 1  ;;  %v15803_v2 = vld [vmem:[#allocation88_spill] sm:$0xff] }
 0x2f1   : > { %v4778_v20 = vmax.f32 %v4652_v53, 0.0  ;;  %v4653_v46 = vadd.f32 %v12974_v38, %v4520_v23  ;;  %v4521_v62 = vmul.f32 %v12965_v47, %v4103_v7  ;;  %v8996_v4 = vpop.f32.mrb[95].mxu1  ;;  %v9722_v53 = vunpack.i.h.bf16 %v12585_v15 }
 0x2f2   : > { %9098 = vmatmul.mubr.msk.bf16.gmra.mrb[196].mxu1 %vm3756_vm5, %v3710_v51  ;;  %v15801_v51 = vld [vmem:[#allocation85_spill] sm:$0xff]  ;;  %v4108_v57 = vpop.f32.mrb[96].mxu1  ;;  %v15804_v4 = vld [vmem:[#allocation86_spill] sm:$0xff] }
 0x2f3   : > { %9101 = vmatprep.mubr.msk.bf16.mxu1 %vm10484_vm3, %v15616_v9  ;;  %4904 = vst.msk [vmem:[#allocation2 + $0xe8] sm:$0xff] %vm3542_vm4, %v4778_v20  ;;  %v3503_v22 = vsel %vm893_vm0, %v15801_v51, %v9712_v13  ;;  %v4779_v16 = vmax.f32 %v4653_v46, 0.0  ;;  %v4654_v1 = vadd.f32 %v12974_v38, %v4521_v62  ;;  %v3629_v20 = vsel %vm3542_vm4, %v3502_v25, %v9716_v52  ;;  %v8999_v46 = vpop.f32.mrb[97].mxu1 }
 0x2f4   : > { %v3630_v39 = vsel %vm3542_vm4, %v3503_v22, %v9717_v33  ;;  %v3505_v7 = vsel %vm893_vm0, %v15803_v2, %v9722_v53  ;;  %v9726_v52 = vunpack.i.l.bf16 %v12661_v24  ;;  %v4522_v33 = vmul.f32 %v12965_v47, %v4108_v57  ;;  %v4111_v51 = vpop.f32.mrb[98].mxu1 }
 0x2f5   : > { %4905 = vst.msk [vmem:[#allocation2 + $0xf0] sm:$0xff] %vm3542_vm4, %v4779_v16  ;;  %v4780_v0 = vmax.f32 %v4654_v1, 0.0  ;;  %v3712_v22 = vpack.c.bf16 %v3630_v39, %v3629_v20  ;;  %v4523_v53 = vmul.f32 %v12965_v47, %v4111_v51  ;;  %v9000_v24 = vpop.f32.mrb[99].mxu1  ;;  %v5404_v1 = vsel %vm2152_vm1, %v5401_v29, %v5403_v30 }
 0x2f6   : > { %v4655_v16 = vadd.f32 %v12974_v38, %v4522_v33  ;;  %v15805_v33 = vld [vmem:[#allocation12_spill] sm:$0xff] }
 0x2f7   : > { %4906 = vst.msk [vmem:[#allocation2 + $0xf8] sm:$0xff] %vm3542_vm4, %v4780_v0  ;;  %v5717_v0 = vrot.slane %v13093_v17, 2  ;;  %v4656_v57 = vadd.f32 %v12974_v38, %v4523_v53  ;;  %v9732_v46 = vunpack.i.h.bf16 %v15805_v33  ;;  %v15806_v53 = vrot.slane %v13015_v45, 2 }
 0x2f9   : > { %v9920_v27 = vpop.permute.xlu1 %9919  ;;  %v5718_v24 = vsel %vm2784_vm2, %v15806_v53, %v5717_v0 }
 0x2fa   : > { %9102 = vmatmul.mubr.msk.bf16.gmra.mrb[200].mxu1 %vm3756_vm5, %v3711_v43  ;;  %v5029_v59 = vld [vmem:[#allocation2 + $0xe0] ss:$2 sm:$0xff]  ;;  %v5155_v13 = vld [vmem:[#allocation2 + $0xe1] ss:$2 sm:$0xff]  ;;  %v9922_v15 = vunpack.i.h.bf16 %v9920_v27  ;;  %v9921_v62 = vunpack.i.l.bf16 %v9920_v27  ;;  %v3504_v43 = vsel %vm893_vm0, %v15804_v4, %v9721_v55  ;;  %v4781_v27 = vmax.f32 %v4655_v16, 0.0  ;;  %v4116_v16 = vpop.f32.mrb[100].mxu1 }
 0x2fb   : > { %9105 = vmatprep.mubr.msk.bf16.mxu1 %vm10484_vm3, %v15616_v9  ;;  %v13110_v23 = vmax.f32 %v5029_v59, %v5155_v13  ;;  %v4782_v4 = vmax.f32 %v4656_v57, 0.0  ;;  %v15807_v57 = vld [vmem:[#allocation89_spill] sm:$0xff] }
 0x2fc   : > { %v6009_v20 = vsel %vm3542_vm4, %v12614_v14, %v9922_v15  ;;  %v6008_v29 = vsel %vm3542_vm4, %v12543_v31, %v9921_v62  ;;  %4907 = vst.msk [vmem:[#allocation2 + $0x100] sm:$0xff] %vm3542_vm4, %v4781_v27  ;;  %v3631_v31 = vsel %vm3542_vm4, %v3504_v43, %v9726_v52  ;;  %v3632_v62 = vsel %vm3542_vm4, %v3505_v7, %v9727_v48 }
 0x2fd   : > { %v5405_v21 = vrot.slane %v13110_v23, 1  ;;  %v5719_v25 = vrot.slane %v13110_v23, 2  ;;  %v9925_v59 = vpop.permute.xlu1 %9924  ;;  %4908 = vst.msk [vmem:[#allocation2 + $0x108] sm:$0xff] %vm3542_vm4, %v4782_v4  ;;  %v9736_v7 = vunpack.i.l.bf16 %v12685_v12  ;;  %v3713_v27 = vpack.c.bf16 %v3632_v62, %v3631_v31 }
 0x2fe   : > { %v9927_v39 = vunpack.i.h.bf16 %v9925_v59  ;;  %v9926_v13 = vunpack.i.l.bf16 %v9925_v59  ;;  %v9003_v59 = vpop.f32.mrb[101].mxu1  ;;  %v5031_v43 = vld [vmem:[#allocation2 + $0xf0] ss:$2 sm:$0xff]  ;;  %v5157_v48 = vld [vmem:[#allocation2 + $0xf1] ss:$2 sm:$0xff] }
 0x2ff   : > { %v5406_v55 = vsel %vm2152_vm1, %v5403_v30, %v5405_v21  ;;  %v5720_v30 = vsel %vm2784_vm2, %v5717_v0, %v5719_v25  ;;  %v4119_v52 = vpop.f32.mrb[102].mxu1 }
 0x300   : > { %v9968_v2 = vpack.i.bf16 %v5406_v55, %v5404_v1  ;;  %v6072_v14 = vsel %vm6069_vm6, %v6008_v29, %v9926_v13  ;;  %v6073_v15 = vsel %vm6069_vm6, %v6009_v20, %v9927_v39  ;;  %v4524_v1 = vmul.f32 %v12965_v47, %v4116_v16  ;;  %v9004_v0 = vpop.f32.mrb[103].mxu1  ;;  %v15808_v29 = vld [vmem:[#allocation87_spill] sm:$0xff] }
 0x301   : > { %v6134_v51 = vpack.c.bf16 %v6073_v15, %v6072_v14  ;;  %v9973_v55 = vpack.i.bf16 %v5720_v30, %v5718_v24  ;;  %v9737_v20 = vunpack.i.h.bf16 %v12685_v12  ;;  %v4525_v13 = vmul.f32 %v12965_v47, %v4119_v52 }
 0x302   : > { %9106 = vmatmul.mubr.msk.bf16.gmra.mrb[204].mxu1 %vm3756_vm5, %v3712_v22  ;;  %9969 = vrot.lane.b32.xlu0 %v9968_v2, %s10485_s29  ;;  %v9731_v22 = vunpack.i.l.bf16 %v15805_v33  ;;  %v4657_v39 = vadd.f32 %v12974_v38, %v4524_v1  ;;  %v3507_v2 = vsel %vm893_vm0, %v15807_v57, %v9732_v46  ;;  %v13166_v12 = vmax.f32 %v5031_v43, %v5157_v48  ;;  %v15810_v57 = vld [vmem:[#allocation92_spill] sm:$0xff] }
 0x303   : > { %9109 = vmatprep.mubr.msk.bf16.mxu1 %vm10484_vm3, %v15616_v9  ;;  %9198 = vmatmul.mubr.msk.bf16.vlgmr.msra.gmra.mrb[96].mxu0 %vm6213_vm7, %v6134_v51  ;;  %v4658_v15 = vadd.f32 %v12974_v38, %v4525_v13  ;;  %v3634_v4 = vsel %vm3542_vm4, %v3507_v2, %v9737_v20  ;;  %v15809_v51 = vld [vmem:[#allocation80_spill] sm:$0xff]  ;;  %v9747_v20 = vunpack.i.h.bf16 %v12701_v61  ;;  %v9746_v52 = vunpack.i.l.bf16 %v12701_v61 }
 0x304   : > { %v3506_v30 = vsel %vm893_vm0, %v15808_v29, %v9731_v22  ;;  %v4783_v14 = vmax.f32 %v4657_v39, 0.0  ;;  %v9742_v31 = vunpack.i.h.bf16 %v15809_v51  ;;  %v9741_v62 = vunpack.i.l.bf16 %v15809_v51  ;;  %v4124_v22 = vpop.f32.mrb[104].mxu1  ;;  %v5033_v16 = vld [vmem:[#allocation2 + $0x100] ss:$2 sm:$0xff]  ;;  %v5159_v53 = vld [vmem:[#allocation2 + $0x101] ss:$2 sm:$0xff] }
 0x305   : > { %v3633_v33 = vsel %vm3542_vm4, %v3506_v30, %v9736_v7  ;;  %v4784_v46 = vmax.f32 %v4658_v15, 0.0  ;;  %v4526_v24 = vmul.f32 %v12965_v47, %v4124_v22  ;;  %v9007_v1 = vpop.f32.mrb[105].mxu1  ;;  %v13177_v59 = vmax.f32 %v5033_v16, %v5159_v53  ;;  %v15811_v29 = vld [vmem:[#allocation90_spill] sm:$0xff] }
 0x306   : > { %9974 = vrot.lane.b32.xlu0 %v9973_v55, %s10486_s27  ;;  %4909 = vst.msk [vmem:[#allocation2 + $0x110] sm:$0xff] %vm3542_vm4, %v4783_v14  ;;  %v5407_v55 = vrot.slane %v13166_v12, 1  ;;  %v4127_v43 = vpop.f32.mrb[106].mxu1  ;;  %v3714_v48 = vpack.c.bf16 %v3634_v4, %v3633_v33  ;;  %v3509_v2 = vsel %vm893_vm0, %v15810_v57, %v9742_v31  ;;  %v3508_v30 = vsel %vm893_vm0, %v15811_v29, %v9741_v62  ;;  %v15812_v14 = vld [vmem:[#allocation74_spill] sm:$0xff] }
 0x307   : > { %4910 = vst.msk [vmem:[#allocation2 + $0x118] sm:$0xff] %vm3542_vm4, %v4784_v46  ;;  %v4659_v7 = vadd.f32 %v12974_v38, %v4526_v24  ;;  %v4527_v39 = vmul.f32 %v12965_v47, %v4127_v43  ;;  %v9008_v13 = vpop.f32.mrb[107].mxu1  ;;  %v5409_v0 = vrot.slane %v13177_v59, 1  ;;  %v9751_v15 = vunpack.i.l.bf16 %v15812_v14 }
 0x308   : > { %v5721_v61 = vrot.slane %v13166_v12, 2  ;;  %v5408_v46 = vsel %vm2152_vm1, %v5405_v21, %v5407_v55  ;;  %v3635_v62 = vsel %vm3542_vm4, %v3508_v30, %v9746_v52  ;;  %v3636_v22 = vsel %vm3542_vm4, %v3509_v2, %v9747_v20  ;;  %v4132_v24 = vpop.f32.mrb[108].mxu1 }
 0x309   : > { %v4785_v33 = vmax.f32 %v4659_v7, 0.0  ;;  %v4660_v4 = vadd.f32 %v12974_v38, %v4527_v39  ;;  %v5410_v51 = vsel %vm2152_vm1, %v5407_v55, %v5409_v0  ;;  %v9752_v21 = vunpack.i.h.bf16 %v15812_v14  ;;  %v15813_v55 = vld [vmem:[#allocation91_spill] sm:$0xff]  ;;  %v9011_v52 = vpop.f32.mrb[109].mxu1 }
 0x30a   : > { %9110 = vmatmul.mubr.msk.bf16.gmra.mrb[208].mxu1 %vm3756_vm5, %v3713_v27  ;;  %v5723_v27 = vrot.slane %v13177_v59, 2  ;;  %v9978_v31 = vpack.i.bf16 %v5410_v51, %v5408_v46  ;;  %v3510_v43 = vsel %vm893_vm0, %v15813_v55, %v9751_v15  ;;  %v4528_v20 = vmul.f32 %v12965_v47, %v4132_v24  ;;  %v4135_v13 = vpop.f32.mrb[110].mxu1  ;;  %v15814_v51 = vld [vmem:[#allocation93_spill] sm:$0xff] }
 0x30b   : > { %9113 = vmatprep.mubr.msk.bf16.mxu1 %vm10484_vm3, %v15616_v9  ;;  %4911 = vst.msk [vmem:[#allocation2 + $0x120] sm:$0xff] %vm3542_vm4, %v4785_v33  ;;  %v4786_v16 = vmax.f32 %v4660_v4, 0.0  ;;  %v9757_v7 = vunpack.i.h.bf16 %v12726_v10  ;;  %v9756_v39 = vunpack.i.l.bf16 %v12726_v10  ;;  %v3715_v2 = vpack.c.bf16 %v3636_v22, %v3635_v62  ;;  %v9012_v33 = vpop.f32.mrb[111].mxu1 }
 0x30c   : > { %v5724_v53 = vsel %vm2784_vm2, %v5721_v61, %v5723_v27  ;;  %9979 = vrot.lane.b32.xlu1 %v9978_v31, %s10485_s29  ;;  %v4661_v14 = vadd.f32 %v12974_v38, %v4528_v20  ;;  %v4529_v15 = vmul.f32 %v12965_v47, %v4135_v13  ;;  %v3511_v31 = vsel %vm893_vm0, %v15814_v51, %v9752_v21 }
 0x30d   : > { %4912 = vst.msk [vmem:[#allocation2 + $0x128] sm:$0xff] %vm3542_vm4, %v4786_v16  ;;  %v3637_v22 = vsel %vm3542_vm4, %v3510_v43, %v9756_v39  ;;  %v3638_v24 = vsel %vm3542_vm4, %v3511_v31, %v9757_v7  ;;  %v9762_v20 = vunpack.i.h.bf16 %v12672_v42 }
 0x30e   : > { %v9930_v1 = vpop.permute.xlu0 %9929  ;;  %v5035_v29 = vld [vmem:[#allocation2 + $0x110] ss:$2 sm:$0xff]  ;;  %v5161_v30 = vld [vmem:[#allocation2 + $0x111] ss:$2 sm:$0xff]  ;;  %v4662_v10 = vadd.f32 %v12974_v38, %v4529_v15  ;;  %v3716_v33 = vpack.c.bf16 %v3638_v24, %v3637_v22  ;;  %v15816_v24 = vld [vmem:[#allocation94_spill] sm:$0xff] }
 0x30f   : > { %v9932_v4 = vunpack.i.h.bf16 %v9930_v1  ;;  %v9931_v46 = vunpack.i.l.bf16 %v9930_v1  ;;  %v13226_v62 = vmax.f32 %v5035_v29, %v5161_v30  ;;  %v9767_v30 = vunpack.i.h.bf16 %v12754_v35 }
 0x310   : > { %v4788_v21 = vmax.f32 %v4662_v10, 0.0 }
 0x311   : > { %v6011_v1 = vsel %vm3542_vm4, %v12707_v44, %v9932_v4  ;;  %v6010_v55 = vsel %vm3542_vm4, %v12623_v19, %v9931_v46  ;;  %v5411_v44 = vrot.slane %v13226_v62, 1  ;;  %v9761_v19 = vunpack.i.l.bf16 %v12672_v42 }
 0x312   : > { %9114 = vmatmul.mubr.msk.bf16.gmra.mrb[212].mxu1 %vm3756_vm5, %v3714_v48  ;;  %v5722_v48 = vsel %vm2784_vm2, %v5719_v25, %v5721_v61  ;;  %v4787_v61 = vmax.f32 %v4661_v14, 0.0  ;;  %4914 = vst.msk [vmem:[#allocation2 + $0x138] sm:$0xff] %vm3542_vm4, %v4788_v21  ;;  %v9766_v14 = vunpack.i.l.bf16 %v12754_v35 }
 0x313   : > { %9117 = vmatprep.mubr.msk.bf16.mxu1 %vm10484_vm3, %v15616_v9  ;;  %v9983_v57 = vpack.i.bf16 %v5724_v53, %v5722_v48  ;;  %v5412_v35 = vsel %vm2152_vm1, %v5409_v0, %v5411_v44  ;;  %v3512_v21 = vsel %vm893_vm0, %v15816_v24, %v9761_v19  ;;  %v15820_v24 = vld [vmem:[#allocation95_spill] sm:$0xff] }
 0x314   : > { %4913 = vst.msk [vmem:[#allocation2 + $0x130] sm:$0xff] %vm3542_vm4, %v4787_v61  ;;  %v5037_v43 = vld [vmem:[#allocation2 + $0x120] ss:$2 sm:$0xff]  ;;  %v5163_v48 = vld [vmem:[#allocation2 + $0x121] ss:$2 sm:$0xff]  ;;  %v5725_v61 = vrot.slane %v13226_v62, 2 }
 0x315   : > { %9984 = vrot.lane.b32.xlu1 %v9983_v57, %s10486_s27 }
 0x316   : > { %v9935_v25 = vpop.permute.xlu0 %9934 }
 0x317   : > { %v9937_v16 = vunpack.i.h.bf16 %v9935_v25  ;;  %v9936_v53 = vunpack.i.l.bf16 %v9935_v25 }
 0x319   : > { %v6074_v39 = vsel %vm6069_vm6, %v6010_v55, %v9936_v53  ;;  %v6075_v13 = vsel %vm6069_vm6, %v6011_v1, %v9937_v16  ;;  %v15815_v16 = vld [vmem:[#allocation96_spill] sm:$0xff]  ;;  %v3639_v55 = vsel %vm3542_vm4, %v3512_v21, %v9766_v14 }
 0x31a   : > { %9118 = vmatmul.mubr.msk.bf16.gmra.mrb[216].mxu1 %vm3756_vm5, %v3715_v2  ;;  %v13242_v2 = vmax.f32 %v5037_v43, %v5163_v48  ;;  %v6135_v29 = vpack.c.bf16 %v6075_v13, %v6074_v39  ;;  %v3513_v53 = vsel %vm893_vm0, %v15815_v16, %v9762_v20  ;;  %v5726_v13 = vsel %vm2784_vm2, %v5723_v27, %v5725_v61  ;;  %v15819_v16 = vld [vmem:[#allocation97_spill] sm:$0xff] }
 0x31b   : > { %9121 = vmatprep.mubr.msk.bf16.mxu1 %vm10484_vm3, %v15616_v9 }
 0x31c   : > { %v5413_v31 = vrot.slane %v13242_v2, 1  ;;  %v5727_v25 = vrot.slane %v13242_v2, 2  ;;  %9201 = vmatprep.mubr.msk.bf16.mxu0 %vm6213_vm7, %v6135_v29  ;;  %v9771_v29 = vunpack.i.l.bf16 %v12687_v40 }
 0x31d   : > { %v4140_v52 = vpop.f32.mrb[112].mxu1 }
 0x31e   : > { %v4530_v7 = vmul.f32 %v12965_v47, %v4140_v52  ;;  %v9015_v57 = vpop.f32.mrb[113].mxu1  ;;  %v5414_v22 = vsel %vm2152_vm1, %v5411_v44, %v5413_v31  ;;  %v3640_v52 = vsel %vm3542_vm4, %v3513_v53, %v9767_v30  ;;  %v5728_v43 = vsel %vm2784_vm2, %v5725_v61, %v5727_v25 }
 0x31f   : > { %v4143_v15 = vpop.f32.mrb[114].mxu1  ;;  %v9988_v1 = vpack.i.bf16 %v5414_v22, %v5412_v35  ;;  %v5165_v57 = vld [vmem:[#allocation2 + $0x131] ss:$2 sm:$0xff]  ;;  %v9772_v44 = vunpack.i.h.bf16 %v12687_v40  ;;  %v9993_v30 = vpack.i.bf16 %v5728_v43, %v5726_v13  ;;  %v3717_v14 = vpack.c.bf16 %v3640_v52, %v3639_v55  ;;  %v15821_v43 = vld [vmem:[#allocation6_spill] sm:$0xff] }
 0x320   : > { %v4663_v4 = vadd.f32 %v12974_v38, %v4530_v7  ;;  %v4531_v46 = vmul.f32 %v12965_v47, %v4143_v15  ;;  %v9016_v51 = vpop.f32.mrb[115].mxu1  ;;  %v5039_v7 = vld [vmem:[#allocation2 + $0x130] ss:$2 sm:$0xff]  ;;  %v3514_v21 = vsel %vm893_vm0, %v15820_v24, %v9771_v29 }
 0x321   : > { %9989 = vrot.lane.b32.xlu0 %v9988_v1, %s10485_s29  ;;  %v15817_v15 = vld [vmem:[#allocation83_spill] sm:$0xff]  ;;  %v13288_v61 = vmax.f32 %v5039_v7, %v5165_v57  ;;  %v3515_v53 = vsel %vm893_vm0, %v15819_v16, %v9772_v44  ;;  %v15822_v44 = vld [vmem:[#allocation98_spill] sm:$0xff] }
 0x322   : > { %v4789_v42 = vmax.f32 %v4663_v4, 0.0  ;;  %v4664_v10 = vadd.f32 %v12974_v38, %v4531_v46  ;;  %9122 = vmatmul.mubr.msk.bf16.gmra.mrb[220].mxu1 %vm3756_vm5, %v3716_v33  ;;  %v9777_v33 = vunpack.i.h.bf16 %v15817_v15  ;;  %v9776_v4 = vunpack.i.l.bf16 %v15817_v15 }
 0x323   : > { %9125 = vmatprep.mubr.msk.bf16.mxu1 %vm10484_vm3, %v15616_v9  ;;  %v5415_v7 = vrot.slane %v13288_v61, 1 }
 0x324   : > { %4915 = vst.msk [vmem:[#allocation2 + $0x140] sm:$0xff] %vm3542_vm4, %v4789_v42  ;;  %v4790_v0 = vmax.f32 %v4664_v10, 0.0  ;;  %v15818_v10 = vld [vmem:[#allocation13_spill] sm:$0xff]  ;;  %v3641_v55 = vsel %vm3542_vm4, %v3514_v21, %v9776_v4  ;;  %v3642_v52 = vsel %vm3542_vm4, %v3515_v53, %v9777_v33  ;;  %v15823_v33 = vld [vmem:[#allocation16_spill] sm:$0xff] }
 0x325   : > { %v4148_v48 = vpop.f32.mrb[116].mxu1  ;;  %v9782_v27 = vunpack.i.h.bf16 %v15818_v10  ;;  %9994 = vrot.lane.b32.xlu0 %v9993_v30, %s10486_s27  ;;  %v9781_v40 = vunpack.i.l.bf16 %v15818_v10  ;;  %v9787_v4 = vunpack.i.h.bf16 %v15823_v33  ;;  %v5729_v10 = vrot.slane %v13288_v61, 2 }
 0x326   : > { %4916 = vst.msk [vmem:[#allocation2 + $0x148] sm:$0xff] %vm3542_vm4, %v4790_v0  ;;  %v4532_v20 = vmul.f32 %v12965_v47, %v4148_v48  ;;  %v9019_v39 = vpop.f32.mrb[117].mxu1  ;;  %v5416_v24 = vsel %vm2152_vm1, %v5413_v31, %v5415_v7 }
 0x327   : > { %v4151_v19 = vpop.f32.mrb[118].mxu1  ;;  %v9940_v1 = vpop.permute.xlu1 %9939  ;;  %v3517_v48 = vsel %vm893_vm0, %v15821_v43, %v9782_v27  ;;  %v3516_v29 = vsel %vm893_vm0, %v15822_v44, %v9781_v40 }
 0x328   : > { %v4665_v46 = vadd.f32 %v12974_v38, %v4532_v20  ;;  %v4533_v51 = vmul.f32 %v12965_v47, %v4151_v19  ;;  %v9020_v42 = vpop.f32.mrb[119].mxu1  ;;  %v9942_v57 = vunpack.i.h.bf16 %v9940_v1  ;;  %v9941_v15 = vunpack.i.l.bf16 %v9940_v1 }
 0x329   : > { %v3718_v42 = vpack.c.bf16 %v3642_v52, %v3641_v55 }
 0x32a   : > { %v4791_v35 = vmax.f32 %v4665_v46, 0.0  ;;  %v4666_v22 = vadd.f32 %v12974_v38, %v4533_v51  ;;  %9126 = vmatmul.mubr.msk.bf16.gmra.mrb[224].mxu1 %vm3756_vm5, %v3717_v14  ;;  %v9786_v46 = vunpack.i.l.bf16 %v15823_v33  ;;  %v6013_v21 = vsel %vm3542_vm4, %v12803_v49, %v9942_v57 }
 0x32b   : > { %9129 = vmatprep.mubr.msk.bf16.mxu1 %vm10484_vm3, %v15616_v9  ;;  %v9945_v27 = vpop.permute.xlu1 %9944  ;;  %v3644_v57 = vsel %vm3542_vm4, %v3517_v48, %v9787_v4  ;;  %v5730_v48 = vsel %vm2784_vm2, %v5727_v25, %v5729_v10 }
 0x32c   : > { %4917 = vst.msk [vmem:[#allocation2 + $0x150] sm:$0xff] %vm3542_vm4, %v4791_v35  ;;  %v4792_v0 = vmax.f32 %v4666_v22, 0.0  ;;  %v9947_v1 = vunpack.i.h.bf16 %v9945_v27  ;;  %v9946_v55 = vunpack.i.l.bf16 %v9945_v27 }
 0x32d   : > { %v4156_v20 = vpop.f32.mrb[120].mxu1  ;;  %v5041_v39 = vld [vmem:[#allocation2 + $0x140] ss:$2 sm:$0xff]  ;;  %v5167_v13 = vld [vmem:[#allocation2 + $0x141] ss:$2 sm:$0xff] }
 0x32e   : > { %4918 = vst.msk [vmem:[#allocation2 + $0x158] sm:$0xff] %vm3542_vm4, %v4792_v0  ;;  %v4534_v19 = vmul.f32 %v12965_v47, %v4156_v20  ;;  %v9023_v30 = vpop.f32.mrb[121].mxu1  ;;  %v13309_v14 = vmax.f32 %v5041_v39, %v5167_v13  ;;  %v6012_v20 = vsel %vm3542_vm4, %v12721_v26, %v9941_v15  ;;  %v3643_v39 = vsel %vm3542_vm4, %v3516_v29, %v9786_v46  ;;  %v15824_v15 = vld [vmem:[#allocation78_spill] sm:$0xff] }
 0x32f   : > { %v4159_v51 = vpop.f32.mrb[122].mxu1  ;;  %v6076_v49 = vsel %vm6069_vm6, %v6012_v20, %v9946_v55  ;;  %v6077_v13 = vsel %vm6069_vm6, %v6013_v21, %v9947_v1  ;;  %v9792_v33 = vunpack.i.h.bf16 %v15824_v15  ;;  %v9791_v4 = vunpack.i.l.bf16 %v15824_v15 }
 0x330   : > { %v4667_v35 = vadd.f32 %v12974_v38, %v4534_v19  ;;  %v4535_v40 = vmul.f32 %v12965_v47, %v4159_v51  ;;  %v9024_v22 = vpop.f32.mrb[123].mxu1  ;;  %v5417_v16 = vrot.slane %v13309_v14, 1  ;;  %v5731_v53 = vrot.slane %v13309_v14, 2 }
 0x331   : > { %v6136_v26 = vpack.c.bf16 %v6077_v13, %v6076_v49  ;;  %v9796_v22 = vunpack.i.l.bf16 %v12836_v3  ;;  %v9807_v15 = vunpack.i.h.bf16 %v12864_v63 }
 0x332   : > { %v4793_v52 = vmax.f32 %v4667_v35, 0.0  ;;  %v4668_v0 = vadd.f32 %v12974_v38, %v4535_v40  ;;  %9130 = vmatmul.mubr.msk.bf16.gmra.mrb[228].mxu1 %vm3756_vm5, %v3718_v42  ;;  %v5418_v43 = vsel %vm2152_vm1, %v5415_v7, %v5417_v16  ;;  %v5732_v7 = vsel %vm2784_vm2, %v5729_v10, %v5731_v53 }
 0x333   : > { %v9998_v31 = vpack.i.bf16 %v5418_v43, %v5416_v24  ;;  %9133 = vmatprep.mubr.msk.bf16.mxu1 %vm10484_vm3, %v15616_v9  ;;  %9202 = vmatmul.mubr.msk.bf16.gmra.mrb[100].mxu0 %vm6213_vm7, %v6136_v26  ;;  %v10003_v51 = vpack.i.bf16 %v5732_v7, %v5730_v48  ;;  %v3719_v42 = vpack.c.bf16 %v3644_v57, %v3643_v39  ;;  %v9797_v40 = vunpack.i.h.bf16 %v12836_v3  ;;  %v15826_v43 = vld [vmem:[#allocation44_spill] sm:$0xff] }
 0x334   : > { %4919 = vst.msk [vmem:[#allocation2 + $0x160] sm:$0xff] %vm3542_vm4, %v4793_v52  ;;  %v4794_v44 = vmax.f32 %v4668_v0, 0.0  ;;  %v15825_v52 = vld [vmem:[#allocation4_spill] sm:$0xff]  ;;  %v3518_v3 = vsel %vm893_vm0, %v15826_v43, %v9791_v4 }
 0x335   : > { %v4164_v19 = vpop.f32.mrb[124].mxu1  ;;  %9999 = vrot.lane.b32.xlu1 %v9998_v31, %s10485_s29  ;;  %v5043_v27 = vld [vmem:[#allocation2 + $0x150] ss:$2 sm:$0xff]  ;;  %v5169_v35 = vld [vmem:[#allocation2 + $0x151] ss:$2 sm:$0xff]  ;;  %v3519_v0 = vsel %vm893_vm0, %v15825_v52, %v9792_v33  ;;  %v3645_v20 = vsel %vm3542_vm4, %v3518_v3, %v9796_v22  ;;  %v9806_v33 = vunpack.i.l.bf16 %v12864_v63  ;;  %v15829_v52 = vld [vmem:[#allocation42_spill] sm:$0xff] }
 0x336   : > { %4920 = vst.msk [vmem:[#allocation2 + $0x168] sm:$0xff] %vm3542_vm4, %v4794_v44  ;;  %v4536_v29 = vmul.f32 %v12965_v47, %v4164_v19  ;;  %v9027_v30 = vpop.f32.mrb[125].mxu1  ;;  %v13356_v55 = vmax.f32 %v5043_v27, %v5169_v35  ;;  %v3646_v39 = vsel %vm3542_vm4, %v3519_v0, %v9797_v40  ;;  %v15827_v44 = vld [vmem:[#allocation11_spill] sm:$0xff] }
 0x337   : > { %v4167_v46 = vpop.f32.mrb[126].mxu1  ;;  %v9802_v7 = vunpack.i.h.bf16 %v15827_v44  ;;  %v9801_v48 = vunpack.i.l.bf16 %v15827_v44 }
 0x338   : > { %v4669_v24 = vadd.f32 %v12974_v38, %v4536_v29  ;;  %v4537_v21 = vmul.f32 %v12965_v47, %v4167_v46  ;;  %v9028_v25 = vpop.f32.mrb[127].mxu1  ;;  %v5419_v30 = vrot.slane %v13356_v55, 1  ;;  %v3720_v46 = vpack.c.bf16 %v3646_v39, %v3645_v20 }
 0x339   : > { %10004 = vrot.lane.b32.xlu1 %v10003_v51, %s10486_s27  ;;  %v5733_v22 = vrot.slane %v13356_v55, 2  ;;  %v3520_v0 = vsel %vm893_vm0, %v15829_v52, %v9801_v48  ;;  %v15830_v48 = vld [vmem:[#allocation18_spill] sm:$0xff] }
 0x33a   : > { %v4795_v10 = vmax.f32 %v4669_v24, 0.0  ;;  %v4670_v1 = vadd.f32 %v12974_v38, %v4537_v21  ;;  %9134 = vmatmul.mubr.msk.bf16.gmra.mrb[232].mxu1 %vm3756_vm5, %v3719_v42  ;;  %v5420_v63 = vsel %vm2152_vm1, %v5417_v16, %v5419_v30  ;;  %v3647_v20 = vsel %vm3542_vm4, %v3520_v0, %v9806_v33 }
 0x33b   : > { %9137 = vmatprep.mubr.msk.bf16.mxu1 %vm10484_vm3, %v15616_v9  ;;  %v5734_v44 = vsel %vm2784_vm2, %v5731_v53, %v5733_v22  ;;  %v9811_v33 = vunpack.i.l.bf16 %v15830_v48 }
 0x33c   : > { %4921 = vst.msk [vmem:[#allocation2 + $0x170] sm:$0xff] %vm3542_vm4, %v4795_v10  ;;  %v4796_v31 = vmax.f32 %v4670_v1, 0.0  ;;  %v15828_v10 = vld [vmem:[#allocation46_spill] sm:$0xff] }
 0x33d   : > { %v4172_v49 = vpop.f32.mrb[128].mxu1  ;;  %v5045_v13 = vld [vmem:[#allocation2 + $0x160] ss:$2 sm:$0xff]  ;;  %v5171_v57 = vld [vmem:[#allocation2 + $0x161] ss:$2 sm:$0xff]  ;;  %v3521_v1 = vsel %vm893_vm0, %v15828_v10, %v9802_v7 }
 0x33e   : > { %4922 = vst.msk [vmem:[#allocation2 + $0x178] sm:$0xff] %vm3542_vm4, %v4796_v31  ;;  %v4538_v26 = vmul.f32 %v12965_v47, %v4172_v49  ;;  %v9031_v19 = vpop.f32.mrb[129].mxu1  ;;  %v13370_v29 = vmax.f32 %v5045_v13, %v5171_v57  ;;  %v3648_v39 = vsel %vm3542_vm4, %v3521_v1, %v9807_v15  ;;  %v9812_v15 = vunpack.i.h.bf16 %v15830_v48 }
 0x33f   : > { %v4175_v4 = vpop.f32.mrb[130].mxu1 }
 0x340   : > { %v4671_v51 = vadd.f32 %v12974_v38, %v4538_v26  ;;  %v4539_v42 = vmul.f32 %v12965_v47, %v4175_v4  ;;  %v9032_v27 = vpop.f32.mrb[131].mxu1  ;;  %v5421_v35 = vrot.slane %v13370_v29, 1  ;;  %v5735_v40 = vrot.slane %v13370_v29, 2 }
 0x341   : > { %v9950_v3 = vpop.permute.xlu0 %9949  ;;  %v9817_v27 = vunpack.i.h.bf16 %v12881_v18 }
 0x342   : > { %v4797_v24 = vmax.f32 %v4671_v51, 0.0  ;;  %v4672_v21 = vadd.f32 %v12974_v38, %v4539_v42  ;;  %9138 = vmatmul.mubr.msk.bf16.gmra.mrb[236].mxu1 %vm3756_vm5, %v3720_v46  ;;  %v5422_v25 = vsel %vm2152_vm1, %v5419_v30, %v5421_v35  ;;  %v5736_v31 = vsel %vm2784_vm2, %v5733_v22, %v5735_v40 }
 0x343   : > { %v10008_v43 = vpack.i.bf16 %v5422_v25, %v5420_v63  ;;  %9141 = vmatprep.mubr.msk.bf16.mxu1 %vm10484_vm3, %v15616_v9  ;;  %v9952_v19 = vunpack.i.h.bf16 %v9950_v3  ;;  %v9951_v30 = vunpack.i.l.bf16 %v9950_v3  ;;  %v10013_v46 = vpack.i.bf16 %v5736_v31, %v5734_v44  ;;  %v15832_v3 = vld [vmem:[#allocation49_spill] sm:$0xff] }
 0x344   : > { %4923 = vst.msk [vmem:[#allocation2 + $0x180] sm:$0xff] %vm3542_vm4, %v4797_v24  ;;  %v4798_v16 = vmax.f32 %v4672_v21, 0.0  ;;  %v3721_v51 = vpack.c.bf16 %v3648_v39, %v3647_v20  ;;  %v9816_v24 = vunpack.i.l.bf16 %v12881_v18  ;;  %v3522_v20 = vsel %vm893_vm0, %v15832_v3, %v9811_v33 }
 0x345   : > { %v4180_v49 = vpop.f32.mrb[132].mxu1  ;;  %10009 = vrot.lane.b32.xlu0 %v10008_v43, %s10485_s29  ;;  %v5047_v7 = vld [vmem:[#allocation2 + $0x170] ss:$2 sm:$0xff]  ;;  %v5173_v26 = vld [vmem:[#allocation2 + $0x171] ss:$2 sm:$0xff]  ;;  %v9955_v42 = vpop.permute.xlu0 %9954  ;;  %v6015_v0 = vsel %vm3542_vm4, %v12897_v36, %v9952_v19  ;;  %v6014_v18 = vsel %vm3542_vm4, %v12822_v8, %v9951_v30  ;;  %v15831_v43 = vld [vmem:[#allocation53_spill] sm:$0xff]  ;;  %v9822_v44 = vunpack.i.h.bf16 %v12812_v11  ;;  %v9827_v33 = vunpack.i.h.bf16 %v12899_v5 }
 0x346   : > { %4924 = vst.msk [vmem:[#allocation2 + $0x188] sm:$0xff] %vm3542_vm4, %v4798_v16  ;;  %v4540_v13 = vmul.f32 %v12965_v47, %v4180_v49  ;;  %v9035_v57 = vpop.f32.mrb[133].mxu1  ;;  %v13414_v63 = vmax.f32 %v5047_v7, %v5173_v26  ;;  %v9957_v25 = vunpack.i.h.bf16 %v9955_v42  ;;  %v9956_v10 = vunpack.i.l.bf16 %v9955_v42  ;;  %v13438_v7 = vld [vmem:[%s15428_s5] ss:$0 sm:$0xff] }
 0x347   : > { %v4183_v4 = vpop.f32.mrb[134].mxu1  ;;  %v3649_v16 = vsel %vm3542_vm4, %v3522_v20, %v9816_v24  ;;  %v13451_v42 = vld [vmem:[%s15429_s6] ss:$0 sm:$0xff] }
 0x348   : > { %v4673_v21 = vadd.f32 %v12974_v38, %v4540_v13  ;;  %v4541_v53 = vmul.f32 %v12965_v47, %v4183_v4  ;;  %v9036_v22 = vpop.f32.mrb[135].mxu1  ;;  %v3523_v47 = vsel %vm893_vm0, %v15831_v43, %v9812_v15  ;;  %v6078_v39 = vsel %vm6069_vm6, %v6014_v18, %v9956_v10  ;;  %v15834_v18 = vld [vmem:[#allocation57_spill] sm:$0xff] }
 0x349   : > { %10014 = vrot.lane.b32.xlu0 %v10013_v46, %s10486_s27  ;;  %v3650_v36 = vsel %vm3542_vm4, %v3523_v47, %v9817_v27  ;;  %v5423_v48 = vrot.slane %v13414_v63, 1  ;;  %v9821_v15 = vunpack.i.l.bf16 %v12812_v11  ;;  %v9826_v4 = vunpack.i.l.bf16 %v12899_v5 }
 0x34a   : > { %v4799_v1 = vmax.f32 %v4673_v21, 0.0  ;;  %v4674_v52 = vadd.f32 %v12974_v38, %v4541_v53  ;;  %9142 = vmatmul.mubr.msk.bf16.gmra.mrb[240].mxu1 %vm3756_vm5, %v3721_v51  ;;  %v6079_v38 = vsel %vm6069_vm6, %v6015_v0, %v9957_v25  ;;  %v3722_v51 = vpack.c.bf16 %v3650_v36, %v3649_v16 }
 0x34b   : > { %9145 = vmatprep.mubr.msk.bf16.mxu1 %vm10484_vm3, %v15616_v9  ;;  %v6137_v31 = vpack.c.bf16 %v6079_v38, %v6078_v39  ;;  %v5737_v22 = vrot.slane %v13414_v63, 2  ;;  %v5424_v10 = vsel %vm2152_vm1, %v5421_v35, %v5423_v48  ;;  %v3524_v43 = vsel %vm893_vm0, %v15834_v18, %v9821_v15 }
 0x34c   : > { %4925 = vst.msk [vmem:[#allocation2 + $0x190] sm:$0xff] %vm3542_vm4, %v4799_v1  ;;  %v4800_v8 = vmax.f32 %v4674_v52, 0.0  ;;  %v15833_v52 = vld [vmem:[#allocation50_spill] sm:$0xff]  ;;  %v3651_v3 = vsel %vm3542_vm4, %v3524_v43, %v9826_v4  ;;  %v9836_v15 = vunpack.i.l.bf16 %v12925_v58 }
 0x34d   : > { %v4188_v49 = vpop.f32.mrb[136].mxu1  ;;  %v5049_v13 = vld [vmem:[#allocation2 + $0x180] ss:$2 sm:$0xff]  ;;  %v5175_v57 = vld [vmem:[#allocation2 + $0x181] ss:$2 sm:$0xff]  ;;  %9205 = vmatprep.mubr.msk.bf16.mxu0 %vm6213_vm7, %v6137_v31  ;;  %v3525_v0 = vsel %vm893_vm0, %v15833_v52, %v9822_v44 }
 0x34e   : > { %4926 = vst.msk [vmem:[#allocation2 + $0x198] sm:$0xff] %vm3542_vm4, %v4800_v8  ;;  %v4542_v26 = vmul.f32 %v13438_v7, %v4188_v49  ;;  %v9039_v19 = vpop.f32.mrb[137].mxu1  ;;  %v13441_v30 = vmax.f32 %v5049_v13, %v5175_v57  ;;  %v3652_v20 = vsel %vm3542_vm4, %v3525_v0, %v9827_v33  ;;  %v5738_v8 = vsel %vm2784_vm2, %v5735_v40, %v5737_v22  ;;  %v15837_v52 = vld [vmem:[#allocation58_spill] sm:$0xff] }
 0x34f   : > { %v4191_v46 = vpop.f32.mrb[138].mxu1  ;;  %v9832_v13 = vunpack.i.h.bf16 %v12840_v50  ;;  %v9831_v57 = vunpack.i.l.bf16 %v12840_v50  ;;  %v3723_v19 = vpack.c.bf16 %v3652_v20, %v3651_v3  ;;  %v9842_v40 = vunpack.i.h.bf16 %v12868_v56 }
 0x350   : > { %v4675_v27 = vadd.f32 %v13451_v42, %v4542_v26  ;;  %v4543_v24 = vmul.f32 %v13438_v7, %v4191_v46  ;;  %v9040_v21 = vpop.f32.mrb[139].mxu1  ;;  %v5425_v53 = vrot.slane %v13441_v30, 1  ;;  %v5739_v11 = vrot.slane %v13441_v30, 2 }
 0x351   : > { %v9841_v50 = vunpack.i.l.bf16 %v12868_v56  ;;  %v15835_v21 = vld [vmem:[#allocation3_spill] sm:$0xff]  ;;  %v3529_v0 = vsel %vm893_vm0, %v15837_v52, %v9842_v40 }
 0x352   : > { %v4801_v25 = vmax.f32 %v4675_v27, 0.0  ;;  %v4676_v5 = vadd.f32 %v13451_v42, %v4543_v24  ;;  %9146 = vmatmul.mubr.msk.bf16.gmra.mrb[244].mxu1 %vm3756_vm5, %v3722_v51  ;;  %v5426_v1 = vsel %vm2152_vm1, %v5423_v48, %v5425_v53  ;;  %v5740_v39 = vsel %vm2784_vm2, %v5737_v22, %v5739_v11  ;;  %v15836_v22 = vld [vmem:[#allocation5_spill] sm:$0xff] }
 0x353   : > { %v10018_v47 = vpack.i.bf16 %v5426_v1, %v5424_v10  ;;  %9149 = vmatprep.mubr.msk.bf16.mxu1 %vm10484_vm3, %v15616_v9  ;;  %v10023_v26 = vpack.i.bf16 %v5740_v39, %v5738_v8  ;;  %v9837_v48 = vunpack.i.h.bf16 %v12925_v58  ;;  %v3527_v58 = vsel %vm893_vm0, %v15835_v21, %v9832_v13 }
 0x354   : > { %4927 = vst.msk [vmem:[#allocation2 + $0x1a0] sm:$0xff] %vm3542_vm4, %v4801_v25  ;;  %v4802_v35 = vmax.f32 %v4676_v5, 0.0  ;;  %v3526_v25 = vsel %vm893_vm0, %v15836_v22, %v9831_v57 }
 0x355   : > { %v4196_v38 = vpop.f32.mrb[140].mxu1  ;;  %10019 = vrot.lane.b32.xlu1 %v10018_v47, %s10485_s29  ;;  %v5051_v31 = vld [vmem:[#allocation2 + $0x190] ss:$2 sm:$0xff]  ;;  %v5177_v49 = vld [vmem:[#allocation2 + $0x191] ss:$2 sm:$0xff]  ;;  %v3653_v5 = vsel %vm3542_vm4, %v3526_v25, %v9836_v15  ;;  %v3654_v10 = vsel %vm3542_vm4, %v3527_v58, %v9837_v48 }
 0x356   : > { %4928 = vst.msk [vmem:[#allocation2 + $0x1a8] sm:$0xff] %vm3542_vm4, %v4802_v35  ;;  %v4544_v16 = vmul.f32 %v13438_v7, %v4196_v38  ;;  %v9043_v36 = vpop.f32.mrb[141].mxu1  ;;  %v13492_v51 = vmax.f32 %v5051_v31, %v5177_v49  ;;  %v15838_v35 = vld [vmem:[#allocation54_spill] sm:$0xff]  ;;  %v9847_v31 = vunpack.i.h.bf16 %v12952_v60  ;;  %v9846_v49 = vunpack.i.l.bf16 %v12952_v60 }
 0x357   : > { %v4199_v44 = vpop.f32.mrb[142].mxu1  ;;  %v3528_v39 = vsel %vm893_vm0, %v15838_v35, %v9841_v50  ;;  %v3724_v57 = vpack.c.bf16 %v3654_v10, %v3653_v5 }
 0x358   : > { %v4677_v33 = vadd.f32 %v13451_v42, %v4544_v16  ;;  %v4545_v4 = vmul.f32 %v13438_v7, %v4199_v44  ;;  %v9044_v46 = vpop.f32.mrb[143].mxu1  ;;  %v9960_v1 = vpop.permute.xlu1 %9959  ;;  %v5427_v3 = vrot.slane %v13492_v51, 1  ;;  %v5741_v44 = vrot.slane %v13492_v51, 2 }
 0x359   : > { %10024 = vrot.lane.b32.xlu1 %v10023_v26, %s10486_s27  ;;  %v9962_v20 = vunpack.i.h.bf16 %v9960_v1  ;;  %v9961_v8 = vunpack.i.l.bf16 %v9960_v1  ;;  %v3655_v22 = vsel %vm3542_vm4, %v3528_v39, %v9846_v49  ;;  %v3656_v5 = vsel %vm3542_vm4, %v3529_v0, %v9847_v31 }
 0x35a   : > { %v4803_v27 = vmax.f32 %v4677_v33, 0.0  ;;  %v4678_v24 = vadd.f32 %v13451_v42, %v4545_v4  ;;  %9150 = vmatmul.mubr.msk.bf16.gmra.mrb[248].mxu1 %vm3756_vm5, %v3723_v19  ;;  %v5428_v46 = vsel %vm2152_vm1, %v5425_v53, %v5427_v3  ;;  %v5742_v0 = vsel %vm2784_vm2, %v5739_v11, %v5741_v44 }
 0x35b   : > { %9153 = vmatprep.mubr.msk.bf16.mxu1 %vm10484_vm3, %v15616_v9  ;;  %v6017_v60 = vsel %vm3542_vm4, %v12999_v37, %v9962_v20  ;;  %v6016_v58 = vsel %vm3542_vm4, %v12913_v32, %v9961_v8  ;;  %v9857_v8 = vunpack.i.h.bf16 %v12979_v54  ;;  %v9856_v31 = vunpack.i.l.bf16 %v12979_v54 }
 0x35c   : > { %4929 = vst.msk [vmem:[#allocation2 + $0x1b0] sm:$0xff] %vm3542_vm4, %v4803_v27  ;;  %v4804_v56 = vmax.f32 %v4678_v24, 0.0  ;;  %v9965_v4 = vpop.permute.xlu1 %9964 }
 0x35d   : > { %v4204_v18 = vpop.f32.mrb[144].mxu1  ;;  %v5053_v43 = vld [vmem:[#allocation2 + $0x1a0] ss:$2 sm:$0xff]  ;;  %v5179_v47 = vld [vmem:[#allocation2 + $0x1a1] ss:$2 sm:$0xff]  ;;  %v9967_v40 = vunpack.i.h.bf16 %v9965_v4  ;;  %v9966_v50 = vunpack.i.l.bf16 %v9965_v4  ;;  %v15841_v4 = vld [vmem:[#allocation60_spill] sm:$0xff] }
 0x35e   : > { %4930 = vst.msk [vmem:[#allocation2 + $0x1b8] sm:$0xff] %vm3542_vm4, %v4804_v56  ;;  %v4546_v38 = vmul.f32 %v13438_v7, %v4204_v18  ;;  %v9047_v16 = vpop.f32.mrb[145].mxu1  ;;  %v13513_v36 = vmax.f32 %v5053_v43, %v5179_v47  ;;  %v3725_v43 = vpack.c.bf16 %v3656_v5, %v3655_v22  ;;  %v15839_v47 = vld [vmem:[#allocation17_spill] sm:$0xff] }
 0x35f   : > { %v4207_v13 = vpop.f32.mrb[146].mxu1  ;;  %v6080_v37 = vsel %vm6069_vm6, %v6016_v58, %v9966_v50  ;;  %v6081_v25 = vsel %vm6069_vm6, %v6017_v60, %v9967_v40  ;;  %v9851_v20 = vunpack.i.l.bf16 %v15839_v47 }
 0x360   : > { %v4679_v26 = vadd.f32 %v13451_v42, %v4546_v38  ;;  %v4547_v19 = vmul.f32 %v13438_v7, %v4207_v13  ;;  %v9048_v48 = vpop.f32.mrb[147].mxu1  ;;  %v5429_v15 = vrot.slane %v13513_v36, 1  ;;  %v5743_v33 = vrot.slane %v13513_v36, 2 }
 0x361   : > { %v6138_v32 = vpack.c.bf16 %v6081_v25, %v6080_v37  ;;  %v3530_v54 = vsel %vm893_vm0, %v15841_v4, %v9851_v20 }
 0x362   : > { %v4805_v27 = vmax.f32 %v4679_v26, 0.0  ;;  %v4680_v24 = vadd.f32 %v13451_v42, %v4547_v19  ;;  %9154 = vmatmul.mubr.msk.bf16.gmra.mrb[252].mxu1 %vm3756_vm5, %v3724_v57  ;;  %v5430_v21 = vsel %vm2152_vm1, %v5427_v3, %v5429_v15  ;;  %v5744_v56 = vsel %vm2784_vm2, %v5741_v44, %v5743_v33  ;;  %v15840_v19 = vld [vmem:[#allocation10_spill] sm:$0xff] }
 0x363   : > { %v10028_v53 = vpack.i.bf16 %v5430_v21, %v5428_v46  ;;  %9157 = vmatprep.mubr.msk.bf16.mxu1 %vm10484_vm3, %v15616_v9  ;;  %9206 = vmatmul.mubr.msk.bf16.gmra.mrb[104].mxu0 %vm6213_vm7, %v6138_v32  ;;  %v9852_v3 = vunpack.i.h.bf16 %v15839_v47  ;;  %v10033_v39 = vpack.i.bf16 %v5744_v56, %v5742_v0  ;;  %v3657_v46 = vsel %vm3542_vm4, %v3530_v54, %v9856_v31  ;;  %v15842_v21 = vld [vmem:[#allocation15_spill] sm:$0xff] }
 0x364   : > { %4931 = vst.msk [vmem:[#allocation2 + $0x1c0] sm:$0xff] %vm3542_vm4, %v4805_v27  ;;  %v4806_v10 = vmax.f32 %v4680_v24, 0.0  ;;  %v9862_v58 = vunpack.i.h.bf16 %v15842_v21  ;;  %v9867_v56 = vunpack.i.h.bf16 %v12996_v41  ;;  %v9866_v32 = vunpack.i.l.bf16 %v12996_v41 }
 0x365   : > { %v4212_v1 = vpop.f32.mrb[148].mxu1  ;;  %10029 = vrot.lane.b32.xlu0 %v10028_v53, %s10485_s29  ;;  %v5055_v38 = vld [vmem:[#allocation2 + $0x1b0] ss:$2 sm:$0xff]  ;;  %v5181_v16 = vld [vmem:[#allocation2 + $0x1b1] ss:$2 sm:$0xff]  ;;  %v3531_v48 = vsel %vm893_vm0, %v15840_v19, %v9852_v3  ;;  %v15845_v19 = vld [vmem:[#allocation22_spill] sm:$0xff] }
 0x366   : > { %4932 = vst.msk [vmem:[#allocation2 + $0x1c8] sm:$0xff] %vm3542_vm4, %v4806_v10  ;;  %v4548_v52 = vmul.f32 %v13438_v7, %v4212_v1  ;;  %v9051_v18 = vpop.f32.mrb[149].mxu1  ;;  %v13560_v26 = vmax.f32 %v5055_v38, %v5181_v16  ;;  %v3658_v60 = vsel %vm3542_vm4, %v3531_v48, %v9857_v8  ;;  %v9861_v10 = vunpack.i.l.bf16 %v15842_v21  ;;  %v15843_v38 = vld [vmem:[#allocation62_spill] sm:$0xff]  ;;  %v15844_v8 = vld [vmem:[#allocation8_spill] sm:$0xff] }
 0x367   : > { %v4215_v35 = vpop.f32.mrb[150].mxu1  ;;  %v3726_v5 = vpack.c.bf16 %v3658_v60, %v3657_v46  ;;  %v3533_v16 = vsel %vm893_vm0, %v15843_v38, %v9862_v58  ;;  %v9872_v48 = vunpack.i.h.bf16 %v15845_v19  ;;  %v9871_v4 = vunpack.i.l.bf16 %v15845_v19 }
 0x368   : > { %v4681_v49 = vadd.f32 %v13451_v42, %v4548_v52  ;;  %v4549_v13 = vmul.f32 %v13438_v7, %v4215_v35  ;;  %v9052_v11 = vpop.f32.mrb[151].mxu1  ;;  %v5431_v25 = vrot.slane %v13560_v26, 1  ;;  %v5745_v3 = vrot.slane %v13560_v26, 2 }
 0x369   : > { %10034 = vrot.lane.b32.xlu0 %v10033_v39, %s10486_s27  ;;  %v3532_v31 = vsel %vm893_vm0, %v15844_v8, %v9861_v10  ;;  %v3660_v11 = vsel %vm3542_vm4, %v3533_v16, %v9867_v56 }
 0x36a   : > { %v4807_v57 = vmax.f32 %v4681_v49, 0.0  ;;  %v4682_v44 = vadd.f32 %v13451_v42, %v4549_v13  ;;  %9158 = vmatmul.mubr.msk.bf16.gmra.mrb[0].mxu1 %vm3756_vm5, %v3725_v43  ;;  %v5432_v41 = vsel %vm2152_vm1, %v5429_v15, %v5431_v25  ;;  %v3659_v13 = vsel %vm3542_vm4, %v3532_v31, %v9866_v32 }
 0x36b   : > { %9161 = vmatprep.mubr.msk.bf16.mxu1 %vm10484_vm3, %v15616_v9 }
 0x36c   : > { %4933 = vst.msk [vmem:[#allocation2 + $0x1d0] sm:$0xff] %vm3542_vm4, %v4807_v57  ;;  %v4808_v40 = vmax.f32 %v4682_v44, 0.0 }
 0x36d   : > { %v4220_v50 = vpop.f32.mrb[152].mxu1  ;;  %v5057_v27 = vld [vmem:[#allocation2 + $0x1c0] ss:$2 sm:$0xff]  ;;  %v5183_v24 = vld [vmem:[#allocation2 + $0x1c1] ss:$2 sm:$0xff] }
 0x36e   : > { %4934 = vst.msk [vmem:[#allocation2 + $0x1d8] sm:$0xff] %vm3542_vm4, %v4808_v40  ;;  %v4550_v22 = vmul.f32 %v13438_v7, %v4220_v50  ;;  %v9055_v53 = vpop.f32.mrb[153].mxu1  ;;  %v13574_v37 = vmax.f32 %v5057_v27, %v5183_v24  ;;  %v5746_v40 = vsel %vm2784_vm2, %v5743_v33, %v5745_v3  ;;  %v3727_v50 = vpack.c.bf16 %v3660_v11, %v3659_v13  ;;  %v15846_v27 = vld [vmem:[#allocation26_spill] sm:$0xff] }
 0x36f   : > { %v4223_v1 = vpop.f32.mrb[154].mxu1  ;;  %v9877_v24 = vunpack.i.h.bf16 %v15846_v27  ;;  %v9876_v21 = vunpack.i.l.bf16 %v15846_v27 }
 0x370   : > { %v4683_v52 = vadd.f32 %v13451_v42, %v4550_v22  ;;  %v4551_v18 = vmul.f32 %v13438_v7, %v4223_v1  ;;  %v9056_v0 = vpop.f32.mrb[155].mxu1  ;;  %v5433_v43 = vrot.slane %v13574_v37, 1  ;;  %v5747_v47 = vrot.slane %v13574_v37, 2 }
 0x372   : > { %v4809_v20 = vmax.f32 %v4683_v52, 0.0  ;;  %v4684_v35 = vadd.f32 %v13451_v42, %v4551_v18  ;;  %9162 = vmatmul.mubr.msk.bf16.gmra.mrb[4].mxu1 %vm3756_vm5, %v3726_v5  ;;  %v5434_v39 = vsel %vm2152_vm1, %v5431_v25, %v5433_v43  ;;  %v5748_v57 = vsel %vm2784_vm2, %v5745_v3, %v5747_v47  ;;  %v15847_v52 = vld [vmem:[#allocation65_spill] sm:$0xff] }
 0x373   : > { %v10038_v49 = vpack.i.bf16 %v5434_v39, %v5432_v41  ;;  %9165 = vmatprep.mubr.msk.bf16.mxu1 %vm10484_vm3, %v15616_v9  ;;  %v10043_v22 = vpack.i.bf16 %v5748_v57, %v5746_v40  ;;  %v3534_v33 = vsel %vm893_vm0, %v15847_v52, %v9871_v4  ;;  %v15849_v40 = vld [vmem:[#allocation20_spill] sm:$0xff] }
 0x374   : > { %4935 = vst.msk [vmem:[#allocation2 + $0x1e0] sm:$0xff] %vm3542_vm4, %v4809_v20  ;;  %v4810_v15 = vmax.f32 %v4684_v35, 0.0  ;;  %v9970_v60 = vpop.permute.xlu0 %9969  ;;  %v15848_v35 = vld [vmem:[#allocation68_spill] sm:$0xff]  ;;  %v3661_v39 = vsel %vm3542_vm4, %v3534_v33, %v9876_v21 }
 0x375   : > { %v4228_v44 = vpop.f32.mrb[156].mxu1  ;;  %10039 = vrot.lane.b32.xlu1 %v10038_v49, %s10485_s29  ;;  %v5059_v53 = vld [vmem:[#allocation2 + $0x1d0] ss:$2 sm:$0xff]  ;;  %v5185_v25 = vld [vmem:[#allocation2 + $0x1d1] ss:$2 sm:$0xff]  ;;  %v9972_v56 = vunpack.i.h.bf16 %v9970_v60  ;;  %v9971_v32 = vunpack.i.l.bf16 %v9970_v60  ;;  %v3535_v41 = vsel %vm893_vm0, %v15848_v35, %v9872_v48 }
 0x376   : > { %4936 = vst.msk [vmem:[#allocation2 + $0x1e8] sm:$0xff] %vm3542_vm4, %v4810_v15  ;;  %v4552_v54 = vmul.f32 %v13438_v7, %v4228_v44  ;;  %v9059_v46 = vpop.f32.mrb[157].mxu1  ;;  %v13622_v20 = vmax.f32 %v5059_v53, %v5185_v25  ;;  %v3662_v8 = vsel %vm3542_vm4, %v3535_v41, %v9877_v24  ;;  %v9887_v25 = vunpack.i.h.bf16 %v13057_v34 }
 0x377   : > { %v4231_v58 = vpop.f32.mrb[158].mxu1  ;;  %v6019_v49 = vsel %vm3542_vm4, %v13093_v17, %v9972_v56  ;;  %v6018_v13 = vsel %vm3542_vm4, %v13015_v45, %v9971_v32  ;;  %v3728_v60 = vpack.c.bf16 %v3662_v8, %v3661_v39  ;;  %v9882_v45 = vunpack.i.h.bf16 %v15849_v40 }
 0x378   : > { %v4685_v5 = vadd.f32 %v13451_v42, %v4552_v54  ;;  %v4553_v10 = vmul.f32 %v13438_v7, %v4231_v58  ;;  %v9060_v1 = vpop.f32.mrb[159].mxu1  ;;  %v9975_v3 = vpop.permute.xlu0 %9974  ;;  %v5435_v17 = vrot.slane %v13622_v20, 1 }
 0x379   : > { %10044 = vrot.lane.b32.xlu1 %v10043_v22, %s10486_s27  ;;  %v9977_v38 = vunpack.i.h.bf16 %v9975_v3  ;;  %v9976_v16 = vunpack.i.l.bf16 %v9975_v3 }
 0x37a   : > { %v4811_v18 = vmax.f32 %v4685_v5, 0.0  ;;  %v4686_v0 = vadd.f32 %v13451_v42, %v4553_v10  ;;  %9166 = vmatmul.mubr.msk.bf16.gmra.mrb[8].mxu1 %vm3756_vm5, %v3727_v50  ;;  %v9881_v50 = vunpack.i.l.bf16 %v15849_v40  ;;  %v9886_v5 = vunpack.i.l.bf16 %v13057_v34  ;;  %v15850_v34 = vld [vmem:[#allocation73_spill] sm:$0xff] }
 0x37b   : > { %9169 = vmatprep.mubr.msk.bf16.mxu1 %vm10484_vm3, %v15616_v9  ;;  %v6082_v11 = vsel %vm6069_vm6, %v6018_v13, %v9976_v16  ;;  %v6083_v15 = vsel %vm6069_vm6, %v6019_v49, %v9977_v38  ;;  %v5749_v10 = vrot.slane %v13622_v20, 2  ;;  %v5436_v1 = vsel %vm2152_vm1, %v5433_v43, %v5435_v17  ;;  %v15852_v16 = vld [vmem:[#allocation21_spill] sm:$0xff] }
 0x37c   : > { %4937 = vst.msk [vmem:[#allocation2 + $0x1f0] sm:$0xff] %vm3542_vm4, %v4811_v18  ;;  %v4812_v31 = vmax.f32 %v4686_v0, 0.0  ;;  %v6139_v48 = vpack.c.bf16 %v6083_v15, %v6082_v11  ;;  %v3537_v18 = vsel %vm893_vm0, %v15850_v34, %v9882_v45  ;;  %v15851_v0 = vld [vmem:[#allocation66_spill] sm:$0xff]  ;;  %v9891_v8 = vunpack.i.l.bf16 %v15852_v16 }
 0x37d   : > { %v4236_v57 = vpop.f32.mrb[160].mxu1  ;;  %v5061_v44 = vld [vmem:[#allocation2 + $0x1e0] ss:$2 sm:$0xff]  ;;  %v5187_v19 = vld [vmem:[#allocation2 + $0x1e1] ss:$2 sm:$0xff]  ;;  %v3536_v3 = vsel %vm893_vm0, %v15851_v0, %v9881_v50  ;;  %v3664_v39 = vsel %vm3542_vm4, %v3537_v18, %v9887_v25  ;;  %v5750_v13 = vsel %vm2784_vm2, %v5747_v47, %v5749_v10 }
 0x37e   : > { %4938 = vst.msk [vmem:[#allocation2 + $0x1f8] sm:$0xff] %vm3542_vm4, %v4812_v31  ;;  %v4554_v4 = vmul.f32 %v13438_v7, %v4236_v57  ;;  %v9063_v54 = vpop.f32.mrb[161].mxu1  ;;  %v13639_v46 = vmax.f32 %v5061_v44, %v5187_v19  ;;  %9209 = vmatprep.mubr.msk.bf16.mxu0 %vm6213_vm7, %v6139_v48  ;;  %v3663_v41 = vsel %vm3542_vm4, %v3536_v3, %v9886_v5  ;;  %v9892_v57 = vunpack.i.h.bf16 %v15852_v16  ;;  %v9980_v48 = vpop.permute.xlu1 %9979 }
 0x37f   : > { %v4239_v27 = vpop.f32.mrb[162].mxu1  ;;  %v9896_v44 = vunpack.i.l.bf16 %v13075_v28  ;;  %v3729_v54 = vpack.c.bf16 %v3664_v39, %v3663_v41  ;;  %v9982_v50 = vunpack.i.h.bf16 %v9980_v48 }
 0x380   : > { %v4687_v24 = vadd.f32 %v13451_v42, %v4554_v4  ;;  %v4555_v21 = vmul.f32 %v13438_v7, %v4239_v27  ;;  %v9064_v58 = vpop.f32.mrb[163].mxu1  ;;  %v5437_v22 = vrot.slane %v13639_v46, 1  ;;  %v5751_v53 = vrot.slane %v13639_v46, 2 }
 0x381   : > { %v9981_v27 = vunpack.i.l.bf16 %v9980_v48  ;;  %v6021_v34 = vsel %vm3542_vm4, %v13166_v12, %v9982_v50 }
 0x382   : > { %v4813_v56 = vmax.f32 %v4687_v24, 0.0  ;;  %v4688_v32 = vadd.f32 %v13451_v42, %v4555_v21  ;;  %9170 = vmatmul.mubr.msk.bf16.gmra.mrb[12].mxu1 %vm3756_vm5, %v3728_v60  ;;  %v5438_v52 = vsel %vm2152_vm1, %v5435_v17, %v5437_v22  ;;  %v5752_v43 = vsel %vm2784_vm2, %v5749_v10, %v5751_v53  ;;  %v15853_v24 = vld [vmem:[#allocation9_spill] sm:$0xff] }
 0x383   : > { %v10048_v33 = vpack.i.bf16 %v5438_v52, %v5436_v1  ;;  %9173 = vmatprep.mubr.msk.bf16.mxu1 %vm10484_vm3, %v15616_v9  ;;  %v10053_v4 = vpack.i.bf16 %v5752_v43, %v5750_v13  ;;  %v9897_v17 = vunpack.i.h.bf16 %v13075_v28  ;;  %v3538_v21 = vsel %vm893_vm0, %v15853_v24, %v9891_v8  ;;  %v15854_v28 = vld [vmem:[#allocation7_spill] sm:$0xff] }
 0x384   : > { %4939 = vst.msk [vmem:[#allocation2 + $0x200] sm:$0xff] %vm3542_vm4, %v4813_v56  ;;  %v4814_v35 = vmax.f32 %v4688_v32, 0.0  ;;  %v3539_v5 = vsel %vm893_vm0, %v15854_v28, %v9892_v57  ;;  %v3665_v10 = vsel %vm3542_vm4, %v3538_v21, %v9896_v44  ;;  %v6020_v18 = vsel %vm3542_vm4, %v13110_v23, %v9981_v27  ;;  %v15857_v21 = vld [vmem:[#allocation70_spill] sm:$0xff] }
 0x385   : > { %v4244_v38 = vpop.f32.mrb[164].mxu1  ;;  %10049 = vrot.lane.b32.xlu0 %v10048_v33, %s10485_s29  ;;  %v5063_v11 = vld [vmem:[#allocation2 + $0x1f0] ss:$2 sm:$0xff]  ;;  %v5189_v15 = vld [vmem:[#allocation2 + $0x1f1] ss:$2 sm:$0xff]  ;;  %v3666_v32 = vsel %vm3542_vm4, %v3539_v5, %v9897_v17 }
 0x386   : > { %4940 = vst.msk [vmem:[#allocation2 + $0x208] sm:$0xff] %vm3542_vm4, %v4814_v35  ;;  %v4556_v31 = vmul.f32 %v13438_v7, %v4244_v38  ;;  %v9067_v49 = vpop.f32.mrb[165].mxu1  ;;  %v13685_v47 = vmax.f32 %v5063_v11, %v5189_v15  ;;  %v3730_v12 = vpack.c.bf16 %v3666_v32, %v3665_v10 }
 0x387   : > { %v4247_v19 = vpop.f32.mrb[166].mxu1  ;;  %v9985_v56 = vpop.permute.xlu1 %9984 }
 0x388   : > { %v4689_v60 = vadd.f32 %v13451_v42, %v4556_v31  ;;  %v4557_v40 = vmul.f32 %v13438_v7, %v4247_v19  ;;  %v9068_v45 = vpop.f32.mrb[167].mxu1  ;;  %v9987_v52 = vunpack.i.h.bf16 %v9985_v56  ;;  %v9986_v33 = vunpack.i.l.bf16 %v9985_v56  ;;  %v15855_v31 = vld [vmem:[#allocation19_spill] sm:$0xff] }
 0x389   : > { %10054 = vrot.lane.b32.xlu0 %v10053_v4, %s10486_s27  ;;  %v5439_v43 = vrot.slane %v13685_v47, 1  ;;  %v9902_v49 = vunpack.i.h.bf16 %v15855_v31  ;;  %v9901_v23 = vunpack.i.l.bf16 %v15855_v31  ;;  %v9907_v4 = vunpack.i.h.bf16 %v13089_v6 }
 0x38a   : > { %v4815_v58 = vmax.f32 %v4689_v60, 0.0  ;;  %v4690_v25 = vadd.f32 %v13451_v42, %v4557_v40  ;;  %9174 = vmatmul.mubr.msk.bf16.gmra.mrb[16].mxu1 %vm3756_vm5, %v3729_v54  ;;  %v6084_v41 = vsel %vm6069_vm6, %v6020_v18, %v9986_v33  ;;  %v6085_v39 = vsel %vm6069_vm6, %v6021_v34, %v9987_v52 }
 0x38b   : > { %9177 = vmatprep.mubr.msk.bf16.mxu1 %vm10484_vm3, %v15616_v9  ;;  %v6140_v13 = vpack.c.bf16 %v6085_v39, %v6084_v41  ;;  %v9906_v54 = vunpack.i.l.bf16 %v13089_v6  ;;  %v5753_v17 = vrot.slane %v13685_v47, 2  ;;  %v5440_v45 = vsel %vm2152_vm1, %v5437_v22, %v5439_v43  ;;  %v15856_v6 = vld [vmem:[#allocation77_spill] sm:$0xff] }
 0x38c   : > { %4941 = vst.msk [vmem:[#allocation2 + $0x210] sm:$0xff] %vm3542_vm4, %v4815_v58  ;;  %v4816_v1 = vmax.f32 %v4690_v25, 0.0  ;;  %v3541_v24 = vsel %vm893_vm0, %v15856_v6, %v9902_v49  ;;  %v3540_v58 = vsel %vm893_vm0, %v15857_v21, %v9901_v23 }
 0x38d   : > { %v4252_v0 = vpop.f32.mrb[168].mxu1  ;;  %v5065_v3 = vld [vmem:[#allocation2 + $0x200] ss:$2 sm:$0xff]  ;;  %v5191_v35 = vld [vmem:[#allocation2 + $0x201] ss:$2 sm:$0xff]  ;;  %9210 = vmatmul.mubr.msk.bf16.gmra.mrb[108].mxu0 %vm6213_vm7, %v6140_v13  ;;  %v3667_v28 = vsel %vm3542_vm4, %v3540_v58, %v9906_v54  ;;  %v3668_v5 = vsel %vm3542_vm4, %v3541_v24, %v9907_v4  ;;  %v5754_v32 = vsel %vm2784_vm2, %v5751_v53, %v5753_v17 }
 0x38e   : > { %4942 = vst.msk [vmem:[#allocation2 + $0x218] sm:$0xff] %vm3542_vm4, %v4816_v1  ;;  %v4558_v38 = vmul.f32 %v13438_v7, %v4252_v0  ;;  %v9071_v16 = vpop.f32.mrb[169].mxu1  ;;  %v13707_v8 = vmax.f32 %v5065_v3, %v5191_v35  ;;  %v3731_v0 = vpack.c.bf16 %v3668_v5, %v3667_v28 }
 0x38f   : > { %v4255_v11 = vpop.f32.mrb[170].mxu1 }
 0x390   : > { %v4691_v15 = vadd.f32 %v13451_v42, %v4558_v38  ;;  %v4559_v57 = vmul.f32 %v13438_v7, %v4255_v11  ;;  %v9072_v44 = vpop.f32.mrb[171].mxu1  ;;  %v5441_v19 = vrot.slane %v13707_v8, 1  ;;  %v5755_v48 = vrot.slane %v13707_v8, 2 }
 0x392   : > { %v4817_v60 = vmax.f32 %v4691_v15, 0.0  ;;  %v4692_v40 = vadd.f32 %v13451_v42, %v4559_v57  ;;  %9178 = vmatmul.mubr.msk.bf16.gmra.mrb[20].mxu1 %vm3756_vm5, %v3730_v12  ;;  %v5442_v50 = vsel %vm2152_vm1, %v5439_v43, %v5441_v19  ;;  %v5756_v22 = vsel %vm2784_vm2, %v5753_v17, %v5755_v48 }
 0x393   : > { %v10058_v27 = vpack.i.bf16 %v5442_v50, %v5440_v45  ;;  %9181 = vmatprep.mubr.msk.bf16.mxu1 %vm10484_vm3, %v15616_v9  ;;  %v9990_v34 = vpop.permute.xlu0 %9989  ;;  %v10063_v18 = vpack.i.bf16 %v5756_v22, %v5754_v32 }
 0x394   : > { %4943 = vst.msk [vmem:[#allocation2 + $0x220] sm:$0xff] %vm3542_vm4, %v4817_v60  ;;  %v4818_v25 = vmax.f32 %v4692_v40, 0.0  ;;  %v9992_v41 = vunpack.i.h.bf16 %v9990_v34  ;;  %v9991_v39 = vunpack.i.l.bf16 %v9990_v34 }
 0x395   : > { %v4260_v10 = vpop.f32.mrb[172].mxu1  ;;  %10059 = vrot.lane.b32.xlu1 %v10058_v27, %s10485_s29  ;;  %v5067_v1 = vld [vmem:[#allocation2 + $0x210] ss:$2 sm:$0xff]  ;;  %v5193_v52 = vld [vmem:[#allocation2 + $0x211] ss:$2 sm:$0xff] }
 0x396   : > { %4944 = vst.msk [vmem:[#allocation2 + $0x228] sm:$0xff] %vm3542_vm4, %v4818_v25  ;;  %v4560_v9 = vmul.f32 %v13438_v7, %v4260_v10  ;;  %v9075_v56 = vpop.f32.mrb[173].mxu1  ;;  %v13748_v38 = vmax.f32 %v5067_v1, %v5193_v52  ;;  %v6023_v13 = vsel %vm3542_vm4, %v13226_v62, %v9992_v41  ;;  %v6022_v11 = vsel %vm3542_vm4, %v13177_v59, %v9991_v39 }
 0x397   : > { %v4263_v33 = vpop.f32.mrb[174].mxu1  ;;  %v9995_v12 = vpop.permute.xlu0 %9994 }
 0x398   : > { %v4693_v3 = vadd.f32 %v13451_v42, %v4560_v9  ;;  %v4561_v35 = vmul.f32 %v13438_v7, %v4263_v33  ;;  %v9076_v43 = vpop.f32.mrb[175].mxu1  ;;  %v9997_v49 = vunpack.i.h.bf16 %v9995_v12  ;;  %v9996_v23 = vunpack.i.l.bf16 %v9995_v12 }
 0x399   : > { %10064 = vrot.lane.b32.xlu1 %v10063_v18, %s10486_s27  ;;  %v5443_v4 = vrot.slane %v13748_v38, 1  ;;  %v5757_v58 = vrot.slane %v13748_v38, 2 }
 0x39a   : > { %v4819_v16 = vmax.f32 %v4693_v3, 0.0  ;;  %v4694_v53 = vadd.f32 %v13451_v42, %v4561_v35  ;;  %9182 = vmatmul.mubr.msk.bf16.gmra.mrb[24].mxu1 %vm3756_vm5, %v3731_v0  ;;  %v6086_v54 = vsel %vm6069_vm6, %v6022_v11, %v9996_v23  ;;  %v6087_v17 = vsel %vm6069_vm6, %v6023_v13, %v9997_v49 }
 0x39b   : > { %v6141_v62 = vpack.c.bf16 %v6087_v17, %v6086_v54  ;;  %v5444_v28 = vsel %vm2152_vm1, %v5441_v19, %v5443_v4  ;;  %v5758_v19 = vsel %vm2784_vm2, %v5755_v48, %v5757_v58 }
 0x39c   : > { %4945 = vst.msk [vmem:[#allocation2 + $0x230] sm:$0xff] %vm3542_vm4, %v4819_v16  ;;  %v4820_v31 = vmax.f32 %v4694_v53, 0.0 }
 0x39d   : > { %v4268_v15 = vpop.f32.mrb[176].mxu1  ;;  %v5069_v57 = vld [vmem:[#allocation2 + $0x220] ss:$2 sm:$0xff]  ;;  %v5195_v44 = vld [vmem:[#allocation2 + $0x221] ss:$2 sm:$0xff]  ;;  %9213 = vmatprep.mubr.msk.bf16.mxu0 %vm6213_vm7, %v6141_v62 }
 0x39e   : > { %4946 = vst.msk [vmem:[#allocation2 + $0x238] sm:$0xff] %vm3542_vm4, %v4820_v31  ;;  %v4562_v60 = vmul.f32 %v13438_v7, %v4268_v15  ;;  %v9079_v40 = vpop.f32.mrb[177].mxu1  ;;  %v13762_v45 = vmax.f32 %v5069_v57, %v5195_v44 }
 0x39f   : > { %v4271_v50 = vpop.f32.mrb[178].mxu1 }
 0x3a0   : > { %v4695_v59 = vadd.f32 %v13451_v42, %v4562_v60  ;;  %v4563_v27 = vmul.f32 %v13438_v7, %v4271_v50  ;;  %v9080_v6 = vpop.f32.mrb[179].mxu1  ;;  %v5445_v24 = vrot.slane %v13762_v45, 1  ;;  %v5759_v21 = vrot.slane %v13762_v45, 2 }
 0x3a2   : > { %v4821_v25 = vmax.f32 %v4695_v59, 0.0  ;;  %v4696_v22 = vadd.f32 %v13451_v42, %v4563_v27  ;;  %v5446_v5 = vsel %vm2152_vm1, %v5443_v4, %v5445_v24  ;;  %v5760_v56 = vsel %vm2784_vm2, %v5757_v58, %v5759_v21 }
 0x3a3   : > { %v10068_v10 = vpack.i.bf16 %v5446_v5, %v5444_v28  ;;  %v10073_v3 = vpack.i.bf16 %v5760_v56, %v5758_v19 }
 0x3a4   : > { %4947 = vst.msk [vmem:[#allocation2 + $0x240] sm:$0xff] %vm3542_vm4, %v4821_v25  ;;  %v4822_v9 = vmax.f32 %v4696_v22, 0.0 }
 0x3a5   : > { %v4276_v32 = vpop.f32.mrb[180].mxu1  ;;  %10069 = vrot.lane.b32.xlu0 %v10068_v10, %s10485_s29  ;;  %v5071_v33 = vld [vmem:[#allocation2 + $0x230] ss:$2 sm:$0xff]  ;;  %v5197_v34 = vld [vmem:[#allocation2 + $0x231] ss:$2 sm:$0xff] }
 0x3a6   : > { %4948 = vst.msk [vmem:[#allocation2 + $0x248] sm:$0xff] %vm3542_vm4, %v4822_v9  ;;  %v4564_v1 = vmul.f32 %v13438_v7, %v4276_v32  ;;  %v9083_v52 = vpop.f32.mrb[181].mxu1  ;;  %v13788_v53 = vmax.f32 %v5071_v33, %v5197_v34 }
 0x3a7   : > { %v4279_v18 = vpop.f32.mrb[182].mxu1  ;;  %v10000_v0 = vpop.permute.xlu1 %9999 }
 0x3a8   : > { %v4697_v35 = vadd.f32 %v13451_v42, %v4564_v1  ;;  %v4565_v43 = vmul.f32 %v13438_v7, %v4279_v18  ;;  %v9084_v41 = vpop.f32.mrb[183].mxu1  ;;  %v10002_v39 = vunpack.i.h.bf16 %v10000_v0  ;;  %v10001_v16 = vunpack.i.l.bf16 %v10000_v0 }
 0x3a9   : > { %10074 = vrot.lane.b32.xlu0 %v10073_v3, %s10486_s27  ;;  %v5447_v54 = vrot.slane %v13788_v53, 1  ;;  %v5761_v22 = vrot.slane %v13788_v53, 2 }
 0x3aa   : > { %v4823_v12 = vmax.f32 %v4697_v35, 0.0  ;;  %v4698_v31 = vadd.f32 %v13451_v42, %v4565_v43  ;;  %v6025_v11 = vsel %vm3542_vm4, %v13288_v61, %v10002_v39  ;;  %v6024_v15 = vsel %vm3542_vm4, %v13242_v2, %v10001_v16 }
 0x3ab   : > { %v10005_v48 = vpop.permute.xlu1 %10004  ;;  %v5448_v10 = vsel %vm2152_vm1, %v5445_v24, %v5447_v54  ;;  %v5762_v24 = vsel %vm2784_vm2, %v5759_v21, %v5761_v22 }
 0x3ac   : > { %4949 = vst.msk [vmem:[#allocation2 + $0x250] sm:$0xff] %vm3542_vm4, %v4823_v12  ;;  %v4824_v49 = vmax.f32 %v4698_v31, 0.0  ;;  %v10007_v23 = vunpack.i.h.bf16 %v10005_v48  ;;  %v10006_v13 = vunpack.i.l.bf16 %v10005_v48 }
 0x3ad   : > { %v4284_v57 = vpop.f32.mrb[184].mxu1  ;;  %v5073_v44 = vld [vmem:[#allocation2 + $0x240] ss:$2 sm:$0xff]  ;;  %v5199_v4 = vld [vmem:[#allocation2 + $0x241] ss:$2 sm:$0xff] }
 0x3ae   : > { %4950 = vst.msk [vmem:[#allocation2 + $0x258] sm:$0xff] %vm3542_vm4, %v4824_v49  ;;  %v6088_v17 = vsel %vm6069_vm6, %v6024_v15, %v10006_v13  ;;  %v6089_v60 = vsel %vm6069_vm6, %v6025_v11, %v10007_v23  ;;  %v4566_v40 = vmul.f32 %v13438_v7, %v4284_v57  ;;  %v9087_v62 = vpop.f32.mrb[185].mxu1  ;;  %v13801_v50 = vmax.f32 %v5073_v44, %v5199_v4 }
 0x3af   : > { %v6142_v61 = vpack.c.bf16 %v6089_v60, %v6088_v17  ;;  %v4287_v59 = vpop.f32.mrb[186].mxu1 }
 0x3b0   : > { %v4699_v2 = vadd.f32 %v13451_v42, %v4566_v40  ;;  %v4567_v27 = vmul.f32 %v13438_v7, %v4287_v59  ;;  %v9088_v6 = vpop.f32.mrb[187].mxu1  ;;  %v5449_v58 = vrot.slane %v13801_v50, 1  ;;  %v5763_v25 = vrot.slane %v13801_v50, 2 }
 0x3b1   : > { %9214 = vmatmul.mubr.msk.bf16.gmra.mrb[112].mxu0 %vm6213_vm7, %v6142_v61 }
 0x3b2   : > { %v4825_v28 = vmax.f32 %v4699_v2, 0.0  ;;  %v4700_v5 = vadd.f32 %v13451_v42, %v4567_v27  ;;  %v5450_v9 = vsel %vm2152_vm1, %v5447_v54, %v5449_v58  ;;  %v5764_v1 = vsel %vm2784_vm2, %v5761_v22, %v5763_v25 }
 0x3b3   : > { %v10078_v56 = vpack.i.bf16 %v5450_v9, %v5448_v10  ;;  %v10083_v35 = vpack.i.bf16 %v5764_v1, %v5762_v24 }
 0x3b4   : > { %4951 = vst.msk [vmem:[#allocation2 + $0x260] sm:$0xff] %vm3542_vm4, %v4825_v28  ;;  %v4826_v32 = vmax.f32 %v4700_v5, 0.0 }
 0x3b5   : > { %v4292_v52 = vpop.f32.mrb[188].mxu1  ;;  %10079 = vrot.lane.b32.xlu1 %v10078_v56, %s10485_s29  ;;  %v5075_v34 = vld [vmem:[#allocation2 + $0x250] ss:$2 sm:$0xff]  ;;  %v5201_v18 = vld [vmem:[#allocation2 + $0x251] ss:$2 sm:$0xff] }
 0x3b6   : > { %4952 = vst.msk [vmem:[#allocation2 + $0x268] sm:$0xff] %vm3542_vm4, %v4826_v32  ;;  %v4568_v19 = vmul.f32 %v13438_v7, %v4292_v52  ;;  %v9091_v33 = vpop.f32.mrb[189].mxu1  ;;  %v13825_v31 = vmax.f32 %v5075_v34, %v5201_v18 }
 0x3b7   : > { %v4295_v0 = vpop.f32.mrb[190].mxu1  ;;  %v10010_v3 = vpop.permute.xlu0 %10009 }
 0x3b8   : > { %v4701_v43 = vadd.f32 %v13451_v42, %v4568_v19  ;;  %v4569_v41 = vmul.f32 %v13438_v7, %v4295_v0  ;;  %v9092_v39 = vpop.f32.mrb[191].mxu1  ;;  %v10012_v16 = vunpack.i.h.bf16 %v10010_v3  ;;  %v10011_v12 = vunpack.i.l.bf16 %v10010_v3 }
 0x3b9   : > { %10084 = vrot.lane.b32.xlu1 %v10083_v35, %s10486_s27  ;;  %v5451_v17 = vrot.slane %v13825_v31, 1  ;;  %v5765_v5 = vrot.slane %v13825_v31, 2 }
 0x3ba   : > { %v4827_v48 = vmax.f32 %v4701_v43, 0.0  ;;  %v4702_v49 = vadd.f32 %v13451_v42, %v4569_v41  ;;  %v6027_v15 = vsel %vm3542_vm4, %v13356_v55, %v10012_v16  ;;  %v6026_v57 = vsel %vm3542_vm4, %v13309_v14, %v10011_v12 }
 0x3bb   : > { %v10015_v21 = vpop.permute.xlu0 %10014  ;;  %v5452_v56 = vsel %vm2152_vm1, %v5449_v58, %v5451_v17  ;;  %v5766_v34 = vsel %vm2784_vm2, %v5763_v25, %v5765_v5 }
 0x3bc   : > { %4953 = vst.msk [vmem:[#allocation2 + $0x270] sm:$0xff] %vm3542_vm4, %v4827_v48  ;;  %v4828_v23 = vmax.f32 %v4702_v49, 0.0  ;;  %v10017_v13 = vunpack.i.h.bf16 %v10015_v21  ;;  %v10016_v11 = vunpack.i.l.bf16 %v10015_v21 }
 0x3bd   : > { %v4300_v44 = vpop.f32.mrb[192].mxu1  ;;  %v5077_v4 = vld [vmem:[#allocation2 + $0x260] ss:$2 sm:$0xff]  ;;  %v5203_v54 = vld [vmem:[#allocation2 + $0x261] ss:$2 sm:$0xff] }
 0x3be   : > { %4954 = vst.msk [vmem:[#allocation2 + $0x278] sm:$0xff] %vm3542_vm4, %v4828_v23  ;;  %v6090_v60 = vsel %vm6069_vm6, %v6026_v57, %v10016_v11  ;;  %v6091_v40 = vsel %vm6069_vm6, %v6027_v15, %v10017_v13  ;;  %v4570_v62 = vmul.f32 %v13438_v7, %v4300_v44  ;;  %v9095_v61 = vpop.f32.mrb[193].mxu1  ;;  %v13838_v59 = vmax.f32 %v5077_v4, %v5203_v54 }
 0x3bf   : > { %v6143_v55 = vpack.c.bf16 %v6091_v40, %v6090_v60  ;;  %v4303_v2 = vpop.f32.mrb[194].mxu1  ;;  %v13879_v40 = vld [vmem:[%s15428_s5] ss:$0 sm:$0xff] }
 0x3c0   : > { %v4703_v14 = vadd.f32 %v13451_v42, %v4570_v62  ;;  %v4571_v27 = vmul.f32 %v13438_v7, %v4303_v2  ;;  %v9096_v6 = vpop.f32.mrb[195].mxu1  ;;  %v5453_v22 = vrot.slane %v13838_v59, 1  ;;  %v5767_v28 = vrot.slane %v13838_v59, 2  ;;  %v13887_v2 = vld [vmem:[%s15429_s6] ss:$0 sm:$0xff] }
 0x3c1   : > { %9217 = vmatprep.mubr.msk.bf16.mxu0 %vm6213_vm7, %v6143_v55 }
 0x3c2   : > { %v4829_v10 = vmax.f32 %v4703_v14, 0.0  ;;  %v4704_v9 = vadd.f32 %v13451_v42, %v4571_v27  ;;  %v5454_v32 = vsel %vm2152_vm1, %v5451_v17, %v5453_v22  ;;  %v5768_v19 = vsel %vm2784_vm2, %v5765_v5, %v5767_v28 }
 0x3c3   : > { %v10088_v1 = vpack.i.bf16 %v5454_v32, %v5452_v56  ;;  %v10093_v43 = vpack.i.bf16 %v5768_v19, %v5766_v34 }
 0x3c4   : > { %4955 = vst.msk [vmem:[#allocation2 + $0x280] sm:$0xff] %vm3542_vm4, %v4829_v10  ;;  %v4830_v52 = vmax.f32 %v4704_v9, 0.0 }
 0x3c5   : > { %v4308_v33 = vpop.f32.mrb[196].mxu1  ;;  %10089 = vrot.lane.b32.xlu0 %v10088_v1, %s10485_s29  ;;  %v5079_v18 = vld [vmem:[#allocation2 + $0x270] ss:$2 sm:$0xff]  ;;  %v5205_v0 = vld [vmem:[#allocation2 + $0x271] ss:$2 sm:$0xff] }
 0x3c6   : > { %4956 = vst.msk [vmem:[#allocation2 + $0x288] sm:$0xff] %vm3542_vm4, %v4830_v52  ;;  %v4572_v24 = vmul.f32 %v13438_v7, %v4308_v33  ;;  %v9099_v58 = vpop.f32.mrb[197].mxu1  ;;  %v13864_v49 = vmax.f32 %v5079_v18, %v5205_v0 }
 0x3c7   : > { %v4311_v3 = vpop.f32.mrb[198].mxu1  ;;  %v10020_v35 = vpop.permute.xlu1 %10019 }
 0x3c8   : > { %v4705_v41 = vadd.f32 %v13451_v42, %v4572_v24  ;;  %v4573_v39 = vmul.f32 %v13438_v7, %v4311_v3  ;;  %v9100_v16 = vpop.f32.mrb[199].mxu1  ;;  %v10022_v12 = vunpack.i.h.bf16 %v10020_v35  ;;  %v10021_v48 = vunpack.i.l.bf16 %v10020_v35 }
 0x3c9   : > { %10094 = vrot.lane.b32.xlu0 %v10093_v43, %s10486_s27  ;;  %v5455_v17 = vrot.slane %v13864_v49, 1  ;;  %v5769_v9 = vrot.slane %v13864_v49, 2 }
 0x3ca   : > { %v4831_v21 = vmax.f32 %v4705_v41, 0.0  ;;  %v4706_v23 = vadd.f32 %v13451_v42, %v4573_v39  ;;  %v6029_v57 = vsel %vm3542_vm4, %v13414_v63, %v10022_v12  ;;  %v6028_v7 = vsel %vm3542_vm4, %v13370_v29, %v10021_v48 }
 0x3cb   : > { %v10025_v25 = vpop.permute.xlu1 %10024  ;;  %v5456_v1 = vsel %vm2152_vm1, %v5453_v22, %v5455_v17  ;;  %v5770_v18 = vsel %vm2784_vm2, %v5767_v28, %v5769_v9 }
 0x3cc   : > { %4957 = vst.msk [vmem:[#allocation2 + $0x290] sm:$0xff] %vm3542_vm4, %v4831_v21  ;;  %v4832_v13 = vmax.f32 %v4706_v23, 0.0  ;;  %v10027_v11 = vunpack.i.h.bf16 %v10025_v25  ;;  %v10026_v15 = vunpack.i.l.bf16 %v10025_v25 }
 0x3cd   : > { %v4316_v44 = vpop.f32.mrb[200].mxu1  ;;  %v5081_v4 = vld [vmem:[#allocation2 + $0x280] ss:$2 sm:$0xff]  ;;  %v5207_v54 = vld [vmem:[#allocation2 + $0x281] ss:$2 sm:$0xff] }
 0x3ce   : > { %4958 = vst.msk [vmem:[#allocation2 + $0x298] sm:$0xff] %vm3542_vm4, %v4832_v13  ;;  %v6092_v42 = vsel %vm6069_vm6, %v6028_v7, %v10026_v15  ;;  %v6093_v60 = vsel %vm6069_vm6, %v6029_v57, %v10027_v11  ;;  %v4574_v63 = vmul.f32 %v13879_v40, %v4316_v44  ;;  %v9103_v62 = vpop.f32.mrb[201].mxu1  ;;  %v13882_v29 = vmax.f32 %v5081_v4, %v5207_v54 }
 0x3cf   : > { %v6144_v61 = vpack.c.bf16 %v6093_v60, %v6092_v42  ;;  %v4319_v55 = vpop.f32.mrb[202].mxu1 }
 0x3d0   : > { %v4707_v14 = vadd.f32 %v13887_v2, %v4574_v63  ;;  %v4575_v27 = vmul.f32 %v13879_v40, %v4319_v55  ;;  %v9104_v6 = vpop.f32.mrb[203].mxu1  ;;  %v5457_v5 = vrot.slane %v13882_v29, 1  ;;  %v5771_v10 = vrot.slane %v13882_v29, 2 }
 0x3d1   : > { %9218 = vmatmul.mubr.msk.bf16.gmra.mrb[116].mxu0 %vm6213_vm7, %v6144_v61 }
 0x3d2   : > { %v4833_v56 = vmax.f32 %v4707_v14, 0.0  ;;  %v4708_v32 = vadd.f32 %v13887_v2, %v4575_v27  ;;  %v5458_v52 = vsel %vm2152_vm1, %v5455_v17, %v5457_v5  ;;  %v5772_v24 = vsel %vm2784_vm2, %v5769_v9, %v5771_v10 }
 0x3d3   : > { %v10098_v19 = vpack.i.bf16 %v5458_v52, %v5456_v1  ;;  %v10103_v41 = vpack.i.bf16 %v5772_v24, %v5770_v18 }
 0x3d4   : > { %4959 = vst.msk [vmem:[#allocation2 + $0x2a0] sm:$0xff] %vm3542_vm4, %v4833_v56  ;;  %v4834_v33 = vmax.f32 %v4708_v32, 0.0 }
 0x3d5   : > { %v4324_v58 = vpop.f32.mrb[204].mxu1  ;;  %10099 = vrot.lane.b32.xlu1 %v10098_v19, %s10485_s29  ;;  %v5083_v0 = vld [vmem:[#allocation2 + $0x290] ss:$2 sm:$0xff]  ;;  %v5209_v3 = vld [vmem:[#allocation2 + $0x291] ss:$2 sm:$0xff] }
 0x3d6   : > { %4960 = vst.msk [vmem:[#allocation2 + $0x2a8] sm:$0xff] %vm3542_vm4, %v4834_v33  ;;  %v4576_v34 = vmul.f32 %v13879_v40, %v4324_v58  ;;  %v9107_v22 = vpop.f32.mrb[205].mxu1  ;;  %v13915_v23 = vmax.f32 %v5083_v0, %v5209_v3  ;;  %v13917_v25 = vpop.f32.mrb[96].mxu0 }
 0x3d7   : > { %v4327_v35 = vpop.f32.mrb[206].mxu1  ;;  %v10030_v43 = vpop.permute.xlu0 %10029 }
 0x3d8   : > { %v4709_v39 = vadd.f32 %v13887_v2, %v4576_v34  ;;  %v4577_v16 = vmul.f32 %v13879_v40, %v4327_v35  ;;  %v9108_v12 = vpop.f32.mrb[207].mxu1  ;;  %v10032_v48 = vunpack.i.h.bf16 %v10030_v43  ;;  %v10031_v21 = vunpack.i.l.bf16 %v10030_v43  ;;  %v13920_v11 = vpop.f32.mrb[97].mxu0 }
 0x3d9   : > { %10104 = vrot.lane.b32.xlu1 %v10103_v41, %s10486_s27  ;;  %v13922_v57 = vpop.f32.mrb[98].mxu0  ;;  %v5459_v61 = vrot.slane %v13915_v23, 1  ;;  %v5773_v33 = vrot.slane %v13915_v23, 2 }
 0x3da   : > { %v4835_v13 = vmax.f32 %v4709_v39, 0.0  ;;  %v4710_v28 = vadd.f32 %v13887_v2, %v4577_v16  ;;  %v13925_v54 = vpop.f32.mrb[99].mxu0  ;;  %v6031_v17 = vsel %vm3542_vm4, %v13492_v51, %v10032_v48  ;;  %v6030_v42 = vsel %vm3542_vm4, %v13441_v30, %v10031_v21 }
 0x3db   : > { %v10035_v15 = vpop.permute.xlu0 %10034  ;;  %v5460_v34 = vsel %vm2152_vm1, %v5457_v5, %v5459_v61  ;;  %v5774_v5 = vsel %vm2784_vm2, %v5771_v10, %v5773_v33 }
 0x3dc   : > { %4961 = vst.msk [vmem:[#allocation2 + $0x2b0] sm:$0xff] %vm3542_vm4, %v4835_v13  ;;  %v4836_v7 = vmax.f32 %v4710_v28, 0.0  ;;  %v10037_v44 = vunpack.i.h.bf16 %v10035_v15  ;;  %v10036_v4 = vunpack.i.l.bf16 %v10035_v15 }
 0x3dd   : > { %v4332_v60 = vpop.f32.mrb[208].mxu1  ;;  %v5085_v63 = vld [vmem:[#allocation2 + $0x2a0] ss:$2 sm:$0xff]  ;;  %v5211_v62 = vld [vmem:[#allocation2 + $0x2a1] ss:$2 sm:$0xff] }
 0x3de   : > { %4962 = vst.msk [vmem:[#allocation2 + $0x2b8] sm:$0xff] %vm3542_vm4, %v4836_v7  ;;  %v6094_v55 = vsel %vm6069_vm6, %v6030_v42, %v10036_v4  ;;  %v6095_v14 = vsel %vm6069_vm6, %v6031_v17, %v10037_v44  ;;  %v4578_v27 = vmul.f32 %v13879_v40, %v4332_v60  ;;  %v9111_v6 = vpop.f32.mrb[209].mxu1  ;;  %v13936_v9 = vmax.f32 %v5085_v63, %v5211_v62 }
 0x3df   : > { %v6145_v51 = vpack.c.bf16 %v6095_v14, %v6094_v55  ;;  %v4335_v56 = vpop.f32.mrb[210].mxu1 }
 0x3e0   : > { %v4711_v30 = vadd.f32 %v13887_v2, %v4578_v27  ;;  %v4579_v32 = vmul.f32 %v13879_v40, %v4335_v56  ;;  %v9112_v1 = vpop.f32.mrb[211].mxu1  ;;  %v5461_v52 = vrot.slane %v13936_v9, 1  ;;  %v5775_v19 = vrot.slane %v13936_v9, 2 }
 0x3e1   : > { %9221 = vmatprep.mubr.msk.bf16.mxu0 %vm6213_vm7, %v6145_v51 }
 0x3e2   : > { %v4837_v24 = vmax.f32 %v4711_v30, 0.0  ;;  %v4712_v58 = vadd.f32 %v13887_v2, %v4579_v32  ;;  %v5462_v22 = vsel %vm2152_vm1, %v5459_v61, %v5461_v52  ;;  %v5776_v3 = vsel %vm2784_vm2, %v5773_v33, %v5775_v19 }
 0x3e3   : > { %v10108_v18 = vpack.i.bf16 %v5462_v22, %v5460_v34  ;;  %v10113_v21 = vpack.i.bf16 %v5776_v3, %v5774_v5 }
 0x3e4   : > { %4963 = vst.msk [vmem:[#allocation2 + $0x2c0] sm:$0xff] %vm3542_vm4, %v4837_v24  ;;  %v4838_v0 = vmax.f32 %v4712_v58, 0.0 }
 0x3e5   : > { %v4340_v35 = vpop.f32.mrb[212].mxu1  ;;  %10109 = vrot.lane.b32.xlu0 %v10108_v18, %s10485_s29  ;;  %v5087_v39 = vld [vmem:[#allocation2 + $0x2b0] ss:$2 sm:$0xff]  ;;  %v5213_v16 = vld [vmem:[#allocation2 + $0x2b1] ss:$2 sm:$0xff] }
 0x3e6   : > { %4964 = vst.msk [vmem:[#allocation2 + $0x2c8] sm:$0xff] %vm3542_vm4, %v4838_v0  ;;  %v4580_v43 = vmul.f32 %v13879_v40, %v4340_v35  ;;  %v9115_v41 = vpop.f32.mrb[213].mxu1  ;;  %v13962_v4 = vmax.f32 %v5087_v39, %v5213_v16 }
 0x3e7   : > { %v4343_v12 = vpop.f32.mrb[214].mxu1  ;;  %v10040_v48 = vpop.permute.xlu1 %10039 }
 0x3e8   : > { %v4713_v13 = vadd.f32 %v13887_v2, %v4580_v43  ;;  %v4581_v28 = vmul.f32 %v13879_v40, %v4343_v12  ;;  %v9116_v15 = vpop.f32.mrb[215].mxu1  ;;  %v10042_v7 = vunpack.i.h.bf16 %v10040_v48  ;;  %v10041_v44 = vunpack.i.l.bf16 %v10040_v48 }
 0x3e9   : > { %10114 = vrot.lane.b32.xlu0 %v10113_v21, %s10486_s27  ;;  %v5463_v51 = vrot.slane %v13962_v4, 1  ;;  %v5777_v0 = vrot.slane %v13962_v4, 2 }
 0x3ea   : > { %v4839_v17 = vmax.f32 %v4713_v13, 0.0  ;;  %v4714_v42 = vadd.f32 %v13887_v2, %v4581_v28  ;;  %v6033_v61 = vsel %vm3542_vm4, %v13560_v26, %v10042_v7  ;;  %v6032_v55 = vsel %vm3542_vm4, %v13513_v36, %v10041_v44 }
 0x3eb   : > { %v10045_v10 = vpop.permute.xlu1 %10044  ;;  %v5464_v43 = vsel %vm2152_vm1, %v5461_v52, %v5463_v51  ;;  %v5778_v52 = vsel %vm2784_vm2, %v5775_v19, %v5777_v0 }
 0x3ec   : > { %4965 = vst.msk [vmem:[#allocation2 + $0x2d0] sm:$0xff] %vm3542_vm4, %v4839_v17  ;;  %v4840_v60 = vmax.f32 %v4714_v42, 0.0  ;;  %v10047_v63 = vunpack.i.h.bf16 %v10045_v10  ;;  %v10046_v62 = vunpack.i.l.bf16 %v10045_v10 }
 0x3ed   : > { %v4348_v14 = vpop.f32.mrb[216].mxu1  ;;  %v5089_v27 = vld [vmem:[#allocation2 + $0x2c0] ss:$2 sm:$0xff]  ;;  %v5215_v6 = vld [vmem:[#allocation2 + $0x2c1] ss:$2 sm:$0xff] }
 0x3ee   : > { %4966 = vst.msk [vmem:[#allocation2 + $0x2d8] sm:$0xff] %vm3542_vm4, %v4840_v60  ;;  %v6096_v56 = vsel %vm6069_vm6, %v6032_v55, %v10046_v62  ;;  %v6097_v30 = vsel %vm6069_vm6, %v6033_v61, %v10047_v63  ;;  %v4582_v32 = vmul.f32 %v13879_v40, %v4348_v14  ;;  %v9119_v1 = vpop.f32.mrb[217].mxu1  ;;  %v13975_v33 = vmax.f32 %v5089_v27, %v5215_v6 }
 0x3ef   : > { %v6146_v26 = vpack.c.bf16 %v6097_v30, %v6096_v56  ;;  %v4351_v24 = vpop.f32.mrb[218].mxu1 }
 0x3f0   : > { %v4715_v36 = vadd.f32 %v13887_v2, %v4582_v32  ;;  %v4583_v58 = vmul.f32 %v13879_v40, %v4351_v24  ;;  %v9120_v34 = vpop.f32.mrb[219].mxu1  ;;  %v5465_v22 = vrot.slane %v13975_v33, 1  ;;  %v5779_v18 = vrot.slane %v13975_v33, 2 }
 0x3f1   : > { %9222 = vmatmul.mubr.msk.bf16.gmra.mrb[120].mxu0 %vm6213_vm7, %v6146_v26 }
 0x3f2   : > { %v4841_v3 = vmax.f32 %v4715_v36, 0.0  ;;  %v4716_v35 = vadd.f32 %v13887_v2, %v4583_v58  ;;  %v5466_v41 = vsel %vm2152_vm1, %v5463_v51, %v5465_v22  ;;  %v5780_v16 = vsel %vm2784_vm2, %v5777_v0, %v5779_v18 }
 0x3f3   : > { %v10118_v5 = vpack.i.bf16 %v5466_v41, %v5464_v43  ;;  %v10123_v44 = vpack.i.bf16 %v5780_v16, %v5778_v52 }
 0x3f4   : > { %4967 = vst.msk [vmem:[#allocation2 + $0x2e0] sm:$0xff] %vm3542_vm4, %v4841_v3  ;;  %v4842_v39 = vmax.f32 %v4716_v35, 0.0 }
 0x3f5   : > { %10119 = vrot.lane.b32.xlu1 %v10118_v5, %s10485_s29  ;;  %v4356_v12 = vpop.f32.mrb[220].mxu1  ;;  %v5091_v13 = vld [vmem:[#allocation2 + $0x2d0] ss:$2 sm:$0xff]  ;;  %v5217_v28 = vld [vmem:[#allocation2 + $0x2d1] ss:$2 sm:$0xff] }
 0x3f6   : > { %4968 = vst.msk [vmem:[#allocation2 + $0x2e8] sm:$0xff] %vm3542_vm4, %v4842_v39  ;;  %v4584_v48 = vmul.f32 %v13879_v40, %v4356_v12  ;;  %v9123_v21 = vpop.f32.mrb[221].mxu1  ;;  %v13999_v62 = vmax.f32 %v5091_v13, %v5217_v28 }
 0x3f7   : > { %v10050_v15 = vpop.permute.xlu0 %10049  ;;  %v4359_v7 = vpop.f32.mrb[222].mxu1 }
 0x3f8   : > { %v4717_v17 = vadd.f32 %v13887_v2, %v4584_v48  ;;  %v4585_v42 = vmul.f32 %v13879_v40, %v4359_v7  ;;  %v9124_v10 = vpop.f32.mrb[223].mxu1  ;;  %v10052_v60 = vunpack.i.h.bf16 %v10050_v15  ;;  %v10051_v63 = vunpack.i.l.bf16 %v10050_v15 }
 0x3f9   : > { %10124 = vrot.lane.b32.xlu1 %v10123_v44, %s10486_s27  ;;  %v5467_v26 = vrot.slane %v13999_v62, 1  ;;  %v5781_v39 = vrot.slane %v13999_v62, 2 }
 0x3fa   : > { %v4843_v61 = vmax.f32 %v4717_v17, 0.0  ;;  %v4718_v55 = vadd.f32 %v13887_v2, %v4585_v42  ;;  %v6035_v51 = vsel %vm3542_vm4, %v13622_v20, %v10052_v60  ;;  %v6034_v56 = vsel %vm3542_vm4, %v13574_v37, %v10051_v63 }
 0x3fb   : > { %v10055_v19 = vpop.permute.xlu0 %10054  ;;  %v5468_v48 = vsel %vm2152_vm1, %v5465_v22, %v5467_v26  ;;  %v5782_v44 = vsel %vm2784_vm2, %v5779_v18, %v5781_v39 }
 0x3fc   : > { %4969 = vst.msk [vmem:[#allocation2 + $0x2f0] sm:$0xff] %vm3542_vm4, %v4843_v61  ;;  %v4844_v14 = vmax.f32 %v4718_v55, 0.0  ;;  %v10057_v27 = vunpack.i.h.bf16 %v10055_v19  ;;  %v10056_v6 = vunpack.i.l.bf16 %v10055_v19 }
 0x3fd   : > { %v4364_v30 = vpop.f32.mrb[224].mxu1  ;;  %v5093_v32 = vld [vmem:[#allocation2 + $0x2e0] ss:$2 sm:$0xff]  ;;  %v5219_v1 = vld [vmem:[#allocation2 + $0x2e1] ss:$2 sm:$0xff] }
 0x3fe   : > { %4970 = vst.msk [vmem:[#allocation2 + $0x2f8] sm:$0xff] %vm3542_vm4, %v4844_v14  ;;  %v6098_v24 = vsel %vm6069_vm6, %v6034_v56, %v10056_v6  ;;  %v6099_v36 = vsel %vm6069_vm6, %v6035_v51, %v10057_v27  ;;  %v4586_v58 = vmul.f32 %v13879_v40, %v4364_v30  ;;  %v9127_v34 = vpop.f32.mrb[225].mxu1  ;;  %v14012_v0 = vmax.f32 %v5093_v32, %v5219_v1 }
 0x3ff   : > { %v6147_v20 = vpack.c.bf16 %v6099_v36, %v6098_v24  ;;  %v4367_v3 = vpop.f32.mrb[226].mxu1 }
 0x400   : > { %v4719_v37 = vadd.f32 %v13887_v2, %v4586_v58  ;;  %v4587_v35 = vmul.f32 %v13879_v40, %v4367_v3  ;;  %v9128_v43 = vpop.f32.mrb[227].mxu1  ;;  %v5469_v41 = vrot.slane %v14012_v0, 1  ;;  %v5783_v5 = vrot.slane %v14012_v0, 2 }
 0x401   : > { %9225 = vmatprep.mubr.msk.bf16.mxu0 %vm6213_vm7, %v6147_v20 }
 0x402   : > { %v4845_v16 = vmax.f32 %v4719_v37, 0.0  ;;  %v4720_v12 = vadd.f32 %v13887_v2, %v4587_v35  ;;  %v5470_v21 = vsel %vm2152_vm1, %v5467_v26, %v5469_v41  ;;  %v5784_v28 = vsel %vm2784_vm2, %v5781_v39, %v5783_v5 }
 0x403   : > { %v10128_v52 = vpack.i.bf16 %v5470_v21, %v5468_v48  ;;  %v10133_v63 = vpack.i.bf16 %v5784_v28, %v5782_v44 }
 0x404   : > { %4971 = vst.msk [vmem:[#allocation2 + $0x300] sm:$0xff] %vm3542_vm4, %v4845_v16  ;;  %v4846_v13 = vmax.f32 %v4720_v12, 0.0 }
 0x405   : > { %10129 = vrot.lane.b32.xlu0 %v10128_v52, %s10485_s29  ;;  %v4372_v15 = vpop.f32.mrb[228].mxu1  ;;  %v5095_v17 = vld [vmem:[#allocation2 + $0x2f0] ss:$2 sm:$0xff]  ;;  %v5221_v42 = vld [vmem:[#allocation2 + $0x2f1] ss:$2 sm:$0xff] }
 0x406   : > { %4972 = vst.msk [vmem:[#allocation2 + $0x308] sm:$0xff] %vm3542_vm4, %v4846_v13  ;;  %v4588_v7 = vmul.f32 %v13879_v40, %v4372_v15  ;;  %v9131_v22 = vpop.f32.mrb[229].mxu1  ;;  %v14038_v6 = vmax.f32 %v5095_v17, %v5221_v42  ;;  %v14040_v51 = vpop.f32.mrb[100].mxu0 }
 0x407   : > { %v10060_v10 = vpop.permute.xlu1 %10059  ;;  %v4375_v60 = vpop.f32.mrb[230].mxu1 }
 0x408   : > { %v4721_v61 = vadd.f32 %v13887_v2, %v4588_v7  ;;  %v4589_v55 = vmul.f32 %v13879_v40, %v4375_v60  ;;  %v9132_v19 = vpop.f32.mrb[231].mxu1  ;;  %v10062_v14 = vunpack.i.h.bf16 %v10060_v10  ;;  %v10061_v27 = vunpack.i.l.bf16 %v10060_v10  ;;  %v14043_v30 = vpop.f32.mrb[101].mxu0 }
 0x409   : > { %10134 = vrot.lane.b32.xlu0 %v10133_v63, %s10486_s27  ;;  %v14045_v1 = vpop.f32.mrb[102].mxu0  ;;  %v5471_v43 = vrot.slane %v14038_v6, 1  ;;  %v5785_v22 = vrot.slane %v14038_v6, 2 }
 0x40a   : > { %v4847_v56 = vmax.f32 %v4721_v61, 0.0  ;;  %v4722_v18 = vadd.f32 %v13887_v2, %v4589_v55  ;;  %v14048_v58 = vpop.f32.mrb[103].mxu0  ;;  %v6037_v34 = vsel %vm3542_vm4, %v13685_v47, %v10062_v14  ;;  %v6036_v20 = vsel %vm3542_vm4, %v13639_v46, %v10061_v27 }
 0x40b   : > { %v10065_v32 = vpop.permute.xlu1 %10064  ;;  %v5472_v42 = vsel %vm2152_vm1, %v5469_v41, %v5471_v43  ;;  %v5786_v41 = vsel %vm2784_vm2, %v5783_v5, %v5785_v22 }
 0x40c   : > { %4973 = vst.msk [vmem:[#allocation2 + $0x310] sm:$0xff] %vm3542_vm4, %v4847_v56  ;;  %v4848_v26 = vmax.f32 %v4722_v18, 0.0  ;;  %v10067_v24 = vunpack.i.h.bf16 %v10065_v32  ;;  %v10066_v36 = vunpack.i.l.bf16 %v10065_v32 }
 0x40d   : > { %v4380_v3 = vpop.f32.mrb[232].mxu1  ;;  %v5097_v37 = vld [vmem:[#allocation2 + $0x300] ss:$2 sm:$0xff]  ;;  %v5223_v35 = vld [vmem:[#allocation2 + $0x301] ss:$2 sm:$0xff] }
 0x40e   : > { %4974 = vst.msk [vmem:[#allocation2 + $0x318] sm:$0xff] %vm3542_vm4, %v4848_v26  ;;  %v6100_v39 = vsel %vm6069_vm6, %v6036_v20, %v10066_v36  ;;  %v6101_v16 = vsel %vm6069_vm6, %v6037_v34, %v10067_v24  ;;  %v4590_v12 = vmul.f32 %v13879_v40, %v4380_v3  ;;  %v9135_v48 = vpop.f32.mrb[233].mxu1  ;;  %v14059_v21 = vmax.f32 %v5097_v37, %v5223_v35 }
 0x40f   : > { %v6148_v47 = vpack.c.bf16 %v6101_v16, %v6100_v39  ;;  %v4383_v52 = vpop.f32.mrb[234].mxu1 }
 0x410   : > { %v4723_v46 = vadd.f32 %v13887_v2, %v4590_v12  ;;  %v4591_v13 = vmul.f32 %v13879_v40, %v4383_v52  ;;  %v9136_v28 = vpop.f32.mrb[235].mxu1  ;;  %v5473_v15 = vrot.slane %v14059_v21, 1  ;;  %v5787_v7 = vrot.slane %v14059_v21, 2 }
 0x411   : > { %9226 = vmatmul.mubr.msk.bf16.gmra.mrb[124].mxu0 %vm6213_vm7, %v6148_v47 }
 0x412   : > { %v4849_v44 = vmax.f32 %v4723_v46, 0.0  ;;  %v4724_v17 = vadd.f32 %v13887_v2, %v4591_v13  ;;  %v5474_v10 = vsel %vm2152_vm1, %v5471_v43, %v5473_v15  ;;  %v5788_v61 = vsel %vm2784_vm2, %v5785_v22, %v5787_v7 }
 0x413   : > { %v10138_v60 = vpack.i.bf16 %v5474_v10, %v5472_v42  ;;  %v10143_v26 = vpack.i.bf16 %v5788_v61, %v5786_v41 }
 0x414   : > { %4975 = vst.msk [vmem:[#allocation2 + $0x320] sm:$0xff] %vm3542_vm4, %v4849_v44  ;;  %v4850_v63 = vmax.f32 %v4724_v17, 0.0 }
 0x415   : > { %10139 = vrot.lane.b32.xlu1 %v10138_v60, %s10485_s29  ;;  %v4388_v55 = vpop.f32.mrb[236].mxu1  ;;  %v5099_v27 = vld [vmem:[#allocation2 + $0x310] ss:$2 sm:$0xff]  ;;  %v5225_v56 = vld [vmem:[#allocation2 + $0x311] ss:$2 sm:$0xff] }
 0x416   : > { %4976 = vst.msk [vmem:[#allocation2 + $0x328] sm:$0xff] %vm3542_vm4, %v4850_v63  ;;  %v4592_v19 = vmul.f32 %v13879_v40, %v4388_v55  ;;  %v9139_v14 = vpop.f32.mrb[237].mxu1  ;;  %v14085_v37 = vmax.f32 %v5099_v27, %v5225_v56 }
 0x417   : > { %v10070_v18 = vpop.permute.xlu0 %10069  ;;  %v4391_v32 = vpop.f32.mrb[238].mxu1 }
 0x418   : > { %v4725_v24 = vadd.f32 %v13887_v2, %v4592_v19  ;;  %v4593_v36 = vmul.f32 %v13879_v40, %v4391_v32  ;;  %v9140_v34 = vpop.f32.mrb[239].mxu1  ;;  %v10072_v20 = vunpack.i.h.bf16 %v10070_v18  ;;  %v10071_v3 = vunpack.i.l.bf16 %v10070_v18 }
 0x419   : > { %10144 = vrot.lane.b32.xlu1 %v10143_v26, %s10486_s27  ;;  %v5475_v28 = vrot.slane %v14085_v37, 1  ;;  %v5789_v14 = vrot.slane %v14085_v37, 2 }
 0x41a   : > { %v4851_v35 = vmax.f32 %v4725_v24, 0.0  ;;  %v4726_v43 = vadd.f32 %v13887_v2, %v4593_v36  ;;  %v6039_v48 = vsel %vm3542_vm4, %v13748_v38, %v10072_v20  ;;  %v6038_v47 = vsel %vm3542_vm4, %v13707_v8, %v10071_v3 }
 0x41b   : > { %v10075_v5 = vpop.permute.xlu0 %10074  ;;  %v5476_v56 = vsel %vm2152_vm1, %v5473_v15, %v5475_v28  ;;  %v5790_v15 = vsel %vm2784_vm2, %v5787_v7, %v5789_v14 }
 0x41c   : > { %4977 = vst.msk [vmem:[#allocation2 + $0x330] sm:$0xff] %vm3542_vm4, %v4851_v35  ;;  %v4852_v39 = vmax.f32 %v4726_v43, 0.0  ;;  %v10077_v16 = vunpack.i.h.bf16 %v10075_v5  ;;  %v10076_v12 = vunpack.i.l.bf16 %v10075_v5 }
 0x41d   : > { %v4396_v52 = vpop.f32.mrb[240].mxu1  ;;  %v5101_v46 = vld [vmem:[#allocation2 + $0x320] ss:$2 sm:$0xff]  ;;  %v5227_v13 = vld [vmem:[#allocation2 + $0x321] ss:$2 sm:$0xff] }
 0x41e   : > { %4978 = vst.msk [vmem:[#allocation2 + $0x338] sm:$0xff] %vm3542_vm4, %v4852_v39  ;;  %v6102_v22 = vsel %vm6069_vm6, %v6038_v47, %v10076_v12  ;;  %v6103_v44 = vsel %vm6069_vm6, %v6039_v48, %v10077_v16  ;;  %v4594_v17 = vmul.f32 %v13879_v40, %v4396_v52  ;;  %v9143_v42 = vpop.f32.mrb[241].mxu1  ;;  %v14098_v10 = vmax.f32 %v5101_v46, %v5227_v13 }
 0x41f   : > { %v6149_v38 = vpack.c.bf16 %v6103_v44, %v6102_v22  ;;  %v4399_v60 = vpop.f32.mrb[242].mxu1 }
 0x420   : > { %v4727_v8 = vadd.f32 %v13887_v2, %v4594_v17  ;;  %v4595_v63 = vmul.f32 %v13879_v40, %v4399_v60  ;;  %v9144_v61 = vpop.f32.mrb[243].mxu1  ;;  %v5477_v55 = vrot.slane %v14098_v10, 1  ;;  %v5791_v19 = vrot.slane %v14098_v10, 2 }
 0x421   : > { %9229 = vmatprep.mubr.msk.bf16.mxu0 %vm6213_vm7, %v6149_v38 }
 0x422   : > { %v4853_v41 = vmax.f32 %v4727_v8, 0.0  ;;  %v4728_v27 = vadd.f32 %v13887_v2, %v4595_v63  ;;  %v5478_v18 = vsel %vm2152_vm1, %v5475_v28, %v5477_v55  ;;  %v5792_v24 = vsel %vm2784_vm2, %v5789_v14, %v5791_v19 }
 0x423   : > { %v10148_v32 = vpack.i.bf16 %v5478_v18, %v5476_v56  ;;  %v10153_v39 = vpack.i.bf16 %v5792_v24, %v5790_v15 }
 0x424   : > { %4979 = vst.msk [vmem:[#allocation2 + $0x340] sm:$0xff] %vm3542_vm4, %v4853_v41  ;;  %v4854_v26 = vmax.f32 %v4728_v27, 0.0 }
 0x425   : > { %10149 = vrot.lane.b32.xlu0 %v10148_v32, %s10485_s29  ;;  %v4404_v36 = vpop.f32.mrb[244].mxu1  ;;  %v5103_v3 = vld [vmem:[#allocation2 + $0x330] ss:$2 sm:$0xff]  ;;  %v5229_v35 = vld [vmem:[#allocation2 + $0x331] ss:$2 sm:$0xff] }
 0x426   : > { %4980 = vst.msk [vmem:[#allocation2 + $0x348] sm:$0xff] %vm3542_vm4, %v4854_v26  ;;  %v4596_v34 = vmul.f32 %v13879_v40, %v4404_v36  ;;  %v9147_v20 = vpop.f32.mrb[245].mxu1  ;;  %v14122_v46 = vmax.f32 %v5103_v3, %v5229_v35 }
 0x427   : > { %v10080_v43 = vpop.permute.xlu1 %10079  ;;  %v4407_v5 = vpop.f32.mrb[246].mxu1 }
 0x428   : > { %v4729_v16 = vadd.f32 %v13887_v2, %v4596_v34  ;;  %v4597_v12 = vmul.f32 %v13879_v40, %v4407_v5  ;;  %v9148_v48 = vpop.f32.mrb[247].mxu1  ;;  %v10082_v47 = vunpack.i.h.bf16 %v10080_v43  ;;  %v10081_v52 = vunpack.i.l.bf16 %v10080_v43 }
 0x429   : > { %10154 = vrot.lane.b32.xlu0 %v10153_v39, %s10486_s27  ;;  %v5479_v61 = vrot.slane %v14122_v46, 1  ;;  %v5793_v20 = vrot.slane %v14122_v46, 2 }
 0x42a   : > { %v4855_v13 = vmax.f32 %v4729_v16, 0.0  ;;  %v4730_v28 = vadd.f32 %v13887_v2, %v4597_v12  ;;  %v6041_v42 = vsel %vm3542_vm4, %v13788_v53, %v10082_v47  ;;  %v6040_v38 = vsel %vm3542_vm4, %v13762_v45, %v10081_v52 }
 0x42b   : > { %v10085_v7 = vpop.permute.xlu1 %10084  ;;  %v5480_v35 = vsel %vm2152_vm1, %v5477_v55, %v5479_v61  ;;  %v5794_v47 = vsel %vm2784_vm2, %v5791_v19, %v5793_v20 }
 0x42c   : > { %4981 = vst.msk [vmem:[#allocation2 + $0x350] sm:$0xff] %vm3542_vm4, %v4855_v13  ;;  %v4856_v22 = vmax.f32 %v4730_v28, 0.0  ;;  %v10087_v44 = vunpack.i.h.bf16 %v10085_v7  ;;  %v10086_v17 = vunpack.i.l.bf16 %v10085_v7 }
 0x42d   : > { %v4412_v60 = vpop.f32.mrb[248].mxu1  ;;  %v5105_v8 = vld [vmem:[#allocation2 + $0x340] ss:$2 sm:$0xff]  ;;  %v5231_v63 = vld [vmem:[#allocation2 + $0x341] ss:$2 sm:$0xff] }
 0x42e   : > { %4982 = vst.msk [vmem:[#allocation2 + $0x358] sm:$0xff] %vm3542_vm4, %v4856_v22  ;;  %v6104_v14 = vsel %vm6069_vm6, %v6040_v38, %v10086_v17  ;;  %v6105_v41 = vsel %vm6069_vm6, %v6041_v42, %v10087_v44  ;;  %v4598_v27 = vmul.f32 %v13879_v40, %v4412_v60  ;;  %v9151_v56 = vpop.f32.mrb[249].mxu1  ;;  %v14135_v18 = vmax.f32 %v5105_v8, %v5231_v63 }
 0x42f   : > { %v6150_v53 = vpack.c.bf16 %v6105_v41, %v6104_v14  ;;  %v4415_v32 = vpop.f32.mrb[250].mxu1 }
 0x430   : > { %v4731_v45 = vadd.f32 %v13887_v2, %v4598_v27  ;;  %v4599_v26 = vmul.f32 %v13879_v40, %v4415_v32  ;;  %v9152_v24 = vpop.f32.mrb[251].mxu1  ;;  %v5481_v36 = vrot.slane %v14135_v18, 1  ;;  %v5795_v34 = vrot.slane %v14135_v18, 2 }
 0x431   : > { %9230 = vmatmul.mubr.msk.bf16.gmra.mrb[128].mxu0 %vm6213_vm7, %v6150_v53 }
 0x432   : > { %v4857_v15 = vmax.f32 %v4731_v45, 0.0  ;;  %v4732_v3 = vadd.f32 %v13887_v2, %v4599_v26  ;;  %v5482_v43 = vsel %vm2152_vm1, %v5479_v61, %v5481_v36  ;;  %v5796_v16 = vsel %vm2784_vm2, %v5793_v20, %v5795_v34 }
 0x433   : > { %v10158_v5 = vpack.i.bf16 %v5482_v43, %v5480_v35  ;;  %v10163_v22 = vpack.i.bf16 %v5796_v16, %v5794_v47 }
 0x434   : > { %4983 = vst.msk [vmem:[#allocation2 + $0x360] sm:$0xff] %vm3542_vm4, %v4857_v15  ;;  %v4858_v39 = vmax.f32 %v4732_v3, 0.0 }
 0x435   : > { %10159 = vrot.lane.b32.xlu1 %v10158_v5, %s10485_s29  ;;  %v4420_v12 = vpop.f32.mrb[252].mxu1  ;;  %v5107_v52 = vld [vmem:[#allocation2 + $0x350] ss:$2 sm:$0xff]  ;;  %v5233_v13 = vld [vmem:[#allocation2 + $0x351] ss:$2 sm:$0xff] }
 0x436   : > { %4984 = vst.msk [vmem:[#allocation2 + $0x368] sm:$0xff] %vm3542_vm4, %v4858_v39  ;;  %v4600_v48 = vmul.f32 %v13879_v40, %v4420_v12  ;;  %v9155_v55 = vpop.f32.mrb[253].mxu1  ;;  %v14161_v8 = vpop.f32.mrb[104].mxu0  ;;  %v14163_v63 = vmax.f32 %v5107_v52, %v5233_v13 }
 0x437   : > { %v10090_v28 = vpop.permute.xlu0 %10089  ;;  %v4423_v7 = vpop.f32.mrb[254].mxu1 }
 0x438   : > { %v4733_v44 = vadd.f32 %v13887_v2, %v4600_v48  ;;  %v4601_v17 = vmul.f32 %v13879_v40, %v4423_v7  ;;  %v9156_v42 = vpop.f32.mrb[255].mxu1  ;;  %v10092_v38 = vunpack.i.h.bf16 %v10090_v28  ;;  %v10091_v60 = vunpack.i.l.bf16 %v10090_v28  ;;  %v14166_v14 = vpop.f32.mrb[105].mxu0 }
 0x439   : > { %10164 = vrot.lane.b32.xlu1 %v10163_v22, %s10486_s27  ;;  %v14168_v27 = vpop.f32.mrb[106].mxu0  ;;  %v5483_v35 = vrot.slane %v14163_v63, 1  ;;  %v5797_v13 = vrot.slane %v14163_v63, 2 }
 0x43a   : > { %v4859_v61 = vmax.f32 %v4733_v44, 0.0  ;;  %v4734_v19 = vadd.f32 %v13887_v2, %v4601_v17  ;;  %v14171_v45 = vpop.f32.mrb[107].mxu0  ;;  %v6043_v26 = vsel %vm3542_vm4, %v13825_v31, %v10092_v38  ;;  %v6042_v24 = vsel %vm3542_vm4, %v13801_v50, %v10091_v60 }
 0x43b   : > { %v10095_v41 = vpop.permute.xlu0 %10094  ;;  %v5484_v22 = vsel %vm2152_vm1, %v5481_v36, %v5483_v35 }
 0x43c   : > { %4985 = vst.msk [vmem:[#allocation2 + $0x370] sm:$0xff] %vm3542_vm4, %v4859_v61  ;;  %v4860_v56 = vmax.f32 %v4734_v19, 0.0  ;;  %v10097_v53 = vunpack.i.h.bf16 %v10095_v41  ;;  %v10096_v32 = vunpack.i.l.bf16 %v10095_v41  ;;  %v5798_v41 = vsel %vm2784_vm2, %v5795_v34, %v5797_v13 }
 0x43d   : > { %v4428_v20 = vpop.f32.mrb[0].mxu1  ;;  %v5109_v15 = vld [vmem:[#allocation2 + $0x360] ss:$2 sm:$0xff]  ;;  %v5235_v3 = vld [vmem:[#allocation2 + $0x361] ss:$2 sm:$0xff] }
 0x43e   : > { %4986 = vst.msk [vmem:[#allocation2 + $0x378] sm:$0xff] %vm3542_vm4, %v4860_v56  ;;  %v6106_v43 = vsel %vm6069_vm6, %v6042_v24, %v10096_v32  ;;  %v6107_v5 = vsel %vm6069_vm6, %v6043_v26, %v10097_v53  ;;  %v4602_v39 = vmul.f32 %v13879_v40, %v4428_v20  ;;  %v9159_v16 = vpop.f32.mrb[1].mxu1  ;;  %v14182_v12 = vmax.f32 %v5109_v15, %v5235_v3 }
 0x43f   : > { %v6151_v31 = vpack.c.bf16 %v6107_v5, %v6106_v43  ;;  %v4431_v48 = vpop.f32.mrb[2].mxu1 }
 0x440   : > { %v4735_v50 = vadd.f32 %v13887_v2, %v4602_v39  ;;  %v4603_v55 = vmul.f32 %v13879_v40, %v4431_v48  ;;  %v9160_v47 = vpop.f32.mrb[3].mxu1  ;;  %v5485_v52 = vrot.slane %v14182_v12, 1  ;;  %v5799_v42 = vrot.slane %v14182_v12, 2 }
 0x441   : > { %9233 = vmatprep.mubr.msk.bf16.mxu0 %vm6213_vm7, %v6151_v31 }
 0x442   : > { %v4861_v28 = vmax.f32 %v4735_v50, 0.0  ;;  %v4736_v7 = vadd.f32 %v13887_v2, %v4603_v55  ;;  %v5486_v44 = vsel %vm2152_vm1, %v5483_v35, %v5485_v52  ;;  %v5800_v61 = vsel %vm2784_vm2, %v5797_v13, %v5799_v42 }
 0x443   : > { %v10168_v17 = vpack.i.bf16 %v5486_v44, %v5484_v22  ;;  %v10173_v24 = vpack.i.bf16 %v5800_v61, %v5798_v41 }
 0x444   : > { %4987 = vst.msk [vmem:[#allocation2 + $0x380] sm:$0xff] %vm3542_vm4, %v4861_v28  ;;  %v4862_v38 = vmax.f32 %v4736_v7, 0.0 }
 0x445   : > { %10169 = vrot.lane.b32.xlu0 %v10168_v17, %s10485_s29  ;;  %v4436_v60 = vpop.f32.mrb[4].mxu1  ;;  %v5111_v56 = vld [vmem:[#allocation2 + $0x370] ss:$2 sm:$0xff]  ;;  %v5237_v53 = vld [vmem:[#allocation2 + $0x371] ss:$2 sm:$0xff] }
 0x446   : > { %4988 = vst.msk [vmem:[#allocation2 + $0x388] sm:$0xff] %vm3542_vm4, %v4862_v38  ;;  %v4604_v19 = vmul.f32 %v13879_v40, %v4436_v60  ;;  %v9163_v36 = vpop.f32.mrb[5].mxu1  ;;  %v14208_v5 = vmax.f32 %v5111_v56, %v5237_v53 }
 0x447   : > { %v10100_v32 = vpop.permute.xlu1 %10099  ;;  %v4439_v26 = vpop.f32.mrb[6].mxu1 }
 0x448   : > { %v4737_v20 = vadd.f32 %v13887_v2, %v4604_v19  ;;  %v4605_v15 = vmul.f32 %v13879_v40, %v4439_v26  ;;  %v9164_v3 = vpop.f32.mrb[7].mxu1  ;;  %v10102_v35 = vunpack.i.h.bf16 %v10100_v32  ;;  %v10101_v43 = vunpack.i.l.bf16 %v10100_v32 }
 0x449   : > { %10174 = vrot.lane.b32.xlu0 %v10173_v24, %s10486_s27  ;;  %v5487_v22 = vrot.slane %v14208_v5, 1  ;;  %v5801_v32 = vrot.slane %v14208_v5, 2 }
 0x44a   : > { %v4863_v39 = vmax.f32 %v4737_v20, 0.0  ;;  %v4738_v16 = vadd.f32 %v13887_v2, %v4605_v15  ;;  %v6045_v55 = vsel %vm3542_vm4, %v13864_v49, %v10102_v35  ;;  %v6044_v47 = vsel %vm3542_vm4, %v13838_v59, %v10101_v43 }
 0x44b   : > { %v10105_v34 = vpop.permute.xlu1 %10104  ;;  %v5488_v20 = vsel %vm2152_vm1, %v5485_v52, %v5487_v22 }
 0x44c   : > { %4989 = vst.msk [vmem:[#allocation2 + $0x390] sm:$0xff] %vm3542_vm4, %v4863_v39  ;;  %v4864_v31 = vmax.f32 %v4738_v16, 0.0  ;;  %v10107_v48 = vunpack.i.h.bf16 %v10105_v34  ;;  %v10106_v50 = vunpack.i.l.bf16 %v10105_v34  ;;  %v5802_v34 = vsel %vm2784_vm2, %v5799_v42, %v5801_v32  ;;  %v10447_v42 = vld [vmem:[%s15433_s10] sm:$0xff]  }
 0x44d   : > { %v4444_v13 = vpop.f32.mrb[8].mxu1  ;;  %v5113_v28 = vld [vmem:[#allocation2 + $0x380] ss:$2 sm:$0xff]  ;;  %v5239_v7 = vld [vmem:[#allocation2 + $0x381] ss:$2 sm:$0xff] }
 0x44e   : > { %4990 = vst.msk [vmem:[#allocation2 + $0x398] sm:$0xff] %vm3542_vm4, %v4864_v31  ;;  %v6108_v44 = vsel %vm6069_vm6, %v6044_v47, %v10106_v50  ;;  %v6109_v17 = vsel %vm6069_vm6, %v6045_v55, %v10107_v48  ;;  %v4606_v38 = vmul.f32 %v13879_v40, %v4444_v13  ;;  %v9167_v60 = vpop.f32.mrb[9].mxu1  ;;  %v14221_v61 = vmax.f32 %v5113_v28, %v5239_v7 }
 0x44f   : > { %v6152_v49 = vpack.c.bf16 %v6109_v17, %v6108_v44  ;;  %v4447_v19 = vpop.f32.mrb[10].mxu1 }
 0x450   : > { %v4739_v59 = vadd.f32 %v13887_v2, %v4606_v38  ;;  %v4607_v36 = vmul.f32 %v13879_v40, %v4447_v19  ;;  %v9168_v41 = vpop.f32.mrb[11].mxu1  ;;  %v5489_v56 = vrot.slane %v14221_v61, 1  ;;  %v5803_v53 = vrot.slane %v14221_v61, 2 }
 0x451   : > { %9234 = vmatmul.mubr.msk.bf16.gmra.mrb[132].mxu0 %vm6213_vm7, %v6152_v49  ;;  %v10487_v41 = vmov 0  }
 0x452   : > { %v4865_v26 = vmax.f32 %v4739_v59, 0.0  ;;  %v4740_v24 = vadd.f32 %v13887_v2, %v4607_v36  ;;  %v5490_v15 = vsel %vm2152_vm1, %v5487_v22, %v5489_v56  ;;  %v5804_v43 = vsel %vm2784_vm2, %v5801_v32, %v5803_v53  ;;  %7685 = vmatprep.subr.bf16.mxu0 %v10487_v41 }
 0x453   : > { %v10178_v3 = vpack.i.bf16 %v5490_v15, %v5488_v20  ;;  %v10183_v47 = vpack.i.bf16 %v5804_v43, %v5802_v34  ;;  %7686 = vmatpush1.bf16.msra.mxu0 %v10447_v42  ;;  %v10448_v34 = vld [vmem:[%s15433_s10 + $0x8] sm:$0xff]  }
 0x454   : > { %4991 = vst.msk [vmem:[#allocation2 + $0x3a0] sm:$0xff] %vm3542_vm4, %v4865_v26  ;;  %v4866_v35 = vmax.f32 %v4740_v24, 0.0  ;;  %7687 = vmatprep.subr.bf16.mxu0 %v10487_v41 }
 0x455   : > { %10179 = vrot.lane.b32.xlu1 %v10178_v3, %s10485_s29  ;;  %v4452_v39 = vpop.f32.mrb[12].mxu1  ;;  %v5115_v31 = vld [vmem:[#allocation2 + $0x390] ss:$2 sm:$0xff]  ;;  %v5241_v48 = vld [vmem:[#allocation2 + $0x391] ss:$2 sm:$0xff] }
 0x456   : > { %4992 = vst.msk [vmem:[#allocation2 + $0x3a8] sm:$0xff] %vm3542_vm4, %v4866_v35  ;;  %v4608_v16 = vmul.f32 %v13879_v40, %v4452_v39  ;;  %v9171_v52 = vpop.f32.mrb[13].mxu1  ;;  %v14247_v17 = vmax.f32 %v5115_v31, %v5241_v48 }
 0x457   : > { %v10110_v50 = vpop.permute.xlu0 %10109  ;;  %v4455_v55 = vpop.f32.mrb[14].mxu1  ;;  %7688 = vmatpush1.bf16.msra.mxu0 %v10448_v34 }
 0x458   : > { %v4741_v13 = vadd.f32 %v13887_v2, %v4608_v16  ;;  %v4609_v28 = vmul.f32 %v13879_v40, %v4455_v55  ;;  %v9172_v7 = vpop.f32.mrb[15].mxu1  ;;  %v10112_v22 = vunpack.i.h.bf16 %v10110_v50  ;;  %v10111_v44 = vunpack.i.l.bf16 %v10110_v50  ;;  %7689 = vmatprep.subr.bf16.mxu0 %v10487_v41 }
 0x459   : > { %10184 = vrot.lane.b32.xlu1 %v10183_v47, %s10486_s27  ;;  %v5491_v3 = vrot.slane %v14247_v17, 1 }
 0x45a   : > { %v4867_v38 = vmax.f32 %v4741_v13, 0.0  ;;  %v4742_v60 = vadd.f32 %v13887_v2, %v4609_v28  ;;  %v6047_v32 = vsel %vm3542_vm4, %v13915_v23, %v10112_v22  ;;  %v6046_v26 = vsel %vm3542_vm4, %v13882_v29, %v10111_v44  ;;  %v10449_v28 = vld [vmem:[%s15433_s10 + $0x10] sm:$0xff]  }
 0x45b   : > { %v10115_v49 = vpop.permute.xlu0 %10114  ;;  %v5805_v13 = vrot.slane %v14247_v17, 2  ;;  %v5492_v22 = vsel %vm2152_vm1, %v5489_v56, %v5491_v3  ;;  %v14301_v56 = vld [vmem:[%s15431_s8] ss:$0 sm:$0xff]  ;;  %7690 = vmatpush1.bf16.msra.mxu0 %v10449_v28 }
 0x45c   : > { %4993 = vst.msk [vmem:[#allocation2 + $0x3b0] sm:$0xff] %vm3542_vm4, %v4867_v38  ;;  %v4868_v19 = vmax.f32 %v4742_v60, 0.0  ;;  %v10117_v59 = vunpack.i.h.bf16 %v10115_v49  ;;  %v10116_v36 = vunpack.i.l.bf16 %v10115_v49  ;;  %7691 = vmatprep.subr.bf16.mxu0 %v10487_v41 }
 0x45d   : > { %v4460_v24 = vpop.f32.mrb[16].mxu1  ;;  %v5117_v20 = vld [vmem:[#allocation2 + $0x3a0] ss:$2 sm:$0xff]  ;;  %v5243_v15 = vld [vmem:[#allocation2 + $0x3a1] ss:$2 sm:$0xff] }
 0x45e   : > { %4994 = vst.msk [vmem:[#allocation2 + $0x3b8] sm:$0xff] %vm3542_vm4, %v4868_v19  ;;  %v6110_v35 = vsel %vm6069_vm6, %v6046_v26, %v10116_v36  ;;  %v6111_v43 = vsel %vm6069_vm6, %v6047_v32, %v10117_v59  ;;  %v4610_v39 = vmul.f32 %v13879_v40, %v4460_v24  ;;  %v9175_v16 = vpop.f32.mrb[17].mxu1  ;;  %v14264_v52 = vmax.f32 %v5117_v20, %v5243_v15  ;;  %v10470_v36 = vld [vmem:[%s15428_s5] ss:$0 sm:$0xff] }
 0x45f   : > { %v6153_v29 = vpack.c.bf16 %v6111_v43, %v6110_v35  ;;  %v4463_v23 = vpop.f32.mrb[18].mxu1  ;;  %v5806_v20 = vsel %vm2784_vm2, %v5803_v53, %v5805_v13  ;;  %v6607_v43 = vmul.f32 %v13917_v25, %v14301_v56  ;;  %v6606_v53 = vmul.f32 %v14301_v56, %v13925_v54 }
 0x460   : > { %v4743_v31 = vadd.f32 %v13887_v2, %v4610_v39  ;;  %v4611_v48 = vmul.f32 %v13879_v40, %v4463_v23  ;;  %v9176_v50 = vpop.f32.mrb[19].mxu1  ;;  %v5493_v55 = vrot.slane %v14264_v52, 1  ;;  %v5807_v47 = vrot.slane %v14264_v52, 2  ;;  %v14282_v2 = vld [vmem:[%s15429_s6] ss:$0 sm:$0xff]  ;;  %v14293_v42 = vpop.f32.mrb[108].mxu0 }
 0x461   : > { %9237 = vmatprep.mubr.msk.bf16.mxu0 %vm6213_vm7, %v6153_v29  ;;  %v14303_v19 = vpop.f32.mrb[109].mxu0 }
 0x462   : > { %v4869_v7 = vmax.f32 %v4743_v31, 0.0  ;;  %v4744_v40 = vadd.f32 %v14282_v2, %v4611_v48  ;;  %v5494_v44 = vsel %vm2152_vm1, %v5491_v3, %v5493_v55  ;;  %v5808_v49 = vsel %vm2784_vm2, %v5805_v13, %v5807_v47  ;;  %v14310_v24 = vpop.f32.mrb[110].mxu0  ;;  %v14324_v31 = vld [vmem:[%s15432_s9] ss:$0 sm:$0xff] }
 0x463   : > { %v10188_v38 = vpack.i.bf16 %v5494_v44, %v5492_v22  ;;  %v10193_v35 = vpack.i.bf16 %v5808_v49, %v5806_v20  ;;  %v14319_v16 = vpop.f32.mrb[111].mxu0  ;;  %v6677_v22 = vadd.f32 %v14324_v31, %v6607_v43  ;;  %v6605_v44 = vmul.f32 %v14301_v56, %v13920_v11 }
 0x464   : > { %4995 = vst.msk [vmem:[#allocation2 + $0x3c0] sm:$0xff] %vm3542_vm4, %v4869_v7  ;;  %v4870_v60 = vmax.f32 %v4744_v40, 0.0 }
 0x465   : > { %10189 = vrot.lane.b32.xlu0 %v10188_v38, %s10485_s29  ;;  %v4468_v59 = vpop.f32.mrb[20].mxu1  ;;  %v5119_v23 = vld [vmem:[#allocation2 + $0x3b0] ss:$2 sm:$0xff]  ;;  %v5245_v34 = vld [vmem:[#allocation2 + $0x3b1] ss:$2 sm:$0xff]  ;;  %v6608_v38 = vmul.f32 %v13922_v57, %v14301_v56 }
 0x466   : > { %4996 = vst.msk [vmem:[#allocation2 + $0x3c8] sm:$0xff] %vm3542_vm4, %v4870_v60  ;;  %v4612_v32 = vmul.f32 %v10470_v36, %v4468_v59  ;;  %v9179_v26 = vpop.f32.mrb[21].mxu1  ;;  %v14330_v40 = vmax.f32 %v5119_v23, %v5245_v34  ;;  %v6676_v60 = vadd.f32 %v14324_v31, %v6606_v53 }
 0x467   : > { %v10120_v15 = vpop.permute.xlu1 %10119  ;;  %v4471_v3 = vpop.f32.mrb[22].mxu1 }
 0x468   : > { %v4745_v39 = vadd.f32 %v14282_v2, %v4612_v32  ;;  %v9180_v29 = vpop.f32.mrb[23].mxu1  ;;  %v10122_v48 = vunpack.i.h.bf16 %v10120_v15  ;;  %v4613_v50 = vmul.f32 %v10470_v36, %v4471_v3  ;;  %v10121_v13 = vunpack.i.l.bf16 %v10120_v15 }
 0x469   : > { %10194 = vrot.lane.b32.xlu0 %v10193_v35, %s10486_s27  ;;  %v6609_v15 = vmul.f32 %v14301_v56, %v14043_v30  ;;  %v5495_v30 = vrot.slane %v14330_v40, 1 }
 0x46a   : > { %v4871_v25 = vmax.f32 %v4745_v39, 0.0  ;;  %v4746_v28 = vadd.f32 %v14282_v2, %v4613_v50  ;;  %v6049_v49 = vsel %vm3542_vm4, %v13962_v4, %v10122_v48  ;;  %v6048_v11 = vsel %vm3542_vm4, %v13936_v9, %v10121_v13  ;;  %v10450_v39 = vld [vmem:[%s15433_s10 + $0x18] sm:$0xff]   ;;  %v10451_v50 = vld [vmem:[%s15433_s10 + $0x20] sm:$0xff]  }
 0x46b   : > { %v10125_v7 = vpop.permute.xlu1 %10124  ;;  %v6675_v9 = vadd.f32 %v14324_v31, %v6605_v44  ;;  %7692 = vmatpush1.bf16.msra.mxu0 %v10450_v39  ;;  %v6678_v13 = vadd.f32 %v14324_v31, %v6608_v38  ;;  %v6679_v44 = vadd.f32 %v14324_v31, %v6609_v15  ;;  %v5809_v38 = vrot.slane %v14330_v40, 2 }
 0x46c   : > { %4997 = vst.msk [vmem:[#allocation2 + $0x3d0] sm:$0xff] %vm3542_vm4, %v4871_v25  ;;  %v10127_v54 = vunpack.i.h.bf16 %v10125_v7  ;;  %v4872_v59 = vmax.f32 %v4746_v28, 0.0  ;;  %v10126_v32 = vunpack.i.l.bf16 %v10125_v7  ;;  %v14359_v25 = vmax.f32 %v6677_v22, 0.0  ;;  %7693 = vmatprep.subr.bf16.mxu0 %v10487_v41 }
 0x46d   : > { %v4476_v26 = vpop.f32.mrb[24].mxu1  ;;  %v5121_v20 = vld [vmem:[#allocation2 + $0x3c0] ss:$2 sm:$0xff]  ;;  %v5247_v43 = vld [vmem:[#allocation2 + $0x3c1] ss:$2 sm:$0xff]  ;;  %v5496_v22 = vsel %vm2152_vm1, %v5493_v55, %v5495_v30 }
 0x46e   : > { %v6113_v57 = vsel %vm6069_vm6, %v6049_v49, %v10127_v54  ;;  %v4614_v3 = vmul.f32 %v10470_v36, %v4476_v26  ;;  %v9183_v35 = vpop.f32.mrb[25].mxu1  ;;  %4998 = vst.msk [vmem:[#allocation2 + $0x3d8] sm:$0xff] %vm3542_vm4, %v4872_v59  ;;  %v6112_v4 = vsel %vm6069_vm6, %v6048_v11, %v10126_v32  ;;  %v14351_v23 = vmax.f32 %v5121_v20, %v5247_v43 }
 0x46f   : > { %v4479_v29 = vpop.f32.mrb[26].mxu1  ;;  %v6154_v34 = vpack.c.bf16 %v6113_v57, %v6112_v4  ;;  %v14364_v54 = vmax.f32 %v6676_v60, 0.0  ;;  %v14377_v60 = vmax.f32 %v6675_v9, 0.0  ;;  %v6612_v26 = vmul.f32 %v14045_v1, %v14301_v56  ;;  %7694 = vmatpush1.bf16.msra.mxu0 %v10451_v50 }
 0x470   : > { %v4747_v53 = vadd.f32 %v14282_v2, %v4614_v3  ;;  %v9184_v48 = vpop.f32.mrb[27].mxu1  ;;  %v4615_v28 = vmul.f32 %v10470_v36, %v4479_v29  ;;  %v5497_v7 = vrot.slane %v14351_v23, 1  ;;  %v5811_v59 = vrot.slane %v14351_v23, 2  ;;  %7695 = vmatprep.subr.bf16.mxu0 %v10487_v41 }
 0x471   : > { %9238 = vmatmul.mubr.msk.bf16.gmra.mrb[136].mxu0 %vm6213_vm7, %v6154_v34  ;;  %v6867_v11 = vrot.slane %v14359_v25, 1  ;;  %v14390_v57 = vmax.f32 %v6678_v13, 0.0  ;;  %v6865_v1 = vrot.slane %v14364_v54, 1  ;;  %v6611_v3 = vmul.f32 %v14040_v51, %v14301_v56 }
 0x472   : > { %v4873_v49 = vmax.f32 %v4747_v53, 0.0  ;;  %v4748_v32 = vadd.f32 %v14282_v2, %v4615_v28  ;;  %v5498_v36 = vsel %vm2152_vm1, %v5495_v30, %v5497_v7  ;;  %v10452_v2 = vld [vmem:[%s15433_s10 + $0x28] sm:$0xff]   ;;  %v5812_v15 = vsel %vm2784_vm2, %v5809_v38, %v5811_v59 }
 0x473   : > { %v10198_v20 = vpack.i.bf16 %v5498_v36, %v5496_v22  ;;  %v14396_v35 = vmax.f32 %v6679_v44, 0.0  ;;  %v6613_v43 = vmul.f32 %v14301_v56, %v14166_v14  ;;  %v5810_v4 = vsel %vm2784_vm2, %v5807_v47, %v5809_v38  ;;  %7696 = vmatpush1.bf16.msra.mxu0 %v10452_v2  ;;  %v10453_v14 = vld [vmem:[%s15433_s10 + $0x30] sm:$0xff]   ;;  %v10454_v2 = vld [vmem:[%s15433_s10 + $0x38] sm:$0xff]  }
 0x474   : > { %4999 = vst.msk [vmem:[#allocation2 + $0x3e0] sm:$0xff] %vm3542_vm4, %v4873_v49  ;;  %v4874_v55 = vmax.f32 %v4748_v32, 0.0  ;;  %v6864_v29 = vrot.slane %v14377_v60, 1  ;;  %v6682_v30 = vadd.f32 %v14324_v31, %v6612_v26  ;;  %v6610_v9 = vmul.f32 %v14301_v56, %v14048_v58  ;;  %7697 = vmatprep.subr.bf16.mxu0 %v10487_v41 }
 0x475   : > { %10199 = vrot.lane.b32.xlu1 %v10198_v20, %s10485_s29  ;;  %v10203_v51 = vpack.i.bf16 %v5812_v15, %v5810_v4  ;;  %v5123_v34 = vld [vmem:[#allocation2 + $0x3d0] ss:$2 sm:$0xff]  ;;  %v5249_v53 = vld [vmem:[#allocation2 + $0x3d1] ss:$2 sm:$0xff]  ;;  %v6869_v47 = vrot.slane %v14390_v57, 1  ;;  %v14418_v58 = vsel %vm2152_vm1, %v6865_v1, %v6867_v11  ;;  %v6681_v28 = vadd.f32 %v14324_v31, %v6611_v3 }
 0x476   : > { %5000 = vst.msk [vmem:[#allocation2 + $0x3e8] sm:$0xff] %vm3542_vm4, %v4874_v55  ;;  %v14415_v13 = vsel %vm2152_vm1, %v6864_v29, %v6865_v1  ;;  %v6871_v44 = vrot.slane %v14396_v35, 1  ;;  %v6683_v49 = vadd.f32 %v14324_v31, %v6613_v43  ;;  %v14423_v22 = vmax.f32 %v5123_v34, %v5249_v53  ;;  %v10455_v53 = vld [vmem:[%s15433_s10 + $0x40] sm:$0xff]  }
 0x477   : > { %v10130_v39 = vpop.permute.xlu0 %10129  ;;  %v14425_v36 = vmax.f32 %v6682_v30, 0.0  ;;  %v6680_v38 = vadd.f32 %v14324_v31, %v6610_v9  ;;  %7698 = vmatpush1.bf16.msra.mxu0 %v10453_v14  ;;  %v6615_v55 = vmul.f32 %v14161_v8, %v14301_v56  ;;  %v6616_v15 = vmul.f32 %v14168_v27, %v14301_v56 }
 0x478   : > { %v10132_v48 = vunpack.i.h.bf16 %v10130_v39  ;;  %v10131_v50 = vunpack.i.l.bf16 %v10130_v39  ;;  %7699 = vmatprep.subr.bf16.mxu0 %v10487_v41  ;;  %v6614_v43 = vmul.f32 %v14301_v56, %v14171_v45  ;;  %v6617_v39 = vmul.f32 %v14301_v56, %v14303_v19 }
 0x479   : > { %10204 = vrot.lane.b32.xlu1 %v10203_v51, %s10486_s27  ;;  %v14446_v30 = vmax.f32 %v6683_v49, 0.0  ;;  %v14451_v51 = vmax.f32 %v6681_v28, 0.0  ;;  %v14454_v45 = vsel %vm2152_vm1, %v6867_v11, %v6869_v47  ;;  %v14459_v19 = vsel %vm2152_vm1, %v6869_v47, %v6871_v44 }
 0x47a   : > { %v6051_v1 = vsel %vm3542_vm4, %v13999_v62, %v10132_v48  ;;  %v6050_v3 = vsel %vm3542_vm4, %v13975_v33, %v10131_v50  ;;  %v5499_v33 = vrot.slane %v14423_v22, 1  ;;  %v10218_v34 = vpack.i.bf16 %v14418_v58, %v14415_v13 }
 0x47b   : > { %v10135_v32 = vpop.permute.xlu0 %10134  ;;  %7700 = vmatpush1.bf16.msra.mxu0 %v10454_v2  ;;  %v6877_v14 = vrot.slane %v14425_v36, 1  ;;  %v14467_v48 = vmax.f32 %v6680_v38, 0.0  ;;  %v6685_v47 = vadd.f32 %v14324_v31, %v6615_v55  ;;  %v6686_v28 = vadd.f32 %v14324_v31, %v6616_v15 }
 0x47c   : > { %v10137_v26 = vunpack.i.h.bf16 %v10135_v32  ;;  %v10136_v20 = vunpack.i.l.bf16 %v10135_v32  ;;  %7701 = vmatprep.subr.bf16.mxu0 %v10487_v41  ;;  %v6684_v49 = vadd.f32 %v14324_v31, %v6614_v43  ;;  %v6687_v32 = vadd.f32 %v14324_v31, %v6617_v39  ;;  %v10456_v39 = vld [vmem:[%s15433_s10 + $0x48] sm:$0xff]  }
 0x47d   : > { %v5125_v29 = vld [vmem:[#allocation2 + $0x3e0] ss:$2 sm:$0xff]  ;;  %v5251_v27 = vld [vmem:[#allocation2 + $0x3e1] ss:$2 sm:$0xff]  ;;  %v5500_v38 = vsel %vm2152_vm1, %v5497_v7, %v5499_v33  ;;  %v5813_v2 = vrot.slane %v14423_v22, 2  ;;  %v6875_v55 = vrot.slane %v14451_v51, 1  ;;  %v6619_v15 = vmul.f32 %v14293_v42, %v14301_v56 }
 0x47e   : > { %v6114_v4 = vsel %vm6069_vm6, %v6050_v3, %v10136_v20  ;;  %v6115_v8 = vsel %vm6069_vm6, %v6051_v1, %v10137_v26  ;;  %v14448_v9 = vmax.f32 %v5125_v29, %v5251_v27  ;;  %v15562_v26 = vrot.slane %v14446_v30, 1 }
 0x47f   : > { %v6155_v62 = vpack.c.bf16 %v6115_v8, %v6114_v4  ;;  %v6620_v1 = vmul.f32 %v14310_v24, %v14301_v56  ;;  %7702 = vmatpush1.bf16.msra.mxu0 %v10455_v53  ;;  %v6873_v7 = vrot.slane %v14467_v48, 1  ;;  %v6618_v4 = vmul.f32 %v14301_v56, %v14319_v16 }
 0x480   : > { %v5501_v11 = vrot.slane %v14448_v9, 1  ;;  %v5815_v50 = vrot.slane %v14448_v9, 2  ;;  %v10223_v42 = vpack.i.bf16 %v14459_v19, %v14454_v45  ;;  %7703 = vmatprep.subr.bf16.mxu0 %v10487_v41  ;;  %v14499_v24 = vmax.f32 %v6685_v47, 0.0 }
 0x481   : > { %9241 = vmatprep.mubr.msk.bf16.mxu0 %vm6213_vm7, %v6155_v62  ;;  %v14501_v27 = vmax.f32 %v6687_v32, 0.0  ;;  %v6878_v16 = vsel %vm2152_vm1, %v6875_v55, %v6877_v14  ;;  %v14508_v53 = vmax.f32 %v6686_v28, 0.0  ;;  %v5814_v47 = vsel %vm2784_vm2, %v5811_v59, %v5813_v2 }
 0x482   : > { %5627 = vrot.lane.b32.xlu1 %v5501_v11, %s10485_s29  ;;  %v5502_v20 = vsel %vm2152_vm1, %v5499_v33, %v5501_v11  ;;  %v5816_v29 = vsel %vm2784_vm2, %v5813_v2, %v5815_v50  ;;  %v14510_v11 = vmax.f32 %v6684_v49, 0.0  ;;  %v6880_v32 = vsel %vm2152_vm1, %v6877_v14, %v15562_v26 }
 0x483   : > { %v10208_v43 = vpack.i.bf16 %v5502_v20, %v5500_v38  ;;  %v6689_v38 = vadd.f32 %v14324_v31, %v6619_v15  ;;  %v6690_v20 = vadd.f32 %v14324_v31, %v6620_v1  ;;  %v10213_v49 = vpack.i.bf16 %v5816_v29, %v5814_v47  ;;  %7704 = vmatpush1.bf16.msra.mxu0 %v10456_v39 }
 0x484   : > { %v9215_v3 = vpop.f32.mrb[112].mxu0  ;;  %v6874_v14 = vsel %vm2152_vm1, %v6871_v44, %v6873_v7  ;;  %7705 = vmatprep.subr.bf16.mxu0 %v10487_v41  ;;  %v6887_v15 = vrot.slane %v14501_v27, 1  ;;  %v6885_v29 = vrot.slane %v14508_v53, 1  ;;  %v6881_v47 = vrot.slane %v14510_v11, 1 }
 0x485   : > { %v6408_v8 = vpop.f32.mrb[113].mxu0  ;;  %10209 = vrot.lane.b32.xlu0 %v10208_v43, %s10485_s29  ;;  %v6688_v43 = vadd.f32 %v14324_v31, %v6618_v4  ;;  %v6883_v4 = vrot.slane %v14499_v24, 1  ;;  %v14541_v26 = vmax.f32 %v6689_v38, 0.0  ;;  %v15858_v13 = vrot.slane %v14446_v30, 1 }
 0x486   : > { %v6621_v62 = vmul.f32 %v14301_v56, %v6408_v8  ;;  %v14505_v33 = vpop.f32.mrb[114].mxu0  ;;  %5941 = vrot.lane.b32.xlu1 %v5815_v50, %s10486_s27  ;;  %v10457_v50 = vld [vmem:[%s15433_s10 + $0x50] sm:$0xff]   ;;  %v6876_v8 = vsel %vm2152_vm1, %v6873_v7, %v6875_v55  ;;  %v6888_v38 = vsel %vm2152_vm1, %v6885_v29, %v6887_v15 }
 0x487   : > { %v6411_v45 = vpop.f32.mrb[115].mxu0  ;;  %v10140_v19 = vpop.permute.xlu1 %10139  ;;  %7706 = vmatpush1.bf16.msra.mxu0 %v10457_v50  ;;  %v6882_v58 = vsel %vm2152_vm1, %v15858_v13, %v6881_v47 }
 0x488   : > { %v6691_v28 = vadd.f32 %v14324_v31, %v6621_v62  ;;  %v6622_v59 = vmul.f32 %v14301_v56, %v6411_v45  ;;  %v10142_v2 = vunpack.i.h.bf16 %v10140_v19  ;;  %v10141_v39 = vunpack.i.l.bf16 %v10140_v19  ;;  %7707 = vmatprep.subr.bf16.mxu0 %v10487_v41 }
 0x489   : > { %10214 = vrot.lane.b32.xlu0 %v10213_v49, %s10486_s27  ;;  %v6623_v62 = vmul.f32 %v9215_v3, %v14301_v56  ;;  %v10233_v45 = vpack.i.bf16 %v6880_v32, %v6878_v16  ;;  %v14545_v49 = vmax.f32 %v6688_v43, 0.0 }
 0x48a   : > { %v14532_v1 = vmax.f32 %v6691_v28, 0.0  ;;  %10224 = vrot.lane.b32.xlu1 %v10223_v42, %s10486_s27  ;;  %v14543_v28 = vmax.f32 %v6690_v20, 0.0  ;;  %v6692_v55 = vadd.f32 %v14324_v31, %v6622_v59  ;;  %v6053_v7 = vsel %vm3542_vm4, %v14038_v6, %v10142_v2  ;;  %v10458_v6 = vld [vmem:[%s15433_s10 + $0x58] sm:$0xff]  }
 0x48b   : > { %v10145_v44 = vpop.permute.xlu1 %10144  ;;  %v6052_v16 = vsel %vm3542_vm4, %v14012_v0, %v10141_v39  ;;  %v6693_v41 = vadd.f32 %v14324_v31, %v6623_v62  ;;  %v10228_v0 = vpack.i.bf16 %v6876_v8, %v6874_v14  ;;  %v6886_v59 = vsel %vm2152_vm1, %v6883_v4, %v6885_v29  ;;  %7708 = vmatpush1.bf16.msra.mxu0 %v10458_v6 }
 0x48c   : > { %v10147_v19 = vunpack.i.h.bf16 %v10145_v44  ;;  %v10146_v3 = vunpack.i.l.bf16 %v10145_v44  ;;  %v6895_v42 = vrot.slane %v14532_v1, 1  ;;  %v6893_v50 = vrot.slane %v14543_v28, 1 }
 0x48d   : > { %10219 = vrot.lane.b32.xlu0 %v10218_v34, %s10486_s27  ;;  %v6889_v34 = vrot.slane %v14545_v49, 1  ;;  %v14572_v2 = vmax.f32 %v6692_v55, 0.0  ;;  %v10243_v39 = vpack.i.bf16 %v6888_v38, %v6886_v59  ;;  %v6884_v62 = vsel %vm2152_vm1, %v6881_v47, %v6883_v4 }
 0x48e   : > { %v6117_v32 = vsel %vm6069_vm6, %v6053_v7, %v10147_v19  ;;  %v6116_v20 = vsel %vm6069_vm6, %v6052_v16, %v10146_v3  ;;  %10234 = vrot.lane.b32.xlu1 %v10233_v45, %s10486_s27  ;;  %v6891_v44 = vrot.slane %v14541_v26, 1  ;;  %v6896_v14 = vsel %vm2152_vm1, %v6893_v50, %v6895_v42 }
 0x48f   : > { %v6156_v43 = vpack.c.bf16 %v6117_v32, %v6116_v20  ;;  %v14579_v8 = vmax.f32 %v6693_v41, 0.0  ;;  %v10238_v29 = vpack.i.bf16 %v6884_v62, %v6882_v58  ;;  %v6897_v19 = vrot.slane %v14572_v2, 1 }
 0x490   : > { %v6894_v45 = vsel %vm2152_vm1, %v6891_v44, %v6893_v50  ;;  %v6890_v4 = vsel %vm2152_vm1, %v6887_v15, %v6889_v34  ;;  %v6892_v47 = vsel %vm2152_vm1, %v6889_v34, %v6891_v44 }
 0x491   : > { %9242 = vmatmul.mubr.msk.bf16.gmra.mrb[140].mxu0 %vm6213_vm7, %v6156_v43  ;;  %10229 = vrot.lane.b32.xlu0 %v10228_v0, %s10486_s27  ;;  %v10253_v55 = vpack.i.bf16 %v6896_v14, %v6894_v45  ;;  %v6899_v7 = vrot.slane %v14579_v8, 1  ;;  %v10248_v16 = vpack.i.bf16 %v6892_v47, %v6890_v4  ;;  %v6898_v6 = vsel %vm2152_vm1, %v6895_v42, %v6897_v19 }
 0x492   : > { %10244 = vrot.lane.b32.xlu1 %v10243_v39, %s10486_s27  ;;  %v6624_v43 = vmul.f32 %v14505_v33, %v14301_v56 }
 0x493   : > { %v6900_v41 = vsel %vm2152_vm1, %v6897_v19, %v6899_v7 }
 0x494   : > { %v10258_v50 = vpack.i.bf16 %v6900_v41, %v6898_v6  ;;  %v6694_v39 = vadd.f32 %v14324_v31, %v6624_v43 }
 0x495   : > { %10239 = vrot.lane.b32.xlu0 %v10238_v29, %s10486_s27 }
 0x496   : > { %10254 = vrot.lane.b32.xlu1 %v10253_v55, %s10486_s27  ;;  %v14603_v44 = vmax.f32 %v6694_v39, 0.0 }
 0x497   : > { %v10150_v3 = vpop.permute.xlu0 %10149 }
 0x498   : > { %v10152_v32 = vunpack.i.h.bf16 %v10150_v3  ;;  %v10151_v38 = vunpack.i.l.bf16 %v10150_v3  ;;  %v6901_v47 = vrot.slane %v14603_v44, 1 }
 0x499   : > { %10249 = vrot.lane.b32.xlu0 %v10248_v16, %s10486_s27 }
 0x49a   : > { %v6055_v59 = vsel %vm3542_vm4, %v14085_v37, %v10152_v32  ;;  %v6054_v13 = vsel %vm3542_vm4, %v14059_v21, %v10151_v38 }
 0x49b   : > { %v10155_v20 = vpop.permute.xlu0 %10154 }
 0x49c   : > { %v10157_v15 = vunpack.i.h.bf16 %v10155_v20  ;;  %v10156_v0 = vunpack.i.l.bf16 %v10155_v20 }
 0x49d   : > { %10259 = vrot.lane.b32.xlu0 %v10258_v50, %s10486_s27 }
 0x49e   : > { %v6118_v58 = vsel %vm6069_vm6, %v6054_v13, %v10156_v0  ;;  %v6119_v42 = vsel %vm6069_vm6, %v6055_v59, %v10157_v15  ;;  %v6902_v13 = vsel %vm2152_vm1, %v6899_v7, %v6901_v47 }
 0x49f   : > { %v6157_v34 = vpack.c.bf16 %v6119_v42, %v6118_v58 }
 0x4a1   : > { %9245 = vmatprep.mubr.msk.bf16.mxu0 %vm6213_vm7, %v6157_v34 }
 0x4a4   : > { %v9219_v62 = vpop.f32.mrb[116].mxu0 }
 0x4a5   : > { %v6627_v33 = vmul.f32 %v9219_v62, %v14301_v56  ;;  %v6424_v37 = vpop.f32.mrb[117].mxu0 }
 0x4a6   : > { %v6625_v14 = vmul.f32 %v14301_v56, %v6424_v37  ;;  %v9220_v21 = vpop.f32.mrb[118].mxu0 }
 0x4a7   : > { %v6697_v29 = vadd.f32 %v14324_v31, %v6627_v33  ;;  %v6427_v45 = vpop.f32.mrb[119].mxu0  ;;  %v10160_v19 = vpop.permute.xlu1 %10159 }
 0x4a8   : > { %v6695_v55 = vadd.f32 %v14324_v31, %v6625_v14  ;;  %v6626_v4 = vmul.f32 %v14301_v56, %v6427_v45  ;;  %v10162_v3 = vunpack.i.h.bf16 %v10160_v19  ;;  %v10161_v16 = vunpack.i.l.bf16 %v10160_v19 }
 0x4a9   : > { %v14611_v32 = vmax.f32 %v6697_v29, 0.0 }
 0x4aa   : > { %v14613_v38 = vmax.f32 %v6695_v55, 0.0  ;;  %v6696_v6 = vadd.f32 %v14324_v31, %v6626_v4  ;;  %v6057_v50 = vsel %vm3542_vm4, %v14122_v46, %v10162_v3  ;;  %v6056_v43 = vsel %vm3542_vm4, %v14098_v10, %v10161_v16 }
 0x4ab   : > { %v10165_v41 = vpop.permute.xlu1 %10164  ;;  %v6907_v58 = vrot.slane %v14611_v32, 1 }
 0x4ac   : > { %v6903_v20 = vrot.slane %v14613_v38, 1  ;;  %v14617_v15 = vmax.f32 %v6696_v6, 0.0  ;;  %v10167_v0 = vunpack.i.h.bf16 %v10165_v41  ;;  %v10166_v59 = vunpack.i.l.bf16 %v10165_v41 }
 0x4ae   : > { %v6905_v42 = vrot.slane %v14617_v15, 1  ;;  %v6121_v34 = vsel %vm6069_vm6, %v6057_v50, %v10167_v0  ;;  %v6904_v39 = vsel %vm2152_vm1, %v6901_v47, %v6903_v20  ;;  %v6120_v62 = vsel %vm6069_vm6, %v6056_v43, %v10166_v59 }
 0x4af   : > { %v10263_v33 = vpack.i.bf16 %v6904_v39, %v6902_v13  ;;  %v6158_v37 = vpack.c.bf16 %v6121_v34, %v6120_v62  ;;  %v6628_v47 = vmul.f32 %v9220_v21, %v14301_v56 }
 0x4b0   : > { %v6906_v46 = vsel %vm2152_vm1, %v6903_v20, %v6905_v42  ;;  %v6908_v14 = vsel %vm2152_vm1, %v6905_v42, %v6907_v58 }
 0x4b1   : > { %10264 = vrot.lane.b32.xlu1 %v10263_v33, %s10486_s27  ;;  %v10268_v10 = vpack.i.bf16 %v6908_v14, %v6906_v46  ;;  %9246 = vmatmul.mubr.msk.bf16.gmra.mrb[144].mxu0 %vm6213_vm7, %v6158_v37  ;;  %v6698_v0 = vadd.f32 %v14324_v31, %v6628_v47 }
 0x4b3   : > { %10269 = vrot.lane.b32.xlu0 %v10268_v10, %s10486_s27  ;;  %v14643_v43 = vmax.f32 %v6698_v0, 0.0 }
 0x4b5   : > { %v6909_v33 = vrot.slane %v14643_v43, 1 }
 0x4b7   : > { %v10170_v7 = vpop.permute.xlu0 %10169 }
 0x4b8   : > { %v10172_v29 = vunpack.i.h.bf16 %v10170_v7  ;;  %v10171_v45 = vunpack.i.l.bf16 %v10170_v7 }
 0x4ba   : > { %v6059_v3 = vsel %vm3542_vm4, %v14163_v63, %v10172_v29  ;;  %v6058_v16 = vsel %vm3542_vm4, %v14135_v18, %v10171_v45 }
 0x4bb   : > { %v10175_v19 = vpop.permute.xlu0 %10174 }
 0x4bc   : > { %v10177_v55 = vunpack.i.h.bf16 %v10175_v19  ;;  %v10176_v4 = vunpack.i.l.bf16 %v10175_v19 }
 0x4be   : > { %v6122_v6 = vsel %vm6069_vm6, %v6058_v16, %v10176_v4  ;;  %v6123_v41 = vsel %vm6069_vm6, %v6059_v3, %v10177_v55  ;;  %v6910_v16 = vsel %vm2152_vm1, %v6907_v58, %v6909_v33 }
 0x4bf   : > { %v6159_v20 = vpack.c.bf16 %v6123_v41, %v6122_v6 }
 0x4c1   : > { %9249 = vmatprep.mubr.msk.bf16.mxu0 %vm6213_vm7, %v6159_v20 }
 0x4c4   : > { %v9223_v50 = vpop.f32.mrb[120].mxu0 }
 0x4c5   : > { %v6631_v21 = vmul.f32 %v9223_v50, %v14301_v56  ;;  %v6440_v59 = vpop.f32.mrb[121].mxu0 }
 0x4c6   : > { %v6629_v63 = vmul.f32 %v14301_v56, %v6440_v59  ;;  %v9224_v13 = vpop.f32.mrb[122].mxu0 }
 0x4c7   : > { %v6701_v18 = vadd.f32 %v14324_v31, %v6631_v21  ;;  %v6443_v42 = vpop.f32.mrb[123].mxu0  ;;  %v10180_v34 = vpop.permute.xlu1 %10179 }
 0x4c8   : > { %v6699_v39 = vadd.f32 %v14324_v31, %v6629_v63  ;;  %v6630_v62 = vmul.f32 %v14301_v56, %v6443_v42  ;;  %v10182_v37 = vunpack.i.h.bf16 %v10180_v34  ;;  %v10181_v46 = vunpack.i.l.bf16 %v10180_v34 }
 0x4c9   : > { %v14651_v14 = vmax.f32 %v6701_v18, 0.0 }
 0x4ca   : > { %v14653_v10 = vmax.f32 %v6699_v39, 0.0  ;;  %v6700_v7 = vadd.f32 %v14324_v31, %v6630_v62  ;;  %v6061_v4 = vsel %vm3542_vm4, %v14208_v5, %v10182_v37  ;;  %v6060_v47 = vsel %vm3542_vm4, %v14182_v12, %v10181_v46 }
 0x4cb   : > { %v10185_v29 = vpop.permute.xlu1 %10184  ;;  %v6915_v6 = vrot.slane %v14651_v14, 1 }
 0x4cc   : > { %v6911_v45 = vrot.slane %v14653_v10, 1  ;;  %v14657_v19 = vmax.f32 %v6700_v7, 0.0  ;;  %v10187_v55 = vunpack.i.h.bf16 %v10185_v29  ;;  %v10186_v3 = vunpack.i.l.bf16 %v10185_v29 }
 0x4ce   : > { %v6913_v41 = vrot.slane %v14657_v19, 1  ;;  %v6125_v20 = vsel %vm6069_vm6, %v6061_v4, %v10187_v55  ;;  %v6912_v0 = vsel %vm2152_vm1, %v6909_v33, %v6911_v45  ;;  %v6124_v50 = vsel %vm6069_vm6, %v6060_v47, %v10186_v3 }
 0x4cf   : > { %v10273_v21 = vpack.i.bf16 %v6912_v0, %v6910_v16  ;;  %v6160_v59 = vpack.c.bf16 %v6125_v20, %v6124_v50  ;;  %v6632_v33 = vmul.f32 %v9224_v13, %v14301_v56 }
 0x4d0   : > { %v6914_v5 = vsel %vm2152_vm1, %v6911_v45, %v6913_v41  ;;  %v6916_v63 = vsel %vm2152_vm1, %v6913_v41, %v6915_v6 }
 0x4d1   : > { %10274 = vrot.lane.b32.xlu1 %v10273_v21, %s10486_s27  ;;  %v10278_v12 = vpack.i.bf16 %v6916_v63, %v6914_v5  ;;  %9250 = vmatmul.mubr.msk.bf16.gmra.mrb[148].mxu0 %vm6213_vm7, %v6160_v59  ;;  %v6702_v55 = vadd.f32 %v14324_v31, %v6632_v33 }
 0x4d3   : > { %10279 = vrot.lane.b32.xlu0 %v10278_v12, %s10486_s27  ;;  %v14683_v47 = vmax.f32 %v6702_v55, 0.0 }
 0x4d5   : > { %v6917_v21 = vrot.slane %v14683_v47, 1 }
 0x4d7   : > { %v10190_v58 = vpop.permute.xlu0 %10189 }
 0x4d8   : > { %v10192_v18 = vunpack.i.h.bf16 %v10190_v58  ;;  %v10191_v42 = vunpack.i.l.bf16 %v10190_v58 }
 0x4da   : > { %v6063_v37 = vsel %vm3542_vm4, %v14247_v17, %v10192_v18  ;;  %v6062_v46 = vsel %vm3542_vm4, %v14221_v61, %v10191_v42 }
 0x4db   : > { %v10195_v34 = vpop.permute.xlu0 %10194 }
 0x4dc   : > { %v10197_v39 = vunpack.i.h.bf16 %v10195_v34  ;;  %v10196_v62 = vunpack.i.l.bf16 %v10195_v34 }
 0x4de   : > { %v6126_v7 = vsel %vm6069_vm6, %v6062_v46, %v10196_v62  ;;  %v6127_v29 = vsel %vm6069_vm6, %v6063_v37, %v10197_v39  ;;  %v6918_v37 = vsel %vm2152_vm1, %v6915_v6, %v6917_v21 }
 0x4df   : > { %v6161_v45 = vpack.c.bf16 %v6127_v29, %v6126_v7 }
 0x4e1   : > { %9253 = vmatprep.mubr.msk.bf16.mxu0 %vm6213_vm7, %v6161_v45 }
 0x4e4   : > { %v9227_v4 = vpop.f32.mrb[124].mxu0 }
 0x4e5   : > { %v6635_v13 = vmul.f32 %v9227_v4, %v14301_v56  ;;  %v6456_v3 = vpop.f32.mrb[125].mxu0 }
 0x4e6   : > { %v6633_v17 = vmul.f32 %v14301_v56, %v6456_v3  ;;  %v9228_v16 = vpop.f32.mrb[126].mxu0 }
 0x4e7   : > { %v6705_v61 = vadd.f32 %v14324_v31, %v6635_v13  ;;  %v6459_v41 = vpop.f32.mrb[127].mxu0  ;;  %v10200_v50 = vpop.permute.xlu1 %10199 }
 0x4e8   : > { %v6703_v20 = vadd.f32 %v14324_v31, %v6633_v17  ;;  %v6634_v0 = vmul.f32 %v14301_v56, %v6459_v41  ;;  %v10202_v12 = vunpack.i.h.bf16 %v10200_v50  ;;  %v10201_v58 = vunpack.i.l.bf16 %v10200_v50 }
 0x4e9   : > { %v14691_v59 = vmax.f32 %v6705_v61, 0.0 }
 0x4ea   : > { %v14693_v5 = vmax.f32 %v6703_v20, 0.0  ;;  %v6704_v63 = vadd.f32 %v14324_v31, %v6634_v0  ;;  %v6065_v7 = vsel %vm3542_vm4, %v14330_v40, %v10202_v12  ;;  %v6064_v29 = vsel %vm3542_vm4, %v14264_v52, %v10201_v58 }
 0x4eb   : > { %v10205_v34 = vpop.permute.xlu1 %10204  ;;  %v6923_v39 = vrot.slane %v14691_v59, 1  ;;  %v7179_v0 = vrot.slane %v14364_v54, 2  ;;  %v6636_v58 = vmul.f32 %v9228_v16, %v14301_v56 }
 0x4ec   : > { %v6919_v18 = vrot.slane %v14693_v5, 1  ;;  %v14697_v42 = vmax.f32 %v6704_v63, 0.0  ;;  %v10207_v62 = vunpack.i.h.bf16 %v10205_v34  ;;  %v10206_v33 = vunpack.i.l.bf16 %v10205_v34 }
 0x4ed   : > { %v7178_v63 = vrot.slane %v14377_v60, 2 }
 0x4ee   : > { %v6921_v46 = vrot.slane %v14697_v42, 1  ;;  %v6920_v45 = vsel %vm2152_vm1, %v6917_v21, %v6919_v18  ;;  %v6128_v55 = vsel %vm6069_vm6, %v6064_v29, %v10206_v33  ;;  %v6129_v4 = vsel %vm6069_vm6, %v6065_v7, %v10207_v62 }
 0x4ef   : > { %v10283_v13 = vpack.i.bf16 %v6920_v45, %v6918_v37  ;;  %v6162_v3 = vpack.c.bf16 %v6129_v4, %v6128_v55  ;;  %v7181_v21 = vrot.slane %v14359_v25, 2  ;;  %v7180_v45 = vsel %vm2784_vm2, %v7178_v63, %v7179_v0 }
 0x4f0   : > { %v6922_v17 = vsel %vm2152_vm1, %v6919_v18, %v6921_v46  ;;  %v6924_v6 = vsel %vm2152_vm1, %v6921_v46, %v6923_v39  ;;  %v6706_v4 = vadd.f32 %v14324_v31, %v6636_v58 }
 0x4f1   : > { %10284 = vrot.lane.b32.xlu1 %v10283_v13, %s10486_s27  ;;  %v10288_v40 = vpack.i.bf16 %v6924_v6, %v6922_v17  ;;  %9254 = vmatmul.mubr.msk.bf16.gmra.mrb[152].mxu0 %vm6213_vm7, %v6162_v3  ;;  %v7182_v16 = vsel %vm2784_vm2, %v7179_v0, %v7181_v21  ;;  %v7183_v6 = vrot.slane %v14390_v57, 2 }
 0x4f3   : > { %10289 = vrot.lane.b32.xlu0 %v10288_v40, %s10486_s27 }
 0x4f4   : > { %v5628_v52 = vpop.permute.xlu1 %5627 }
 0x4f5   : > { %v6068_v18 = vsel %vm3542_vm4, %v14448_v9, %v5628_v52  ;;  %v14737_v52 = vmax.f32 %v6706_v4, 0.0 }
 0x4f7   : > { %v10210_v61 = vpop.permute.xlu0 %10209 }
 0x4f8   : > { %v10212_v41 = vunpack.i.h.bf16 %v10210_v61  ;;  %v10211_v20 = vunpack.i.l.bf16 %v10210_v61  ;;  %v5942_v50 = vpop.permute.xlu1 %5941 }
 0x4f9   : > { %v6132_v46 = vsel %vm6069_vm6, %v6068_v18, %v5942_v50 }
 0x4fa   : > { %v6067_v33 = vsel %vm3542_vm4, %v14423_v22, %v10212_v41  ;;  %v6066_v37 = vsel %vm3542_vm4, %v14351_v23, %v10211_v20  ;;  %v6164_v13 = vpack.c.bf16 %v6132_v46, %v6132_v46  ;;  %v7185_v22 = vrot.slane %v14396_v35, 2 }
 0x4fb   : > { %v10215_v12 = vpop.permute.xlu0 %10214  ;;  %v7430_v23 = vpack.c.bf16 %v7182_v16, %v7180_v45  ;;  %v6925_v46 = vrot.slane %v14737_v52, 1 }
 0x4fc   : > { %v10217_v34 = vunpack.i.h.bf16 %v10215_v12  ;;  %v10216_v62 = vunpack.i.l.bf16 %v10215_v12  ;;  %v10225_v20 = vpop.permute.xlu1 %10224  ;;  %v7186_v58 = vsel %vm2784_vm2, %v7183_v6, %v7185_v22 }
 0x4fe   : > { %v6130_v7 = vsel %vm6069_vm6, %v6066_v37, %v10216_v62  ;;  %v6131_v29 = vsel %vm6069_vm6, %v6067_v33, %v10217_v34  ;;  %v7184_v37 = vsel %vm2784_vm2, %v7181_v21, %v7183_v6  ;;  %v7189_v21 = vrot.slane %v14451_v51, 2 }
 0x4ff   : > { %v6163_v55 = vpack.c.bf16 %v6131_v29, %v6130_v7  ;;  %v10220_v9 = vpop.permute.xlu0 %10219  ;;  %v7432_v29 = vpack.c.bf16 %v7186_v58, %v7184_v37 }
 0x500   : > { %v10222_v3 = vunpack.i.h.bf16 %v10220_v9  ;;  %v10221_v17 = vunpack.i.l.bf16 %v10220_v9  ;;  %v7187_v9 = vrot.slane %v14467_v48, 2 }
 0x501   : > { %9257 = vmatprep.mubr.msk.bf16.mxu0 %vm6213_vm7, %v6163_v55 }
 0x502   : > { %9258 = vmatmul.mubr.msk.bf16.gmra.mrb[156].mxu0 %vm6213_vm7, %v6164_v13  ;;  %v7367_v0 = vsel %vm6069_vm6, %v14364_v54, %v10222_v3  ;;  %v7366_v50 = vsel %vm6069_vm6, %v14377_v60, %v10221_v17  ;;  %v10226_v54 = vunpack.i.l.bf16 %v10225_v20  ;;  %v10227_v60 = vunpack.i.h.bf16 %v10225_v20 }
 0x503   : > { %8592 = vmatprep.mubr.msk.bf16.mxu0 %vm6069_vm6, %v7430_v23  ;;  %v7429_v7 = vpack.c.bf16 %v7367_v0, %v7366_v50  ;;  %v6926_v3 = vsel %vm2152_vm1, %v6923_v39, %v6925_v46  ;;  %v7188_v0 = vsel %vm2784_vm2, %v7185_v22, %v7187_v9  ;;  %v7190_v50 = vsel %vm2784_vm2, %v7187_v9, %v7189_v21 }
 0x504   : > { %v9231_v40 = vpop.f32.mrb[128].mxu0  ;;  %v7368_v17 = vsel %vm6069_vm6, %v14359_v25, %v10226_v54  ;;  %v7191_v22 = vrot.slane %v14425_v36, 2 }
 0x505   : > { %v6639_v61 = vmul.f32 %v9231_v40, %v14301_v56  ;;  %v6472_v41 = vpop.f32.mrb[129].mxu0 }
 0x506   : > { %v6637_v63 = vmul.f32 %v14301_v56, %v6472_v41  ;;  %v9232_v12 = vpop.f32.mrb[130].mxu0  ;;  %v10230_v41 = vpop.permute.xlu0 %10229 }
 0x507   : > { %v6709_v18 = vadd.f32 %v14324_v31, %v6639_v61  ;;  %v6475_v34 = vpop.f32.mrb[131].mxu0  ;;  %v7369_v61 = vsel %vm6069_vm6, %v14390_v57, %v10227_v60  ;;  %v7193_v57 = vrot.slane %v14446_v30, 2 }
 0x508   : > { %v6707_v62 = vadd.f32 %v14324_v31, %v6637_v63  ;;  %v6638_v33 = vmul.f32 %v14301_v56, %v6475_v34  ;;  %v7431_v63 = vpack.c.bf16 %v7369_v61, %v7368_v17  ;;  %v10231_v34 = vunpack.i.l.bf16 %v10230_v41 }
 0x509   : > { %v14751_v45 = vmax.f32 %v6709_v18, 0.0  ;;  %v10232_v18 = vunpack.i.h.bf16 %v10230_v41  ;;  %v7194_v54 = vsel %vm2784_vm2, %v7191_v22, %v7193_v57 }
 0x50a   : > { %v14753_v16 = vmax.f32 %v6707_v62, 0.0  ;;  %v6708_v55 = vadd.f32 %v14324_v31, %v6638_v33  ;;  %7718 = vmatmul.mubr.bf16.vlgmr.msra.gmra.mrb[160].mxu0 %v7429_v7  ;;  %v7434_v62 = vpack.c.bf16 %v7190_v50, %v7188_v0  ;;  %v7370_v33 = vsel %vm6069_vm6, %v14396_v35, %v10231_v34 }
 0x50b   : > { %8593 = vmatprep.mubr.msk.bf16.mxu0 %vm6069_vm6, %v7432_v29  ;;  %v6931_v23 = vrot.slane %v14751_v45, 1  ;;  %v7371_v37 = vsel %vm6069_vm6, %v14467_v48, %v10232_v18  ;;  %v7192_v29 = vsel %vm2784_vm2, %v7189_v21, %v7191_v22  ;;  %v6640_v35 = vmul.f32 %v9232_v12, %v14301_v56  ;;  %v14808_v12 = vld [vmem:[%s15431_s8] ss:$0 sm:$0xff] }
 0x50c   : > { %v6927_v4 = vrot.slane %v14753_v16, 1  ;;  %v14758_v13 = vmax.f32 %v6708_v55, 0.0  ;;  %v7433_v7 = vpack.c.bf16 %v7371_v37, %v7370_v33  ;;  %v7436_v9 = vpack.c.bf16 %v7194_v54, %v7192_v29 }
 0x50d   : > { %v6710_v61 = vadd.f32 %v14324_v31, %v6640_v35  ;;  %v7199_v56 = vrot.slane %v14508_v53, 2 }
 0x50e   : > { %v6929_v6 = vrot.slane %v14758_v13, 1  ;;  %v6928_v40 = vsel %vm2152_vm1, %v6925_v46, %v6927_v4  ;;  %v10235_v46 = vpop.permute.xlu1 %10234 }
 0x50f   : > { %v10293_v20 = vpack.i.bf16 %v6928_v40, %v6926_v3  ;;  %v10237_v60 = vunpack.i.h.bf16 %v10235_v46  ;;  %v10236_v55 = vunpack.i.l.bf16 %v10235_v46  ;;  %v7197_v3 = vrot.slane %v14499_v24, 2  ;;  %v14823_v46 = vld [vmem:[%s15432_s9] ss:$0 sm:$0xff] }
 0x510   : > { %v6930_v39 = vsel %vm2152_vm1, %v6927_v4, %v6929_v6  ;;  %v6932_v25 = vsel %vm2152_vm1, %v6929_v6, %v6931_v23  ;;  %v7195_v4 = vrot.slane %v14510_v11, 2  ;;  %v10240_v6 = vpop.permute.xlu0 %10239 }
 0x511   : > { %10294 = vrot.lane.b32.xlu1 %v10293_v20, %s10486_s27  ;;  %v10298_v58 = vpack.i.bf16 %v6932_v25, %v6930_v39  ;;  %v7372_v48 = vsel %vm6069_vm6, %v14451_v51, %v10236_v55  ;;  %v7373_v17 = vsel %vm6069_vm6, %v14425_v36, %v10237_v60  ;;  %v7201_v20 = vrot.slane %v14501_v27, 2 }
 0x512   : > { %7726 = vmatmul.mubr.bf16.gmra.mrb[164].mxu0 %v7431_v63  ;;  %v7196_v21 = vsel %vm2784_vm2, %v7193_v57, %v7195_v4  ;;  %v7198_v40 = vsel %vm2784_vm2, %v7195_v4, %v7197_v3  ;;  %v7435_v41 = vpack.c.bf16 %v7373_v17, %v7372_v48  ;;  %v10242_v0 = vunpack.i.h.bf16 %v10240_v6 }
 0x513   : > { %10299 = vrot.lane.b32.xlu0 %v10298_v58, %s10486_s27  ;;  %8594 = vmatprep.mubr.msk.bf16.mxu0 %vm6069_vm6, %v7434_v62  ;;  %v10241_v50 = vunpack.i.l.bf16 %v10240_v6  ;;  %v7438_v39 = vpack.c.bf16 %v7198_v40, %v7196_v21  ;;  %v14803_v36 = vmax.f32 %v6710_v61, 0.0  ;;  %v10245_v58 = vpop.permute.xlu1 %10244  ;;  %v7202_v22 = vsel %vm2784_vm2, %v7199_v56, %v7201_v20 }
 0x514   : > { %v7375_v57 = vsel %vm6069_vm6, %v14510_v11, %v10242_v0  ;;  %v7200_v29 = vsel %vm2784_vm2, %v7197_v3, %v7199_v56  ;;  %v7203_v48 = vrot.slane %v14545_v49, 2  ;;  %v7205_v3 = vrot.slane %v14541_v26, 2 }
 0x515   : > { %v7374_v62 = vsel %vm6069_vm6, %v14446_v30, %v10241_v50  ;;  %v10246_v30 = vunpack.i.l.bf16 %v10245_v58  ;;  %v6933_v60 = vrot.slane %v14803_v36, 1  ;;  %v7440_v55 = vpack.c.bf16 %v7202_v22, %v7200_v29 }
 0x516   : > { %v7437_v11 = vpack.c.bf16 %v7375_v57, %v7374_v62 }
 0x517   : > { %v6934_v21 = vsel %vm2152_vm1, %v6931_v23, %v6933_v60  ;;  %v7376_v40 = vsel %vm6069_vm6, %v14499_v24, %v10246_v30 }
 0x51a   : > { %7734 = vmatmul.mubr.bf16.gmra.mrb[168].mxu0 %v7433_v7 }
 0x51b   : > { %8595 = vmatprep.mubr.msk.bf16.mxu0 %vm6069_vm6, %v7436_v9  ;;  %v10247_v9 = vunpack.i.h.bf16 %v10245_v58 }
 0x51d   : > { %v7377_v50 = vsel %vm6069_vm6, %v14508_v53, %v10247_v9  ;;  %v7209_v53 = vrot.slane %v14532_v1, 2  ;;  %v7213_v9 = vrot.slane %v14579_v8, 2 }
 0x522   : > { %7742 = vmatmul.mubr.bf16.gmra.mrb[172].mxu0 %v7435_v41 }
 0x523   : > { %8596 = vmatprep.mubr.msk.bf16.mxu0 %vm6069_vm6, %v7438_v39  ;;  %v10250_v39 = vpop.permute.xlu0 %10249 }
 0x524   : > { %v9235_v51 = vpop.f32.mrb[132].mxu0  ;;  %v10251_v62 = vunpack.i.l.bf16 %v10250_v39 }
 0x525   : > { %v6643_v25 = vmul.f32 %v14808_v12, %v9235_v51  ;;  %v6488_v63 = vpop.f32.mrb[133].mxu0  ;;  %v7204_v51 = vsel %vm2784_vm2, %v7201_v20, %v7203_v48  ;;  %v7207_v20 = vrot.slane %v14543_v28, 2 }
 0x526   : > { %v6641_v18 = vmul.f32 %v14808_v12, %v6488_v63  ;;  %v14812_v34 = vpop.f32.mrb[134].mxu0  ;;  %v7439_v63 = vpack.c.bf16 %v7377_v50, %v7376_v40  ;;  %v7378_v22 = vsel %vm6069_vm6, %v14501_v27, %v10251_v62  ;;  %v7217_v50 = vrot.slane %v14613_v38, 2 }
 0x527   : > { %v6713_v33 = vadd.f32 %v14324_v31, %v6643_v25  ;;  %v6491_v37 = vpop.f32.mrb[135].mxu0  ;;  %v7206_v25 = vsel %vm2784_vm2, %v7203_v48, %v7205_v3  ;;  %v7208_v29 = vsel %vm2784_vm2, %v7205_v3, %v7207_v20  ;;  %v6644_v48 = vmul.f32 %v14808_v12, %v14812_v34 }
 0x528   : > { %v6711_v54 = vadd.f32 %v14823_v46, %v6641_v18  ;;  %v6642_v7 = vmul.f32 %v14808_v12, %v6491_v37  ;;  %v10252_v18 = vunpack.i.h.bf16 %v10250_v39  ;;  %v7442_v57 = vpack.c.bf16 %v7206_v25, %v7204_v51  ;;  %v10255_v37 = vpop.permute.xlu1 %10254 }
 0x529   : > { %v14829_v4 = vmax.f32 %v6713_v33, 0.0  ;;  %v10257_v30 = vunpack.i.h.bf16 %v10255_v37  ;;  %v6714_v39 = vadd.f32 %v14823_v46, %v6644_v48 }
 0x52a   : > { %v14831_v31 = vmax.f32 %v6711_v54, 0.0  ;;  %v6712_v35 = vadd.f32 %v14823_v46, %v6642_v7  ;;  %7750 = vmatmul.mubr.bf16.gmra.mrb[176].mxu0 %v7437_v11  ;;  %v7379_v33 = vsel %vm6069_vm6, %v14545_v49, %v10252_v18  ;;  %v7210_v54 = vsel %vm2784_vm2, %v7207_v20, %v7209_v53 }
 0x52b   : > { %8597 = vmatprep.mubr.msk.bf16.mxu0 %vm6069_vm6, %v7440_v55  ;;  %v6939_v61 = vrot.slane %v14829_v4, 1  ;;  %v7441_v7 = vpack.c.bf16 %v7379_v33, %v7378_v22  ;;  %v7444_v11 = vpack.c.bf16 %v7210_v54, %v7208_v29  ;;  %v7211_v55 = vrot.slane %v14572_v2, 2 }
 0x52c   : > { %v6935_v17 = vrot.slane %v14831_v31, 1  ;;  %v14836_v6 = vmax.f32 %v6712_v35, 0.0  ;;  %v7381_v49 = vsel %vm6069_vm6, %v14543_v28, %v10257_v30  ;;  %v10260_v35 = vpop.permute.xlu0 %10259 }
 0x52d   : > { %v7214_v3 = vsel %vm2784_vm2, %v7211_v55, %v7213_v9  ;;  %v10262_v40 = vunpack.i.h.bf16 %v10260_v35 }
 0x52e   : > { %v6937_v41 = vrot.slane %v14836_v6, 1  ;;  %v6936_v0 = vsel %vm2152_vm1, %v6933_v60, %v6935_v17  ;;  %v10256_v60 = vunpack.i.l.bf16 %v10255_v37 }
 0x52f   : > { %v10303_v56 = vpack.i.bf16 %v6936_v0, %v6934_v21  ;;  %v7383_v25 = vsel %vm6069_vm6, %v14572_v2, %v10262_v40  ;;  %v7219_v2 = vrot.slane %v14617_v15, 2 }
 0x530   : > { %v6938_v23 = vsel %vm2152_vm1, %v6935_v17, %v6937_v41  ;;  %v6940_v24 = vsel %vm2152_vm1, %v6937_v41, %v6939_v61  ;;  %v7380_v27 = vsel %vm6069_vm6, %v14541_v26, %v10256_v60  ;;  %v7212_v17 = vsel %vm2784_vm2, %v7209_v53, %v7211_v55 }
 0x531   : > { %10304 = vrot.lane.b32.xlu1 %v10303_v56, %s10486_s27  ;;  %v10308_v58 = vpack.i.bf16 %v6940_v24, %v6938_v23  ;;  %v7443_v21 = vpack.c.bf16 %v7381_v49, %v7380_v27  ;;  %v10261_v41 = vunpack.i.l.bf16 %v10260_v35  ;;  %v7446_v0 = vpack.c.bf16 %v7214_v3, %v7212_v17  ;;  %v10265_v23 = vpop.permute.xlu1 %10264  ;;  %v10270_v17 = vpop.permute.xlu0 %10269 }
 0x532   : > { %7758 = vmatmul.mubr.bf16.gmra.mrb[180].mxu0 %v7439_v63  ;;  %v7215_v26 = vrot.slane %v14603_v44, 2  ;;  %v14887_v24 = vmax.f32 %v6714_v39, 0.0  ;;  %v10267_v33 = vunpack.i.h.bf16 %v10265_v23  ;;  %v10266_v37 = vunpack.i.l.bf16 %v10265_v23 }
 0x533   : > { %10309 = vrot.lane.b32.xlu0 %v10308_v58, %s10486_s27  ;;  %8598 = vmatprep.mubr.msk.bf16.mxu0 %vm6069_vm6, %v7442_v57  ;;  %v7382_v51 = vsel %vm6069_vm6, %v14532_v1, %v10261_v41  ;;  %v7220_v35 = vsel %vm2784_vm2, %v7217_v50, %v7219_v2 }
 0x534   : > { %v7218_v18 = vsel %vm2784_vm2, %v7215_v26, %v7217_v50  ;;  %v7445_v22 = vpack.c.bf16 %v7383_v25, %v7382_v51  ;;  %v7216_v1 = vsel %vm2784_vm2, %v7213_v9, %v7215_v26  ;;  %v7384_v27 = vsel %vm6069_vm6, %v14579_v8, %v10266_v37 }
 0x535   : > { %v7448_v54 = vpack.c.bf16 %v7218_v18, %v7216_v1  ;;  %v7385_v49 = vsel %vm6069_vm6, %v14603_v44, %v10267_v33  ;;  %v10272_v50 = vunpack.i.h.bf16 %v10270_v17  ;;  %v10271_v26 = vunpack.i.l.bf16 %v10270_v17 }
 0x536   : > { %v7447_v8 = vpack.c.bf16 %v7385_v49, %v7384_v27  ;;  %v7229_v1 = vrot.slane %v14651_v14, 2  ;;  %v7233_v27 = vrot.slane %v14693_v5, 2 }
 0x537   : > { %v7386_v51 = vsel %vm6069_vm6, %v14613_v38, %v10271_v26  ;;  %v7387_v25 = vsel %vm6069_vm6, %v14617_v15, %v10272_v50 }
 0x538   : > { %v7449_v18 = vpack.c.bf16 %v7387_v25, %v7386_v51 }
 0x53a   : > { %7766 = vmatmul.mubr.bf16.gmra.mrb[184].mxu0 %v7441_v7  ;;  %v6941_v7 = vrot.slane %v14887_v24, 1 }
 0x53b   : > { %8599 = vmatprep.mubr.msk.bf16.mxu0 %vm6069_vm6, %v7444_v11  ;;  %v7221_v11 = vrot.slane %v14611_v32, 2 }
 0x53c   : > { %v6942_v40 = vsel %vm2152_vm1, %v6939_v61, %v6941_v7  ;;  %v7223_v61 = vrot.slane %v14643_v43, 2 }
 0x53d   : > { %v7222_v48 = vsel %vm2784_vm2, %v7219_v2, %v7221_v11 }
 0x542   : > { %7774 = vmatmul.mubr.bf16.gmra.mrb[188].mxu0 %v7443_v21 }
 0x543   : > { %8600 = vmatprep.mubr.msk.bf16.mxu0 %vm6069_vm6, %v7446_v0  ;;  %v10275_v23 = vpop.permute.xlu1 %10274 }
 0x544   : > { %v9239_v28 = vpop.f32.mrb[136].mxu0 }
 0x545   : > { %v6647_v34 = vmul.f32 %v14808_v12, %v9239_v28  ;;  %v6504_v56 = vpop.f32.mrb[137].mxu0  ;;  %v10280_v2 = vpop.permute.xlu0 %10279 }
 0x546   : > { %v6645_v63 = vmul.f32 %v14808_v12, %v6504_v56  ;;  %v9240_v58 = vpop.f32.mrb[138].mxu0  ;;  %v7225_v56 = vrot.slane %v14653_v10, 2 }
 0x547   : > { %v6717_v62 = vadd.f32 %v14823_v46, %v6647_v34  ;;  %v6507_v57 = vpop.f32.mrb[139].mxu0  ;;  %v7450_v34 = vpack.c.bf16 %v7222_v48, %v7220_v35  ;;  %v6648_v33 = vmul.f32 %v14808_v12, %v9240_v58 }
 0x548   : > { %v6715_v53 = vadd.f32 %v14823_v46, %v6645_v63  ;;  %v6646_v20 = vmul.f32 %v14808_v12, %v6507_v57  ;;  %v7226_v63 = vsel %vm2784_vm2, %v7223_v61, %v7225_v56  ;;  %v10277_v57 = vunpack.i.h.bf16 %v10275_v23 }
 0x549   : > { %v14897_v29 = vmax.f32 %v6717_v62, 0.0  ;;  %v7224_v62 = vsel %vm2784_vm2, %v7221_v11, %v7223_v61  ;;  %v10281_v11 = vunpack.i.l.bf16 %v10280_v2  ;;  %v6718_v49 = vadd.f32 %v14823_v46, %v6648_v33 }
 0x54a   : > { %v14899_v30 = vmax.f32 %v6715_v53, 0.0  ;;  %v6716_v60 = vadd.f32 %v14823_v46, %v6646_v20  ;;  %7782 = vmatmul.mubr.bf16.gmra.mrb[192].mxu0 %v7445_v22  ;;  %v10276_v53 = vunpack.i.l.bf16 %v10275_v23  ;;  %v7452_v20 = vpack.c.bf16 %v7226_v63, %v7224_v62 }
 0x54b   : > { %8601 = vmatprep.mubr.msk.bf16.mxu0 %vm6069_vm6, %v7448_v54  ;;  %v6947_v3 = vrot.slane %v14897_v29, 1  ;;  %v7227_v22 = vrot.slane %v14657_v19, 2  ;;  %v7389_v15 = vsel %vm6069_vm6, %v14643_v43, %v10277_v57  ;;  %v7390_v48 = vsel %vm6069_vm6, %v14653_v10, %v10281_v11 }
 0x54c   : > { %v6943_v55 = vrot.slane %v14899_v30, 1  ;;  %v14905_v9 = vmax.f32 %v6716_v60, 0.0  ;;  %v7388_v38 = vsel %vm6069_vm6, %v14611_v32, %v10276_v53  ;;  %v10282_v60 = vunpack.i.h.bf16 %v10280_v2 }
 0x54d   : > { %v7228_v37 = vsel %vm2784_vm2, %v7225_v56, %v7227_v22  ;;  %v7230_v54 = vsel %vm2784_vm2, %v7227_v22, %v7229_v1  ;;  %v7231_v32 = vrot.slane %v14683_v47, 2 }
 0x54e   : > { %v6945_v21 = vrot.slane %v14905_v9, 1  ;;  %v6944_v41 = vsel %vm2152_vm1, %v6941_v7, %v6943_v55  ;;  %v7451_v7 = vpack.c.bf16 %v7389_v15, %v7388_v38  ;;  %v7391_v17 = vsel %vm6069_vm6, %v14657_v19, %v10282_v60 }
 0x54f   : > { %v10313_v0 = vpack.i.bf16 %v6944_v41, %v6942_v40  ;;  %v7232_v10 = vsel %vm2784_vm2, %v7229_v1, %v7231_v32  ;;  %v7235_v19 = vrot.slane %v14697_v42, 2 }
 0x550   : > { %v6946_v39 = vsel %vm2152_vm1, %v6943_v55, %v6945_v21  ;;  %v6948_v44 = vsel %vm2152_vm1, %v6945_v21, %v6947_v3  ;;  %v7454_v55 = vpack.c.bf16 %v7230_v54, %v7228_v37  ;;  %v14953_v21 = vmax.f32 %v6718_v49, 0.0 }
 0x551   : > { %10314 = vrot.lane.b32.xlu1 %v10313_v0, %s10486_s27  ;;  %v10318_v28 = vpack.i.bf16 %v6948_v44, %v6946_v39  ;;  %v7236_v22 = vsel %vm2784_vm2, %v7233_v27, %v7235_v19  ;;  %v7241_v49 = vrot.slane %v14753_v16, 2 }
 0x552   : > { %7790 = vmatmul.mubr.bf16.gmra.mrb[196].mxu0 %v7447_v8  ;;  %v7234_v8 = vsel %vm2784_vm2, %v7231_v32, %v7233_v27  ;;  %v6949_v51 = vrot.slane %v14953_v21, 1 }
 0x553   : > { %10319 = vrot.lane.b32.xlu0 %v10318_v28, %s10486_s27  ;;  %8602 = vmatprep.mubr.msk.bf16.mxu0 %vm6069_vm6, %v7450_v34  ;;  %v7453_v28 = vpack.c.bf16 %v7391_v17, %v7390_v48  ;;  %v7456_v61 = vpack.c.bf16 %v7234_v8, %v7232_v10  ;;  %v7245_v8 = vrot.slane %v14751_v45, 2 }
 0x554   : > { %v6950_v33 = vsel %vm2152_vm1, %v6947_v3, %v6949_v51  ;;  %v7239_v3 = vrot.slane %v14737_v52, 2 }
 0x55a   : > { %7798 = vmatmul.mubr.bf16.gmra.mrb[200].mxu0 %v7449_v18  ;;  %v7237_v18 = vrot.slane %v14691_v59, 2 }
 0x55b   : > { %8603 = vmatprep.mubr.msk.bf16.mxu0 %vm6069_vm6, %v7452_v20 }
 0x55c   : > { %v7238_v1 = vsel %vm2784_vm2, %v7235_v19, %v7237_v18  ;;  %v7240_v48 = vsel %vm2784_vm2, %v7237_v18, %v7239_v3 }
 0x55d   : > { %v7458_v27 = vpack.c.bf16 %v7238_v1, %v7236_v22 }
 0x562   : > { %7806 = vmatmul.mubr.bf16.gmra.mrb[204].mxu0 %v7451_v7 }
 0x563   : > { %8604 = vmatprep.mubr.msk.bf16.mxu0 %vm6069_vm6, %v7454_v55  ;;  %v10285_v40 = vpop.permute.xlu1 %10284 }
 0x564   : > { %v9243_v43 = vpop.f32.mrb[140].mxu0  ;;  %v10287_v34 = vunpack.i.h.bf16 %v10285_v40  ;;  %v10286_v56 = vunpack.i.l.bf16 %v10285_v40 }
 0x565   : > { %v6651_v58 = vmul.f32 %v14808_v12, %v9243_v43  ;;  %v6520_v35 = vpop.f32.mrb[141].mxu0  ;;  %v10290_v15 = vpop.permute.xlu0 %10289 }
 0x566   : > { %v6649_v41 = vmul.f32 %v14808_v12, %v6520_v35  ;;  %v9244_v0 = vpop.f32.mrb[142].mxu0  ;;  %v7392_v53 = vsel %vm6069_vm6, %v14651_v14, %v10286_v56  ;;  %v7393_v20 = vsel %vm6069_vm6, %v14683_v47, %v10287_v34  ;;  %v10292_v60 = vunpack.i.h.bf16 %v10290_v15 }
 0x567   : > { %v6721_v39 = vadd.f32 %v14823_v46, %v6651_v58  ;;  %v6523_v44 = vpop.f32.mrb[143].mxu0  ;;  %v7455_v14 = vpack.c.bf16 %v7393_v20, %v7392_v53  ;;  %v10291_v11 = vunpack.i.l.bf16 %v10290_v15  ;;  %v7242_v58 = vsel %vm2784_vm2, %v7239_v3, %v7241_v49 }
 0x568   : > { %v6719_v50 = vadd.f32 %v14823_v46, %v6649_v41  ;;  %v6650_v26 = vmul.f32 %v14808_v12, %v6523_v44  ;;  %v7395_v43 = vsel %vm6069_vm6, %v14697_v42, %v10292_v60  ;;  %v7460_v17 = vpack.c.bf16 %v7242_v58, %v7240_v48 }
 0x569   : > { %v14963_v25 = vmax.f32 %v6721_v39, 0.0  ;;  %v7394_v32 = vsel %vm6069_vm6, %v14693_v5, %v10291_v11  ;;  %v6652_v40 = vmul.f32 %v14808_v12, %v9244_v0  ;;  %v7243_v41 = vrot.slane %v14758_v13, 2 }
 0x56a   : > { %v14965_v23 = vmax.f32 %v6719_v50, 0.0  ;;  %v6720_v63 = vadd.f32 %v14823_v46, %v6650_v26  ;;  %7814 = vmatmul.mubr.bf16.gmra.mrb[208].mxu0 %v7453_v28  ;;  %v7457_v35 = vpack.c.bf16 %v7395_v43, %v7394_v32 }
 0x56b   : > { %8605 = vmatprep.mubr.msk.bf16.mxu0 %vm6069_vm6, %v7456_v61  ;;  %v6955_v38 = vrot.slane %v14963_v25, 1  ;;  %v6722_v5 = vadd.f32 %v14823_v46, %v6652_v40  ;;  %v7244_v26 = vsel %vm2784_vm2, %v7241_v49, %v7243_v41  ;;  %v7246_v28 = vsel %vm2784_vm2, %v7243_v41, %v7245_v8 }
 0x56c   : > { %v6951_v62 = vrot.slane %v14965_v23, 1  ;;  %v14971_v57 = vmax.f32 %v6720_v63, 0.0  ;;  %v7462_v20 = vpack.c.bf16 %v7246_v28, %v7244_v26  ;;  %v7251_v40 = vrot.slane %v14836_v6, 2 }
 0x56d   : > { %v15010_v56 = vmax.f32 %v6722_v5, 0.0  ;;  %v7253_v41 = vrot.slane %v14829_v4, 2 }
 0x56e   : > { %v6953_v2 = vrot.slane %v14971_v57, 1  ;;  %v6952_v37 = vsel %vm2152_vm1, %v6949_v51, %v6951_v62 }
 0x56f   : > { %v10323_v54 = vpack.i.bf16 %v6952_v37, %v6950_v33  ;;  %v6957_v33 = vrot.slane %v15010_v56, 1  ;;  %v7254_v26 = vsel %vm2784_vm2, %v7251_v40, %v7253_v41 }
 0x570   : > { %v6954_v7 = vsel %vm2152_vm1, %v6951_v62, %v6953_v2  ;;  %v6956_v47 = vsel %vm2152_vm1, %v6953_v2, %v6955_v38 }
 0x571   : > { %10324 = vrot.lane.b32.xlu1 %v10323_v54, %s10486_s27  ;;  %v10328_v55 = vpack.i.bf16 %v6956_v47, %v6954_v7  ;;  %v6958_v3 = vsel %vm2152_vm1, %v6955_v38, %v6957_v33 }
 0x572   : > { %7822 = vmatmul.mubr.bf16.gmra.mrb[212].mxu0 %v7455_v14  ;;  %v7247_v14 = vrot.slane %v14803_v36, 2 }
 0x573   : > { %10329 = vrot.lane.b32.xlu0 %v10328_v55, %s10486_s27  ;;  %8606 = vmatprep.mubr.msk.bf16.mxu0 %vm6069_vm6, %v7458_v27 }
 0x57a   : > { %7830 = vmatmul.mubr.bf16.gmra.mrb[216].mxu0 %v7457_v35  ;;  %v7248_v35 = vsel %vm2784_vm2, %v7245_v8, %v7247_v14 }
 0x57b   : > { %8607 = vmatprep.mubr.msk.bf16.mxu0 %vm6069_vm6, %v7460_v17 }
 0x583   : > { %v10295_v39 = vpop.permute.xlu1 %10294 }
 0x584   : > { %v10297_v44 = vunpack.i.h.bf16 %v10295_v39  ;;  %v10296_v42 = vunpack.i.l.bf16 %v10295_v39  ;;  %v9247_v50 = vpop.f32.mrb[144].mxu0 }
 0x585   : > { %v6655_v10 = vmul.f32 %v14808_v12, %v9247_v50  ;;  %v6536_v19 = vpop.f32.mrb[145].mxu0  ;;  %v10300_v34 = vpop.permute.xlu0 %10299 }
 0x586   : > { %v7396_v0 = vsel %vm6069_vm6, %v14691_v59, %v10296_v42  ;;  %v6653_v61 = vmul.f32 %v14808_v12, %v6536_v19  ;;  %v9248_v51 = vpop.f32.mrb[146].mxu0  ;;  %v7397_v63 = vsel %vm6069_vm6, %v14737_v52, %v10297_v44  ;;  %v10302_v1 = vunpack.i.h.bf16 %v10300_v34 }
 0x587   : > { %v6725_v18 = vadd.f32 %v14823_v46, %v6655_v10  ;;  %v6539_v62 = vpop.f32.mrb[147].mxu0  ;;  %v7459_v53 = vpack.c.bf16 %v7397_v63, %v7396_v0  ;;  %v10301_v15 = vunpack.i.l.bf16 %v10300_v34  ;;  %v7249_v59 = vrot.slane %v14831_v31, 2 }
 0x588   : > { %v6723_v22 = vadd.f32 %v14823_v46, %v6653_v61  ;;  %v6654_v2 = vmul.f32 %v14808_v12, %v6539_v62  ;;  %v7399_v11 = vsel %vm6069_vm6, %v14758_v13, %v10302_v1  ;;  %v6656_v38 = vmul.f32 %v14808_v12, %v9248_v51 }
 0x589   : > { %7838 = vmatmul.mubr.bf16.gmra.mrb[220].mxu0 %v7459_v53  ;;  %v15020_v37 = vmax.f32 %v6725_v18, 0.0  ;;  %v7398_v60 = vsel %vm6069_vm6, %v14753_v16, %v10301_v15  ;;  %v7250_v55 = vsel %vm2784_vm2, %v7247_v14, %v7249_v59  ;;  %v7252_v50 = vsel %vm2784_vm2, %v7249_v59, %v7251_v40 }
 0x58a   : > { %v15022_v54 = vmax.f32 %v6723_v22, 0.0  ;;  %v6724_v52 = vadd.f32 %v14823_v46, %v6654_v2  ;;  %8608 = vmatprep.mubr.msk.bf16.mxu0 %vm6069_vm6, %v7462_v20  ;;  %v7461_v58 = vpack.c.bf16 %v7399_v11, %v7398_v60  ;;  %v7464_v16 = vpack.c.bf16 %v7250_v55, %v7248_v35 }
 0x58b   : > { %v6963_v27 = vrot.slane %v15020_v37, 1  ;;  %v6726_v8 = vadd.f32 %v14823_v46, %v6656_v38  ;;  %v7466_v20 = vpack.c.bf16 %v7254_v26, %v7252_v50  ;;  %v7255_v14 = vrot.slane %v14887_v24, 2 }
 0x58c   : > { %v6959_v7 = vrot.slane %v15022_v54, 1  ;;  %v15028_v47 = vmax.f32 %v6724_v52, 0.0  ;;  %v7259_v38 = vrot.slane %v14905_v9, 2 }
 0x58d   : > { %v15056_v0 = vmax.f32 %v6726_v8, 0.0  ;;  %v7261_v8 = vrot.slane %v14897_v29, 2 }
 0x58e   : > { %v6961_v49 = vrot.slane %v15028_v47, 1  ;;  %v6960_v32 = vsel %vm2152_vm1, %v6957_v33, %v6959_v7 }
 0x58f   : > { %v10333_v43 = vpack.i.bf16 %v6960_v32, %v6958_v3  ;;  %v6965_v59 = vrot.slane %v15056_v0, 1 }
 0x590   : > { %v6962_v48 = vsel %vm2152_vm1, %v6959_v7, %v6961_v49  ;;  %v6964_v13 = vsel %vm2152_vm1, %v6961_v49, %v6963_v27 }
 0x591   : > { %10334 = vrot.lane.b32.xlu1 %v10333_v43, %s10486_s27  ;;  %7846 = vmatmul.mubr.bf16.gmra.mrb[224].mxu0 %v7461_v58  ;;  %v10338_v17 = vpack.i.bf16 %v6964_v13, %v6962_v48  ;;  %v6966_v43 = vsel %vm2152_vm1, %v6963_v27, %v6965_v59  ;;  %v7256_v48 = vsel %vm2784_vm2, %v7253_v41, %v7255_v14 }
 0x592   : > { %8609 = vmatprep.mubr.msk.bf16.mxu0 %vm6069_vm6, %v7464_v16 }
 0x593   : > { %10339 = vrot.lane.b32.xlu0 %v10338_v17, %s10486_s27 }
 0x5a3   : > { %v10305_v5 = vpop.permute.xlu1 %10304 }
 0x5a4   : > { %v10307_v39 = vunpack.i.h.bf16 %v10305_v5  ;;  %v10306_v44 = vunpack.i.l.bf16 %v10305_v5  ;;  %v9251_v42 = vpop.f32.mrb[148].mxu0 }
 0x5a5   : > { %v6659_v28 = vmul.f32 %v14808_v12, %v9251_v42  ;;  %v6552_v10 = vpop.f32.mrb[149].mxu0  ;;  %v10310_v19 = vpop.permute.xlu0 %10309 }
 0x5a6   : > { %v7400_v34 = vsel %vm6069_vm6, %v14751_v45, %v10306_v44  ;;  %v6657_v61 = vmul.f32 %v14808_v12, %v6552_v10  ;;  %v9252_v51 = vpop.f32.mrb[150].mxu0  ;;  %v7401_v63 = vsel %vm6069_vm6, %v14803_v36, %v10307_v39  ;;  %v10312_v1 = vunpack.i.h.bf16 %v10310_v19 }
 0x5a7   : > { %v6729_v18 = vadd.f32 %v14823_v46, %v6659_v28  ;;  %v6555_v62 = vpop.f32.mrb[151].mxu0  ;;  %v7463_v53 = vpack.c.bf16 %v7401_v63, %v7400_v34  ;;  %v10311_v15 = vunpack.i.l.bf16 %v10310_v19  ;;  %v7257_v45 = vrot.slane %v14899_v30, 2 }
 0x5a8   : > { %v6727_v22 = vadd.f32 %v14823_v46, %v6657_v61  ;;  %v6658_v2 = vmul.f32 %v14808_v12, %v6555_v62  ;;  %v7403_v55 = vsel %vm6069_vm6, %v14836_v6, %v10312_v1  ;;  %v6660_v27 = vmul.f32 %v14808_v12, %v9252_v51 }
 0x5a9   : > { %7854 = vmatmul.mubr.bf16.gmra.mrb[228].mxu0 %v7463_v53  ;;  %v15066_v33 = vmax.f32 %v6729_v18, 0.0  ;;  %v7402_v11 = vsel %vm6069_vm6, %v14831_v31, %v10311_v15  ;;  %v7258_v49 = vsel %vm2784_vm2, %v7255_v14, %v7257_v45  ;;  %v7260_v26 = vsel %vm2784_vm2, %v7257_v45, %v7259_v38 }
 0x5aa   : > { %v15068_v52 = vmax.f32 %v6727_v22, 0.0  ;;  %v6728_v36 = vadd.f32 %v14823_v46, %v6658_v2  ;;  %8610 = vmatprep.mubr.msk.bf16.mxu0 %vm6069_vm6, %v7466_v20  ;;  %v7465_v16 = vpack.c.bf16 %v7403_v55, %v7402_v11  ;;  %v7468_v13 = vpack.c.bf16 %v7258_v49, %v7256_v48 }
 0x5ab   : > { %v6971_v3 = vrot.slane %v15066_v33, 1  ;;  %v6730_v40 = vadd.f32 %v14823_v46, %v6660_v27  ;;  %v7262_v51 = vsel %vm2784_vm2, %v7259_v38, %v7261_v8  ;;  %v7265_v1 = vrot.slane %v14965_v23, 2 }
 0x5ac   : > { %v6967_v7 = vrot.slane %v15068_v52, 1  ;;  %v15074_v60 = vmax.f32 %v6728_v36, 0.0  ;;  %v7470_v45 = vpack.c.bf16 %v7262_v51, %v7260_v26 }
 0x5ad   : > { %v15097_v28 = vmax.f32 %v6730_v40, 0.0 }
 0x5ae   : > { %v6969_v32 = vrot.slane %v15074_v60, 1  ;;  %v6968_v58 = vsel %vm2152_vm1, %v6965_v59, %v6967_v7 }
 0x5af   : > { %v10343_v35 = vpack.i.bf16 %v6968_v58, %v6966_v43 }
 0x5b0   : > { %v6970_v31 = vsel %vm2152_vm1, %v6967_v7, %v6969_v32  ;;  %v6972_v17 = vsel %vm2152_vm1, %v6969_v32, %v6971_v3 }
 0x5b1   : > { %10344 = vrot.lane.b32.xlu1 %v10343_v35, %s10486_s27  ;;  %7862 = vmatmul.mubr.bf16.gmra.mrb[232].mxu0 %v7465_v16  ;;  %v10348_v6 = vpack.i.bf16 %v6972_v17, %v6970_v31 }
 0x5b2   : > { %8611 = vmatprep.mubr.msk.bf16.mxu0 %vm6069_vm6, %v7468_v13 }
 0x5b3   : > { %10349 = vrot.lane.b32.xlu0 %v10348_v6, %s10486_s27 }
 0x5c3   : > { %v10315_v41 = vpop.permute.xlu1 %10314 }
 0x5c4   : > { %v10317_v5 = vunpack.i.h.bf16 %v10315_v41  ;;  %v10316_v39 = vunpack.i.l.bf16 %v10315_v41  ;;  %v9255_v44 = vpop.f32.mrb[152].mxu0 }
 0x5c5   : > { %v6663_v42 = vmul.f32 %v14808_v12, %v9255_v44  ;;  %v6568_v50 = vpop.f32.mrb[153].mxu0  ;;  %v10320_v19 = vpop.permute.xlu0 %10319 }
 0x5c6   : > { %v6661_v10 = vmul.f32 %v14808_v12, %v6568_v50  ;;  %v9256_v34 = vpop.f32.mrb[154].mxu0  ;;  %v7404_v61 = vsel %vm6069_vm6, %v14829_v4, %v10316_v39  ;;  %v7405_v62 = vsel %vm6069_vm6, %v14887_v24, %v10317_v5  ;;  %v10322_v15 = vunpack.i.h.bf16 %v10320_v19 }
 0x5c7   : > { %v6733_v63 = vadd.f32 %v14823_v46, %v6663_v42  ;;  %v6571_v18 = vpop.f32.mrb[155].mxu0  ;;  %v7467_v22 = vpack.c.bf16 %v7405_v62, %v7404_v61  ;;  %v10321_v2 = vunpack.i.l.bf16 %v10320_v19  ;;  %v6973_v4 = vrot.slane %v15097_v28, 1 }
 0x5c8   : > { %v6731_v53 = vadd.f32 %v14823_v46, %v6661_v10  ;;  %v6662_v20 = vmul.f32 %v14808_v12, %v6571_v18  ;;  %v7263_v24 = vrot.slane %v14953_v21, 2  ;;  %v7407_v49 = vsel %vm6069_vm6, %v14905_v9, %v10322_v15 }
 0x5c9   : > { %v15110_v59 = vmax.f32 %v6733_v63, 0.0  ;;  %7870 = vmatmul.mubr.bf16.gmra.mrb[236].mxu0 %v7467_v22  ;;  %v7406_v55 = vsel %vm6069_vm6, %v14899_v30, %v10321_v2  ;;  %v6974_v35 = vsel %vm2152_vm1, %v6971_v3, %v6973_v4  ;;  %v6664_v48 = vmul.f32 %v14808_v12, %v9256_v34 }
 0x5ca   : > { %v15112_v36 = vmax.f32 %v6731_v53, 0.0  ;;  %v6732_v14 = vadd.f32 %v14823_v46, %v6662_v20  ;;  %8612 = vmatprep.mubr.msk.bf16.mxu0 %vm6069_vm6, %v7470_v45  ;;  %v7266_v32 = vsel %vm2784_vm2, %v7263_v24, %v7265_v1  ;;  %v7469_v31 = vpack.c.bf16 %v7407_v49, %v7406_v55 }
 0x5cb   : > { %v6979_v43 = vrot.slane %v15110_v59, 1  ;;  %v7264_v30 = vsel %vm2784_vm2, %v7261_v8, %v7263_v24  ;;  %v6734_v38 = vadd.f32 %v14823_v46, %v6664_v48  ;;  %v7269_v55 = vrot.slane %v14963_v25, 2 }
 0x5cc   : > { %v6975_v7 = vrot.slane %v15112_v36, 1  ;;  %v15118_v11 = vmax.f32 %v6732_v14, 0.0  ;;  %v7472_v6 = vpack.c.bf16 %v7266_v32, %v7264_v30  ;;  %v7267_v14 = vrot.slane %v14971_v57, 2 }
 0x5cd   : > { %v15140_v8 = vmax.f32 %v6734_v38, 0.0 }
 0x5ce   : > { %v6977_v58 = vrot.slane %v15118_v11, 1  ;;  %v6976_v16 = vsel %vm2152_vm1, %v6973_v4, %v6975_v7  ;;  %v7268_v48 = vsel %vm2784_vm2, %v7265_v1, %v7267_v14 }
 0x5cf   : > { %v10353_v13 = vpack.i.bf16 %v6976_v16, %v6974_v35  ;;  %v6981_v10 = vrot.slane %v15140_v8, 1 }
 0x5d0   : > { %v6978_v9 = vsel %vm2152_vm1, %v6975_v7, %v6977_v58  ;;  %v6980_v17 = vsel %vm2152_vm1, %v6977_v58, %v6979_v43 }
 0x5d1   : > { %10354 = vrot.lane.b32.xlu1 %v10353_v13, %s10486_s27  ;;  %v10358_v27 = vpack.i.bf16 %v6980_v17, %v6978_v9  ;;  %7878 = vmatmul.mubr.bf16.gmra.mrb[240].mxu0 %v7469_v31  ;;  %v7270_v13 = vsel %vm2784_vm2, %v7267_v14, %v7269_v55  ;;  %v15175_v31 = vld [vmem:[%s15434_s11] ss:$0 sm:$0xff] }
 0x5d2   : > { %8613 = vmatprep.mubr.msk.bf16.mxu0 %vm6069_vm6, %v7472_v6 }
 0x5d3   : > { %10359 = vrot.lane.b32.xlu0 %v10358_v27, %s10486_s27 }
 0x5d5   : > { %v9259_v3 = vpop.f32.mrb[156].mxu0 }
 0x5d6   : > { %v6667_v40 = vmul.f32 %v14808_v12, %v9259_v3  ;;  %v6584_v41 = vpop.f32.mrb[157].mxu0  ;;  %v7273_v3 = vrot.slane %v15022_v54, 2 }
 0x5d7   : > { %v6665_v5 = vmul.f32 %v14808_v12, %v6584_v41  ;;  %v9260_v39 = vpop.f32.mrb[158].mxu0  ;;  %v15185_v41 = vld [vmem:[%s15435_s12] ss:$0 sm:$0xff] }
 0x5d8   : > { %v6737_v44 = vadd.f32 %v14823_v46, %v6667_v40  ;;  %v6587_v42 = vpop.f32.mrb[159].mxu0  ;;  %v7271_v40 = vrot.slane %v15010_v56, 2 }
 0x5d9   : > { %v6735_v50 = vadd.f32 %v14823_v46, %v6665_v5  ;;  %v6666_v26 = vmul.f32 %v14808_v12, %v6587_v42  ;;  %v6982_v12 = vsel %vm2152_vm1, %v6979_v43, %v6981_v10 }
 0x5da   : > { %v15147_v19 = vmax.f32 %v6737_v44, 0.0 }
 0x5db   : > { %v15149_v34 = vmax.f32 %v6735_v50, 0.0  ;;  %v6736_v61 = vadd.f32 %v14823_v46, %v6666_v26 }
 0x5dc   : > { %v6987_v53 = vrot.slane %v15147_v19, 1 }
 0x5dd   : > { %v6983_v51 = vrot.slane %v15149_v34, 1  ;;  %v15153_v63 = vmax.f32 %v6736_v61, 0.0  ;;  %v7719_v18 = vpop.f32.mrb[160].mxu0 }
 0x5de   : > { %v7721_v62 = vpop.f32.mrb[161].mxu0  ;;  %v7980_v1 = vmul.f32 %v15175_v31, %v7719_v18 }
 0x5df   : > { %v6985_v20 = vrot.slane %v15153_v63, 1  ;;  %v7722_v22 = vpop.f32.mrb[162].mxu0  ;;  %v6984_v15 = vsel %vm2152_vm1, %v6981_v10, %v6983_v51  ;;  %v7274_v10 = vsel %vm2784_vm2, %v7271_v40, %v7273_v3 }
 0x5e0   : > { %v7724_v2 = vpop.f32.mrb[163].mxu0  ;;  %v10363_v45 = vpack.i.bf16 %v6984_v15, %v6982_v12  ;;  %v8050_v42 = vadd.f32 %v15185_v41, %v7980_v1 }
 0x5e1   : > { %v6986_v4 = vsel %vm2152_vm1, %v6983_v51, %v6985_v20  ;;  %v6988_v46 = vsel %vm2152_vm1, %v6985_v20, %v6987_v53  ;;  %v7272_v51 = vsel %vm2784_vm2, %v7269_v55, %v7271_v40 }
 0x5e2   : > { %10364 = vrot.lane.b32.xlu1 %v10363_v45, %s10486_s27  ;;  %v10368_v24 = vpack.i.bf16 %v6988_v46, %v6986_v4  ;;  %v7476_v20 = vpack.c.bf16 %v7274_v10, %v7272_v51  ;;  %v7277_v10 = vrot.slane %v15020_v37, 2 }
 0x5e3   : > { %v10325_v7 = vpop.permute.xlu1 %10324 }
 0x5e4   : > { %v10327_v49 = vunpack.i.h.bf16 %v10325_v7  ;;  %v10326_v32 = vunpack.i.l.bf16 %v10325_v7  ;;  %10369 = vrot.lane.b32.xlu0 %v10368_v24, %s10486_s27 }
 0x5e5   : > { %v7727_v43 = vpop.f32.mrb[164].mxu0  ;;  %v10330_v58 = vpop.permute.xlu0 %10329 }
 0x5e6   : > { %7113 = vrot.lane.b32.xlu1 %v6987_v53, %s10486_s27  ;;  %v7729_v35 = vpop.f32.mrb[165].mxu0  ;;  %v7408_v16 = vsel %vm6069_vm6, %v14897_v29, %v10326_v32  ;;  %v7409_v9 = vsel %vm6069_vm6, %v14953_v21, %v10327_v49  ;;  %v10332_v27 = vunpack.i.h.bf16 %v10330_v58  ;;  %v10331_v38 = vunpack.i.l.bf16 %v10330_v58 }
 0x5e7   : > { %v7730_v30 = vpop.f32.mrb[166].mxu0  ;;  %v7471_v6 = vpack.c.bf16 %v7409_v9, %v7408_v16  ;;  %v7474_v29 = vpack.c.bf16 %v7270_v13, %v7268_v48  ;;  %v7981_v21 = vmul.f32 %v15175_v31, %v7722_v22  ;;  %v8113_v22 = vmax.f32 %v8050_v42, 0.0 }
 0x5e8   : > { %v7732_v17 = vpop.f32.mrb[167].mxu0  ;;  %v7410_v39 = vsel %vm6069_vm6, %v14965_v23, %v10331_v38  ;;  %v7411_v44 = vsel %vm6069_vm6, %v14971_v57, %v10332_v27  ;;  %v7982_v12 = vmul.f32 %v15175_v31, %v7727_v43  ;;  %v7983_v4 = vmul.f32 %v15175_v31, %v7730_v30 }
 0x5e9   : > { %7886 = vmatmul.mubr.bf16.gmra.mrb[244].mxu0 %v7471_v6  ;;  %v8051_v18 = vadd.f32 %v15185_v41, %v7981_v21  ;;  %v7473_v57 = vpack.c.bf16 %v7411_v44, %v7410_v39  ;;  %v7275_v42 = vrot.slane %v15028_v47, 2 }
 0x5ea   : > { %8614 = vmatprep.mubr.msk.bf16.mxu0 %vm6069_vm6, %v7474_v29  ;;  %v8052_v7 = vadd.f32 %v15185_v41, %v7982_v12  ;;  %v8053_v43 = vadd.f32 %v15185_v41, %v7983_v4 }
 0x5eb   : > { %v8114_v45 = vmax.f32 %v8051_v18, 0.0  ;;  %v7276_v12 = vsel %vm2784_vm2, %v7273_v3, %v7275_v42 }
 0x5ec   : > { %v8115_v13 = vmax.f32 %v8052_v7, 0.0  ;;  %v8116_v17 = vmax.f32 %v8053_v43, 0.0 }
 0x5ed   : > { %v7735_v5 = vpop.f32.mrb[168].mxu0 }
 0x5ee   : > { %v7984_v50 = vmul.f32 %v15175_v31, %v7735_v5  ;;  %v7737_v26 = vpop.f32.mrb[169].mxu0 }
 0x5ef   : > { %v7738_v61 = vpop.f32.mrb[170].mxu0 }
 0x5f0   : > { %v8054_v62 = vadd.f32 %v15185_v41, %v7984_v50  ;;  %v7985_v23 = vmul.f32 %v15175_v31, %v7738_v61  ;;  %v7740_v53 = vpop.f32.mrb[171].mxu0 }
 0x5f1   : > { %7894 = vmatmul.mubr.bf16.gmra.mrb[248].mxu0 %v7473_v57 }
 0x5f2   : > { %v8117_v15 = vmax.f32 %v8054_v62, 0.0  ;;  %v8055_v2 = vadd.f32 %v15185_v41, %v7985_v23  ;;  %8615 = vmatprep.mubr.msk.bf16.mxu0 %vm6069_vm6, %v7476_v20 }
 0x5f4   : > { %v8176_v46 = vmax.f32 %v8113_v22, %v8117_v15  ;;  %v8118_v14 = vmax.f32 %v8055_v2, 0.0  ;;  %v7278_v15 = vsel %vm2784_vm2, %v7275_v42, %v7277_v10 }
 0x5f5   : > { %v7743_v24 = vpop.f32.mrb[172].mxu0 }
 0x5f6   : > { %v8177_v55 = vmax.f32 %v8114_v45, %v8118_v14  ;;  %v7986_v49 = vmul.f32 %v15175_v31, %v7743_v24  ;;  %v7745_v32 = vpop.f32.mrb[173].mxu0 }
 0x5f7   : > { %v7746_v58 = vpop.f32.mrb[174].mxu0 }
 0x5f8   : > { %v8056_v35 = vadd.f32 %v15185_v41, %v7986_v49  ;;  %v7987_v16 = vmul.f32 %v15175_v31, %v7746_v58  ;;  %v7748_v48 = vpop.f32.mrb[175].mxu0  ;;  %v7478_v49 = vpack.c.bf16 %v7278_v15, %v7276_v12 }
 0x5fa   : > { %v8119_v9 = vmax.f32 %v8056_v35, 0.0  ;;  %v8057_v30 = vadd.f32 %v15185_v41, %v7987_v16  ;;  %v7281_v35 = vrot.slane %v15068_v52, 2 }
 0x5fc   : > { %v8178_v6 = vmax.f32 %v8115_v13, %v8119_v9  ;;  %v8120_v27 = vmax.f32 %v8057_v30, 0.0 }
 0x5fd   : > { %v7751_v38 = vpop.f32.mrb[176].mxu0 }
 0x5fe   : > { %v8179_v29 = vmax.f32 %v8116_v17, %v8120_v27  ;;  %v7988_v1 = vmul.f32 %v15175_v31, %v7751_v38  ;;  %v7753_v40 = vpop.f32.mrb[177].mxu0 }
 0x5ff   : > { %v7754_v21 = vpop.f32.mrb[178].mxu0 }
 0x600   : > { %v8058_v5 = vadd.f32 %v15185_v41, %v7988_v1  ;;  %v7989_v39 = vmul.f32 %v15175_v31, %v7754_v21  ;;  %v7756_v44 = vpop.f32.mrb[179].mxu0 }
 0x602   : > { %v8121_v50 = vmax.f32 %v8058_v5, 0.0  ;;  %v8059_v26 = vadd.f32 %v15185_v41, %v7989_v39 }
 0x603   : > { %v10335_v61 = vpop.permute.xlu1 %10334 }
 0x604   : > { %v8180_v51 = vmax.f32 %v8176_v46, %v8121_v50  ;;  %v8122_v18 = vmax.f32 %v8059_v26, 0.0  ;;  %v10337_v62 = vunpack.i.h.bf16 %v10335_v61  ;;  %v10336_v23 = vunpack.i.l.bf16 %v10335_v61 }
 0x605   : > { %v7759_v53 = vpop.f32.mrb[180].mxu0  ;;  %v10340_v2 = vpop.permute.xlu0 %10339 }
 0x606   : > { %v8181_v57 = vmax.f32 %v8177_v55, %v8122_v18  ;;  %v7990_v20 = vmul.f32 %v15175_v31, %v7759_v53  ;;  %v7761_v22 = vpop.f32.mrb[181].mxu0  ;;  %v7412_v4 = vsel %vm6069_vm6, %v14963_v25, %v10336_v23  ;;  %v7413_v46 = vsel %vm6069_vm6, %v15010_v56, %v10337_v62 }
 0x607   : > { %v7762_v45 = vpop.f32.mrb[182].mxu0  ;;  %v7475_v55 = vpack.c.bf16 %v7413_v46, %v7412_v4  ;;  %v10342_v32 = vunpack.i.h.bf16 %v10340_v2  ;;  %v10341_v58 = vunpack.i.l.bf16 %v10340_v2  ;;  %v7279_v56 = vrot.slane %v15056_v0, 2 }
 0x608   : > { %v8060_v14 = vadd.f32 %v15185_v41, %v7990_v20  ;;  %v7991_v24 = vmul.f32 %v15175_v31, %v7762_v45  ;;  %v7764_v7 = vpop.f32.mrb[183].mxu0 }
 0x609   : > { %7902 = vmatmul.mubr.bf16.gmra.mrb[252].mxu0 %v7475_v55  ;;  %v7415_v13 = vsel %vm6069_vm6, %v15028_v47, %v10342_v32  ;;  %v7414_v9 = vsel %vm6069_vm6, %v15022_v54, %v10341_v58  ;;  %v7282_v1 = vsel %vm2784_vm2, %v7279_v56, %v7281_v35  ;;  %v7280_v39 = vsel %vm2784_vm2, %v7277_v10, %v7279_v56 }
 0x60a   : > { %v8123_v3 = vmax.f32 %v8060_v14, 0.0  ;;  %v8061_v43 = vadd.f32 %v15185_v41, %v7991_v24  ;;  %8616 = vmatprep.mubr.msk.bf16.mxu0 %vm6069_vm6, %v7478_v49  ;;  %v7477_v5 = vpack.c.bf16 %v7415_v13, %v7414_v9  ;;  %v7480_v42 = vpack.c.bf16 %v7282_v1, %v7280_v39 }
 0x60b   : > { %v7283_v24 = vrot.slane %v15074_v60, 2  ;;  %v7285_v55 = vrot.slane %v15066_v33, 2 }
 0x60c   : > { %v8182_v16 = vmax.f32 %v8178_v6, %v8123_v3  ;;  %v8124_v25 = vmax.f32 %v8061_v43, 0.0 }
 0x60d   : > { %v7767_v48 = vpop.f32.mrb[184].mxu0  ;;  %v7286_v56 = vsel %vm2784_vm2, %v7283_v24, %v7285_v55 }
 0x60e   : > { %v8183_v30 = vmax.f32 %v8179_v29, %v8124_v25  ;;  %v7992_v17 = vmul.f32 %v15175_v31, %v7767_v48  ;;  %v7769_v27 = vpop.f32.mrb[185].mxu0 }
 0x60f   : > { %v7770_v38 = vpop.f32.mrb[186].mxu0 }
 0x610   : > { %v8062_v6 = vadd.f32 %v15185_v41, %v7992_v17  ;;  %v7993_v40 = vmul.f32 %v15175_v31, %v7770_v38  ;;  %v7772_v21 = vpop.f32.mrb[187].mxu0 }
 0x611   : > { %7910 = vmatmul.mubr.bf16.gmra.mrb[0].mxu0 %v7477_v5  ;;  %v7289_v21 = vrot.slane %v15112_v36, 2 }
 0x612   : > { %v8125_v44 = vmax.f32 %v8062_v6, 0.0  ;;  %v8063_v47 = vadd.f32 %v15185_v41, %v7993_v40  ;;  %8617 = vmatprep.mubr.msk.bf16.mxu0 %vm6069_vm6, %v7480_v42 }
 0x614   : > { %v8184_v54 = vmax.f32 %v8180_v51, %v8125_v44  ;;  %v8126_v29 = vmax.f32 %v8063_v47, 0.0 }
 0x615   : > { %v7775_v50 = vpop.f32.mrb[188].mxu0 }
 0x616   : > { %v8185_v26 = vmax.f32 %v8181_v57, %v8126_v29  ;;  %v7994_v61 = vmul.f32 %v15175_v31, %v7775_v50  ;;  %v7777_v18 = vpop.f32.mrb[189].mxu0 }
 0x617   : > { %v7778_v62 = vpop.f32.mrb[190].mxu0 }
 0x618   : > { %v8190_v23 = vmax.f32 %v8184_v54, %v8185_v26  ;;  %v8064_v53 = vadd.f32 %v15185_v41, %v7994_v61  ;;  %v7995_v10 = vmul.f32 %v15175_v31, %v7778_v62  ;;  %v7780_v20 = vpop.f32.mrb[191].mxu0 }
 0x61a   : > { %v8127_v22 = vmax.f32 %v8064_v53, 0.0  ;;  %v8065_v12 = vadd.f32 %v15185_v41, %v7995_v10 }
 0x61c   : > { %v8186_v51 = vmax.f32 %v8182_v16, %v8127_v22  ;;  %v8128_v15 = vmax.f32 %v8065_v12, 0.0  ;;  %v7284_v16 = vsel %vm2784_vm2, %v7281_v35, %v7283_v24 }
 0x61d   : > { %v7783_v2 = vpop.f32.mrb[192].mxu0  ;;  %v7482_v40 = vpack.c.bf16 %v7286_v56, %v7284_v16 }
 0x61e   : > { %v8188_v45 = vsel %vm8187_vm8, %v8128_v15, -inf  ;;  %v7785_v4 = vpop.f32.mrb[193].mxu0  ;;  %v7996_v35 = vmul.f32 %v15175_v31, %v7783_v2  ;;  %v8200_v42 = vsel %vm8199_vm9, %v8128_v15, -inf }
 0x61f   : > { %v8189_v57 = vmax.f32 %v8183_v30, %v8188_v45  ;;  %v7786_v46 = vpop.f32.mrb[194].mxu0 }
 0x620   : > { %v7788_v14 = vpop.f32.mrb[195].mxu0  ;;  %v7997_v5 = vmul.f32 %v15175_v31, %v7786_v46  ;;  %v8066_v50 = vadd.f32 %v15185_v41, %v7996_v35  ;;  %v7291_v35 = vrot.slane %v15118_v11, 2 }
 0x621   : > { %v8191_v7 = vmax.f32 %v8186_v51, %v8189_v57 }
 0x622   : > { %v8067_v53 = vadd.f32 %v15185_v41, %v7997_v5  ;;  %v8129_v12 = vmax.f32 %v8066_v50, 0.0  ;;  %v7293_v5 = vrot.slane %v15110_v59, 2 }
 0x623   : > { %v15250_v49 = vmax.f32 %v8190_v23, %v8191_v7  ;;  %v10345_v32 = vpop.permute.xlu1 %10344 }
 0x624   : > { %v10347_v58 = vunpack.i.h.bf16 %v10345_v32  ;;  %v10346_v3 = vunpack.i.l.bf16 %v10345_v32  ;;  %v8130_v45 = vmax.f32 %v8067_v53, 0.0 }
 0x625   : > { %v10350_v43 = vpop.permute.xlu0 %10349  ;;  %v7791_v25 = vpop.f32.mrb[196].mxu0 }
 0x626   : > { %v7417_v48 = vsel %vm6069_vm6, %v15056_v0, %v10347_v58  ;;  %v7416_v13 = vsel %vm6069_vm6, %v15020_v37, %v10346_v3  ;;  %v7793_v9 = vpop.f32.mrb[197].mxu0  ;;  %v10352_v27 = vunpack.i.h.bf16 %v10350_v43  ;;  %v10351_v38 = vunpack.i.l.bf16 %v10350_v43 }
 0x627   : > { %v7479_v30 = vpack.c.bf16 %v7417_v48, %v7416_v13  ;;  %v7794_v17 = vpop.f32.mrb[198].mxu0  ;;  %v7287_v37 = vrot.slane %v15097_v28, 2  ;;  %v7998_v51 = vmul.f32 %v15175_v31, %v7791_v25 }
 0x628   : > { %v7999_v1 = vmul.f32 %v15175_v31, %v7794_v17  ;;  %v7796_v6 = vpop.f32.mrb[199].mxu0  ;;  %v7419_v39 = vsel %vm6069_vm6, %v15074_v60, %v10352_v27  ;;  %v7418_v44 = vsel %vm6069_vm6, %v15068_v52, %v10351_v38 }
 0x629   : > { %7918 = vmatmul.mubr.bf16.gmra.mrb[4].mxu0 %v7479_v30  ;;  %v7290_v29 = vsel %vm2784_vm2, %v7287_v37, %v7289_v21  ;;  %v7481_v62 = vpack.c.bf16 %v7419_v39, %v7418_v44  ;;  %v7288_v60 = vsel %vm2784_vm2, %v7285_v55, %v7287_v37  ;;  %v8068_v14 = vadd.f32 %v15185_v41, %v7998_v51 }
 0x62a   : > { %v8069_v0 = vadd.f32 %v15185_v41, %v7999_v1  ;;  %8618 = vmatprep.mubr.msk.bf16.mxu0 %vm6069_vm6, %v7482_v40  ;;  %v7484_v22 = vpack.c.bf16 %v7290_v29, %v7288_v60 }
 0x62b   : > { %v8131_v25 = vmax.f32 %v8068_v14, 0.0 }
 0x62c   : > { %v8132_v47 = vmax.f32 %v8069_v0, 0.0 }
 0x62d   : > { %v7799_v54 = vpop.f32.mrb[200].mxu0 }
 0x62e   : > { %v8201_v26 = vmax.f32 %v8200_v42, %v8132_v47  ;;  %v8000_v61 = vmul.f32 %v15175_v31, %v7799_v54  ;;  %v7801_v18 = vpop.f32.mrb[201].mxu0 }
 0x62f   : > { %v7802_v23 = vpop.f32.mrb[202].mxu0 }
 0x630   : > { %v8070_v52 = vadd.f32 %v15185_v41, %v8000_v61  ;;  %v8001_v10 = vmul.f32 %v15175_v31, %v7802_v23  ;;  %v7804_v20 = vpop.f32.mrb[203].mxu0  ;;  %v7294_v61 = vsel %vm2784_vm2, %v7291_v35, %v7293_v5 }
 0x631   : > { %7926 = vmatmul.mubr.bf16.gmra.mrb[8].mxu0 %v7481_v62 }
 0x632   : > { %v8133_v15 = vmax.f32 %v8070_v52, 0.0  ;;  %v8071_v2 = vadd.f32 %v15185_v41, %v8001_v10  ;;  %8619 = vmatprep.mubr.msk.bf16.mxu0 %vm6069_vm6, %v7484_v22 }
 0x634   : > { %v8202_v4 = vmax.f32 %v8129_v12, %v8133_v15  ;;  %v8134_v57 = vmax.f32 %v8071_v2, 0.0  ;;  %v7297_v15 = vrot.slane %v15149_v34, 2 }
 0x635   : > { %v7807_v46 = vpop.f32.mrb[204].mxu0 }
 0x636   : > { %v8203_v24 = vmax.f32 %v8130_v45, %v8134_v57  ;;  %v8002_v7 = vmul.f32 %v15175_v31, %v7807_v46  ;;  %v7809_v55 = vpop.f32.mrb[205].mxu0 }
 0x637   : > { %v7810_v32 = vpop.f32.mrb[206].mxu0 }
 0x638   : > { %v8072_v58 = vadd.f32 %v15185_v41, %v8002_v7  ;;  %v8003_v3 = vmul.f32 %v15175_v31, %v7810_v32  ;;  %v7812_v43 = vpop.f32.mrb[207].mxu0 }
 0x63a   : > { %v8135_v16 = vmax.f32 %v8072_v58, 0.0  ;;  %v8073_v56 = vadd.f32 %v15185_v41, %v8003_v3 }
 0x63c   : > { %v8204_v48 = vmax.f32 %v8131_v25, %v8135_v16  ;;  %v8136_v13 = vmax.f32 %v8073_v56, 0.0 }
 0x63d   : > { %v7815_v9 = vpop.f32.mrb[208].mxu0 }
 0x63e   : > { %v8205_v30 = vmax.f32 %v8201_v26, %v8136_v13  ;;  %v8004_v17 = vmul.f32 %v15175_v31, %v7815_v9  ;;  %v7817_v27 = vpop.f32.mrb[209].mxu0  ;;  %v7292_v26 = vsel %vm2784_vm2, %v7289_v21, %v7291_v35 }
 0x63f   : > { %v7818_v38 = vpop.f32.mrb[210].mxu0  ;;  %v7486_v21 = vpack.c.bf16 %v7294_v61, %v7292_v26 }
 0x640   : > { %v8074_v1 = vadd.f32 %v15185_v41, %v8004_v17  ;;  %v8005_v6 = vmul.f32 %v15175_v31, %v7818_v38  ;;  %v7820_v40 = vpop.f32.mrb[211].mxu0 }
 0x642   : > { %v8137_v0 = vmax.f32 %v8074_v1, 0.0  ;;  %v8075_v37 = vadd.f32 %v15185_v41, %v8005_v6 }
 0x643   : > { %v10355_v39 = vpop.permute.xlu1 %10354 }
 0x644   : > { %v8206_v44 = vmax.f32 %v8202_v4, %v8137_v0  ;;  %v8138_v47 = vmax.f32 %v8075_v37, 0.0  ;;  %v10357_v42 = vunpack.i.h.bf16 %v10355_v39  ;;  %v10356_v54 = vunpack.i.l.bf16 %v10355_v39 }
 0x645   : > { %v10360_v29 = vpop.permute.xlu0 %10359  ;;  %v7823_v50 = vpop.f32.mrb[212].mxu0 }
 0x646   : > { %v8207_v18 = vmax.f32 %v8203_v24, %v8138_v47  ;;  %v7421_v62 = vsel %vm6069_vm6, %v15097_v28, %v10357_v42  ;;  %v7420_v23 = vsel %vm6069_vm6, %v15066_v33, %v10356_v54  ;;  %v7825_v60 = vpop.f32.mrb[213].mxu0  ;;  %v8006_v52 = vmul.f32 %v15175_v31, %v7823_v50 }
 0x647   : > { %v7483_v53 = vpack.c.bf16 %v7421_v62, %v7420_v23  ;;  %v7826_v10 = vpop.f32.mrb[214].mxu0  ;;  %v10362_v20 = vunpack.i.h.bf16 %v10360_v29  ;;  %v10361_v22 = vunpack.i.l.bf16 %v10360_v29  ;;  %v7295_v33 = vrot.slane %v15140_v8, 2 }
 0x648   : > { %v8007_v12 = vmul.f32 %v15175_v31, %v7826_v10  ;;  %v7828_v51 = vpop.f32.mrb[215].mxu0  ;;  %v8076_v2 = vadd.f32 %v15185_v41, %v8006_v52 }
 0x649   : > { %7934 = vmatmul.mubr.bf16.gmra.mrb[12].mxu0 %v7483_v53  ;;  %v7423_v4 = vsel %vm6069_vm6, %v15118_v11, %v10362_v20  ;;  %v7422_v57 = vsel %vm6069_vm6, %v15112_v36, %v10361_v22  ;;  %v7298_v7 = vsel %vm2784_vm2, %v7295_v33, %v7297_v15  ;;  %v7296_v25 = vsel %vm2784_vm2, %v7293_v5, %v7295_v33 }
 0x64a   : > { %v8077_v28 = vadd.f32 %v15185_v41, %v8007_v12  ;;  %8620 = vmatprep.mubr.msk.bf16.mxu0 %vm6069_vm6, %v7486_v21  ;;  %v8139_v45 = vmax.f32 %v8076_v2, 0.0  ;;  %v7485_v3 = vpack.c.bf16 %v7423_v4, %v7422_v57  ;;  %v7488_v36 = vpack.c.bf16 %v7298_v7, %v7296_v25 }
 0x64b   : > { %v8193_v20 = vrot.slane %v15250_v49, 4 }
 0x64c   : > { %v8140_v46 = vmax.f32 %v8077_v28, 0.0  ;;  %v8208_v14 = vmax.f32 %v8204_v48, %v8139_v45  ;;  %v7299_v48 = vrot.slane %v15153_v63, 2 }
 0x64d   : > { %v7831_v24 = vpop.f32.mrb[216].mxu0  ;;  %v8194_v28 = vmax.f32 %v15250_v49, %v8193_v20 }
 0x64e   : > { %v15312_v55 = vmax.f32 %v8205_v30, %v8140_v46  ;;  %v8008_v32 = vmul.f32 %v15175_v31, %v7831_v24  ;;  %v7833_v58 = vpop.f32.mrb[217].mxu0  ;;  %v7301_v30 = vrot.slane %v15147_v19, 2  ;;  %v7300_v0 = vsel %vm2784_vm2, %v7297_v15, %v7299_v48 }
 0x64f   : > { %v7834_v43 = vpop.f32.mrb[218].mxu0 }
 0x650   : > { %v8078_v16 = vadd.f32 %v15185_v41, %v8008_v32  ;;  %v8009_v11 = vmul.f32 %v15175_v31, %v7834_v43  ;;  %v7836_v56 = vpop.f32.mrb[219].mxu0  ;;  %v7302_v37 = vsel %vm2784_vm2, %v7299_v48, %v7301_v30  ;;  %v7492_v10 = vpack.c.bf16 %v7301_v30, %v7301_v30 }
 0x651   : > { %7942 = vmatmul.mubr.bf16.gmra.mrb[16].mxu0 %v7485_v3 }
 0x652   : > { %v8141_v13 = vmax.f32 %v8078_v16, 0.0  ;;  %v8079_v9 = vadd.f32 %v15185_v41, %v8009_v11  ;;  %8621 = vmatprep.mubr.msk.bf16.mxu0 %vm6069_vm6, %v7488_v36 }
 0x654   : > { %v8210_v17 = vmax.f32 %v8206_v44, %v8141_v13  ;;  %v8142_v27 = vmax.f32 %v8079_v9, 0.0  ;;  %v10365_v38 = vpop.permute.xlu1 %10364  ;;  %v7490_v44 = vpack.c.bf16 %v7302_v37, %v7300_v0 }
 0x655   : > { %v10367_v1 = vunpack.i.h.bf16 %v10365_v38  ;;  %v10366_v6 = vunpack.i.l.bf16 %v10365_v38 }
 0x656   : > { %v8211_v40 = vmax.f32 %v8207_v18, %v8142_v27  ;;  %v10370_v35 = vpop.permute.xlu0 %10369 }
 0x657   : > { %v7425_v5 = vsel %vm6069_vm6, %v15140_v8, %v10367_v1  ;;  %v7424_v39 = vsel %vm6069_vm6, %v15110_v59, %v10366_v6  ;;  %v10372_v42 = vunpack.i.h.bf16 %v10370_v35  ;;  %v10371_v54 = vunpack.i.l.bf16 %v10370_v35 }
 0x658   : > { %v7487_v47 = vpack.c.bf16 %v7425_v5, %v7424_v39 }
 0x659   : > { %v7427_v50 = vsel %vm6069_vm6, %v15153_v63, %v10372_v42  ;;  %v7426_v26 = vsel %vm6069_vm6, %v15149_v34, %v10371_v54  ;;  %v7114_v63 = vpop.permute.xlu1 %7113 }
 0x65a   : > { %7950 = vmatmul.mubr.bf16.gmra.mrb[20].mxu0 %v7487_v47  ;;  %v7489_v60 = vpack.c.bf16 %v7427_v50, %v7426_v26  ;;  %v7428_v51 = vsel %vm6069_vm6, %v15147_v19, %v7114_v63 }
 0x65b   : > { %8622 = vmatprep.mubr.msk.bf16.mxu0 %vm6069_vm6, %v7490_v44  ;;  %v7491_v57 = vpack.c.bf16 %v7428_v51, %v7428_v51 }
 0x65c   : > { %v7839_v29 = vpop.f32.mrb[220].mxu0 }
 0x65d   : > { %v8010_v61 = vmul.f32 %v15175_v31, %v7839_v29  ;;  %v7841_v8 = vpop.f32.mrb[221].mxu0 }
 0x65e   : > { %v7842_v18 = vpop.f32.mrb[222].mxu0 }
 0x65f   : > { %v8080_v59 = vadd.f32 %v15185_v41, %v8010_v61  ;;  %v8011_v62 = vmul.f32 %v15175_v31, %v7842_v18  ;;  %v7844_v23 = vpop.f32.mrb[223].mxu0 }
 0x661   : > { %v8143_v53 = vmax.f32 %v8080_v59, 0.0  ;;  %v8081_v52 = vadd.f32 %v15185_v41, %v8011_v62 }
 0x662   : > { %7958 = vmatmul.mubr.bf16.gmra.mrb[24].mxu0 %v7489_v60 }
 0x663   : > { %v8212_v34 = vmax.f32 %v8208_v14, %v8143_v53  ;;  %v8144_v22 = vmax.f32 %v8081_v52, 0.0  ;;  %8623 = vmatprep.mubr.msk.bf16.mxu0 %vm6069_vm6, %v7492_v10  ;;  %v8195_v14 = vrot.slane %v8194_v28, 2 }
 0x664   : > { %v7847_v12 = vpop.f32.mrb[224].mxu0 }
 0x665   : > { %v8217_v21 = vmax.f32 %v8211_v40, %v8212_v34  ;;  %v8214_v15 = vsel %vm8213_vm10, %v8144_v22, -inf  ;;  %v7849_v2 = vpop.f32.mrb[225].mxu0  ;;  %v8196_v32 = vmax.f32 %v8194_v28, %v8195_v14  ;;  %v8012_v9 = vmul.f32 %v15175_v31, %v7847_v12 }
 0x666   : > { %v8215_v33 = vmax.f32 %v15312_v55, %v8214_v15  ;;  %v7850_v45 = vpop.f32.mrb[226].mxu0  ;;  %v8226_v38 = vsel %vm8225_vm12, %v8144_v22, -inf }
 0x667   : > { %v7852_v4 = vpop.f32.mrb[227].mxu0  ;;  %v8197_v19 = vrot.slane %v8196_v32, 1  ;;  %v8082_v6 = vadd.f32 %v15185_v41, %v8012_v9 }
 0x668   : > { %v8216_v46 = vmax.f32 %v8215_v33, %v8210_v17  ;;  %v8013_v17 = vmul.f32 %v15175_v31, %v7850_v45 }
 0x669   : > { %v8198_v16 = vmax.f32 %v8196_v32, %v8197_v19  ;;  %v8145_v54 = vmax.f32 %v8082_v6, 0.0 }
 0x66a   : > { %v8218_v24 = vmax.f32 %v8216_v46, %v8217_v21  ;;  %7966 = vmatmul.mubr.bf16.gmra.mrb[28].mxu0 %v7491_v57  ;;  %v8083_v5 = vadd.f32 %v15185_v41, %v8013_v17 }
 0x66c   : > { %v8219_v7 = vrot.slane %v8218_v24, 4  ;;  %v8146_v50 = vmax.f32 %v8083_v5, 0.0 }
 0x66e   : > { %v8220_v58 = vmax.f32 %v8218_v24, %v8219_v7 }
 0x670   : > { %v8221_v3 = vrot.slane %v8220_v58, 2 }
 0x672   : > { %v8222_v43 = vmax.f32 %v8220_v58, %v8221_v3 }
 0x674   : > { %v8223_v25 = vrot.slane %v8222_v43, 1 }
 0x676   : > { %v8224_v11 = vmax.f32 %v8222_v43, %v8223_v25 }
 0x678   : > { %v15344_v49 = vsel %vm8275_vm11, %v8198_v16, %v8224_v11 }
 0x67c   : > { %v7855_v55 = vpop.f32.mrb[228].mxu0 }
 0x67d   : > { %v7857_v56 = vpop.f32.mrb[229].mxu0  ;;  %v8014_v18 = vmul.f32 %v15175_v31, %v7855_v55 }
 0x67e   : > { %v7858_v36 = vpop.f32.mrb[230].mxu0 }
 0x67f   : > { %v8015_v48 = vmul.f32 %v15175_v31, %v7858_v36  ;;  %v7860_v13 = vpop.f32.mrb[231].mxu0  ;;  %v8084_v62 = vadd.f32 %v15185_v41, %v8014_v18 }
 0x681   : > { %v8085_v30 = vadd.f32 %v15185_v41, %v8015_v48  ;;  %v8147_v63 = vmax.f32 %v8084_v62, 0.0 }
 0x683   : > { %v8148_v27 = vmax.f32 %v8085_v30, 0.0 }
 0x684   : > { %v7863_v1 = vpop.f32.mrb[232].mxu0 }
 0x685   : > { %v8227_v40 = vmax.f32 %v8226_v38, %v8148_v27  ;;  %v8016_v35 = vmul.f32 %v15175_v31, %v7863_v1  ;;  %v7865_v0 = vpop.f32.mrb[233].mxu0 }
 0x686   : > { %v7866_v37 = vpop.f32.mrb[234].mxu0 }
 0x687   : > { %v8086_v39 = vadd.f32 %v15185_v41, %v8016_v35  ;;  %v8017_v47 = vmul.f32 %v15175_v31, %v7866_v37  ;;  %v7868_v42 = vpop.f32.mrb[235].mxu0 }
 0x689   : > { %v8149_v44 = vmax.f32 %v8086_v39, 0.0  ;;  %v8087_v29 = vadd.f32 %v15185_v41, %v8017_v47 }
 0x68b   : > { %v8228_v26 = vmax.f32 %v8145_v54, %v8149_v44  ;;  %v8150_v61 = vmax.f32 %v8087_v29, 0.0 }
 0x68d   : > { %v8229_v8 = vmax.f32 %v8146_v50, %v8150_v61 }
 0x69c   : > { %v7871_v59 = vpop.f32.mrb[236].mxu0 }
 0x69d   : > { %v8018_v23 = vmul.f32 %v15175_v31, %v7871_v59  ;;  %v7873_v60 = vpop.f32.mrb[237].mxu0 }
 0x69e   : > { %v7874_v53 = vpop.f32.mrb[238].mxu0 }
 0x69f   : > { %v8088_v52 = vadd.f32 %v15185_v41, %v8018_v23  ;;  %v8019_v10 = vmul.f32 %v15175_v31, %v7874_v53  ;;  %v7876_v20 = vpop.f32.mrb[239].mxu0 }
 0x6a1   : > { %v8151_v34 = vmax.f32 %v8088_v52, 0.0  ;;  %v8089_v22 = vadd.f32 %v15185_v41, %v8019_v10 }
 0x6a3   : > { %v8230_v12 = vmax.f32 %v8147_v63, %v8151_v34  ;;  %v8152_v51 = vmax.f32 %v8089_v22, 0.0 }
 0x6a4   : > { %v7879_v21 = vpop.f32.mrb[240].mxu0 }
 0x6a5   : > { %v8231_v15 = vmax.f32 %v8227_v40, %v8152_v51  ;;  %v8020_v2 = vmul.f32 %v15175_v31, %v7879_v21  ;;  %v7881_v28 = vpop.f32.mrb[241].mxu0 }
 0x6a6   : > { %v7882_v33 = vpop.f32.mrb[242].mxu0 }
 0x6a7   : > { %v8090_v45 = vadd.f32 %v15185_v41, %v8020_v2  ;;  %v8021_v4 = vmul.f32 %v15175_v31, %v7882_v33  ;;  %v7884_v57 = vpop.f32.mrb[243].mxu0 }
 0x6a9   : > { %v8153_v46 = vmax.f32 %v8090_v45, 0.0  ;;  %v8091_v14 = vadd.f32 %v15185_v41, %v8021_v4 }
 0x6ab   : > { %v8232_v24 = vmax.f32 %v8228_v26, %v8153_v46  ;;  %v8154_v7 = vmax.f32 %v8091_v14, 0.0 }
 0x6ad   : > { %v8233_v32 = vmax.f32 %v8229_v8, %v8154_v7 }
 0x6bc   : > { %v7887_v58 = vpop.f32.mrb[244].mxu0 }
 0x6bd   : > { %v8022_v3 = vmul.f32 %v15175_v31, %v7887_v58  ;;  %v7889_v19 = vpop.f32.mrb[245].mxu0 }
 0x6be   : > { %v7890_v43 = vpop.f32.mrb[246].mxu0 }
 0x6bf   : > { %v8092_v25 = vadd.f32 %v15185_v41, %v8022_v3  ;;  %v8023_v16 = vmul.f32 %v15175_v31, %v7890_v43  ;;  %v7892_v11 = vpop.f32.mrb[247].mxu0 }
 0x6c1   : > { %v8155_v55 = vmax.f32 %v8092_v25, 0.0  ;;  %v8093_v56 = vadd.f32 %v15185_v41, %v8023_v16 }
 0x6c3   : > { %v8234_v36 = vmax.f32 %v8230_v12, %v8155_v55  ;;  %v8156_v48 = vmax.f32 %v8093_v56, 0.0 }
 0x6c4   : > { %v7895_v13 = vpop.f32.mrb[248].mxu0 }
 0x6c5   : > { %v8235_v9 = vmax.f32 %v8231_v15, %v8156_v48  ;;  %v8024_v30 = vmul.f32 %v15175_v31, %v7895_v13  ;;  %v7897_v17 = vpop.f32.mrb[249].mxu0 }
 0x6c6   : > { %v7898_v27 = vpop.f32.mrb[250].mxu0 }
 0x6c7   : > { %v8094_v38 = vadd.f32 %v15185_v41, %v8024_v30  ;;  %v8025_v1 = vmul.f32 %v15175_v31, %v7898_v27  ;;  %v7900_v6 = vpop.f32.mrb[251].mxu0 }
 0x6c9   : > { %v8157_v40 = vmax.f32 %v8094_v38, 0.0  ;;  %v8095_v35 = vadd.f32 %v15185_v41, %v8025_v1 }
 0x6cb   : > { %v8236_v0 = vmax.f32 %v8232_v24, %v8157_v40  ;;  %v8158_v37 = vmax.f32 %v8095_v35, 0.0 }
 0x6cd   : > { %v8240_v5 = vmax.f32 %v8235_v9, %v8236_v0  ;;  %v8237_v39 = vmax.f32 %v8233_v32, %v8158_v37 }
 0x6dc   : > { %v7903_v47 = vpop.f32.mrb[252].mxu0 }
 0x6dd   : > { %v8026_v42 = vmul.f32 %v15175_v31, %v7903_v47  ;;  %v7905_v54 = vpop.f32.mrb[253].mxu0 }
 0x6de   : > { %v7906_v44 = vpop.f32.mrb[254].mxu0 }
 0x6df   : > { %v8096_v29 = vadd.f32 %v15185_v41, %v8026_v42  ;;  %v7908_v50 = vpop.f32.mrb[255].mxu0  ;;  %v8027_v51 = vmul.f32 %v15175_v31, %v7906_v44 }
 0x6e1   : > { %v8159_v26 = vmax.f32 %v8096_v29, 0.0  ;;  %v8097_v33 = vadd.f32 %v15185_v41, %v8027_v51 }
 0x6e3   : > { %v8238_v61 = vsel %vm2152_vm1, %v8159_v26, -inf  ;;  %v8250_v24 = vsel %vm8249_vm13, %v8159_v26, -inf  ;;  %v8160_v7 = vmax.f32 %v8097_v33, 0.0 }
 0x6e4   : > { %v8239_v8 = vmax.f32 %v8234_v36, %v8238_v61  ;;  %v7911_v18 = vpop.f32.mrb[0].mxu0 }
 0x6e5   : > { %v7913_v59 = vpop.f32.mrb[1].mxu0  ;;  %v8028_v46 = vmul.f32 %v15175_v31, %v7911_v18 }
 0x6e6   : > { %v8241_v62 = vmax.f32 %v8237_v39, %v8239_v8  ;;  %v7914_v23 = vpop.f32.mrb[2].mxu0 }
 0x6e7   : > { %v7916_v60 = vpop.f32.mrb[3].mxu0  ;;  %v8029_v32 = vmul.f32 %v15175_v31, %v7914_v23  ;;  %v8098_v43 = vadd.f32 %v15185_v41, %v8028_v46 }
 0x6e8   : > { %v8242_v53 = vmax.f32 %v8240_v5, %v8241_v62 }
 0x6e9   : > { %v8099_v56 = vadd.f32 %v15185_v41, %v8029_v32  ;;  %v8161_v9 = vmax.f32 %v8098_v43, 0.0 }
 0x6ea   : > { %v8243_v52 = vrot.slane %v8242_v53, 4 }
 0x6eb   : > { %v8162_v27 = vmax.f32 %v8099_v56, 0.0 }
 0x6ec   : > { %v8244_v10 = vmax.f32 %v8242_v53, %v8243_v52 }
 0x6ee   : > { %v8245_v20 = vrot.slane %v8244_v10, 2 }
 0x6f0   : > { %v8246_v63 = vmax.f32 %v8244_v10, %v8245_v20 }
 0x6f2   : > { %v8247_v34 = vrot.slane %v8246_v63, 1 }
 0x6f4   : > { %v8248_v22 = vmax.f32 %v8246_v63, %v8247_v34 }
 0x6f6   : > { %v15379_v12 = vsel %vm8213_vm10, %v15344_v49, %v8248_v22 }
 0x6fc   : > { %v7919_v21 = vpop.f32.mrb[4].mxu0 }
 0x6fd   : > { %v8030_v15 = vmul.f32 %v15175_v31, %v7919_v21  ;;  %v7921_v2 = vpop.f32.mrb[5].mxu0 }
 0x6fe   : > { %v7922_v28 = vpop.f32.mrb[6].mxu0 }
 0x6ff   : > { %v8100_v45 = vadd.f32 %v15185_v41, %v8030_v15  ;;  %v8031_v4 = vmul.f32 %v15175_v31, %v7922_v28  ;;  %v7924_v57 = vpop.f32.mrb[7].mxu0 }
 0x701   : > { %v8163_v14 = vmax.f32 %v8100_v45, 0.0  ;;  %v8101_v49 = vadd.f32 %v15185_v41, %v8031_v4 }
 0x703   : > { %v8251_v58 = vmax.f32 %v8250_v24, %v8163_v14  ;;  %v8164_v3 = vmax.f32 %v8101_v49, 0.0 }
 0x704   : > { %v7927_v19 = vpop.f32.mrb[8].mxu0 }
 0x705   : > { %v8252_v25 = vmax.f32 %v8160_v7, %v8164_v3  ;;  %v8032_v16 = vmul.f32 %v15175_v31, %v7927_v19  ;;  %v7929_v11 = vpop.f32.mrb[9].mxu0 }
 0x706   : > { %v7930_v55 = vpop.f32.mrb[10].mxu0 }
 0x707   : > { %v8102_v36 = vadd.f32 %v15185_v41, %v8032_v16  ;;  %v8033_v48 = vmul.f32 %v15175_v31, %v7930_v55  ;;  %v7932_v13 = vpop.f32.mrb[11].mxu0  ;;  %v10473_v55 = vld [vmem:[%s15434_s11] ss:$0 sm:$0xff] }
 0x709   : > { %v8165_v30 = vmax.f32 %v8102_v36, 0.0  ;;  %v8103_v17 = vadd.f32 %v15185_v41, %v8033_v48 }
 0x70b   : > { %v8253_v38 = vmax.f32 %v8161_v9, %v8165_v30  ;;  %v8166_v1 = vmax.f32 %v8103_v17, 0.0 }
 0x70d   : > { %v8254_v6 = vmax.f32 %v8162_v27, %v8166_v1 }
 0x71c   : > { %v7935_v40 = vpop.f32.mrb[12].mxu0 }
 0x71d   : > { %v8034_v35 = vmul.f32 %v15175_v31, %v7935_v40  ;;  %v7937_v0 = vpop.f32.mrb[13].mxu0 }
 0x71e   : > { %v7938_v37 = vpop.f32.mrb[14].mxu0 }
 0x71f   : > { %v8104_v5 = vadd.f32 %v15185_v41, %v8034_v35  ;;  %v8035_v39 = vmul.f32 %v15175_v31, %v7938_v37  ;;  %v7940_v47 = vpop.f32.mrb[15].mxu0 }
 0x721   : > { %v8167_v42 = vmax.f32 %v8104_v5, 0.0  ;;  %v8105_v54 = vadd.f32 %v15185_v41, %v8035_v39 }
 0x723   : > { %v8255_v44 = vmax.f32 %v8251_v58, %v8167_v42  ;;  %v8168_v29 = vmax.f32 %v8105_v54, 0.0 }
 0x724   : > { %v7943_v50 = vpop.f32.mrb[16].mxu0 }
 0x725   : > { %v8256_v26 = vmax.f32 %v8252_v25, %v8168_v29  ;;  %v8036_v61 = vmul.f32 %v15175_v31, %v7943_v50  ;;  %v7945_v8 = vpop.f32.mrb[17].mxu0 }
 0x726   : > { %v7946_v18 = vpop.f32.mrb[18].mxu0 }
 0x727   : > { %v8106_v59 = vadd.f32 %v15185_v41, %v8036_v61  ;;  %v8037_v62 = vmul.f32 %v15175_v31, %v7946_v18  ;;  %v7948_v23 = vpop.f32.mrb[19].mxu0 }
 0x729   : > { %v8169_v60 = vmax.f32 %v8106_v59, 0.0  ;;  %v8107_v53 = vadd.f32 %v15185_v41, %v8037_v62 }
 0x72b   : > { %v8257_v52 = vmax.f32 %v8253_v38, %v8169_v60  ;;  %v8170_v10 = vmax.f32 %v8107_v53, 0.0 }
 0x72d   : > { %v8258_v20 = vmax.f32 %v8254_v6, %v8170_v10  ;;  %v7951_v63 = vpop.f32.mrb[20].mxu0 }
 0x72e   : > { %v8038_v34 = vmul.f32 %v15175_v31, %v7951_v63  ;;  %v7953_v22 = vpop.f32.mrb[21].mxu0 }
 0x72f   : > { %v7954_v51 = vpop.f32.mrb[22].mxu0 }
 0x730   : > { %v8108_v21 = vadd.f32 %v15185_v41, %v8038_v34  ;;  %v8039_v15 = vmul.f32 %v15175_v31, %v7954_v51  ;;  %v7956_v2 = vpop.f32.mrb[23].mxu0 }
 0x732   : > { %v8171_v28 = vmax.f32 %v8108_v21, 0.0  ;;  %v8109_v33 = vadd.f32 %v15185_v41, %v8039_v15 }
 0x734   : > { %v8259_v45 = vmax.f32 %v8255_v44, %v8171_v28  ;;  %v8172_v4 = vmax.f32 %v8109_v33, 0.0 }
 0x735   : > { %v7959_v57 = vpop.f32.mrb[24].mxu0 }
 0x736   : > { %v8260_v46 = vmax.f32 %v8256_v26, %v8172_v4  ;;  %v8040_v14 = vmul.f32 %v15175_v31, %v7959_v57  ;;  %v7961_v49 = vpop.f32.mrb[25].mxu0 }
 0x737   : > { %v7962_v24 = vpop.f32.mrb[26].mxu0 }
 0x738   : > { %v8110_v7 = vadd.f32 %v15185_v41, %v8040_v14  ;;  %v8041_v32 = vmul.f32 %v15175_v31, %v7962_v24  ;;  %v7964_v58 = vpop.f32.mrb[27].mxu0 }
 0x73a   : > { %v8173_v3 = vmax.f32 %v8110_v7, 0.0  ;;  %v8111_v19 = vadd.f32 %v15185_v41, %v8041_v32 }
 0x73c   : > { %v8261_v43 = vmax.f32 %v8257_v52, %v8173_v3  ;;  %v8174_v25 = vmax.f32 %v8111_v19, 0.0 }
 0x73d   : > { %v7967_v16 = vpop.f32.mrb[28].mxu0 }
 0x73e   : > { %v8262_v11 = vmax.f32 %v8258_v20, %v8174_v25  ;;  %v8042_v56 = vmul.f32 %v10473_v55, %v7967_v16  ;;  %v7969_v36 = vpop.f32.mrb[29].mxu0 }
 0x73f   : > { %v7970_v48 = vpop.f32.mrb[30].mxu0 }
 0x740   : > { %v8267_v13 = vmax.f32 %v8261_v43, %v8262_v11  ;;  %v8112_v9 = vadd.f32 %v15185_v41, %v8042_v56  ;;  %v7971_v31 = vpop.f32.mrb[31].mxu0 }
 0x742   : > { %v8175_v30 = vmax.f32 %v8112_v9, 0.0 }
 0x744   : > { %v8264_v17 = vsel %vm8263_vm14, %v8175_v30, -inf }
 0x745   : > { %v8265_v27 = vmax.f32 %v8259_v45, %v8264_v17 }
 0x747   : > { %v8266_v38 = vmax.f32 %v8265_v27, %v8260_v46 }
 0x749   : > { %v8268_v1 = vmax.f32 %v8266_v38, %v8267_v13 }
 0x74b   : > { %v8269_v6 = vrot.slane %v8268_v1, 4 }
 0x74d   : > { %v8270_v40 = vmax.f32 %v8268_v1, %v8269_v6 }
 0x74f   : > { %v8271_v35 = vrot.slane %v8270_v40, 2 }
 0x751   : > { %v8272_v0 = vmax.f32 %v8270_v40, %v8271_v35 }
 0x753   : > { %v8273_v37 = vrot.slane %v8272_v0, 1 }
 0x755   : > { %v8274_v5 = vmax.f32 %v8272_v0, %v8273_v37 }
 0x757   : > { %v8279_v41 = vsel %vm8278_vm15, %v15379_v12, %v8274_v5 }
 0x758   : > { %8280 = vst [vmem:[%s438_s30] sm:$0xf] %v8279_v41 }
 0x759 PF: > { %s23_s25 = sadd.s32 1, %s10480_s25  }
 0x75a   : > { %p20_p4 = scmp.ge.s32.totalorder %s23_s25, 4  }
 0x75c   :  { %22 = sbr.rel (!%p20_p4) target bundleno = 1 (0x1), region = 227 }

</bundles_post_ra>
